<compile_context>
chip_gen: v7x
topology: tpu7x:2x2x1
jax: 0.10.0
libtpu: 0.0.40
codegen_flags: <defaults>
</compile_context>

<pallas_src>
import jax
import jax.numpy as jnp
from jax.experimental import pallas as pl
from jax.experimental.pallas import tpu as pltpu


def _fused_mlp_kernel(x_ref,
                      w1_ref, s1_ref, b1_ref,
                      w2_ref, s2_ref, b2_ref,
                      w3_ref, s3_ref, b3_ref,
                      o_ref):
    """One batch tile through the whole MLP; weights stay VMEM-resident."""
    # Cast the (small) activation tile in-kernel instead of in the wrapper.
    x = x_ref[...].astype(jnp.bfloat16)

    # Layer 1: int8 -> bf16 (exact for values in [-127, 127]), f32 accum,
    # per-output-channel dequant scale fused into the bias/ReLU epilogue.
    h1 = jnp.dot(x, w1_ref[...].astype(jnp.bfloat16),
                 preferred_element_type=jnp.float32)
    h1 = jnp.maximum(h1 * s1_ref[...] + b1_ref[...], 0.0).astype(jnp.bfloat16)

    # Layer 2.
    h2 = jnp.dot(h1, w2_ref[...].astype(jnp.bfloat16),
                 preferred_element_type=jnp.float32)
    h2 = jnp.maximum(h2 * s2_ref[...] + b2_ref[...], 0.0).astype(jnp.bfloat16)

    # Layer 3 (output lane-padded to 128).
    out = jnp.dot(h2, w3_ref[...].astype(jnp.bfloat16),
                  preferred_element_type=jnp.float32)
    o_ref[...] = (out * s3_ref[...] + b3_ref[...]).astype(o_ref.dtype)


def init_params(key, input_dim, num_labels=10, dtype=jnp.float32):
    """Deterministic synthetic parameters; shapes match the nn.Linear layers.

    Weights are stored transposed relative to PyTorch: (in_features, out_features).
    """
    dims = [(input_dim, 2048), (2048, 1024), (1024, num_labels)]
    params = []
    for (din, dout) in dims:
        key, kw, kb = jax.random.split(key, 3)
        bound = 1.0 / jnp.sqrt(din)  # same scale as PyTorch's default init
        w = jax.random.uniform(kw, (din, dout), dtype, -bound, bound)
        b = jax.random.uniform(kb, (dout,), dtype, -bound, bound)
        params.append((w, b))
    return params


def _quantize_per_channel(w):
    """Symmetric per-output-channel int8 quantization: w ~= wq * scale."""
    amax = jnp.max(jnp.abs(w), axis=0, keepdims=True)                  # (1, out)
    scale = jnp.where(amax > 0.0, amax / 127.0, 1.0).astype(jnp.float32)
    wq = jnp.clip(jnp.round(w / scale), -127.0, 127.0).astype(jnp.int8)
    return wq, scale


def prepare_params(params, lane=128):
    """One-time prep: pad last layer to a lane-dense width, int8-quantize weights."""
    (w1, b1), (w2, b2), (w3, b3) = params
    n_out = w3.shape[1]
    n_pad = max(lane, ((n_out + lane - 1) // lane) * lane)

    w3p = jnp.zeros((w3.shape[0], n_pad), w3.dtype).at[:, :n_out].set(w3)
    b3p = jnp.zeros((n_pad,), b3.dtype).at[:n_out].set(b3)

    w1q, s1 = _quantize_per_channel(w1)
    w2q, s2 = _quantize_per_channel(w2)
    w3q, s3 = _quantize_per_channel(w3p)

    prepared = (
        w1q, s1, b1.reshape(1, -1).astype(jnp.float32),
        w2q, s2, b2.reshape(1, -1).astype(jnp.float32),
        w3q, s3, b3p.reshape(1, -1).astype(jnp.float32),
    )
    return prepared, n_out


def mlp_classifier_forward(x, prepared_params, n_out, *, tile_b=128,
                           slice_output=True):
    """y = linear3(relu(linear2(relu(linear1(x))))) — one fused Pallas call."""
    w1, s1, b1, w2, s2, b2, w3, s3, b3 = prepared_params
    B, din = x.shape
    n_pad = w3.shape[1]
    tb = min(tile_b, B)

    def resident(a):  # full array, constant block index -> read once, stay in VMEM
        return pl.BlockSpec(a.shape, lambda i: (0,) * a.ndim)

    out_padded = pl.pallas_call(
        _fused_mlp_kernel,
        out_shape=jax.ShapeDtypeStruct((B, n_pad), jnp.float32),
        grid=(pl.cdiv(B, tb),),
        in_specs=[
            pl.BlockSpec((tb, din), lambda i: (i, 0)),
            resident(w1), resident(s1), resident(b1),
            resident(w2), resident(s2), resident(b2),
            resident(w3), resident(s3), resident(b3),
        ],
        out_specs=pl.BlockSpec((tb, n_pad), lambda i: (i, 0)),
        compiler_params=pltpu.CompilerParams(
            dimension_semantics=("parallel",),
            vmem_limit_bytes=32 * 1024 * 1024,
        ),
    )(x, w1, s1, b1, w2, s2, b2, w3, s3, b3)

    if slice_output:
        return out_padded[:, :n_out]
    return out_padded  # lane-dense (B, 128); consumer folds the [:, :n_out] slice


def _reference_quantized(x, prepared_params, n_out):
    """Same math as the kernel (int8 weights, bf16 activations, f32 accum)."""
    w1, s1, b1, w2, s2, b2, w3, s3, b3 = prepared_params
    h = x.astype(jnp.bfloat16)
    h = jnp.dot(h, w1.astype(jnp.bfloat16), preferred_element_type=jnp.float32)
    h = jnp.maximum(h * s1 + b1, 0.0).astype(jnp.bfloat16)
    h = jnp.dot(h, w2.astype(jnp.bfloat16), preferred_element_type=jnp.float32)
    h = jnp.maximum(h * s2 + b2, 0.0).astype(jnp.bfloat16)
    h = jnp.dot(h, w3.astype(jnp.bfloat16), preferred_element_type=jnp.float32)
    return (h * s3 + b3)[:, :n_out]


if __name__ == "__main__":
    key = jax.random.PRNGKey(0)
    kx, kp = jax.random.split(key)

    batch = 256          # amortizes the weight read over 2 batch tiles of 128
    input_dim = 256
    num_labels = 10

    x = jax.random.normal(kx, (batch, input_dim), dtype=jnp.float32)
    params = init_params(kp, input_dim, num_labels)
    prepared, n_out = prepare_params(params)

    out = mlp_classifier_forward(x, prepared, n_out, tile_b=128)
    out = jax.block_until_ready(out)
    assert out.shape == (batch, num_labels)

    # 1) Exact-path reference (same int8/bf16/f32 policy as the kernel).
    ref_q = _reference_quantized(x, prepared, n_out)
    assert jnp.allclose(out, ref_q, atol=2e-2, rtol=2e-2)

    # 2) Full-f32 PyTorch-equivalent math: loose numeric check + argmax agreement
    #    (quantization should not change the predicted class for most rows).
    (fw1, fb1), (fw2, fb2), (fw3, fb3) = params
    ref32 = jnp.maximum(x @ fw1 + fb1, 0.0)
    ref32 = jnp.maximum(ref32 @ fw2 + fb2, 0.0)
    ref32 = ref32 @ fw3 + fb3
    assert jnp.allclose(out, ref32, atol=1e-1, rtol=1e-1)
    agreement = jnp.mean(
        (jnp.argmax(out, axis=-1) == jnp.argmax(ref32, axis=-1)).astype(jnp.float32)
    )
    assert agreement >= 0.9, f"argmax agreement too low: {agreement}"

    print("KERNEL_OK")
</pallas_src>

<mosaic_0001>
module attributes {stable_mosaic.version = 11 : i64} {
  func.func @_fused_mlp_kernel(%arg0: i32, %arg1: memref<128x256xf32, #tpu.memory_space<vmem>>, %arg2: memref<256x2048xi8, #tpu.memory_space<vmem>>, %arg3: memref<1x2048xf32, #tpu.memory_space<vmem>>, %arg4: memref<1x2048xf32, #tpu.memory_space<vmem>>, %arg5: memref<2048x1024xi8, #tpu.memory_space<vmem>>, %arg6: memref<1x1024xf32, #tpu.memory_space<vmem>>, %arg7: memref<1x1024xf32, #tpu.memory_space<vmem>>, %arg8: memref<1024x128xi8, #tpu.memory_space<vmem>>, %arg9: memref<1x128xf32, #tpu.memory_space<vmem>>, %arg10: memref<1x128xf32, #tpu.memory_space<vmem>>, %arg11: memref<128x128xf32, #tpu.memory_space<vmem>>) attributes {dimension_semantics = [#tpu.dimension_semantics<parallel>], iteration_bounds = array<i64: 2>, scalar_prefetch = 0 : i64, scratch_operands = 0 : i64, tpu.core_type = #tpu.core_type<tc>, window_params = [{transform_indices = @transform_0, window_bounds = array<i64: 128, 256>}, {pipeline_mode = #tpu.pipeline_mode<synchronous>, transform_indices = @transform_1, window_bounds = array<i64: 256, 2048>}, {pipeline_mode = #tpu.pipeline_mode<synchronous>, transform_indices = @transform_2, window_bounds = array<i64: 1, 2048>}, {pipeline_mode = #tpu.pipeline_mode<synchronous>, transform_indices = @transform_3, window_bounds = array<i64: 1, 2048>}, {pipeline_mode = #tpu.pipeline_mode<synchronous>, transform_indices = @transform_4, window_bounds = array<i64: 2048, 1024>}, {pipeline_mode = #tpu.pipeline_mode<synchronous>, transform_indices = @transform_5, window_bounds = array<i64: 1, 1024>}, {pipeline_mode = #tpu.pipeline_mode<synchronous>, transform_indices = @transform_6, window_bounds = array<i64: 1, 1024>}, {pipeline_mode = #tpu.pipeline_mode<synchronous>, transform_indices = @transform_7, window_bounds = array<i64: 1024, 128>}, {pipeline_mode = #tpu.pipeline_mode<synchronous>, transform_indices = @transform_8, window_bounds = array<i64: 1, 128>}, {pipeline_mode = #tpu.pipeline_mode<synchronous>, transform_indices = @transform_9, window_bounds = array<i64: 1, 128>}, {transform_indices = @transform_10, window_bounds = array<i64: 128, 128>}]} {
    %c0 = arith.constant 0 : index
    %c0_0 = arith.constant 0 : index
    %0 = vector.load %arg1[%c0, %c0_0] : memref<128x256xf32, #tpu.memory_space<vmem>>, vector<128x256xf32>
    %1 = arith.truncf %0 : vector<128x256xf32> to vector<128x256xbf16>
    %c0_1 = arith.constant 0 : index
    %c0_2 = arith.constant 0 : index
    %2 = vector.load %arg2[%c0_1, %c0_2] : memref<256x2048xi8, #tpu.memory_space<vmem>>, vector<256x2048xi8>
    %3 = arith.sitofp %2 : vector<256x2048xi8> to vector<256x2048xbf16>
    %cst = arith.constant dense<0.000000e+00> : vector<128x2048xf32>
    %4 = tpu.matmul %1, %3, %cst {dimension_numbers = #tpu.dot_dimension_numbers<[1], [0], [0], [1], [0, 0, 1, 1], [], []>} : vector<128x256xbf16>, vector<256x2048xbf16>, vector<128x2048xf32> -> vector<128x2048xf32>
    %c0_3 = arith.constant 0 : index
    %c0_4 = arith.constant 0 : index
    %5 = vector.load %arg3[%c0_3, %c0_4] : memref<1x2048xf32, #tpu.memory_space<vmem>>, vector<1x2048xf32>
    %6 = vector.broadcast %5 : vector<1x2048xf32> to vector<128x2048xf32>
    %7 = arith.mulf %4, %6 : vector<128x2048xf32>
    %c0_5 = arith.constant 0 : index
    %c0_6 = arith.constant 0 : index
    %8 = vector.load %arg4[%c0_5, %c0_6] : memref<1x2048xf32, #tpu.memory_space<vmem>>, vector<1x2048xf32>
    %9 = vector.broadcast %8 : vector<1x2048xf32> to vector<128x2048xf32>
    %10 = arith.addf %7, %9 : vector<128x2048xf32>
    %cst_7 = arith.constant 0.000000e+00 : f32
    %11 = vector.broadcast %cst_7 : f32 to vector<128x2048xf32>
    %12 = arith.maximumf %10, %11 : vector<128x2048xf32>
    %13 = arith.truncf %12 : vector<128x2048xf32> to vector<128x2048xbf16>
    %c0_8 = arith.constant 0 : index
    %c0_9 = arith.constant 0 : index
    %14 = vector.load %arg5[%c0_8, %c0_9] : memref<2048x1024xi8, #tpu.memory_space<vmem>>, vector<2048x1024xi8>
    %15 = arith.sitofp %14 : vector<2048x1024xi8> to vector<2048x1024xbf16>
    %cst_10 = arith.constant dense<0.000000e+00> : vector<128x1024xf32>
    %16 = tpu.matmul %13, %15, %cst_10 {dimension_numbers = #tpu.dot_dimension_numbers<[1], [0], [0], [1], [0, 0, 1, 1], [], []>} : vector<128x2048xbf16>, vector<2048x1024xbf16>, vector<128x1024xf32> -> vector<128x1024xf32>
    %c0_11 = arith.constant 0 : index
    %c0_12 = arith.constant 0 : index
    %17 = vector.load %arg6[%c0_11, %c0_12] : memref<1x1024xf32, #tpu.memory_space<vmem>>, vector<1x1024xf32>
    %18 = vector.broadcast %17 : vector<1x1024xf32> to vector<128x1024xf32>
    %19 = arith.mulf %16, %18 : vector<128x1024xf32>
    %c0_13 = arith.constant 0 : index
    %c0_14 = arith.constant 0 : index
    %20 = vector.load %arg7[%c0_13, %c0_14] : memref<1x1024xf32, #tpu.memory_space<vmem>>, vector<1x1024xf32>
    %21 = vector.broadcast %20 : vector<1x1024xf32> to vector<128x1024xf32>
    %22 = arith.addf %19, %21 : vector<128x1024xf32>
    %cst_15 = arith.constant 0.000000e+00 : f32
    %23 = vector.broadcast %cst_15 : f32 to vector<128x1024xf32>
    %24 = arith.maximumf %22, %23 : vector<128x1024xf32>
    %25 = arith.truncf %24 : vector<128x1024xf32> to vector<128x1024xbf16>
    %c0_16 = arith.constant 0 : index
    %c0_17 = arith.constant 0 : index
    %26 = vector.load %arg8[%c0_16, %c0_17] : memref<1024x128xi8, #tpu.memory_space<vmem>>, vector<1024x128xi8>
    %27 = arith.sitofp %26 : vector<1024x128xi8> to vector<1024x128xbf16>
    %cst_18 = arith.constant dense<0.000000e+00> : vector<128x128xf32>
    %28 = tpu.matmul %25, %27, %cst_18 {dimension_numbers = #tpu.dot_dimension_numbers<[1], [0], [0], [1], [0, 0, 1, 1], [], []>} : vector<128x1024xbf16>, vector<1024x128xbf16>, vector<128x128xf32> -> vector<128x128xf32>
    %c0_19 = arith.constant 0 : index
    %c0_20 = arith.constant 0 : index
    %29 = vector.load %arg9[%c0_19, %c0_20] : memref<1x128xf32, #tpu.memory_space<vmem>>, vector<1x128xf32>
    %30 = vector.broadcast %29 : vector<1x128xf32> to vector<128x128xf32>
    %31 = arith.mulf %28, %30 : vector<128x128xf32>
    %c0_21 = arith.constant 0 : index
    %c0_22 = arith.constant 0 : index
    %32 = vector.load %arg10[%c0_21, %c0_22] : memref<1x128xf32, #tpu.memory_space<vmem>>, vector<1x128xf32>
    %33 = vector.broadcast %32 : vector<1x128xf32> to vector<128x128xf32>
    %34 = arith.addf %31, %33 : vector<128x128xf32>
    %c0_23 = arith.constant 0 : index
    %c0_24 = arith.constant 0 : index
    %35 = vector.load %arg11[%c0_23, %c0_24] : memref<128x128xf32, #tpu.memory_space<vmem>>, vector<128x128xf32>
    tpu.vector_store %arg11[%c0_23, %c0_24], %34 {strides = array<i32>} : memref<128x128xf32, #tpu.memory_space<vmem>>, vector<128x128xf32>,
    return
  }
  func.func @transform_0(%arg0: i32) -> (i32, i32) {
    %c0_i32 = arith.constant 0 : i32
    %c0_i32_0 = arith.constant 0 : i32
    return %arg0, %c0_i32 : i32, i32
  }
  func.func @transform_1(%arg0: i32) -> (i32, i32) {
    %c0_i32 = arith.constant 0 : i32
    %c0_i32_0 = arith.constant 0 : i32
    %c0_i32_1 = arith.constant 0 : i32
    return %c0_i32, %c0_i32_0 : i32, i32
  }
  func.func @transform_2(%arg0: i32) -> (i32, i32) {
    %c0_i32 = arith.constant 0 : i32
    %c0_i32_0 = arith.constant 0 : i32
    %c0_i32_1 = arith.constant 0 : i32
    return %c0_i32, %c0_i32_0 : i32, i32
  }
  func.func @transform_3(%arg0: i32) -> (i32, i32) {
    %c0_i32 = arith.constant 0 : i32
    %c0_i32_0 = arith.constant 0 : i32
    %c0_i32_1 = arith.constant 0 : i32
    return %c0_i32, %c0_i32_0 : i32, i32
  }
  func.func @transform_4(%arg0: i32) -> (i32, i32) {
    %c0_i32 = arith.constant 0 : i32
    %c0_i32_0 = arith.constant 0 : i32
    %c0_i32_1 = arith.constant 0 : i32
    return %c0_i32, %c0_i32_0 : i32, i32
  }
  func.func @transform_5(%arg0: i32) -> (i32, i32) {
    %c0_i32 = arith.constant 0 : i32
    %c0_i32_0 = arith.constant 0 : i32
    %c0_i32_1 = arith.constant 0 : i32
    return %c0_i32, %c0_i32_0 : i32, i32
  }
  func.func @transform_6(%arg0: i32) -> (i32, i32) {
    %c0_i32 = arith.constant 0 : i32
    %c0_i32_0 = arith.constant 0 : i32
    %c0_i32_1 = arith.constant 0 : i32
    return %c0_i32, %c0_i32_0 : i32, i32
  }
  func.func @transform_7(%arg0: i32) -> (i32, i32) {
    %c0_i32 = arith.constant 0 : i32
    %c0_i32_0 = arith.constant 0 : i32
    %c0_i32_1 = arith.constant 0 : i32
    return %c0_i32, %c0_i32_0 : i32, i32
  }
  func.func @transform_8(%arg0: i32) -> (i32, i32) {
    %c0_i32 = arith.constant 0 : i32
    %c0_i32_0 = arith.constant 0 : i32
    %c0_i32_1 = arith.constant 0 : i32
    return %c0_i32, %c0_i32_0 : i32, i32
  }
  func.func @transform_9(%arg0: i32) -> (i32, i32) {
    %c0_i32 = arith.constant 0 : i32
    %c0_i32_0 = arith.constant 0 : i32
    %c0_i32_1 = arith.constant 0 : i32
    return %c0_i32, %c0_i32_0 : i32, i32
  }
  func.func @transform_10(%arg0: i32) -> (i32, i32) {
    %c0_i32 = arith.constant 0 : i32
    %c0_i32_0 = arith.constant 0 : i32
    return %arg0, %c0_i32 : i32, i32
  }
}

</mosaic_0001>

<bundles_post_ra>
// kernel: tpu_custom_call.1
= control target key start
LH: loop header
LB: loop body
LE: loop exit
PB: predicated region body
PF: predicated region fallthrough
CT: control target
= control target key end

     0   :  { %s15347_s0 = inlined_call_operand.hbm [shape: f32[256,256], index: 0, kind: input, shape index: {}]   ;;  %s15348_s1 = inlined_call_operand.hbm [shape: s8[256,2048], index: 1, kind: input, shape index: {}]   ;;  %s15349_s2 = inlined_call_operand.hbm [shape: f32[1,2048], index: 2, kind: input, shape index: {}]   ;;  %s15350_s3 = inlined_call_operand.hbm [shape: f32[1,2048], index: 3, kind: input, shape index: {}]   ;;  %s15351_s4 = inlined_call_operand.hbm [shape: s8[2048,1024], index: 4, kind: input, shape index: {}]   ;;  %s15352_s5 = inlined_call_operand.hbm [shape: f32[1,1024], index: 5, kind: input, shape index: {}]   ;;  %s15353_s6 = inlined_call_operand.hbm [shape: f32[1,1024], index: 6, kind: input, shape index: {}]   ;;  %s15354_s7 = inlined_call_operand.hbm [shape: s8[1024,128], index: 7, kind: input, shape index: {}]   ;;  %s15355_s8 = inlined_call_operand.hbm [shape: f32[1,128], index: 8, kind: input, shape index: {}]   ;;  %s15356_s9 = inlined_call_operand.hbm [shape: f32[1,128], index: 9, kind: input, shape index: {}]   ;;  %s15357_s10 = inlined_call_operand.hbm [shape: f32[256,128], index: 10, kind: output, shape index: {}]  }
   0x1   :  { %15789 = sst [smem:[#allocation164_spill]] %s15348_s1 }
   0x2   :  { %15790 = sst [smem:[#allocation165_spill]] %s15349_s2 }
   0x3   :  { %15791 = sst [smem:[#allocation166_spill]] %s15357_s10 }
   0x4   :  { %15 = vsyncpa [#allocation3], 0 }
   0x5   :  { %17 = vsyncpa [#allocation3 + $0x1], 0 }
   0x6   :  { %18 = vsyncpa [#allocation6], 0 }
   0x7   :  { %19 = vsyncpa [#allocation9], 0 }
   0x8   :  { %20 = vsyncpa [#allocation12], 0 }
   0x9   :  { %21 = vsyncpa [#allocation15], 0 }
   0xa   :  { %22 = vsyncpa [#allocation18], 0 }
   0xb   :  { %23 = vsyncpa [#allocation4], 0 }
   0xc   :  { %25 = vsyncpa [#allocation4 + $0x1], 0  ;;  %s11089_s13 = smov 0   ;;  %s11091_s14 = smov 0  }
   0xd   :  { %s11093_s15 = smov 0   ;;  %s11095_s16 = smov 0  }
   0xe LB: > { %s11014_s17 = smov [#allocation5]   ;;  %s11110_s19 = sadd.s32 4294967295, %s11012_s16   ;;  %s11012_s16 = sphi %s11095_s16, %s16712_s16   ;;  %s11008_s15 = sphi %s11093_s15, %s16711_s15   ;;  %s11004_s14 = sphi %s11091_s14, %s16710_s14   ;;  %s11000_s13 = sphi %s11089_s13, %s16709_s13  }
   0xf   : > { %s289_s18 = sshll.u32 %s11014_s17, 4  ;;  %p9305_p0 = scmp.ge.s32.totalorder %s11012_s16, 1  ;;  %s11115_s18 = int_to_ptr.vmem [resolvable:$true] %s289_s18 }
  0x10   : > { %p15360_p1 = scmp.eq.s32.totalorder %s11110_s19, 0  ;;  %p277_p2 = scmp.lt.s32.totalorder %s11012_s16, 3 }
  0x11   : > { %s11015_s21 = smov [#allocation8]   ;;  %s11016_s24 = smov [#allocation11]  }
  0x12   : > { %p11117_p3 = pnand %p9305_p0, %p277_p2  ;;  %s314_s22 = sshll.u32 %s11015_s21, 4  ;;  %s11130_s22 = int_to_ptr.vmem [resolvable:$true] %s314_s22 }
  0x13   : > { %s338_s25 = sshll.u32 %s11016_s24, 4  ;;  %s15795_s1 = sld [smem:[#allocation164_spill]]  ;;  %s11132_s25 = int_to_ptr.vmem [resolvable:$true] %s338_s25 }
  0x14   : > { %s15792_s20 = scalar_select %p11117_p3, 1, 0 }
  0x15   : > { %p10534_p5 = pneg %p11117_p3 }
  0x16   : > { %15793 = sst [smem:[#allocation27_spill]] %s15792_s20 }
  0x17   : > { %p11126_p6 = pnand %p10534_p5, %p15360_p1 }
  0x19   : > { %s10644_s28 = scalar_lea.hbm %s15795_s1, 16384  ;;  %p11142_p8 = pneg %p11126_p6 }
  0x1a   : > { %p10645_p7 = scmp.ne.s32.totalorder %s15795_s1, %s10644_s28  ;;  %p10651_p11 = scmp.lt.u32.totalorder %s10644_s28, %s15795_s1 }
  0x1c   : > { %p10647_p9 = pnand %p11142_p8, %p10645_p7 }
  0x1e   : > { %p10648_p10 = pneg %p10647_p9 }
  0x20   : > { %p10653_p12 = pnand %p10651_p11, %p10648_p10 }
  0x22   : > { %10656 = shalt.err (!%p10653_p12)
}
  0x23   : > { %s10657_s21 = scalar_lea.vmem %s11115_s18, 16384  ;;  %p10665_p5 = scmp.lt.s32.totalorder %s11115_s18, %s11115_s18 }
  0x24   : > { %p10658_p13 = scmp.ne.s32.totalorder %s11115_s18, %s10657_s21  ;;  %p10666_p4 = scmp.lt.s32.totalorder %s10657_s21, %s10657_s21 }
  0x26   : > { %p10660_p0 = pnand %p10658_p13, %p11142_p8  ;;  %p10667_p7 = por %p10666_p4, %p10665_p5 }
  0x28   : > { %p10661_p2 = pneg %p10660_p0 }
  0x2a   : > { %p10668_p9 = pnand %p10667_p7, %p10661_p2 }
  0x2c   : > { %10671 = shalt.err (!%p10668_p9)
}
  0x2d   : > { %s11017_s24 = smov 2048   ;;  %s11018_s26 = smov 128  }
  0x2e   : > { %10537 = dma.hbm_to_vmem [thread:$0]  (!%p11126_p6), %s15795_s1, 16384, %s11115_s18, [#allocation6], %s11017_s24, %s11017_s24, %s11018_s26  }
  0x2f   : > { %s10672_s12 = scalar_lea.hbm %s15350_s3, 256 }
  0x30   : > { %p10673_p4 = scmp.ne.s32.totalorder %s15350_s3, %s10672_s12  ;;  %p10679_p12 = scmp.lt.u32.totalorder %s10672_s12, %s15350_s3 }
  0x32   : > { %p10675_p10 = pnand %p10673_p4, %p11142_p8 }
  0x34   : > { %p10676_p11 = pneg %p10675_p10 }
  0x36   : > { %p10681_p13 = pnand %p10679_p12, %p10676_p11 }
  0x38   : > { %10684 = shalt.err (!%p10681_p13)
}
  0x39   : > { %s10685_s18 = scalar_lea.vmem %s11130_s22, 256  ;;  %p10693_p7 = scmp.lt.s32.totalorder %s11130_s22, %s11130_s22 }
  0x3a   : > { %p10686_p0 = scmp.ne.s32.totalorder %s11130_s22, %s10685_s18  ;;  %p10694_p9 = scmp.lt.s32.totalorder %s10685_s18, %s10685_s18 }
  0x3c   : > { %p10688_p2 = pnand %p10686_p0, %p11142_p8  ;;  %p10695_p4 = por %p10694_p9, %p10693_p7 }
  0x3e   : > { %p10689_p5 = pneg %p10688_p2 }
  0x40   : > { %p10696_p10 = pnand %p10695_p4, %p10689_p5 }
  0x42   : > { %10699 = shalt.err (!%p10696_p10)
}
  0x43   : > { %10543 = dma.hbm_to_vmem [thread:$0]  (!%p11126_p6), %s15350_s3, 256, %s11130_s22, [#allocation9]  }
  0x44   : > { %s10700_s28 = scalar_lea.hbm %s15352_s5, 128 }
  0x45   : > { %p10701_p11 = scmp.ne.s32.totalorder %s15352_s5, %s10700_s28  ;;  %p10707_p0 = scmp.lt.u32.totalorder %s10700_s28, %s15352_s5 }
  0x47   : > { %p10703_p12 = pnand %p10701_p11, %p11142_p8 }
  0x49   : > { %p10704_p13 = pneg %p10703_p12 }
  0x4b   : > { %p10709_p2 = pnand %p10707_p0, %p10704_p13 }
  0x4d   : > { %10712 = shalt.err (!%p10709_p2)
}
  0x4e   : > { %s10713_s22 = scalar_lea.vmem %s11132_s25, 128  ;;  %p10721_p4 = scmp.lt.s32.totalorder %s11132_s25, %s11132_s25 }
  0x4f   : > { %p10714_p5 = scmp.ne.s32.totalorder %s11132_s25, %s10713_s22  ;;  %p10722_p10 = scmp.lt.s32.totalorder %s10713_s22, %s10713_s22 }
  0x51   : > { %p10716_p7 = pnand %p10714_p5, %p11142_p8  ;;  %p10723_p11 = por %p10722_p10, %p10721_p4 }
  0x53   : > { %p10717_p9 = pneg %p10716_p7 }
  0x55   : > { %p10724_p12 = pnand %p10723_p11, %p10717_p9 }
  0x57   : > { %10727 = shalt.err (!%p10724_p12)
}
  0x58   : > { %10549 = dma.hbm_to_vmem [thread:$0]  (!%p11126_p6), %s15352_s5, 128, %s11132_s25, [#allocation12]  }
  0x59   : > { %s11019_s10 = smov [#allocation14]   ;;  %s10728_s28 = scalar_lea.hbm %s15354_s7, 4096 }
  0x5a   : > { %s359_s20 = sshll.u32 %s11019_s10, 4  ;;  %p10729_p13 = scmp.ne.s32.totalorder %s15354_s7, %s10728_s28  ;;  %s360_s20 = int_to_ptr.vmem [resolvable:$true] %s359_s20 }
  0x5b   : > { %p10735_p5 = scmp.lt.u32.totalorder %s10728_s28, %s15354_s7 }
  0x5c   : > { %p10731_p0 = pnand %p10729_p13, %p11142_p8 }
  0x5e   : > { %p10732_p2 = pneg %p10731_p0 }
  0x60   : > { %p10737_p7 = pnand %p10735_p5, %p10732_p2 }
  0x62   : > { %10740 = shalt.err (!%p10737_p7)
}
  0x63   : > { %s10741_s25 = scalar_lea.vmem %s360_s20, 4096  ;;  %p10749_p11 = scmp.lt.s32.totalorder %s360_s20, %s360_s20 }
  0x64   : > { %p10742_p9 = scmp.ne.s32.totalorder %s360_s20, %s10741_s25  ;;  %p10750_p12 = scmp.lt.s32.totalorder %s10741_s25, %s10741_s25 }
  0x66   : > { %p10744_p4 = pnand %p10742_p9, %p11142_p8  ;;  %p10751_p1 = por %p10750_p12, %p10749_p11 }
  0x68   : > { %p10745_p10 = pneg %p10744_p4 }
  0x6a   : > { %p10752_p3 = pnand %p10751_p1, %p10745_p10 }
  0x6c   : > { %10755 = shalt.err (!%p10752_p3)
}
  0x6d   : > { %s11020_s22 = smov 8   ;;  %s11021_s10 = smov [#allocation7]  }
  0x6e   : > { %10555 = dma.hbm_to_vmem [thread:$0]  (!%p11126_p6), %s15354_s7, 4096, %s360_s20, [#allocation15], %s11018_s26, %s11018_s26, %s11020_s22  }
  0x6f   : > { %s303_s24 = sshll.u32 %s11021_s10, 4  ;;  %s11022_s27 = smov [#allocation10]   ;;  %s304_s24 = int_to_ptr.vmem [resolvable:$true] %s303_s24 }
  0x70   : > { %s324_s28 = sshll.u32 %s11022_s27, 4  ;;  %s15797_s2 = sld [smem:[#allocation165_spill]]  ;;  %s325_s28 = int_to_ptr.vmem [resolvable:$true] %s324_s28 }
  0x76   : > { %s10756_s12 = scalar_lea.hbm %s15797_s2, 256 }
  0x77   : > { %p10757_p1 = scmp.ne.s32.totalorder %s15797_s2, %s10756_s12  ;;  %p10763_p0 = scmp.lt.u32.totalorder %s10756_s12, %s15797_s2 }
  0x79   : > { %p10759_p3 = pnand %p10757_p1, %p11142_p8 }
  0x7b   : > { %p10760_p13 = pneg %p10759_p3 }
  0x7d   : > { %p10765_p2 = pnand %p10763_p0, %p10760_p13 }
  0x7f   : > { %10768 = shalt.err (!%p10765_p2)
}
  0x80   : > { %s10769_s26 = scalar_lea.vmem %s304_s24, 256  ;;  %p10777_p4 = scmp.lt.s32.totalorder %s304_s24, %s304_s24 }
  0x81   : > { %p10770_p5 = scmp.ne.s32.totalorder %s304_s24, %s10769_s26  ;;  %p10778_p10 = scmp.lt.s32.totalorder %s10769_s26, %s10769_s26 }
  0x83   : > { %p10772_p7 = pnand %p10770_p5, %p11142_p8  ;;  %p10779_p11 = por %p10778_p10, %p10777_p4 }
  0x85   : > { %p10773_p9 = pneg %p10772_p7 }
  0x87   : > { %p10780_p12 = pnand %p10779_p11, %p10773_p9 }
  0x89   : > { %10783 = shalt.err (!%p10780_p12)
}
  0x8a   : > { %10540 = dma.hbm_to_vmem [thread:$0]  (!%p11126_p6), %s15797_s2, 256, %s304_s24, [#allocation6]  }
  0x8b   : > { %s10784_s10 = scalar_lea.hbm %s15351_s4, 65536 }
  0x8c   : > { %p10785_p1 = scmp.ne.s32.totalorder %s15351_s4, %s10784_s10  ;;  %p10791_p0 = scmp.lt.u32.totalorder %s10784_s10, %s15351_s4 }
  0x8e   : > { %p10787_p3 = pnand %p10785_p1, %p11142_p8 }
  0x90   : > { %p10788_p13 = pneg %p10787_p3 }
  0x92   : > { %p10793_p2 = pnand %p10791_p0, %p10788_p13 }
  0x94   : > { %10796 = shalt.err (!%p10793_p2)
}
  0x95   : > { %s10797_s17 = scalar_lea.vmem %s325_s28, 65536  ;;  %p10805_p4 = scmp.lt.s32.totalorder %s325_s28, %s325_s28 }
  0x96   : > { %p10798_p5 = scmp.ne.s32.totalorder %s325_s28, %s10797_s17  ;;  %p10806_p10 = scmp.lt.s32.totalorder %s10797_s17, %s10797_s17 }
  0x98   : > { %p10800_p7 = pnand %p10798_p5, %p11142_p8  ;;  %p10807_p11 = por %p10806_p10, %p10805_p4 }
  0x9a   : > { %p10801_p9 = pneg %p10800_p7 }
  0x9c   : > { %p10808_p12 = pnand %p10807_p11, %p10801_p9 }
  0x9e   : > { %10811 = shalt.err (!%p10808_p12)
}
  0x9f   : > { %s11023_s24 = smov 1024   ;;  %s11024_s25 = smov 64  }
  0xa0   : > { %10546 = dma.hbm_to_vmem [thread:$0]  (!%p11126_p6), %s15351_s4, 65536, %s325_s28, [#allocation9], %s11023_s24, %s11023_s24, %s11024_s25  }
  0xa1   : > { %s11025_s20 = smov [#allocation13]   ;;  %s11026_s1 = smov [#allocation16]  }
  0xa2   : > { %s349_s22 = sshll.u32 %s11025_s20, 4  ;;  %s373_s18 = sshll.u32 %s11026_s1, 4  ;;  %s350_s22 = int_to_ptr.vmem [resolvable:$true] %s349_s22  ;;  %s374_s18 = int_to_ptr.vmem [resolvable:$true] %s373_s18 }
  0xa3   : > { %s10812_s29 = scalar_lea.hbm %s15353_s6, 128 }
  0xa4   : > { %p10813_p1 = scmp.ne.s32.totalorder %s15353_s6, %s10812_s29  ;;  %p10819_p0 = scmp.lt.u32.totalorder %s10812_s29, %s15353_s6 }
  0xa6   : > { %p10815_p3 = pnand %p10813_p1, %p11142_p8 }
  0xa8   : > { %p10816_p13 = pneg %p10815_p3 }
  0xaa   : > { %p10821_p2 = pnand %p10819_p0, %p10816_p13 }
  0xac   : > { %10824 = shalt.err (!%p10821_p2)
}
  0xad   : > { %s10825_s28 = scalar_lea.vmem %s350_s22, 128  ;;  %p10833_p4 = scmp.lt.s32.totalorder %s350_s22, %s350_s22 }
  0xae   : > { %p10826_p5 = scmp.ne.s32.totalorder %s350_s22, %s10825_s28  ;;  %p10834_p10 = scmp.lt.s32.totalorder %s10825_s28, %s10825_s28 }
  0xb0   : > { %p10828_p7 = pnand %p10826_p5, %p11142_p8  ;;  %p10835_p11 = por %p10834_p10, %p10833_p4 }
  0xb2   : > { %p10829_p9 = pneg %p10828_p7 }
  0xb4   : > { %p10836_p12 = pnand %p10835_p11, %p10829_p9 }
  0xb6   : > { %10839 = shalt.err (!%p10836_p12)
}
  0xb7   : > { %10552 = dma.hbm_to_vmem [thread:$0]  (!%p11126_p6), %s15353_s6, 128, %s350_s22, [#allocation12]  }
  0xb8   : > { %s10840_s26 = scalar_lea.hbm %s15355_s8, 16 }
  0xb9   : > { %p10841_p1 = scmp.ne.s32.totalorder %s15355_s8, %s10840_s26  ;;  %p10847_p0 = scmp.lt.u32.totalorder %s10840_s26, %s15355_s8 }
  0xbb   : > { %p10843_p3 = pnand %p10841_p1, %p11142_p8 }
  0xbd   : > { %p10844_p13 = pneg %p10843_p3 }
  0xbf   : > { %p10849_p2 = pnand %p10847_p0, %p10844_p13 }
  0xc1   : > { %10852 = shalt.err (!%p10849_p2)
}
  0xc2   : > { %s10853_s29 = scalar_lea.vmem %s374_s18, 16  ;;  %s10860_s22 = scalar_lea.vmem %s374_s18, 32 }
  0xc3   : > { %p10854_p5 = scmp.ne.s32.totalorder %s374_s18, %s10853_s29  ;;  %p10861_p4 = scmp.lt.s32.totalorder %s374_s18, %s374_s18 }
  0xc4   : > { %p10862_p10 = scmp.lt.s32.totalorder %s10860_s22, %s10853_s29 }
  0xc5   : > { %p10856_p7 = pnand %p10854_p5, %p11142_p8 }
  0xc6   : > { %p10863_p11 = por %p10862_p10, %p10861_p4 }
  0xc7   : > { %p10857_p9 = pneg %p10856_p7 }
  0xc9   : > { %p10864_p12 = pnand %p10863_p11, %p10857_p9 }
  0xcb   : > { %10867 = shalt.err (!%p10864_p12)
}
  0xcc   : > { %10558 = dma.hbm_to_vmem [thread:$0]  (!%p11126_p6), %s15355_s8, 16, %s374_s18, [#allocation15]  }
  0xcd   : > { %s11027_s17 = smov [#allocation17]   ;;  %s10868_s2 = scalar_lea.hbm %s15356_s9, 16 }
  0xce   : > { %s384_s28 = sshll.u32 %s11027_s17, 4  ;;  %p10869_p1 = scmp.ne.s32.totalorder %s15356_s9, %s10868_s2  ;;  %s385_s28 = int_to_ptr.vmem [resolvable:$true] %s384_s28 }
  0xcf   : > { %p10875_p0 = scmp.lt.u32.totalorder %s10868_s2, %s15356_s9 }
  0xd0   : > { %p10871_p3 = pnand %p10869_p1, %p11142_p8 }
  0xd2   : > { %p10872_p13 = pneg %p10871_p3 }
  0xd4   : > { %p10877_p2 = pnand %p10875_p0, %p10872_p13 }
  0xd6   : > { %10880 = shalt.err (!%p10877_p2)
}
  0xd7   : > { %s10881_s18 = scalar_lea.vmem %s385_s28, 16  ;;  %s10888_s10 = scalar_lea.vmem %s385_s28, 32 }
  0xd8   : > { %p10882_p5 = scmp.ne.s32.totalorder %s385_s28, %s10881_s18  ;;  %p10889_p4 = scmp.lt.s32.totalorder %s385_s28, %s385_s28 }
  0xd9   : > { %p10890_p10 = scmp.lt.s32.totalorder %s10888_s10, %s10881_s18 }
  0xda   : > { %p10884_p7 = pnand %p10882_p5, %p11142_p8 }
  0xdb   : > { %p10891_p11 = por %p10890_p10, %p10889_p4 }
  0xdc   : > { %p10885_p9 = pneg %p10884_p7 }
  0xde   : > { %p10892_p12 = pnand %p10891_p11, %p10885_p9 }
  0xe0   : > { %10895 = shalt.err (!%p10892_p12)
}
  0xe1   : > { %10561 = dma.hbm_to_vmem [thread:$0]  (!%p11126_p6), %s15356_s9, 16, %s385_s28, [#allocation18]  }
  0xe2   : > { %s9304_s11 = sadd.s32 4294967294, %s11012_s16   ;;  %s11322_s23 = sadd.s32 1, %s11012_s16  }
  0xe3   : > { %s35_s22 = ssub.s32 %s11012_s16, %s11322_s23  ;;  %s38_s30 = sadd.s32 1, %s11008_s15 }
  0xe4   : > { %p36_p8 = scmp.eq.s32.totalorder %s35_s22, 0  ;;  %p45_p1 = scmp.ne.s32.totalorder %s11008_s15, %s11004_s14 }
  0xe5   : > { %p46_p3 = scmp.eq.s32.totalorder %s11012_s16, 0  ;;  %p51_p13 = scmp.ne.s32.totalorder %s11004_s14, %s11000_s13 }
  0xe6   : > { %s11333_s12 = scalar_select %p36_p8, %s11008_s15, %s38_s30  }
  0xe7   : > { %p11335_p0 = por %p46_p3, %p45_p1  ;;  %p15799_p2 = scmp.eq.s32.totalorder %s11110_s19, 0 }
  0xe8   : > { %p264_p5 = scmp.eq.s32.totalorder %s11110_s19, 1  ;;  %p270_p7 = scmp.eq.s32.totalorder %s9304_s11, 1 }
  0xe9   : > { %p11341_p6 = por %p15799_p2, %p51_p13  ;;  %p10579_p9 = scmp.lt.s32.totalorder %s11012_s16, 2 }
  0xea   : > { %s395_s24 = sand.u32 1, %s11008_s15   ;;  %p11348_p4 = por %p264_p5, %p45_p1 }
  0xeb   : > { %p11352_p10 = por %p270_p7, %p51_p13  ;;  %s9316_s21 = sshll.u32 %s395_s24, 8 }
  0xec   : > { %s15801_s25 = scalar_select %p11348_p4, 1, 0 }
  0xed   : > { %s15802_s2 = scalar_select %p11352_p10, 1, 0 }
  0xee   : > { %s9340_s26 = sshll.u32 %s11012_s16, 12  ;;  %s399_s10 = scalar_lea.vmem [#allocation2], %s9316_s21 }
  0xef   : > { %s11360_s18 = scalar_lea.hbm %s15347_s0, %s9340_s26  ;;  %s407_s27 = sshll.u32 %s399_s10, 4  ;;  %s11362_s27 = int_to_ptr.vmem [resolvable:$true] %s407_s27 }
  0xf0   : > { %p11366_p11 = pnand %p10579_p9, %p11335_p0  ;;  %s11370_s11 = scalar_lea.sflag [#allocation3], %s395_s24 }
  0xf1   : > { %s10896_s22 = scalar_lea.hbm %s11360_s18, 4096  ;;  %s10901_s17 = scalar_lea.hbm %s15347_s0, 8192 }
  0xf2   : > { %p10897_p12 = scmp.ne.s32.totalorder %s11360_s18, %s10896_s22  ;;  %p10898_p8 = pneg %p11366_p11 }
  0xf3   : > { %p10902_p13 = scmp.lt.u32.totalorder %s11360_s18, %s15347_s0  ;;  %p10903_p0 = scmp.lt.u32.totalorder %s10901_s17, %s10896_s22 }
  0xf4   : > { %p10899_p1 = pnand %p10898_p8, %p10897_p12  ;;  %p10905_p5 = scmp.lt.u32.totalorder %s10896_s22, %s11360_s18 }
  0xf5   : > { %p10904_p2 = por %p10903_p0, %p10902_p13 }
  0xf6   : > { %p10900_p3 = pneg %p10899_p1 }
  0xf7   : > { %p10906_p7 = por %p10905_p5, %p10904_p2 }
  0xf9   : > { %p10907_p9 = pnand %p10906_p7, %p10900_p3 }
  0xfb   : > { %10910 = shalt.err (!%p10907_p9)
}
  0xfc   : > { %s10911_s24 = scalar_lea.vmem %s11362_s27, 4096  ;;  %s11028_s1 = smov [#allocation2]  }
  0xfd   : > { %p10912_p12 = scmp.ne.s32.totalorder %s11362_s27, %s10911_s24  ;;  %s10916_s10 = sshll.u32 %s11028_s1, 4  ;;  %s10917_s10 = int_to_ptr.vmem [resolvable:$false] %s10916_s10 }
  0xfe   : > { %s10918_s30 = scalar_lea.vmem %s10917_s10, 8192  ;;  %p10919_p4 = scmp.lt.s32.totalorder %s11362_s27, %s10917_s10 }
  0xff   : > { %p10914_p1 = pnand %p10912_p12, %p10898_p8  ;;  %p10920_p13 = scmp.lt.s32.totalorder %s10918_s30, %s10911_s24 }
 0x101   : > { %p10915_p10 = pneg %p10914_p1  ;;  %p10921_p0 = por %p10920_p13, %p10919_p4 }
 0x103   : > { %p10922_p2 = pnand %p10921_p0, %p10915_p10 }
 0x105   : > { %10925 = shalt.err (!%p10922_p2)
}
 0x106   : > { %s11029_s22 = smov 256   ;;  %s11030_s21 = smov 16  }
 0x107   : > { %10565 = dma.hbm_to_vmem [thread:$0]  (!%p11366_p11), %s11360_s18, 4096, %s11362_s27, %s11370_s11, %s11029_s22, %s11029_s22, %s11030_s21  }
 0x108   : > { %s15804_s17 = sld [smem:[#allocation27_spill]] }
 0x10e   : > { %p15805_p8 = scmp.ne.s32.totalorder %s15804_s17, 0 }
 0x110   : > { %419 = sbr.rel (%p15805_p8) target bundleno = 2175 (0x87f), region = 60 }
 0x117   : > { %s11401_s26 = sand.u32 1, %s11004_s14  }
 0x118   : > { %s9321_s20 = sshll.u32 %s11401_s26, 8  ;;  %s422_s24 = scalar_lea.sflag [#allocation3], %s11401_s26 }
 0x119   : > { %s11405_s1 = scalar_lea.vmem [#allocation2], %s9321_s20 }
 0x11a   : > { %10971 = dma.done.wait (%p11341_p6), %s422_s24, 4096  }
 0x11b   : > { %10973 = vsyncadd (%p11341_p6), %s422_s24, 4294963200  ;;  %p15806_p4 = scmp.eq.s32.totalorder %s11110_s19, 0 }
 0x11d   : > { %10975 = dma.done.wait (%p15806_p4), [#allocation6], 16640   ;;  %p15807_p10 = pmov %p15806_p4 }
 0x11e   : > { %p15808_p11 = pmov %p15806_p4 }
 0x11f   : > { %10977 = vsyncadd (%p15807_p10), [#allocation6], 4294950656 }
 0x120   : > { %10979 = dma.done.wait (%p15808_p11), [#allocation9], 65792   ;;  %p15809_p3 = pmov %p15806_p4 }
 0x122   : > { %10981 = vsyncadd (%p15809_p3), [#allocation9], 4294901504  ;;  %p15810_p5 = pmov %p15809_p3 }
 0x123   : > { %p15811_p7 = pmov %p15809_p3 }
 0x124   : > { %10983 = dma.done.wait (%p15810_p5), [#allocation12], 256  }
 0x125   : > { %10985 = vsyncadd (%p15811_p7), [#allocation12], 4294967040  ;;  %p15812_p6 = pmov %p15809_p3 }
 0x126   : > { %p15813_p9 = pmov %p15809_p3 }
 0x127   : > { %10987 = dma.done.wait (%p15812_p6), [#allocation15], 4112  }
 0x128   : > { %10989 = vsyncadd (%p15813_p9), [#allocation15], 4294963184  ;;  %p15814_p12 = pmov %p15809_p3 }
 0x129   : > { %p15815_p1 = pmov %p15809_p3 }
 0x12a   : > { %10991 = dma.done.wait (%p15814_p12), [#allocation18], 16  }
 0x12b   : > { %10993 = vsyncadd (%p15815_p1), [#allocation18], 4294967280  ;;  %v550_v0 = vld [vmem:[#allocation5 + $0x8] sm:$0xff]  ;;  %v552_v1 = vld [vmem:[#allocation5 + $0x18] sm:$0xff]  ;;  %s9331_s28 = sshll.u32 %s11401_s26, 7  ;;  %s9341_s27 = sshll.u32 %s11110_s19, 11 }
 0x12c   : > { %v549_v2 = vld [vmem:[#allocation5] sm:$0xff]  ;;  %v678_v3 = vunpack.c.l.s8.bf16 %v550_v0  ;;  %v694_v4 = vunpack.c.h.s8.bf16 %v550_v0  ;;  %v680_v5 = vunpack.c.l.s8.bf16 %v552_v1  ;;  %v696_v6 = vunpack.c.h.s8.bf16 %v552_v1  ;;  %v551_v7 = vld [vmem:[#allocation5 + $0x10] sm:$0xff]  ;;  %v566_v10 = vld [vmem:[#allocation5 + $0x88] sm:$0xff]  ;;  %s15235_s18 = scalar_lea.vmem [#allocation19], %s9331_s28  ;;  %s16705_s30 = sld [smem:[#allocation166_spill]] }
 0x12d   : > { %v677_v8 = vunpack.c.l.s8.bf16 %v549_v2  ;;  %v679_v9 = vunpack.c.l.s8.bf16 %v551_v7  ;;  %v568_v11 = vld [vmem:[#allocation5 + $0x98] sm:$0xff]  ;;  %v693_v12 = vunpack.c.h.s8.bf16 %v549_v2  ;;  %v695_v13 = vunpack.c.h.s8.bf16 %v551_v7  ;;  %v565_v16 = vld [vmem:[#allocation5 + $0x80] sm:$0xff]  ;;  %v567_v17 = vld [vmem:[#allocation5 + $0x90] sm:$0xff]  ;;  %s9145_s29 = sshll.u32 %s15235_s18, 4  ;;  %s9132_s19 = scalar_lea.sflag [#allocation4], %s11401_s26  ;;  %s15300_s29 = int_to_ptr.vmem [resolvable:$true] %s9145_s29 }
 0x12e   : > { %933 = vmatprep.subr.bf16.mxu0 %v678_v3  ;;  %1046 = vmatprep.subr.bf16.mxu1 %v680_v5  ;;  %v710_v14 = vunpack.c.l.s8.bf16 %v566_v10  ;;  %v712_v15 = vunpack.c.l.s8.bf16 %v568_v11  ;;  %v709_v18 = vunpack.c.l.s8.bf16 %v565_v16  ;;  %v711_v19 = vunpack.c.l.s8.bf16 %v567_v17  ;;  %v582_v22 = vld [vmem:[#allocation5 + $0x108] sm:$0xff]  ;;  %v584_v23 = vld [vmem:[#allocation5 + $0x118] sm:$0xff]  ;;  %v581_v28 = vld [vmem:[#allocation5 + $0x100] sm:$0xff]  ;;  %s10926_s21 = scalar_lea.vmem %s15300_s29, 2048  ;;  %p16706_p0 = scmp.ne.s32.totalorder %s15801_s25, 0 }
 0x12f   : > { %934 = vmatpush1.bf16.msra.mxu0 %v677_v8  ;;  %1047 = vmatpush1.bf16.msra.mxu1 %v679_v9  ;;  %v726_v20 = vunpack.c.h.s8.bf16 %v566_v10  ;;  %v728_v21 = vunpack.c.h.s8.bf16 %v568_v11  ;;  %v725_v24 = vunpack.c.h.s8.bf16 %v565_v16  ;;  %v727_v25 = vunpack.c.h.s8.bf16 %v567_v17  ;;  %v583_v29 = vld [vmem:[#allocation5 + $0x110] sm:$0xff]  ;;  %v502_v30 = vld [vmem:[%s11405_s1 + $0x8] sm:$0xff]  ;;  %v504_v31 = vld [vmem:[%s11405_s1 + $0x18] sm:$0xff]  ;;  %p10927_p13 = scmp.ne.s32.totalorder %s15300_s29, %s10926_s21  ;;  %s11031_s17 = smov [#allocation19]  }
 0x130   : > { %935 = vmatprep.subr.bf16.mxu0 %v694_v4  ;;  %1048 = vmatprep.subr.bf16.mxu1 %v696_v6  ;;  %v742_v26 = vunpack.c.l.s8.bf16 %v582_v22  ;;  %v744_v27 = vunpack.c.l.s8.bf16 %v584_v23  ;;  %v741_v32 = vunpack.c.l.s8.bf16 %v581_v28  ;;  %v743_v33 = vunpack.c.l.s8.bf16 %v583_v29  ;;  %v598_v37 = vld [vmem:[#allocation5 + $0x188] sm:$0xff]  ;;  %v600_v38 = vld [vmem:[#allocation5 + $0x198] sm:$0xff]  ;;  %v597_v43 = vld [vmem:[#allocation5 + $0x180] sm:$0xff]  ;;  %s10930_s20 = sshll.u32 %s11031_s17, 4  ;;  %s10931_s20 = int_to_ptr.vmem [resolvable:$false] %s10930_s20 }
 0x131   : > { %v758_v34 = vunpack.c.h.s8.bf16 %v582_v22  ;;  %v760_v35 = vunpack.c.h.s8.bf16 %v584_v23  ;;  %v11433_v36 = vpack.c.bf16 %v504_v31, %v502_v30  ;;  %v757_v39 = vunpack.c.h.s8.bf16 %v581_v28  ;;  %v599_v44 = vld [vmem:[#allocation5 + $0x190] sm:$0xff]  ;;  %v614_v49 = vld [vmem:[#allocation5 + $0x208] sm:$0xff]  ;;  %v616_v50 = vld [vmem:[#allocation5 + $0x218] sm:$0xff]  ;;  %p10928_p2 = pnand %p10927_p13, %p16706_p0  ;;  %s10932_s24 = scalar_lea.vmem %s10931_s20, 4096 }
 0x132   : > { %v759_v40 = vunpack.c.h.s8.bf16 %v583_v29  ;;  %v774_v41 = vunpack.c.l.s8.bf16 %v598_v37  ;;  %v776_v42 = vunpack.c.l.s8.bf16 %v600_v38  ;;  %v773_v45 = vunpack.c.l.s8.bf16 %v597_v43  ;;  %v613_v55 = vld [vmem:[#allocation5 + $0x200] sm:$0xff]  ;;  %v615_v56 = vld [vmem:[#allocation5 + $0x210] sm:$0xff]  ;;  %v630_v61 = vld [vmem:[#allocation5 + $0x288] sm:$0xff]  ;;  %s15298_s22 = scalar_lea.hbm %s16705_s30, %s9341_s27  ;;  %p10933_p4 = scmp.lt.s32.totalorder %s15300_s29, %s10931_s20 }
 0x133   : > { %936 = vmatpush1.bf16.msra.mxu0 %v693_v12  ;;  %1049 = vmatpush1.bf16.msra.mxu1 %v695_v13  ;;  %v775_v46 = vunpack.c.l.s8.bf16 %v599_v44  ;;  %v790_v47 = vunpack.c.h.s8.bf16 %v598_v37  ;;  %v792_v48 = vunpack.c.h.s8.bf16 %v600_v38  ;;  %v789_v51 = vunpack.c.h.s8.bf16 %v597_v43  ;;  %v632_v62 = vld [vmem:[#allocation5 + $0x298] sm:$0xff]  ;;  %v629_v3 = vld [vmem:[#allocation5 + $0x280] sm:$0xff]  ;;  %v631_v4 = vld [vmem:[#allocation5 + $0x290] sm:$0xff]  ;;  %p10929_p8 = pneg %p10928_p2  ;;  %p10934_p10 = scmp.lt.s32.totalorder %s10932_s24, %s10926_s21 }
 0x134   : > { %937 = vmatprep.subr.bf16.mxu0 %v710_v14  ;;  %1050 = vmatprep.subr.bf16.mxu1 %v712_v15  ;;  %v791_v52 = vunpack.c.h.s8.bf16 %v599_v44  ;;  %v806_v53 = vunpack.c.l.s8.bf16 %v614_v49  ;;  %v808_v54 = vunpack.c.l.s8.bf16 %v616_v50  ;;  %v805_v57 = vunpack.c.l.s8.bf16 %v613_v55  ;;  %v646_v9 = vld [vmem:[#allocation5 + $0x308] sm:$0xff]  ;;  %v648_v10 = vld [vmem:[#allocation5 + $0x318] sm:$0xff]  ;;  %v645_v15 = vld [vmem:[#allocation5 + $0x300] sm:$0xff] }
 0x135   : > { %965 = vmatprep.mubr.bf16.mxu0 %v11433_v36  ;;  %1078 = vmatprep.mubr.bf16.mxu1 %v11433_v36  ;;  %v807_v58 = vunpack.c.l.s8.bf16 %v615_v56  ;;  %v822_v59 = vunpack.c.h.s8.bf16 %v614_v49  ;;  %v824_v60 = vunpack.c.h.s8.bf16 %v616_v50  ;;  %v821_v63 = vunpack.c.h.s8.bf16 %v613_v55  ;;  %v647_v16 = vld [vmem:[#allocation5 + $0x310] sm:$0xff]  ;;  %v664_v22 = vld [vmem:[#allocation5 + $0x398] sm:$0xff]  ;;  %v501_v38 = vld [vmem:[%s11405_s1] sm:$0xff]  ;;  %p10935_p11 = por %p10934_p10, %p10933_p4 }
 0x136   : > { %v823_v0 = vunpack.c.h.s8.bf16 %v615_v56  ;;  %v838_v1 = vunpack.c.l.s8.bf16 %v630_v61  ;;  %v840_v2 = vunpack.c.l.s8.bf16 %v632_v62  ;;  %v837_v5 = vunpack.c.l.s8.bf16 %v629_v3  ;;  %v663_v28 = vld [vmem:[#allocation5 + $0x390] sm:$0xff]  ;;  %v505_v56 = vld [vmem:[%s11405_s1 + $0x20] sm:$0xff] }
 0x137   : > { %938 = vmatpush1.bf16.msra.mxu0 %v709_v18  ;;  %1051 = vmatpush1.bf16.msra.mxu1 %v711_v19  ;;  %v839_v6 = vunpack.c.l.s8.bf16 %v631_v4  ;;  %v854_v7 = vunpack.c.h.s8.bf16 %v630_v61  ;;  %v856_v8 = vunpack.c.h.s8.bf16 %v632_v62  ;;  %v853_v11 = vunpack.c.h.s8.bf16 %v629_v3  ;;  %v555_v43 = vld [vmem:[#allocation5 + $0x30] sm:$0xff]  ;;  %p10936_p3 = pnand %p10935_p11, %p10929_p8 }
 0x138   : > { %939 = vmatprep.subr.bf16.mxu0 %v726_v20  ;;  %1052 = vmatprep.subr.bf16.mxu1 %v728_v21  ;;  %v855_v12 = vunpack.c.h.s8.bf16 %v631_v4  ;;  %v870_v13 = vunpack.c.l.s8.bf16 %v646_v9  ;;  %v872_v14 = vunpack.c.l.s8.bf16 %v648_v10  ;;  %v869_v17 = vunpack.c.l.s8.bf16 %v645_v15  ;;  %v662_v21 = vld [vmem:[#allocation5 + $0x388] sm:$0xff]  ;;  %v571_v61 = vld [vmem:[#allocation5 + $0xb0] sm:$0xff] }
 0x139   : > { %v871_v18 = vunpack.c.l.s8.bf16 %v647_v16  ;;  %v886_v19 = vunpack.c.h.s8.bf16 %v646_v9  ;;  %v888_v20 = vunpack.c.h.s8.bf16 %v648_v10  ;;  %v885_v23 = vunpack.c.h.s8.bf16 %v645_v15  ;;  %v509_v10 = vld [vmem:[%s11405_s1 + $0x40] sm:$0xff]  ;;  %v587_v15 = vld [vmem:[#allocation5 + $0x130] sm:$0xff] }
 0x13a   : > { %v903_v30 = vunpack.c.l.s8.bf16 %v663_v28  ;;  %v918_v31 = vunpack.c.h.s8.bf16 %v662_v21  ;;  %v919_v37 = vunpack.c.h.s8.bf16 %v663_v28  ;;  %v699_v55 = vunpack.c.h.s8.bf16 %v555_v43  ;;  %v513_v28 = vld [vmem:[%s11405_s1 + $0x60] sm:$0xff] }
 0x13b   : > { %940 = vmatpush1.bf16.msra.mxu0 %v725_v24  ;;  %1053 = vmatpush1.bf16.msra.mxu1 %v727_v25  ;;  %v887_v24 = vunpack.c.h.s8.bf16 %v647_v16  ;;  %v902_v25 = vunpack.c.l.s8.bf16 %v662_v21  ;;  %v731_v9 = vunpack.c.h.s8.bf16 %v571_v61 }
 0x13c   : > { %941 = vmatprep.subr.bf16.mxu0 %v742_v26  ;;  %1054 = vmatprep.subr.bf16.mxu1 %v744_v27  ;;  %v904_v26 = vunpack.c.l.s8.bf16 %v664_v22  ;;  %v661_v27 = vld [vmem:[#allocation5 + $0x380] sm:$0xff] }
 0x13d   : > { %v901_v29 = vunpack.c.l.s8.bf16 %v661_v27 }
 0x13f   : > { %942 = vmatpush1.bf16.msra.mxu0 %v741_v32  ;;  %1055 = vmatpush1.bf16.msra.mxu1 %v743_v33  ;;  %v920_v32 = vunpack.c.h.s8.bf16 %v664_v22  ;;  %v554_v33 = vld [vmem:[#allocation5 + $0x28] sm:$0xff] }
 0x140   : > { %943 = vmatprep.subr.bf16.mxu0 %v758_v34  ;;  %1056 = vmatprep.subr.bf16.mxu1 %v760_v35  ;;  %v556_v34 = vld [vmem:[#allocation5 + $0x38] sm:$0xff]  ;;  %v917_v35 = vunpack.c.h.s8.bf16 %v661_v27  ;;  %v698_v49 = vunpack.c.h.s8.bf16 %v554_v33  ;;  %v763_v27 = vunpack.c.h.s8.bf16 %v587_v15 }
 0x141   : > { %v700_v50 = vunpack.c.h.s8.bf16 %v556_v34 }
 0x143   : > { %944 = vmatpush1.bf16.msra.mxu0 %v757_v39  ;;  %1057 = vmatpush1.bf16.msra.mxu1 %v759_v40  ;;  %v503_v39 = vld [vmem:[%s11405_s1 + $0x10] sm:$0xff]  ;;  %v682_v40 = vunpack.c.l.s8.bf16 %v554_v33 }
 0x144   : > { %945 = vmatprep.subr.bf16.mxu0 %v774_v41  ;;  %1058 = vmatprep.subr.bf16.mxu1 %v776_v42  ;;  %v684_v41 = vunpack.c.l.s8.bf16 %v556_v34  ;;  %v553_v42 = vld [vmem:[#allocation5 + $0x20] sm:$0xff]  ;;  %v11439_v44 = vpack.c.bf16 %v503_v39, %v501_v38  ;;  %v603_v33 = vld [vmem:[#allocation5 + $0x1b0] sm:$0xff] }
 0x145   : > { %v779_v39 = vunpack.c.l.s8.bf16 %v603_v33 }
 0x147   : > { %946 = vmatpush1.bf16.msra.mxu0 %v773_v45  ;;  %1059 = vmatpush1.bf16.msra.mxu1 %v775_v46  ;;  %v506_v45 = vld [vmem:[%s11405_s1 + $0x28] sm:$0xff]  ;;  %v508_v46 = vld [vmem:[%s11405_s1 + $0x38] sm:$0xff] }
 0x148   : > { %947 = vmatprep.subr.bf16.mxu0 %v790_v47  ;;  %1060 = vmatprep.subr.bf16.mxu1 %v792_v48  ;;  %v681_v47 = vunpack.c.l.s8.bf16 %v553_v42  ;;  %v683_v48 = vunpack.c.l.s8.bf16 %v555_v43  ;;  %v618_v43 = vld [vmem:[#allocation5 + $0x228] sm:$0xff] }
 0x14b   : > { %948 = vmatpush1.bf16.msra.mxu0 %v789_v51  ;;  %1061 = vmatpush1.bf16.msra.mxu1 %v791_v52  ;;  %v11443_v51 = vpack.c.bf16 %v508_v46, %v506_v45  ;;  %v570_v52 = vld [vmem:[#allocation5 + $0xa8] sm:$0xff]  ;;  %v620_v45 = vld [vmem:[#allocation5 + $0x238] sm:$0xff] }
 0x14c   : > { %949 = vmatprep.subr.bf16.mxu0 %v806_v53  ;;  %1062 = vmatprep.subr.bf16.mxu1 %v808_v54  ;;  %v572_v53 = vld [vmem:[#allocation5 + $0xb8] sm:$0xff]  ;;  %v697_v54 = vunpack.c.h.s8.bf16 %v553_v42  ;;  %v730_v3 = vunpack.c.h.s8.bf16 %v570_v52 }
 0x14d   : > { %v732_v4 = vunpack.c.h.s8.bf16 %v572_v53 }
 0x14f   : > { %950 = vmatpush1.bf16.msra.mxu0 %v805_v57  ;;  %1063 = vmatpush1.bf16.msra.mxu1 %v807_v58  ;;  %v507_v57 = vld [vmem:[%s11405_s1 + $0x30] sm:$0xff]  ;;  %v714_v58 = vunpack.c.l.s8.bf16 %v570_v52  ;;  %v812_v52 = vunpack.c.l.s8.bf16 %v620_v45 }
 0x150   : > { %951 = vmatprep.subr.bf16.mxu0 %v822_v59  ;;  %1064 = vmatprep.subr.bf16.mxu1 %v824_v60  ;;  %v716_v59 = vunpack.c.l.s8.bf16 %v572_v53  ;;  %v569_v60 = vld [vmem:[#allocation5 + $0xa0] sm:$0xff]  ;;  %v11451_v62 = vpack.c.bf16 %v507_v57, %v505_v56  ;;  %v522_v56 = vld [vmem:[%s11405_s1 + $0xa8] sm:$0xff]  ;;  %v524_v57 = vld [vmem:[%s11405_s1 + $0xb8] sm:$0xff] }
 0x151   : > { %v617_v53 = vld [vmem:[#allocation5 + $0x220] sm:$0xff] }
 0x153   : > { %952 = vmatpush1.bf16.msra.mxu0 %v821_v63  ;;  %1065 = vmatpush1.bf16.msra.mxu1 %v823_v0  ;;  %v510_v63 = vld [vmem:[%s11405_s1 + $0x48] sm:$0xff]  ;;  %v512_v0 = vld [vmem:[%s11405_s1 + $0x58] sm:$0xff] }
 0x154   : > { %953 = vmatprep.subr.bf16.mxu0 %v838_v1  ;;  %1066 = vmatprep.subr.bf16.mxu1 %v840_v2  ;;  %v713_v1 = vunpack.c.l.s8.bf16 %v569_v60  ;;  %v715_v2 = vunpack.c.l.s8.bf16 %v571_v61  ;;  %v828_v61 = vunpack.c.h.s8.bf16 %v620_v45 }
 0x157   : > { %954 = vmatpush1.bf16.msra.mxu0 %v837_v5  ;;  %1067 = vmatpush1.bf16.msra.mxu1 %v839_v6  ;;  %v11455_v5 = vpack.c.bf16 %v512_v0, %v510_v63  ;;  %v586_v6 = vld [vmem:[#allocation5 + $0x128] sm:$0xff]  ;;  %v11491_v63 = vpack.c.bf16 %v524_v57, %v522_v56 }
 0x158   : > { %955 = vmatprep.subr.bf16.mxu0 %v854_v7  ;;  %1068 = vmatprep.subr.bf16.mxu1 %v856_v8  ;;  %v588_v7 = vld [vmem:[#allocation5 + $0x138] sm:$0xff]  ;;  %v729_v8 = vunpack.c.h.s8.bf16 %v569_v60  ;;  %v762_v21 = vunpack.c.h.s8.bf16 %v586_v6  ;;  %v826_v60 = vunpack.c.h.s8.bf16 %v618_v43  ;;  %v634_v0 = vld [vmem:[#allocation5 + $0x2a8] sm:$0xff] }
 0x159   : > { %v764_v22 = vunpack.c.h.s8.bf16 %v588_v7  ;;  %15817 = vst [vmem:[#allocation29_spill] sm:$0xff] %v11491_v63 }
 0x15b   : > { %956 = vmatpush1.bf16.msra.mxu0 %v853_v11  ;;  %1069 = vmatpush1.bf16.msra.mxu1 %v855_v12  ;;  %v511_v11 = vld [vmem:[%s11405_s1 + $0x50] sm:$0xff]  ;;  %v746_v12 = vunpack.c.l.s8.bf16 %v586_v6 }
 0x15c   : > { %957 = vmatprep.subr.bf16.mxu0 %v870_v13  ;;  %1070 = vmatprep.subr.bf16.mxu1 %v872_v14  ;;  %v748_v13 = vunpack.c.l.s8.bf16 %v588_v7  ;;  %v585_v14 = vld [vmem:[#allocation5 + $0x120] sm:$0xff]  ;;  %v11463_v16 = vpack.c.bf16 %v511_v11, %v509_v10  ;;  %v523_v6 = vld [vmem:[%s11405_s1 + $0xb0] sm:$0xff]  ;;  %v842_v7 = vunpack.c.l.s8.bf16 %v634_v0 }
 0x15d   : > { %v635_v10 = vld [vmem:[#allocation5 + $0x2b0] sm:$0xff] }
 0x15f   : > { %958 = vmatpush1.bf16.msra.mxu0 %v869_v17  ;;  %1071 = vmatpush1.bf16.msra.mxu1 %v871_v18  ;;  %v514_v17 = vld [vmem:[%s11405_s1 + $0x68] sm:$0xff]  ;;  %v516_v18 = vld [vmem:[%s11405_s1 + $0x78] sm:$0xff] }
 0x160   : > { %959 = vmatprep.subr.bf16.mxu0 %v886_v19  ;;  %1072 = vmatprep.subr.bf16.mxu1 %v888_v20  ;;  %v745_v19 = vunpack.c.l.s8.bf16 %v585_v14  ;;  %v747_v20 = vunpack.c.l.s8.bf16 %v587_v15  ;;  %v843_v15 = vunpack.c.l.s8.bf16 %v635_v10 }
 0x163   : > { %960 = vmatpush1.bf16.msra.mxu0 %v885_v23  ;;  %1073 = vmatpush1.bf16.msra.mxu1 %v887_v24  ;;  %v11467_v23 = vpack.c.bf16 %v516_v18, %v514_v17  ;;  %v602_v24 = vld [vmem:[#allocation5 + $0x1a8] sm:$0xff]  ;;  %v858_v17 = vunpack.c.h.s8.bf16 %v634_v0 }
 0x164   : > { %961 = vmatprep.subr.bf16.mxu0 %v902_v25  ;;  %1074 = vmatprep.subr.bf16.mxu1 %v904_v26  ;;  %v604_v25 = vld [vmem:[#allocation5 + $0x1b8] sm:$0xff]  ;;  %v761_v26 = vunpack.c.h.s8.bf16 %v585_v14 }
 0x167   : > { %962 = vmatpush1.bf16.msra.mxu0 %v901_v29  ;;  %1075 = vmatpush1.bf16.msra.mxu1 %v903_v30  ;;  %v515_v29 = vld [vmem:[%s11405_s1 + $0x70] sm:$0xff]  ;;  %v778_v30 = vunpack.c.l.s8.bf16 %v602_v24 }
 0x168   : > { %963 = vmatprep.subr.bf16.mxu0 %v918_v31  ;;  %1076 = vmatprep.subr.bf16.mxu1 %v920_v32  ;;  %v780_v31 = vunpack.c.l.s8.bf16 %v604_v25  ;;  %v601_v32 = vld [vmem:[#allocation5 + $0x1a0] sm:$0xff]  ;;  %v11475_v34 = vpack.c.bf16 %v515_v29, %v513_v28 }
 0x169   : > { %v777_v38 = vunpack.c.l.s8.bf16 %v601_v32  ;;  %v793_v46 = vunpack.c.h.s8.bf16 %v601_v32  ;;  %v649_v29 = vld [vmem:[#allocation5 + $0x320] sm:$0xff]  ;;  %v530_v32 = vld [vmem:[%s11405_s1 + $0xe8] sm:$0xff] }
 0x16a   : > { %v889_v45 = vunpack.c.h.s8.bf16 %v649_v29 }
 0x16b   : > { %964 = vmatpush1.bf16.msra.mxu0 %v917_v35  ;;  %1077 = vmatpush1.bf16.msra.mxu1 %v919_v37  ;;  %v518_v35 = vld [vmem:[%s11405_s1 + $0x88] sm:$0xff]  ;;  %v520_v37 = vld [vmem:[%s11405_s1 + $0x98] sm:$0xff] }
 0x16c   : > { %1159 = vmatprep.subr.bf16.mxu0 %v682_v40  ;;  %1272 = vmatprep.subr.bf16.mxu1 %v684_v41  ;;  %v794_v40 = vunpack.c.h.s8.bf16 %v602_v24  ;;  %v796_v41 = vunpack.c.h.s8.bf16 %v604_v25  ;;  %v11479_v42 = vpack.c.bf16 %v520_v37, %v518_v35  ;;  %v859_v24 = vunpack.c.h.s8.bf16 %v635_v10  ;;  %v525_v25 = vld [vmem:[%s11405_s1 + $0xc0] sm:$0xff] }
 0x16d   : > { %v873_v35 = vunpack.c.l.s8.bf16 %v649_v29 }
 0x16e   : > { %966 = vmatmul.mubr.bf16.vlgmr.msra.gmra.mrb[0].mxu0 %v11439_v44  ;;  %1079 = vmatmul.mubr.bf16.vlgmr.msra.gmra.mrb[0].mxu1 %v11439_v44 }
 0x16f   : > { %1160 = vmatpush1.bf16.msra.mxu0 %v681_v47  ;;  %1273 = vmatpush1.bf16.msra.mxu1 %v683_v48  ;;  %v795_v47 = vunpack.c.h.s8.bf16 %v603_v33  ;;  %v517_v48 = vld [vmem:[%s11405_s1 + $0x80] sm:$0xff]  ;;  %v532_v33 = vld [vmem:[%s11405_s1 + $0xf8] sm:$0xff] }
 0x170   : > { %1161 = vmatprep.subr.bf16.mxu0 %v698_v49  ;;  %1274 = vmatprep.subr.bf16.mxu1 %v700_v50  ;;  %v519_v49 = vld [vmem:[%s11405_s1 + $0x90] sm:$0xff]  ;;  %v810_v50 = vunpack.c.l.s8.bf16 %v618_v43  ;;  %v668_v43 = vld [vmem:[#allocation5 + $0x3b8] sm:$0xff] }
 0x171   : > { %975 = vmatprep.mubr.bf16.mxu0 %v11443_v51  ;;  %1088 = vmatprep.mubr.bf16.mxu1 %v11443_v51 }
 0x173   : > { %1162 = vmatpush1.bf16.msra.mxu0 %v697_v54  ;;  %1275 = vmatpush1.bf16.msra.mxu1 %v699_v55  ;;  %v619_v54 = vld [vmem:[#allocation5 + $0x230] sm:$0xff]  ;;  %v11487_v55 = vpack.c.bf16 %v519_v49, %v517_v48 }
 0x174   : > { %1163 = vmatprep.subr.bf16.mxu0 %v714_v58  ;;  %1276 = vmatprep.subr.bf16.mxu1 %v716_v59  ;;  %v809_v58 = vunpack.c.l.s8.bf16 %v617_v53  ;;  %v811_v59 = vunpack.c.l.s8.bf16 %v619_v54  ;;  %v531_v48 = vld [vmem:[%s11405_s1 + $0xf0] sm:$0xff] }
 0x175   : > { %15816 = vst [vmem:[#allocation28_spill] sm:$0xff] %v11487_v55 }
 0x176   : > { %976 = vmatmul.mubr.bf16.gmra.mrb[4].mxu0 %v11451_v62  ;;  %1089 = vmatmul.mubr.bf16.gmra.mrb[4].mxu1 %v11451_v62 }
 0x177   : > { %1164 = vmatpush1.bf16.msra.mxu0 %v713_v1  ;;  %1277 = vmatpush1.bf16.msra.mxu1 %v715_v2  ;;  %v636_v1 = vld [vmem:[#allocation5 + $0x2b8] sm:$0xff]  ;;  %v825_v2 = vunpack.c.h.s8.bf16 %v617_v53  ;;  %v667_v53 = vld [vmem:[#allocation5 + $0x3b0] sm:$0xff] }
 0x178   : > { %1165 = vmatprep.subr.bf16.mxu0 %v730_v3  ;;  %1278 = vmatprep.subr.bf16.mxu1 %v732_v4  ;;  %v827_v3 = vunpack.c.h.s8.bf16 %v619_v54  ;;  %v521_v4 = vld [vmem:[%s11405_s1 + $0xa0] sm:$0xff]  ;;  %v860_v18 = vunpack.c.h.s8.bf16 %v636_v1  ;;  %v907_v57 = vunpack.c.l.s8.bf16 %v667_v53 }
 0x179   : > { %985 = vmatprep.mubr.bf16.mxu0 %v11455_v5  ;;  %1098 = vmatprep.mubr.bf16.mxu1 %v11455_v5  ;;  %v11499_v11 = vpack.c.bf16 %v523_v6, %v521_v4  ;;  %v557_v4 = vld [vmem:[#allocation5 + $0x40] sm:$0xff]  ;;  %v559_v6 = vld [vmem:[#allocation5 + $0x50] sm:$0xff] }
 0x17b   : > { %1166 = vmatpush1.bf16.msra.mxu0 %v729_v8  ;;  %1279 = vmatpush1.bf16.msra.mxu1 %v731_v9  ;;  %v844_v8 = vunpack.c.l.s8.bf16 %v636_v1  ;;  %v633_v9 = vld [vmem:[#allocation5 + $0x2a0] sm:$0xff]  ;;  %15818 = vst [vmem:[#allocation30_spill] sm:$0xff] %v11499_v11  ;;  %v923_v1 = vunpack.c.h.s8.bf16 %v667_v53  ;;  %v607_v53 = vld [vmem:[#allocation5 + $0x1d0] sm:$0xff] }
 0x17c   : > { %1167 = vmatprep.subr.bf16.mxu0 %v746_v12  ;;  %1280 = vmatprep.subr.bf16.mxu1 %v748_v13  ;;  %v526_v12 = vld [vmem:[%s11405_s1 + $0xc8] sm:$0xff]  ;;  %v528_v13 = vld [vmem:[%s11405_s1 + $0xd8] sm:$0xff]  ;;  %v841_v14 = vunpack.c.l.s8.bf16 %v633_v9 }
 0x17e   : > { %986 = vmatmul.mubr.bf16.gmra.mrb[8].mxu0 %v11463_v16  ;;  %1099 = vmatmul.mubr.bf16.gmra.mrb[8].mxu1 %v11463_v16 }
 0x17f   : > { %1168 = vmatpush1.bf16.msra.mxu0 %v745_v19  ;;  %1281 = vmatpush1.bf16.msra.mxu1 %v747_v20  ;;  %v11503_v19 = vpack.c.bf16 %v528_v13, %v526_v12  ;;  %v650_v20 = vld [vmem:[#allocation5 + $0x328] sm:$0xff]  ;;  %v576_v13 = vld [vmem:[#allocation5 + $0xd8] sm:$0xff] }
 0x180   : > { %1169 = vmatprep.subr.bf16.mxu0 %v762_v21  ;;  %1282 = vmatprep.subr.bf16.mxu1 %v764_v22  ;;  %v652_v21 = vld [vmem:[#allocation5 + $0x338] sm:$0xff]  ;;  %v857_v22 = vunpack.c.h.s8.bf16 %v633_v9  ;;  %v574_v12 = vld [vmem:[#allocation5 + $0xc8] sm:$0xff] }
 0x181   : > { %995 = vmatprep.mubr.bf16.mxu0 %v11467_v23  ;;  %1108 = vmatprep.mubr.bf16.mxu1 %v11467_v23  ;;  %15819 = vst [vmem:[#allocation31_spill] sm:$0xff] %v11503_v19  ;;  %v876_v28 = vunpack.c.l.s8.bf16 %v652_v21 }
 0x183   : > { %1170 = vmatpush1.bf16.msra.mxu0 %v761_v26  ;;  %1283 = vmatpush1.bf16.msra.mxu1 %v763_v27  ;;  %v527_v26 = vld [vmem:[%s11405_s1 + $0xd0] sm:$0xff]  ;;  %v874_v27 = vunpack.c.l.s8.bf16 %v650_v20 }
 0x184   : > { %1171 = vmatprep.subr.bf16.mxu0 %v778_v30  ;;  %1284 = vmatprep.subr.bf16.mxu1 %v780_v31  ;;  %v651_v30 = vld [vmem:[#allocation5 + $0x330] sm:$0xff]  ;;  %v11511_v31 = vpack.c.bf16 %v527_v26, %v525_v25  ;;  %v734_v25 = vunpack.c.h.s8.bf16 %v574_v12  ;;  %v736_v26 = vunpack.c.h.s8.bf16 %v576_v13 }
 0x185   : > { %v875_v37 = vunpack.c.l.s8.bf16 %v651_v30 }
 0x186   : > { %996 = vmatmul.mubr.bf16.gmra.mrb[12].mxu0 %v11475_v34  ;;  %1109 = vmatmul.mubr.bf16.gmra.mrb[12].mxu1 %v11475_v34  ;;  %15820 = vst [vmem:[#allocation32_spill] sm:$0xff] %v11511_v31 }
 0x187   : > { %1172 = vmatpush1.bf16.msra.mxu0 %v777_v38  ;;  %1285 = vmatpush1.bf16.msra.mxu1 %v779_v39  ;;  %v890_v38 = vunpack.c.h.s8.bf16 %v650_v20  ;;  %v892_v39 = vunpack.c.h.s8.bf16 %v652_v21  ;;  %v573_v20 = vld [vmem:[#allocation5 + $0xc0] sm:$0xff]  ;;  %v575_v21 = vld [vmem:[#allocation5 + $0xd0] sm:$0xff] }
 0x188   : > { %1173 = vmatprep.subr.bf16.mxu0 %v794_v40  ;;  %1286 = vmatprep.subr.bf16.mxu1 %v796_v41  ;;  %v11515_v40 = vpack.c.bf16 %v532_v33, %v530_v32  ;;  %v666_v41 = vld [vmem:[#allocation5 + $0x3a8] sm:$0xff]  ;;  %v733_v29 = vunpack.c.h.s8.bf16 %v573_v20 }
 0x189   : > { %1005 = vmatprep.mubr.bf16.mxu0 %v11479_v42  ;;  %1118 = vmatprep.mubr.bf16.mxu1 %v11479_v42  ;;  %v906_v49 = vunpack.c.l.s8.bf16 %v666_v41 }
 0x18a   : > { %15821 = vst [vmem:[#allocation33_spill] sm:$0xff] %v11515_v40 }
 0x18b   : > { %1174 = vmatpush1.bf16.msra.mxu0 %v793_v46  ;;  %1287 = vmatpush1.bf16.msra.mxu1 %v795_v47  ;;  %v891_v46 = vunpack.c.h.s8.bf16 %v651_v30  ;;  %v529_v47 = vld [vmem:[%s11405_s1 + $0xe0] sm:$0xff]  ;;  %v735_v30 = vunpack.c.h.s8.bf16 %v575_v21 }
 0x18c   : > { %1175 = vmatprep.subr.bf16.mxu0 %v810_v50  ;;  %1288 = vmatprep.subr.bf16.mxu1 %v812_v52  ;;  %v908_v50 = vunpack.c.l.s8.bf16 %v668_v43  ;;  %v665_v52 = vld [vmem:[#allocation5 + $0x3a0] sm:$0xff]  ;;  %v11523_v54 = vpack.c.bf16 %v531_v48, %v529_v47 }
 0x18d   : > { %v905_v56 = vunpack.c.l.s8.bf16 %v665_v52  ;;  %v921_v0 = vunpack.c.h.s8.bf16 %v665_v52  ;;  %v605_v52 = vld [vmem:[#allocation5 + $0x1c0] sm:$0xff] }
 0x18e   : > { %1006 = vmatmul.mubr.bf16.gmra.mrb[16].mxu0 %v11487_v55  ;;  %1119 = vmatmul.mubr.bf16.gmra.mrb[16].mxu1 %v11487_v55  ;;  %15822 = vst [vmem:[#allocation34_spill] sm:$0xff] %v11523_v54 }
 0x18f   : > { %1176 = vmatpush1.bf16.msra.mxu0 %v809_v58  ;;  %1289 = vmatpush1.bf16.msra.mxu1 %v811_v59  ;;  %v922_v58 = vunpack.c.h.s8.bf16 %v666_v41  ;;  %v924_v59 = vunpack.c.h.s8.bf16 %v668_v43 }
 0x190   : > { %1177 = vmatprep.subr.bf16.mxu0 %v826_v60  ;;  %1290 = vmatprep.subr.bf16.mxu1 %v828_v61  ;;  %v558_v60 = vld [vmem:[#allocation5 + $0x48] sm:$0xff]  ;;  %v560_v61 = vld [vmem:[#allocation5 + $0x58] sm:$0xff] }
 0x191   : > { %1015 = vmatprep.mubr.bf16.mxu0 %v11491_v63  ;;  %1128 = vmatprep.mubr.bf16.mxu1 %v11491_v63  ;;  %v702_v9 = vunpack.c.h.s8.bf16 %v558_v60  ;;  %v704_v10 = vunpack.c.h.s8.bf16 %v560_v61 }
 0x193   : > { %1178 = vmatpush1.bf16.msra.mxu0 %v825_v2  ;;  %1291 = vmatpush1.bf16.msra.mxu1 %v827_v3  ;;  %v686_v2 = vunpack.c.l.s8.bf16 %v558_v60  ;;  %v688_v3 = vunpack.c.l.s8.bf16 %v560_v61  ;;  %v622_v60 = vld [vmem:[#allocation5 + $0x248] sm:$0xff]  ;;  %v624_v61 = vld [vmem:[#allocation5 + $0x258] sm:$0xff] }
 0x194   : > { %1179 = vmatprep.subr.bf16.mxu0 %v842_v7  ;;  %1292 = vmatprep.subr.bf16.mxu1 %v844_v8  ;;  %v685_v7 = vunpack.c.l.s8.bf16 %v557_v4  ;;  %v687_v8 = vunpack.c.l.s8.bf16 %v559_v6 }
 0x196   : > { %1016 = vmatmul.mubr.bf16.gmra.mrb[20].mxu0 %v11499_v11  ;;  %1129 = vmatmul.mubr.bf16.gmra.mrb[20].mxu1 %v11499_v11 }
 0x197   : > { %1180 = vmatpush1.bf16.msra.mxu0 %v841_v14  ;;  %1293 = vmatpush1.bf16.msra.mxu1 %v843_v15  ;;  %v701_v14 = vunpack.c.h.s8.bf16 %v557_v4  ;;  %v703_v15 = vunpack.c.h.s8.bf16 %v559_v6  ;;  %v621_v4 = vld [vmem:[#allocation5 + $0x240] sm:$0xff]  ;;  %v623_v6 = vld [vmem:[#allocation5 + $0x250] sm:$0xff] }
 0x198   : > { %1181 = vmatprep.subr.bf16.mxu0 %v858_v17  ;;  %1294 = vmatprep.subr.bf16.mxu1 %v860_v18  ;;  %v718_v17 = vunpack.c.l.s8.bf16 %v574_v12  ;;  %v720_v18 = vunpack.c.l.s8.bf16 %v576_v13  ;;  %v638_v12 = vld [vmem:[#allocation5 + $0x2c8] sm:$0xff]  ;;  %v640_v13 = vld [vmem:[#allocation5 + $0x2d8] sm:$0xff] }
 0x199   : > { %1025 = vmatprep.mubr.bf16.mxu0 %v11503_v19  ;;  %1138 = vmatprep.mubr.bf16.mxu1 %v11503_v19 }
 0x19b   : > { %1182 = vmatpush1.bf16.msra.mxu0 %v857_v22  ;;  %1295 = vmatpush1.bf16.msra.mxu1 %v859_v24  ;;  %v717_v22 = vunpack.c.l.s8.bf16 %v573_v20  ;;  %v719_v24 = vunpack.c.l.s8.bf16 %v575_v21  ;;  %v637_v20 = vld [vmem:[#allocation5 + $0x2c0] sm:$0xff]  ;;  %v639_v21 = vld [vmem:[#allocation5 + $0x2d0] sm:$0xff] }
 0x19c   : > { %1183 = vmatprep.subr.bf16.mxu0 %v874_v27  ;;  %1296 = vmatprep.subr.bf16.mxu1 %v876_v28  ;;  %v590_v27 = vld [vmem:[#allocation5 + $0x148] sm:$0xff]  ;;  %v592_v28 = vld [vmem:[#allocation5 + $0x158] sm:$0xff] }
 0x19d   : > { %v750_v32 = vunpack.c.l.s8.bf16 %v590_v27  ;;  %v752_v33 = vunpack.c.l.s8.bf16 %v592_v28  ;;  %v766_v41 = vunpack.c.h.s8.bf16 %v590_v27  ;;  %v768_v43 = vunpack.c.h.s8.bf16 %v592_v28  ;;  %v654_v27 = vld [vmem:[#allocation5 + $0x348] sm:$0xff]  ;;  %v656_v28 = vld [vmem:[#allocation5 + $0x358] sm:$0xff] }
 0x19e   : > { %1026 = vmatmul.mubr.bf16.gmra.mrb[24].mxu0 %v11511_v31  ;;  %1139 = vmatmul.mubr.bf16.gmra.mrb[24].mxu1 %v11511_v31 }
 0x19f   : > { %1184 = vmatpush1.bf16.msra.mxu0 %v873_v35  ;;  %1297 = vmatpush1.bf16.msra.mxu1 %v875_v37  ;;  %v589_v35 = vld [vmem:[#allocation5 + $0x140] sm:$0xff]  ;;  %v591_v37 = vld [vmem:[#allocation5 + $0x150] sm:$0xff] }
 0x1a0   : > { %1185 = vmatprep.subr.bf16.mxu0 %v890_v38  ;;  %1298 = vmatprep.subr.bf16.mxu1 %v892_v39  ;;  %v749_v38 = vunpack.c.l.s8.bf16 %v589_v35  ;;  %v751_v39 = vunpack.c.l.s8.bf16 %v591_v37  ;;  %v765_v47 = vunpack.c.h.s8.bf16 %v589_v35  ;;  %v767_v48 = vunpack.c.h.s8.bf16 %v591_v37  ;;  %v653_v35 = vld [vmem:[#allocation5 + $0x340] sm:$0xff]  ;;  %v655_v37 = vld [vmem:[#allocation5 + $0x350] sm:$0xff] }
 0x1a1   : > { %1035 = vmatprep.mubr.bf16.mxu0 %v11515_v40  ;;  %1148 = vmatprep.mubr.bf16.mxu1 %v11515_v40 }
 0x1a3   : > { %1186 = vmatpush1.bf16.msra.mxu0 %v889_v45  ;;  %1299 = vmatpush1.bf16.msra.mxu1 %v891_v46  ;;  %v606_v45 = vld [vmem:[#allocation5 + $0x1c8] sm:$0xff]  ;;  %v608_v46 = vld [vmem:[#allocation5 + $0x1d8] sm:$0xff] }
 0x1a4   : > { %1187 = vmatprep.subr.bf16.mxu0 %v906_v49  ;;  %1300 = vmatprep.subr.bf16.mxu1 %v908_v50  ;;  %v782_v49 = vunpack.c.l.s8.bf16 %v606_v45  ;;  %v784_v50 = vunpack.c.l.s8.bf16 %v608_v46 }
 0x1a6   : > { %1036 = vmatmul.mubr.bf16.gmra.mrb[28].mxu0 %v11523_v54  ;;  %1149 = vmatmul.mubr.bf16.gmra.mrb[28].mxu1 %v11523_v54 }
 0x1a7   : > { %1188 = vmatpush1.bf16.msra.mxu0 %v905_v56  ;;  %1301 = vmatpush1.bf16.msra.mxu1 %v907_v57  ;;  %v781_v56 = vunpack.c.l.s8.bf16 %v605_v52  ;;  %v783_v57 = vunpack.c.l.s8.bf16 %v607_v53 }
 0x1a8   : > { %1189 = vmatprep.subr.bf16.mxu0 %v922_v58  ;;  %1302 = vmatprep.subr.bf16.mxu1 %v924_v59  ;;  %v798_v58 = vunpack.c.h.s8.bf16 %v606_v45  ;;  %v800_v59 = vunpack.c.h.s8.bf16 %v608_v46  ;;  %v670_v45 = vld [vmem:[#allocation5 + $0x3c8] sm:$0xff]  ;;  %v672_v46 = vld [vmem:[#allocation5 + $0x3d8] sm:$0xff] }
 0x1a9   : > { %1191 = vmatprep.mubr.bf16.mxu0 %v11433_v36  ;;  %1304 = vmatprep.mubr.bf16.mxu1 %v11433_v36 }
 0x1ab   : > { %1190 = vmatpush1.bf16.msra.mxu0 %v921_v0  ;;  %1303 = vmatpush1.bf16.msra.mxu1 %v923_v1  ;;  %v797_v0 = vunpack.c.h.s8.bf16 %v605_v52  ;;  %v799_v1 = vunpack.c.h.s8.bf16 %v607_v53  ;;  %v669_v52 = vld [vmem:[#allocation5 + $0x3c0] sm:$0xff]  ;;  %v671_v53 = vld [vmem:[#allocation5 + $0x3d0] sm:$0xff] }
 0x1ac   : > { %1385 = vmatprep.subr.bf16.mxu0 %v686_v2  ;;  %1498 = vmatprep.subr.bf16.mxu1 %v688_v3  ;;  %v814_v2 = vunpack.c.l.s8.bf16 %v622_v60  ;;  %v816_v3 = vunpack.c.l.s8.bf16 %v624_v61 }
 0x1ae   : > { %1192 = vmatmul.mubr.bf16.vlgmr.msra.gmra.mrb[32].mxu0 %v11439_v44  ;;  %1305 = vmatmul.mubr.bf16.vlgmr.msra.gmra.mrb[32].mxu1 %v11439_v44 }
 0x1af   : > { %1386 = vmatpush1.bf16.msra.mxu0 %v685_v7  ;;  %1499 = vmatpush1.bf16.msra.mxu1 %v687_v8  ;;  %v813_v7 = vunpack.c.l.s8.bf16 %v621_v4  ;;  %v815_v8 = vunpack.c.l.s8.bf16 %v623_v6 }
 0x1b0   : > { %1387 = vmatprep.subr.bf16.mxu0 %v702_v9  ;;  %1500 = vmatprep.subr.bf16.mxu1 %v704_v10  ;;  %v830_v9 = vunpack.c.h.s8.bf16 %v622_v60  ;;  %v832_v10 = vunpack.c.h.s8.bf16 %v624_v61  ;;  %v562_v60 = vld [vmem:[#allocation5 + $0x68] sm:$0xff]  ;;  %v564_v61 = vld [vmem:[#allocation5 + $0x78] sm:$0xff] }
 0x1b1   : > { %1201 = vmatprep.mubr.bf16.mxu0 %v11443_v51  ;;  %1314 = vmatprep.mubr.bf16.mxu1 %v11443_v51 }
 0x1b3   : > { %1388 = vmatpush1.bf16.msra.mxu0 %v701_v14  ;;  %1501 = vmatpush1.bf16.msra.mxu1 %v703_v15  ;;  %v829_v14 = vunpack.c.h.s8.bf16 %v621_v4  ;;  %v831_v15 = vunpack.c.h.s8.bf16 %v623_v6  ;;  %v561_v4 = vld [vmem:[#allocation5 + $0x60] sm:$0xff]  ;;  %v563_v6 = vld [vmem:[#allocation5 + $0x70] sm:$0xff] }
 0x1b4   : > { %1389 = vmatprep.subr.bf16.mxu0 %v718_v17  ;;  %1502 = vmatprep.subr.bf16.mxu1 %v720_v18  ;;  %v846_v17 = vunpack.c.l.s8.bf16 %v638_v12  ;;  %v848_v18 = vunpack.c.l.s8.bf16 %v640_v13 }
 0x1b6   : > { %1202 = vmatmul.mubr.bf16.gmra.mrb[36].mxu0 %v11451_v62  ;;  %1315 = vmatmul.mubr.bf16.gmra.mrb[36].mxu1 %v11451_v62 }
 0x1b7   : > { %1390 = vmatpush1.bf16.msra.mxu0 %v717_v22  ;;  %1503 = vmatpush1.bf16.msra.mxu1 %v719_v24  ;;  %v845_v22 = vunpack.c.l.s8.bf16 %v637_v20  ;;  %v847_v24 = vunpack.c.l.s8.bf16 %v639_v21 }
 0x1b8   : > { %1391 = vmatprep.subr.bf16.mxu0 %v734_v25  ;;  %1504 = vmatprep.subr.bf16.mxu1 %v736_v26  ;;  %v862_v25 = vunpack.c.h.s8.bf16 %v638_v12  ;;  %v864_v26 = vunpack.c.h.s8.bf16 %v640_v13  ;;  %v578_v12 = vld [vmem:[#allocation5 + $0xe8] sm:$0xff]  ;;  %v580_v13 = vld [vmem:[#allocation5 + $0xf8] sm:$0xff] }
 0x1b9   : > { %1211 = vmatprep.mubr.bf16.mxu0 %v11455_v5  ;;  %1324 = vmatprep.mubr.bf16.mxu1 %v11455_v5 }
 0x1bb   : > { %1392 = vmatpush1.bf16.msra.mxu0 %v733_v29  ;;  %1505 = vmatpush1.bf16.msra.mxu1 %v735_v30  ;;  %v861_v29 = vunpack.c.h.s8.bf16 %v637_v20  ;;  %v863_v30 = vunpack.c.h.s8.bf16 %v639_v21  ;;  %v577_v20 = vld [vmem:[#allocation5 + $0xe0] sm:$0xff]  ;;  %v579_v21 = vld [vmem:[#allocation5 + $0xf0] sm:$0xff] }
 0x1bc   : > { %1393 = vmatprep.subr.bf16.mxu0 %v750_v32  ;;  %1506 = vmatprep.subr.bf16.mxu1 %v752_v33  ;;  %v878_v32 = vunpack.c.l.s8.bf16 %v654_v27  ;;  %v880_v33 = vunpack.c.l.s8.bf16 %v656_v28 }
 0x1be   : > { %1212 = vmatmul.mubr.bf16.gmra.mrb[40].mxu0 %v11463_v16  ;;  %1325 = vmatmul.mubr.bf16.gmra.mrb[40].mxu1 %v11463_v16 }
 0x1bf   : > { %1394 = vmatpush1.bf16.msra.mxu0 %v749_v38  ;;  %1507 = vmatpush1.bf16.msra.mxu1 %v751_v39  ;;  %v877_v38 = vunpack.c.l.s8.bf16 %v653_v35  ;;  %v879_v39 = vunpack.c.l.s8.bf16 %v655_v37 }
 0x1c0   : > { %1395 = vmatprep.subr.bf16.mxu0 %v766_v41  ;;  %1508 = vmatprep.subr.bf16.mxu1 %v768_v43  ;;  %v894_v41 = vunpack.c.h.s8.bf16 %v654_v27  ;;  %v896_v43 = vunpack.c.h.s8.bf16 %v656_v28  ;;  %v594_v27 = vld [vmem:[#allocation5 + $0x168] sm:$0xff]  ;;  %v596_v28 = vld [vmem:[#allocation5 + $0x178] sm:$0xff] }
 0x1c1   : > { %1221 = vmatprep.mubr.bf16.mxu0 %v11467_v23  ;;  %1334 = vmatprep.mubr.bf16.mxu1 %v11467_v23 }
 0x1c3   : > { %1396 = vmatpush1.bf16.msra.mxu0 %v765_v47  ;;  %1509 = vmatpush1.bf16.msra.mxu1 %v767_v48  ;;  %v893_v47 = vunpack.c.h.s8.bf16 %v653_v35  ;;  %v895_v48 = vunpack.c.h.s8.bf16 %v655_v37  ;;  %v593_v35 = vld [vmem:[#allocation5 + $0x160] sm:$0xff]  ;;  %v595_v37 = vld [vmem:[#allocation5 + $0x170] sm:$0xff] }
 0x1c4   : > { %1397 = vmatprep.subr.bf16.mxu0 %v782_v49  ;;  %1510 = vmatprep.subr.bf16.mxu1 %v784_v50  ;;  %v910_v49 = vunpack.c.l.s8.bf16 %v670_v45  ;;  %v912_v50 = vunpack.c.l.s8.bf16 %v672_v46 }
 0x1c6   : > { %1222 = vmatmul.mubr.bf16.gmra.mrb[44].mxu0 %v11475_v34  ;;  %1335 = vmatmul.mubr.bf16.gmra.mrb[44].mxu1 %v11475_v34 }
 0x1c7   : > { %1398 = vmatpush1.bf16.msra.mxu0 %v781_v56  ;;  %1511 = vmatpush1.bf16.msra.mxu1 %v783_v57  ;;  %v909_v56 = vunpack.c.l.s8.bf16 %v669_v52  ;;  %v911_v57 = vunpack.c.l.s8.bf16 %v671_v53 }
 0x1c8   : > { %1399 = vmatprep.subr.bf16.mxu0 %v798_v58  ;;  %1512 = vmatprep.subr.bf16.mxu1 %v800_v59  ;;  %v926_v58 = vunpack.c.h.s8.bf16 %v670_v45  ;;  %v928_v59 = vunpack.c.h.s8.bf16 %v672_v46  ;;  %v610_v45 = vld [vmem:[#allocation5 + $0x1e8] sm:$0xff]  ;;  %v612_v46 = vld [vmem:[#allocation5 + $0x1f8] sm:$0xff] }
 0x1c9   : > { %1231 = vmatprep.mubr.bf16.mxu0 %v11479_v42  ;;  %1344 = vmatprep.mubr.bf16.mxu1 %v11479_v42 }
 0x1cb   : > { %1400 = vmatpush1.bf16.msra.mxu0 %v797_v0  ;;  %1513 = vmatpush1.bf16.msra.mxu1 %v799_v1  ;;  %v925_v0 = vunpack.c.h.s8.bf16 %v669_v52  ;;  %v927_v1 = vunpack.c.h.s8.bf16 %v671_v53  ;;  %v609_v52 = vld [vmem:[#allocation5 + $0x1e0] sm:$0xff]  ;;  %v611_v53 = vld [vmem:[#allocation5 + $0x1f0] sm:$0xff] }
 0x1cc   : > { %1401 = vmatprep.subr.bf16.mxu0 %v814_v2  ;;  %1514 = vmatprep.subr.bf16.mxu1 %v816_v3  ;;  %v690_v2 = vunpack.c.l.s8.bf16 %v562_v60  ;;  %v692_v3 = vunpack.c.l.s8.bf16 %v564_v61 }
 0x1ce   : > { %1232 = vmatmul.mubr.bf16.gmra.mrb[48].mxu0 %v11487_v55  ;;  %1345 = vmatmul.mubr.bf16.gmra.mrb[48].mxu1 %v11487_v55 }
 0x1cf   : > { %1402 = vmatpush1.bf16.msra.mxu0 %v813_v7  ;;  %1515 = vmatpush1.bf16.msra.mxu1 %v815_v8  ;;  %v689_v7 = vunpack.c.l.s8.bf16 %v561_v4  ;;  %v691_v8 = vunpack.c.l.s8.bf16 %v563_v6 }
 0x1d0   : > { %1403 = vmatprep.subr.bf16.mxu0 %v830_v9  ;;  %1516 = vmatprep.subr.bf16.mxu1 %v832_v10  ;;  %v706_v9 = vunpack.c.h.s8.bf16 %v562_v60  ;;  %v708_v10 = vunpack.c.h.s8.bf16 %v564_v61  ;;  %v626_v60 = vld [vmem:[#allocation5 + $0x268] sm:$0xff]  ;;  %v628_v61 = vld [vmem:[#allocation5 + $0x278] sm:$0xff] }
 0x1d1   : > { %1241 = vmatprep.mubr.bf16.mxu0 %v11491_v63  ;;  %1354 = vmatprep.mubr.bf16.mxu1 %v11491_v63 }
 0x1d3   : > { %1404 = vmatpush1.bf16.msra.mxu0 %v829_v14  ;;  %1517 = vmatpush1.bf16.msra.mxu1 %v831_v15  ;;  %v705_v14 = vunpack.c.h.s8.bf16 %v561_v4  ;;  %v707_v15 = vunpack.c.h.s8.bf16 %v563_v6  ;;  %v625_v4 = vld [vmem:[#allocation5 + $0x260] sm:$0xff]  ;;  %v627_v6 = vld [vmem:[#allocation5 + $0x270] sm:$0xff] }
 0x1d4   : > { %1405 = vmatprep.subr.bf16.mxu0 %v846_v17  ;;  %1518 = vmatprep.subr.bf16.mxu1 %v848_v18  ;;  %v722_v17 = vunpack.c.l.s8.bf16 %v578_v12  ;;  %v724_v18 = vunpack.c.l.s8.bf16 %v580_v13 }
 0x1d6   : > { %1242 = vmatmul.mubr.bf16.gmra.mrb[52].mxu0 %v11499_v11  ;;  %1355 = vmatmul.mubr.bf16.gmra.mrb[52].mxu1 %v11499_v11 }
 0x1d7   : > { %1406 = vmatpush1.bf16.msra.mxu0 %v845_v22  ;;  %1519 = vmatpush1.bf16.msra.mxu1 %v847_v24  ;;  %v721_v22 = vunpack.c.l.s8.bf16 %v577_v20  ;;  %v723_v24 = vunpack.c.l.s8.bf16 %v579_v21 }
 0x1d8   : > { %1407 = vmatprep.subr.bf16.mxu0 %v862_v25  ;;  %1520 = vmatprep.subr.bf16.mxu1 %v864_v26  ;;  %v738_v25 = vunpack.c.h.s8.bf16 %v578_v12  ;;  %v740_v26 = vunpack.c.h.s8.bf16 %v580_v13  ;;  %v11577_v12 = vld [vmem:[#allocation5 + $0x2e8] sm:$0xff]  ;;  %v11579_v13 = vld [vmem:[#allocation5 + $0x2f8] sm:$0xff] }
 0x1d9   : > { %1251 = vmatprep.mubr.bf16.mxu0 %v11503_v19  ;;  %1364 = vmatprep.mubr.bf16.mxu1 %v11503_v19 }
 0x1db   : > { %1408 = vmatpush1.bf16.msra.mxu0 %v861_v29  ;;  %1521 = vmatpush1.bf16.msra.mxu1 %v863_v30  ;;  %v737_v29 = vunpack.c.h.s8.bf16 %v577_v20  ;;  %v739_v30 = vunpack.c.h.s8.bf16 %v579_v21  ;;  %v850_v20 = vunpack.c.l.s8.bf16 %v11577_v12  ;;  %v852_v21 = vunpack.c.l.s8.bf16 %v11579_v13 }
 0x1dc   : > { %1409 = vmatprep.subr.bf16.mxu0 %v878_v32  ;;  %1522 = vmatprep.subr.bf16.mxu1 %v880_v33  ;;  %v754_v32 = vunpack.c.l.s8.bf16 %v594_v27  ;;  %v756_v33 = vunpack.c.l.s8.bf16 %v596_v28 }
 0x1de   : > { %1252 = vmatmul.mubr.bf16.gmra.mrb[56].mxu0 %v11511_v31  ;;  %1365 = vmatmul.mubr.bf16.gmra.mrb[56].mxu1 %v11511_v31 }
 0x1df   : > { %1410 = vmatpush1.bf16.msra.mxu0 %v877_v38  ;;  %1523 = vmatpush1.bf16.msra.mxu1 %v879_v39  ;;  %v753_v38 = vunpack.c.l.s8.bf16 %v593_v35  ;;  %v755_v39 = vunpack.c.l.s8.bf16 %v595_v37 }
 0x1e0   : > { %1411 = vmatprep.subr.bf16.mxu0 %v894_v41  ;;  %1524 = vmatprep.subr.bf16.mxu1 %v896_v43  ;;  %v770_v41 = vunpack.c.h.s8.bf16 %v594_v27  ;;  %v772_v43 = vunpack.c.h.s8.bf16 %v596_v28  ;;  %v11598_v27 = vld [vmem:[#allocation5 + $0x370] sm:$0xff]  ;;  %v1841_v28 = vlaneseq }
 0x1e1   : > { %1261 = vmatprep.mubr.bf16.mxu0 %v11515_v40  ;;  %1374 = vmatprep.mubr.bf16.mxu1 %v11515_v40 }
 0x1e3   : > { %1412 = vmatpush1.bf16.msra.mxu0 %v893_v47  ;;  %1525 = vmatpush1.bf16.msra.mxu1 %v895_v48  ;;  %v769_v47 = vunpack.c.h.s8.bf16 %v593_v35  ;;  %v771_v48 = vunpack.c.h.s8.bf16 %v595_v37  ;;  %v11604_v35 = vld [vmem:[#allocation5 + $0x3e8] sm:$0xff]  ;;  %v11606_v37 = vld [vmem:[#allocation5 + $0x3f8] sm:$0xff] }
 0x1e4   : > { %1413 = vmatprep.subr.bf16.mxu0 %v910_v49  ;;  %1526 = vmatprep.subr.bf16.mxu1 %v912_v50  ;;  %v786_v49 = vunpack.c.l.s8.bf16 %v610_v45  ;;  %v788_v50 = vunpack.c.l.s8.bf16 %v612_v46 }
 0x1e6   : > { %1262 = vmatmul.mubr.bf16.gmra.mrb[60].mxu0 %v11523_v54  ;;  %1375 = vmatmul.mubr.bf16.gmra.mrb[60].mxu1 %v11523_v54 }
 0x1e7   : > { %1414 = vmatpush1.bf16.msra.mxu0 %v909_v56  ;;  %1527 = vmatpush1.bf16.msra.mxu1 %v911_v57  ;;  %v785_v56 = vunpack.c.l.s8.bf16 %v609_v52  ;;  %v787_v57 = vunpack.c.l.s8.bf16 %v611_v53 }
 0x1e8   : > { %1415 = vmatprep.subr.bf16.mxu0 %v926_v58  ;;  %1528 = vmatprep.subr.bf16.mxu1 %v928_v59  ;;  %v802_v58 = vunpack.c.h.s8.bf16 %v610_v45  ;;  %v804_v59 = vunpack.c.h.s8.bf16 %v612_v46  ;;  %v11612_v45 = vld [vmem:[#allocation5 + $0x3e0] sm:$0xff]  ;;  %v11614_v46 = vld [vmem:[#allocation5 + $0x3f0] sm:$0xff] }
 0x1e9   : > { %1417 = vmatprep.mubr.bf16.mxu0 %v11433_v36  ;;  %1530 = vmatprep.mubr.bf16.mxu1 %v11433_v36 }
 0x1eb   : > { %1416 = vmatpush1.bf16.msra.mxu0 %v925_v0  ;;  %1529 = vmatpush1.bf16.msra.mxu1 %v927_v1  ;;  %v801_v0 = vunpack.c.h.s8.bf16 %v609_v52  ;;  %v803_v1 = vunpack.c.h.s8.bf16 %v611_v53  ;;  %v11620_v52 = vld [vmem:[#allocation10 + $0x8] sm:$0xff]  ;;  %v11622_v53 = vld [vmem:[#allocation10 + $0x18] sm:$0xff] }
 0x1ec   : > { %1611 = vmatprep.subr.bf16.mxu0 %v690_v2  ;;  %1724 = vmatprep.subr.bf16.mxu1 %v692_v3  ;;  %v818_v2 = vunpack.c.l.s8.bf16 %v626_v60  ;;  %v820_v3 = vunpack.c.l.s8.bf16 %v628_v61 }
 0x1ee   : > { %1418 = vmatmul.mubr.bf16.vlgmr.msra.gmra.mrb[64].mxu0 %v11439_v44  ;;  %1531 = vmatmul.mubr.bf16.vlgmr.msra.gmra.mrb[64].mxu1 %v11439_v44 }
 0x1ef   : > { %1612 = vmatpush1.bf16.msra.mxu0 %v689_v7  ;;  %1725 = vmatpush1.bf16.msra.mxu1 %v691_v8  ;;  %v817_v7 = vunpack.c.l.s8.bf16 %v625_v4  ;;  %v819_v8 = vunpack.c.l.s8.bf16 %v627_v6 }
 0x1f0   : > { %1613 = vmatprep.subr.bf16.mxu0 %v706_v9  ;;  %1726 = vmatprep.subr.bf16.mxu1 %v708_v10  ;;  %v834_v9 = vunpack.c.h.s8.bf16 %v626_v60  ;;  %v836_v10 = vunpack.c.h.s8.bf16 %v628_v61  ;;  %v11629_v60 = vld [vmem:[#allocation10 + $0x10] sm:$0xff]  ;;  %v11631_v61 = vshrl.u32 %v1841_v28, 7  ;;  %v11660_v28 = vld [vmem:[#allocation10 + $0x88] sm:$0xff] }
 0x1f1   : > { %1427 = vmatprep.mubr.bf16.mxu0 %v11443_v51  ;;  %1540 = vmatprep.mubr.bf16.mxu1 %v11443_v51 }
 0x1f3   : > { %1614 = vmatpush1.bf16.msra.mxu0 %v705_v14  ;;  %1727 = vmatpush1.bf16.msra.mxu1 %v707_v15  ;;  %v11583_v14 = vld [vmem:[#allocation5 + $0x2e0] sm:$0xff]  ;;  %v833_v15 = vunpack.c.h.s8.bf16 %v625_v4  ;;  %v11639_v4 = vld [vmem:[#allocation10 + $0x48] sm:$0xff] }
 0x1f4   : > { %1615 = vmatprep.subr.bf16.mxu0 %v722_v17  ;;  %1728 = vmatprep.subr.bf16.mxu1 %v724_v18  ;;  %v835_v17 = vunpack.c.h.s8.bf16 %v627_v6  ;;  %v11585_v18 = vld [vmem:[#allocation5 + $0x2f0] sm:$0xff] }
 0x1f6   : > { %1428 = vmatmul.mubr.bf16.gmra.mrb[68].mxu0 %v11451_v62  ;;  %1541 = vmatmul.mubr.bf16.gmra.mrb[68].mxu1 %v11451_v62 }
 0x1f7   : > { %1616 = vmatpush1.bf16.msra.mxu0 %v721_v22  ;;  %1729 = vmatpush1.bf16.msra.mxu1 %v723_v24  ;;  %v11589_v22 = vld [vmem:[#allocation5 + $0x368] sm:$0xff]  ;;  %v11591_v24 = vld [vmem:[#allocation5 + $0x378] sm:$0xff] }
 0x1f8   : > { %1617 = vmatprep.subr.bf16.mxu0 %v738_v25  ;;  %1730 = vmatprep.subr.bf16.mxu1 %v740_v26  ;;  %v11593_v25 = vld [vmem:[#allocation5 + $0x360] sm:$0xff]  ;;  %v849_v26 = vunpack.c.l.s8.bf16 %v11583_v14 }
 0x1f9   : > { %1437 = vmatprep.mubr.bf16.mxu0 %v11455_v5  ;;  %1550 = vmatprep.mubr.bf16.mxu1 %v11455_v5 }
 0x1fb   : > { %1618 = vmatpush1.bf16.msra.mxu0 %v737_v29  ;;  %1731 = vmatpush1.bf16.msra.mxu1 %v739_v30  ;;  %v851_v29 = vunpack.c.l.s8.bf16 %v11585_v18  ;;  %v866_v30 = vunpack.c.h.s8.bf16 %v11577_v12  ;;  %v11647_v12 = vld [vmem:[#allocation10 + $0x40] sm:$0xff] }
 0x1fc   : > { %1619 = vmatprep.subr.bf16.mxu0 %v754_v32  ;;  %1732 = vmatprep.subr.bf16.mxu1 %v756_v33  ;;  %v868_v32 = vunpack.c.h.s8.bf16 %v11579_v13  ;;  %v865_v33 = vunpack.c.h.s8.bf16 %v11583_v14  ;;  %v11649_v13 = vld [vmem:[#allocation10 + $0x50] sm:$0xff] }
 0x1fe   : > { %1438 = vmatmul.mubr.bf16.gmra.mrb[72].mxu0 %v11463_v16  ;;  %1551 = vmatmul.mubr.bf16.gmra.mrb[72].mxu1 %v11463_v16 }
 0x1ff   : > { %1620 = vmatpush1.bf16.msra.mxu0 %v753_v38  ;;  %1733 = vmatpush1.bf16.msra.mxu1 %v755_v39  ;;  %v867_v38 = vunpack.c.h.s8.bf16 %v11585_v18  ;;  %v882_v39 = vunpack.c.l.s8.bf16 %v11589_v22  ;;  %v11684_v18 = vsub.s32 2, %v11631_v61 }
 0x200   : > { %1621 = vmatprep.subr.bf16.mxu0 %v770_v41  ;;  %1734 = vmatprep.subr.bf16.mxu1 %v772_v43  ;;  %v884_v41 = vunpack.c.l.s8.bf16 %v11591_v24  ;;  %v881_v43 = vunpack.c.l.s8.bf16 %v11593_v25 }
 0x201   : > { %1447 = vmatprep.mubr.bf16.mxu0 %v11467_v23  ;;  %1560 = vmatprep.mubr.bf16.mxu1 %v11467_v23  ;;  %15825 = vst [vmem:[#allocation37_spill] sm:$0xff] %v11684_v18 }
 0x203   : > { %1622 = vmatpush1.bf16.msra.mxu0 %v769_v47  ;;  %1735 = vmatpush1.bf16.msra.mxu1 %v771_v48  ;;  %v883_v47 = vunpack.c.l.s8.bf16 %v11598_v27  ;;  %v898_v48 = vunpack.c.h.s8.bf16 %v11589_v22  ;;  %v11775_v22 = vld [vmem:[#allocation10 + $0x150] sm:$0xff] }
 0x204   : > { %1623 = vmatprep.subr.bf16.mxu0 %v786_v49  ;;  %1736 = vmatprep.subr.bf16.mxu1 %v788_v50  ;;  %v900_v49 = vunpack.c.h.s8.bf16 %v11591_v24  ;;  %v11765_v50 = vld [vmem:[#allocation10 + $0x148] sm:$0xff]  ;;  %15830 = vst [vmem:[#allocation42_spill] sm:$0xff] %v11775_v22  ;;  %v11841_v24 = vld [vmem:[#allocation10 + $0x210] sm:$0xff] }
 0x205   : > { %v11827_v22 = vld [vmem:[#allocation10 + $0x208] sm:$0xff]  ;;  %15845 = vst [vmem:[#allocation49_spill] sm:$0xff] %v11841_v24 }
 0x206   : > { %1448 = vmatmul.mubr.bf16.gmra.mrb[76].mxu0 %v11475_v34  ;;  %1561 = vmatmul.mubr.bf16.gmra.mrb[76].mxu1 %v11475_v34 }
 0x207   : > { %1624 = vmatpush1.bf16.msra.mxu0 %v785_v56  ;;  %1737 = vmatpush1.bf16.msra.mxu1 %v787_v57  ;;  %v11755_v57 = vld [vmem:[#allocation10 + $0x100] sm:$0xff]  ;;  %v11757_v56 = vld [vmem:[#allocation10 + $0x110] sm:$0xff] }
 0x208   : > { %1625 = vmatprep.subr.bf16.mxu0 %v802_v58  ;;  %1738 = vmatprep.subr.bf16.mxu1 %v804_v59  ;;  %v11627_v59 = vld [vmem:[#allocation10] sm:$0xff] }
 0x209   : > { %1457 = vmatprep.mubr.bf16.mxu0 %v11479_v42  ;;  %1570 = vmatprep.mubr.bf16.mxu1 %v11479_v42  ;;  %v11797_v58 = vld [vmem:[#allocation10 + $0x180] sm:$0xff] }
 0x20a   : > { %15836 = vst [vmem:[#allocation44_spill] sm:$0xff] %v11797_v58  ;;  %v11855_v58 = vld [vmem:[#allocation10 + $0x258] sm:$0xff] }
 0x20b   : > { %1626 = vmatpush1.bf16.msra.mxu0 %v801_v0  ;;  %1739 = vmatpush1.bf16.msra.mxu1 %v803_v1  ;;  %v11737_v1 = vld [vmem:[#allocation10 + $0x108] sm:$0xff]  ;;  %15847 = vst [vmem:[#allocation51_spill] sm:$0xff] %v11855_v58  ;;  %v15858_v58 = vunpack.c.h.s8.bf16 %v11620_v52 }
 0x20c   : > { %1627 = vmatprep.subr.bf16.mxu0 %v818_v2  ;;  %1740 = vmatprep.subr.bf16.mxu1 %v820_v3 }
 0x20e   : > { %1458 = vmatmul.mubr.bf16.gmra.mrb[80].mxu0 %v11487_v55  ;;  %1571 = vmatmul.mubr.bf16.gmra.mrb[80].mxu1 %v11487_v55  ;;  %v11805_v55 = vld [vmem:[#allocation10 + $0x1c8] sm:$0xff] }
 0x20f   : > { %1628 = vmatpush1.bf16.msra.mxu0 %v817_v7  ;;  %1741 = vmatpush1.bf16.msra.mxu1 %v819_v8  ;;  %v11718_v7 = vld [vmem:[#allocation10 + $0xd0] sm:$0xff] }
 0x210   : > { %1629 = vmatprep.subr.bf16.mxu0 %v834_v9  ;;  %1742 = vmatprep.subr.bf16.mxu1 %v836_v10  ;;  %v11645_v10 = vld [vmem:[#allocation10 + $0x58] sm:$0xff] }
 0x211   : > { %1467 = vmatprep.mubr.bf16.mxu0 %v11491_v63  ;;  %1580 = vmatprep.mubr.bf16.mxu1 %v11491_v63  ;;  %v11767_v9 = vld [vmem:[#allocation10 + $0x158] sm:$0xff]  ;;  %v11785_v63 = vld [vmem:[#allocation10 + $0x188] sm:$0xff] }
 0x212   : > { %15828 = vst [vmem:[#allocation40_spill] sm:$0xff] %v11767_v9  ;;  %15833 = vst [vmem:[#allocation43_spill] sm:$0xff] %v11785_v63  ;;  %v15840_v9 = vunpack.c.l.s8.bf16 %v11614_v46  ;;  %v11839_v63 = vld [vmem:[#allocation10 + $0x200] sm:$0xff] }
 0x213   : > { %1630 = vmatpush1.bf16.msra.mxu0 %v833_v15  ;;  %1743 = vmatpush1.bf16.msra.mxu1 %v835_v17  ;;  %v11670_v15 = vld [vmem:[#allocation10 + $0x80] sm:$0xff]  ;;  %v11687_v17 = vsub.s32 3, %v11631_v61  ;;  %15844 = vst [vmem:[#allocation48_spill] sm:$0xff] %v11839_v63  ;;  %v15857_v63 = vunpack.c.l.s8.bf16 %v11629_v60 }
 0x214   : > { %1631 = vmatprep.subr.bf16.mxu0 %v850_v20  ;;  %1744 = vmatprep.subr.bf16.mxu1 %v852_v21  ;;  %v11672_v20 = vld [vmem:[#allocation10 + $0x90] sm:$0xff]  ;;  %v11674_v21 = vld [vmem:[#allocation7] sm:$0xff] }
 0x215   : > { %15826 = vst [vmem:[#allocation38_spill] sm:$0xff] %v11687_v17  ;;  %v11726_v8 = vrot.slane %v11674_v21, %v11684_v18  ;;  %v11734_v3 = vrot.slane %v11674_v21, %v11687_v17 }
 0x216   : > { %1468 = vmatmul.mubr.bf16.gmra.mrb[84].mxu0 %v11499_v11  ;;  %1581 = vmatmul.mubr.bf16.gmra.mrb[84].mxu1 %v11499_v11  ;;  %v11773_v11 = vld [vmem:[#allocation10 + $0x140] sm:$0xff] }
 0x217   : > { %1632 = vmatpush1.bf16.msra.mxu0 %v849_v26  ;;  %1745 = vmatpush1.bf16.msra.mxu1 %v851_v29  ;;  %v11662_v29 = vld [vmem:[#allocation10 + $0x98] sm:$0xff]  ;;  %v11677_v26 = vsub.s32 1, %v11631_v61  ;;  %15829 = vst [vmem:[#allocation41_spill] sm:$0xff] %v11773_v11  ;;  %v15842_v11 = vunpack.c.h.s8.bf16 %v11604_v35 }
 0x218   : > { %1633 = vmatprep.subr.bf16.mxu0 %v866_v30  ;;  %1746 = vmatprep.subr.bf16.mxu1 %v868_v32  ;;  %v11665_v30 = vsub.s32 0, %v11631_v61  ;;  %v11681_v32 = vld [vmem:[#allocation8] sm:$0xff] }
 0x219   : > { %1477 = vmatprep.mubr.bf16.mxu0 %v11503_v19  ;;  %1590 = vmatprep.mubr.bf16.mxu1 %v11503_v19  ;;  %15824 = vst [vmem:[#allocation36_spill] sm:$0xff] %v11677_v26  ;;  %v11712_v14 = vrot.slane %v11674_v21, %v11677_v26  ;;  %v11730_v2 = vrot.slane %v11681_v32, %v11677_v26  ;;  %v11799_v19 = vld [vmem:[#allocation10 + $0x190] sm:$0xff] }
 0x21a   : > { %15823 = vst [vmem:[#allocation35_spill] sm:$0xff] %v11665_v30  ;;  %v11697_v6 = vrot.slane %v11674_v21, %v11665_v30  ;;  %v11751_v0 = vrot.slane %v11681_v32, %v11687_v17  ;;  %v15834_v17 = vunpack.c.l.s8.bf16 %v11604_v35  ;;  %15837 = vst [vmem:[#allocation45_spill] sm:$0xff] %v11799_v19  ;;  %v15850_v35 = vunpack.c.l.s8.bf16 %v11620_v52 }
 0x21b   : > { %1634 = vmatpush1.bf16.msra.mxu0 %v865_v33  ;;  %1747 = vmatpush1.bf16.msra.mxu1 %v867_v38  ;;  %v11708_v38 = vrot.slane %v11681_v32, %v11665_v30  ;;  %v11716_v33 = vld [vmem:[#allocation10 + $0xc0] sm:$0xff]  ;;  %v11898_v19 = vsub.s32 6, %v11631_v61 }
 0x21c   : > { %1635 = vmatprep.subr.bf16.mxu0 %v882_v39  ;;  %1748 = vmatprep.subr.bf16.mxu1 %v884_v41  ;;  %v11700_v39 = vld [vmem:[#allocation10 + $0xc8] sm:$0xff]  ;;  %v11702_v41 = vld [vmem:[#allocation10 + $0xd8] sm:$0xff] }
 0x21d   : > { %15854 = vst [vmem:[#allocation54_spill] sm:$0xff] %v11898_v19 }
 0x21e   : > { %1478 = vmatmul.mubr.bf16.gmra.mrb[88].mxu0 %v11511_v31  ;;  %1591 = vmatmul.mubr.bf16.gmra.mrb[88].mxu1 %v11511_v31  ;;  %v11901_v31 = vsub.s32 7, %v11631_v61 }
 0x21f   : > { %1636 = vmatpush1.bf16.msra.mxu0 %v881_v43  ;;  %1749 = vmatpush1.bf16.msra.mxu1 %v883_v47  ;;  %v11739_v43 = vld [vmem:[#allocation10 + $0x118] sm:$0xff]  ;;  %v11747_v47 = vrot.slane %v11681_v32, %v11684_v18 }
 0x220   : > { %15827 = vst [vmem:[#allocation39_spill] sm:$0xff] %v11739_v43  ;;  %1637 = vmatprep.subr.bf16.mxu0 %v898_v48  ;;  %1750 = vmatprep.subr.bf16.mxu1 %v900_v49  ;;  %v15831_v48 = vunpack.c.h.s8.bf16 %v11593_v25  ;;  %v15832_v49 = vunpack.c.h.s8.bf16 %v11598_v27  ;;  %v15835_v25 = vunpack.c.l.s8.bf16 %v11606_v37  ;;  %v11807_v27 = vld [vmem:[#allocation10 + $0x1d8] sm:$0xff]  ;;  %15855 = vst [vmem:[#allocation55_spill] sm:$0xff] %v11901_v31  ;;  %v11952_v24 = vrot.slane %v11674_v21, %v11901_v31 }
 0x221   : > { %1487 = vmatprep.mubr.bf16.mxu0 %v11515_v40  ;;  %1600 = vmatprep.mubr.bf16.mxu1 %v11515_v40  ;;  %v11787_v40 = vld [vmem:[#allocation10 + $0x198] sm:$0xff] }
 0x222   : > { %v11829_v43 = vld [vmem:[#allocation10 + $0x218] sm:$0xff]  ;;  %15865 = vst [vmem:[#allocation61_spill] sm:$0xff] %v11952_v24  ;;  %v11973_v24 = vld [vmem:[#allocation10 + $0x300] sm:$0xff] }
 0x223   : > { %1638 = vmatpush1.bf16.msra.mxu0 %v15831_v48  ;;  %1751 = vmatpush1.bf16.msra.mxu1 %v15832_v49  ;;  %v11815_v48 = vld [vmem:[#allocation10 + $0x1c0] sm:$0xff]  ;;  %15841 = vst [vmem:[#allocation47_spill] sm:$0xff] %v11829_v43  ;;  %v11878_v49 = vld [vmem:[#allocation10 + $0x298] sm:$0xff]  ;;  %v11922_v43 = vld [vmem:[#allocation10 + $0x2c8] sm:$0xff] }
 0x224   : > { %1639 = vmatprep.subr.bf16.mxu0 %v15834_v17  ;;  %1752 = vmatprep.subr.bf16.mxu1 %v15835_v25  ;;  %v11817_v17 = vld [vmem:[#allocation10 + $0x1d0] sm:$0xff]  ;;  %v15839_v25 = vunpack.c.l.s8.bf16 %v11612_v45 }
 0x225   : > { %15838 = vst [vmem:[#allocation46_spill] sm:$0xff] %v11817_v17  ;;  %v15851_v17 = vunpack.c.l.s8.bf16 %v11622_v53 }
 0x226   : > { %1488 = vmatmul.mubr.bf16.gmra.mrb[92].mxu0 %v11523_v54  ;;  %1601 = vmatmul.mubr.bf16.gmra.mrb[92].mxu1 %v11523_v54  ;;  %v11849_v54 = vld [vmem:[#allocation10 + $0x248] sm:$0xff] }
 0x227   : > { %1640 = vmatpush1.bf16.msra.mxu0 %v15839_v25  ;;  %1753 = vmatpush1.bf16.msra.mxu1 %v15840_v9  ;;  %v15843_v25 = vunpack.c.h.s8.bf16 %v11606_v37  ;;  %15846 = vst [vmem:[#allocation50_spill] sm:$0xff] %v11849_v54  ;;  %v15848_v37 = vunpack.c.h.s8.bf16 %v11612_v45  ;;  %v11881_v9 = vsub.s32 4, %v11631_v61  ;;  %v11888_v45 = vld [vmem:[#allocation10 + $0x290] sm:$0xff]  ;;  %v11944_v54 = vrot.slane %v11674_v21, %v11898_v19 }
 0x228   : > { %1641 = vmatprep.subr.bf16.mxu0 %v15842_v11  ;;  %1643 = vmatprep.mubr.bf16.mxu0 %v11433_v36  ;;  %v11859_v11 = vld [vmem:[#allocation10 + $0x250] sm:$0xff] }
 0x229   : > { %1754 = vmatprep.subr.bf16.mxu1 %v15843_v25  ;;  %1756 = vmatprep.mubr.bf16.mxu1 %v11433_v36  ;;  %v11857_v36 = vld [vmem:[#allocation10 + $0x240] sm:$0xff]  ;;  %v15849_v25 = vunpack.c.h.s8.bf16 %v11614_v46  ;;  %15852 = vst [vmem:[#allocation52_spill] sm:$0xff] %v11881_v9  ;;  %v11924_v46 = vld [vmem:[#allocation10 + $0x2d8] sm:$0xff]  ;;  %v11930_v52 = vrot.slane %v11681_v32, %v11881_v9  ;;  %15863 = vst [vmem:[#allocation59_spill] sm:$0xff] %v11944_v54 }
 0x22a   : > { %v11975_v54 = vld [vmem:[#allocation10 + $0x310] sm:$0xff] }
 0x22b   : > { %1642 = vmatpush1.bf16.msra.mxu0 %v15848_v37  ;;  %1755 = vmatpush1.bf16.msra.mxu1 %v15849_v25  ;;  %v11876_v25 = vld [vmem:[#allocation10 + $0x288] sm:$0xff]  ;;  %v11891_v37 = vsub.s32 5, %v11631_v61  ;;  %v15859_v61 = vunpack.c.h.s8.bf16 %v11622_v53  ;;  %15860 = vst [vmem:[#allocation56_spill] sm:$0xff] %v11930_v52  ;;  %v15868_v52 = vunpack.c.h.s8.bf16 %v11627_v59  ;;  %15872 = vst [vmem:[#allocation66_spill] sm:$0xff] %v11975_v54 }
 0x22c   : > { %4437 = vmatprep.subr.bf16.mxu0 %v15850_v35  ;;  %5341 = vmatprep.subr.bf16.mxu1 %v15851_v17  ;;  %v11886_v17 = vld [vmem:[#allocation10 + $0x280] sm:$0xff]  ;;  %v15856_v35 = vunpack.c.l.s8.bf16 %v11627_v59  ;;  %v15873_v59 = vunpack.c.l.s8.bf16 %v11639_v4  ;;  %v12027_v54 = vld [vmem:[#allocation10 + $0x3c8] sm:$0xff] }
 0x22d   : > { %15853 = vst [vmem:[#allocation53_spill] sm:$0xff] %v11891_v37  ;;  %v11934_v53 = vrot.slane %v11674_v21, %v11891_v37 }
 0x22e   : > { %1644 = vmatmul.mubr.bf16.vlgmr.msra.gmra.mrb[96].mxu0 %v11439_v44  ;;  %1757 = vmatmul.mubr.bf16.vlgmr.msra.gmra.mrb[96].mxu1 %v11439_v44  ;;  %v11938_v44 = vld [vmem:[#allocation10 + $0x2c0] sm:$0xff] }
 0x22f   : > { %4438 = vmatpush1.bf16.msra.mxu0 %v15856_v35  ;;  %5342 = vmatpush1.bf16.msra.mxu1 %v15857_v63  ;;  %v11919_v63 = vrot.slane %v11674_v21, %v11881_v9  ;;  %15861 = vst [vmem:[#allocation57_spill] sm:$0xff] %v11934_v53  ;;  %v11940_v35 = vld [vmem:[#allocation10 + $0x2d0] sm:$0xff]  ;;  %v11955_v9 = vld [vmem:[#allocation10 + $0x308] sm:$0xff]  ;;  %v15869_v53 = vunpack.c.h.s8.bf16 %v11629_v60  ;;  %v11969_v21 = vrot.slane %v11681_v32, %v11901_v31  ;;  %v15874_v60 = vunpack.c.l.s8.bf16 %v11645_v10 }
 0x230   : > { %4439 = vmatprep.subr.bf16.mxu0 %v15858_v58  ;;  %5343 = vmatprep.subr.bf16.mxu1 %v15859_v61  ;;  %15862 = vst [vmem:[#allocation58_spill] sm:$0xff] %v11940_v35  ;;  %15866 = vst [vmem:[#allocation62_spill] sm:$0xff] %v11955_v9  ;;  %v11957_v61 = vld [vmem:[#allocation10 + $0x318] sm:$0xff]  ;;  %v11985_v31 = vld [vmem:[#allocation10 + $0x348] sm:$0xff]  ;;  %v15880_v35 = vunpack.c.l.s8.bf16 %v11649_v13 }
 0x231   : > { %1653 = vmatprep.mubr.bf16.mxu0 %v11443_v51  ;;  %1766 = vmatprep.mubr.bf16.mxu1 %v11443_v51  ;;  %v11948_v51 = vrot.slane %v11681_v32, %v11891_v37  ;;  %15867 = vst [vmem:[#allocation63_spill] sm:$0xff] %v11957_v61  ;;  %v11965_v37 = vrot.slane %v11681_v32, %v11898_v19  ;;  %15871 = vst [vmem:[#allocation65_spill] sm:$0xff] %v11969_v21  ;;  %v12015_v9 = vld [vmem:[#allocation10 + $0x380] sm:$0xff]  ;;  %v12017_v21 = vld [vmem:[#allocation10 + $0x390] sm:$0xff]  ;;  %v15883_v61 = vunpack.c.h.s8.bf16 %v11639_v4 }
 0x232   : > { %15875 = vst [vmem:[#allocation67_spill] sm:$0xff] %v11985_v31  ;;  %15881 = vst [vmem:[#allocation71_spill] sm:$0xff] %v12015_v9  ;;  %v12029_v19 = vld [vmem:[#allocation10 + $0x3d8] sm:$0xff]  ;;  %v12039_v58 = vld [vmem:[#allocation10 + $0x3d0] sm:$0xff] }
 0x233   : > { %15864 = vst [vmem:[#allocation60_spill] sm:$0xff] %v11948_v51  ;;  %4440 = vmatpush1.bf16.msra.mxu0 %v15868_v52  ;;  %5344 = vmatpush1.bf16.msra.mxu1 %v15869_v53  ;;  %15870 = vst [vmem:[#allocation64_spill] sm:$0xff] %v11965_v37  ;;  %v11987_v51 = vld [vmem:[#allocation10 + $0x358] sm:$0xff]  ;;  %v11993_v37 = vld [vmem:[#allocation10 + $0x340] sm:$0xff] }
 0x234   : > { %4441 = vmatprep.subr.bf16.mxu0 %v15873_v59  ;;  %5345 = vmatprep.subr.bf16.mxu1 %v15874_v60  ;;  %15876 = vst [vmem:[#allocation68_spill] sm:$0xff] %v11987_v51  ;;  %v11995_v52 = vld [vmem:[#allocation10 + $0x350] sm:$0xff]  ;;  %v12003_v53 = vld [vmem:[#allocation10 + $0x388] sm:$0xff]  ;;  %v12005_v59 = vld [vmem:[#allocation10 + $0x398] sm:$0xff]  ;;  %v15879_v60 = vunpack.c.l.s8.bf16 %v11647_v12 }
 0x235   : > { %15877 = vst [vmem:[#allocation69_spill] sm:$0xff] %v12003_v53  ;;  %15878 = vst [vmem:[#allocation70_spill] sm:$0xff] %v12005_v59  ;;  %v12045_v31 = vld [vmem:[#allocation10 + $0x408] sm:$0xff]  ;;  %v12047_v4 = vld [vmem:[#allocation10 + $0x418] sm:$0xff]  ;;  %v15893_v59 = vunpack.c.l.s8.bf16 %v11660_v28 }
 0x236   : > { %1654 = vmatmul.mubr.bf16.gmra.mrb[100].mxu0 %v11451_v62  ;;  %1767 = vmatmul.mubr.bf16.gmra.mrb[100].mxu1 %v11451_v62  ;;  %15882 = vst [vmem:[#allocation72_spill] sm:$0xff] %v12017_v21  ;;  %v12037_v62 = vld [vmem:[#allocation10 + $0x3c0] sm:$0xff]  ;;  %15886 = vst [vmem:[#allocation74_spill] sm:$0xff] %v12039_v58  ;;  %v12069_v32 = vld [vmem:[#allocation10 + $0x448] sm:$0xff]  ;;  %v15902_v58 = vunpack.c.l.s8.bf16 %v11672_v20 }
 0x237   : > { %4442 = vmatpush1.bf16.msra.mxu0 %v15879_v60  ;;  %5346 = vmatpush1.bf16.msra.mxu1 %v15880_v35  ;;  %v15884_v60 = vunpack.c.h.s8.bf16 %v11645_v10  ;;  %15885 = vst [vmem:[#allocation73_spill] sm:$0xff] %v12037_v62  ;;  %15887 = vst [vmem:[#allocation75_spill] sm:$0xff] %v12045_v31  ;;  %v12057_v53 = vld [vmem:[#allocation10 + $0x400] sm:$0xff]  ;;  %v12071_v51 = vld [vmem:[#allocation10 + $0x458] sm:$0xff] }
 0x238   : > { %4443 = vmatprep.subr.bf16.mxu0 %v15883_v61  ;;  %1663 = vmatprep.mubr.bf16.mxu0 %v11455_v5  ;;  %15888 = vst [vmem:[#allocation76_spill] sm:$0xff] %v12047_v4  ;;  %v15889_v61 = vunpack.c.h.s8.bf16 %v11647_v12  ;;  %15891 = vst [vmem:[#allocation77_spill] sm:$0xff] %v12057_v53  ;;  %v15894_v12 = vunpack.c.l.s8.bf16 %v11662_v29  ;;  %v12077_v9 = vld [vmem:[#allocation10 + $0x440] sm:$0xff]  ;;  %v12101_v21 = vld [vmem:[#allocation10 + $0x490] sm:$0xff]  ;;  %v15905_v4 = vunpack.c.h.s8.bf16 %v11660_v28 }
 0x239   : > { %5347 = vmatprep.subr.bf16.mxu1 %v15884_v60  ;;  %1776 = vmatprep.mubr.bf16.mxu1 %v11455_v5  ;;  %v15890_v60 = vunpack.c.h.s8.bf16 %v11649_v13  ;;  %v12059_v5 = vld [vmem:[#allocation10 + $0x410] sm:$0xff]  ;;  %15895 = vst [vmem:[#allocation79_spill] sm:$0xff] %v12069_v32  ;;  %15896 = vst [vmem:[#allocation80_spill] sm:$0xff] %v12071_v51  ;;  %v12099_v31 = vld [vmem:[#allocation10 + $0x480] sm:$0xff] }
 0x23a   : > { %15892 = vst [vmem:[#allocation78_spill] sm:$0xff] %v12059_v5  ;;  %15897 = vst [vmem:[#allocation81_spill] sm:$0xff] %v12077_v9  ;;  %v12079_v13 = vld [vmem:[#allocation10 + $0x450] sm:$0xff]  ;;  %v12121_v53 = vld [vmem:[#allocation7 + $0x8] sm:$0xff] }
 0x23b   : > { %4444 = vmatpush1.bf16.msra.mxu0 %v15889_v61  ;;  %5348 = vmatpush1.bf16.msra.mxu1 %v15890_v60  ;;  %15898 = vst [vmem:[#allocation82_spill] sm:$0xff] %v12079_v13  ;;  %v12087_v61 = vld [vmem:[#allocation10 + $0x488] sm:$0xff]  ;;  %15903 = vst [vmem:[#allocation85_spill] sm:$0xff] %v12099_v31  ;;  %v15969_v31 = vld [vmem:[#allocation44_spill] sm:$0xff] }
 0x23c   : > { %4445 = vmatprep.subr.bf16.mxu0 %v15893_v59  ;;  %5349 = vmatprep.subr.bf16.mxu1 %v15894_v12  ;;  %15899 = vst [vmem:[#allocation83_spill] sm:$0xff] %v12087_v61  ;;  %v12089_v59 = vld [vmem:[#allocation10 + $0x498] sm:$0xff]  ;;  %v15901_v12 = vunpack.c.l.s8.bf16 %v11670_v15  ;;  %15904 = vst [vmem:[#allocation86_spill] sm:$0xff] %v12101_v21  ;;  %v15968_v21 = vunpack.c.l.s8.bf16 %v11787_v40 }
 0x23d   : > { %15900 = vst [vmem:[#allocation84_spill] sm:$0xff] %v12089_v59 }
 0x23e   : > { %1664 = vmatmul.mubr.bf16.gmra.mrb[104].mxu0 %v11463_v16  ;;  %1777 = vmatmul.mubr.bf16.gmra.mrb[104].mxu1 %v11463_v16 }
 0x23f   : > { %4446 = vmatpush1.bf16.msra.mxu0 %v15901_v12  ;;  %5350 = vmatpush1.bf16.msra.mxu1 %v15902_v58  ;;  %v15906_v12 = vunpack.c.h.s8.bf16 %v11662_v29 }
 0x240   : > { %4447 = vmatprep.subr.bf16.mxu0 %v15905_v4  ;;  %1673 = vmatprep.mubr.bf16.mxu0 %v11467_v23 }
 0x241   : > { %5351 = vmatprep.subr.bf16.mxu1 %v15906_v12  ;;  %v967_v5 = vpop.f32.mrb[0].mxu0  ;;  %v1080_v10 = vpop.f32.mrb[0].mxu1  ;;  %1786 = vmatprep.mubr.bf16.mxu1 %v11467_v23  ;;  %v15907_v12 = vunpack.c.h.s8.bf16 %v11670_v15 }
 0x242   : > { %v1921_v16 = vmul.f32 %v11697_v6, %v967_v5  ;;  %v1923_v35 = vmul.f32 %v11726_v8, %v1080_v10  ;;  %v969_v58 = vpop.f32.mrb[1].mxu0  ;;  %v1082_v60 = vpop.f32.mrb[1].mxu1  ;;  %v15908_v5 = vunpack.c.h.s8.bf16 %v11672_v20  ;;  %v12131_v10 = vrot.slane %v12121_v53, %v11665_v30 }
 0x243   : > { %v1922_v23 = vmul.f32 %v11712_v14, %v969_v58  ;;  %v1924_v4 = vmul.f32 %v11734_v3, %v1082_v60  ;;  %v971_v28 = vpop.f32.mrb[2].mxu0  ;;  %v1084_v29 = vpop.f32.mrb[2].mxu1  ;;  %4448 = vmatpush1.bf16.msra.mxu0 %v15907_v12  ;;  %v15910_v12 = vunpack.c.l.s8.bf16 %v11700_v39 }
 0x244   : > { %5352 = vmatpush1.bf16.msra.mxu1 %v15908_v5  ;;  %15909 = vst [vmem:[#allocation87_spill] sm:$0xff] %v12131_v10  ;;  %v2261_v51 = vadd.f32 %v11708_v38, %v1921_v16  ;;  %v2263_v58 = vadd.f32 %v11747_v47, %v1923_v35  ;;  %v1937_v60 = vmul.f32 %v11697_v6, %v971_v28  ;;  %v973_v9 = vpop.f32.mrb[3].mxu0  ;;  %v1086_v15 = vpop.f32.mrb[3].mxu1  ;;  %v15911_v16 = vunpack.c.l.s8.bf16 %v11702_v41  ;;  %v12146_v35 = vld [vmem:[#allocation8 + $0x8] sm:$0xff] }
 0x245   : > { %v1939_v13 = vmul.f32 %v11726_v8, %v1084_v29  ;;  %4449 = vmatprep.subr.bf16.mxu0 %v15910_v12  ;;  %v2262_v20 = vadd.f32 %v11730_v2, %v1922_v23  ;;  %v2264_v5 = vadd.f32 %v11751_v0, %v1924_v4  ;;  %v1938_v10 = vmul.f32 %v11712_v14, %v973_v9 }
 0x246   : > { %v1940_v32 = vmul.f32 %v11734_v3, %v1086_v15  ;;  %5353 = vmatprep.subr.bf16.mxu1 %v15911_v16  ;;  %v2517_v28 = vmax.f32 %v2261_v51, 0.0  ;;  %v2519_v29 = vmax.f32 %v2263_v58, 0.0  ;;  %v2277_v61 = vadd.f32 %v11708_v38, %v1937_v60  ;;  %1674 = vmatmul.mubr.bf16.gmra.mrb[108].mxu0 %v11475_v34 }
 0x247   : > { %v2279_v62 = vadd.f32 %v11747_v47, %v1939_v13  ;;  %1787 = vmatmul.mubr.bf16.gmra.mrb[108].mxu1 %v11475_v34  ;;  %v2518_v4 = vmax.f32 %v2262_v20, 0.0  ;;  %v2520_v23 = vmax.f32 %v2264_v5, 0.0  ;;  %v2278_v9 = vadd.f32 %v11730_v2, %v1938_v10  ;;  %1683 = vmatprep.mubr.bf16.mxu0 %v11479_v42 }
 0x248   : > { %v2280_v15 = vadd.f32 %v11751_v0, %v1940_v32  ;;  %v15912_v12 = vunpack.c.l.s8.bf16 %v11716_v33  ;;  %v15913_v51 = vunpack.c.l.s8.bf16 %v11718_v7  ;;  %v2533_v58 = vmax.f32 %v2277_v61, 0.0  ;;  %1796 = vmatprep.mubr.bf16.mxu1 %v11479_v42 }
 0x249   : > { %v2535_v60 = vmax.f32 %v2279_v62, 0.0  ;;  %v15914_v13 = vunpack.c.h.s8.bf16 %v11700_v39  ;;  %v15915_v16 = vunpack.c.h.s8.bf16 %v11702_v41  ;;  %v12164_v34 = vrot.slane %v12146_v35, %v11665_v30  ;;  %v977_v5 = vpop.f32.mrb[4].mxu0 }
 0x24a   : > { %4450 = vmatpush1.bf16.msra.mxu0 %v15912_v12  ;;  %5354 = vmatpush1.bf16.msra.mxu1 %v15913_v51  ;;  %v12168_v32 = vrot.slane %v12121_v53, %v11684_v18  ;;  %v2534_v10 = vmax.f32 %v2278_v9, 0.0  ;;  %v2536_v20 = vmax.f32 %v2280_v15, 0.0  ;;  %v1090_v12 = vpop.f32.mrb[4].mxu1  ;;  %v12174_v39 = vrot.slane %v12146_v35, %v11684_v18  ;;  %v979_v51 = vpop.f32.mrb[5].mxu0 }
 0x24b   : > { %4451 = vmatprep.subr.bf16.mxu0 %v15914_v13  ;;  %5355 = vmatprep.subr.bf16.mxu1 %v15915_v16  ;;  %15916 = vst [vmem:[#allocation88_spill] sm:$0xff] %v12164_v34  ;;  %v12178_v41 = vrot.slane %v12121_v53, %v11677_v26  ;;  %v12180_v62 = vpack.c.bf16 %v2533_v58, %v2517_v28  ;;  %v1092_v13 = vpop.f32.mrb[5].mxu1  ;;  %v15924_v28 = vunpack.c.h.s8.bf16 %v11716_v33 }
 0x24c   : > { %15917 = vst [vmem:[#allocation89_spill] sm:$0xff] %v12168_v32  ;;  %15918 = vst [vmem:[#allocation90_spill] sm:$0xff] %v12174_v39  ;;  %v12182_v61 = vpack.c.bf16 %v2535_v60, %v2519_v29  ;;  %v1953_v9 = vmul.f32 %v11697_v6, %v977_v5  ;;  %v1955_v15 = vmul.f32 %v11726_v8, %v1090_v12  ;;  %v981_v39 = vpop.f32.mrb[6].mxu0  ;;  %v1094_v34 = vpop.f32.mrb[6].mxu1 }
 0x24d   : > { %15919 = vst [vmem:[#allocation91_spill] sm:$0xff] %v12178_v41  ;;  %15920 = vst [vmem:[#allocation92_spill] sm:$0xff] %v12180_v62  ;;  %v12186_v16 = vpack.c.bf16 %v2534_v10, %v2518_v4  ;;  %v12188_v42 = vpack.c.bf16 %v2536_v20, %v2520_v23  ;;  %v1954_v18 = vmul.f32 %v11712_v14, %v979_v51  ;;  %v15925_v23 = vunpack.c.h.s8.bf16 %v11718_v7  ;;  %v983_v10 = vpop.f32.mrb[7].mxu0  ;;  %v1096_v20 = vpop.f32.mrb[7].mxu1 }
 0x24e   : > { %15921 = vst [vmem:[#allocation93_spill] sm:$0xff] %v12182_v61  ;;  %v1956_v30 = vmul.f32 %v11734_v3, %v1092_v13  ;;  %4452 = vmatpush1.bf16.msra.mxu0 %v15924_v28  ;;  %v2293_v29 = vadd.f32 %v11708_v38, %v1953_v9  ;;  %v2295_v58 = vadd.f32 %v11747_v47, %v1955_v15  ;;  %v15926_v9 = vunpack.c.l.s8.bf16 %v11737_v1  ;;  %v15927_v13 = vld [vmem:[#allocation28_spill] sm:$0xff] }
 0x24f   : > { %15922 = vst [vmem:[#allocation94_spill] sm:$0xff] %v12186_v16  ;;  %15923 = vst [vmem:[#allocation95_spill] sm:$0xff] %v12188_v42  ;;  %v1969_v60 = vmul.f32 %v11697_v6, %v981_v39  ;;  %v1971_v4 = vmul.f32 %v11726_v8, %v1094_v34  ;;  %5356 = vmatpush1.bf16.msra.mxu1 %v15925_v23  ;;  %v2294_v5 = vadd.f32 %v11730_v2, %v1954_v18 }
 0x250   : > { %v2296_v12 = vadd.f32 %v11751_v0, %v1956_v30  ;;  %v1970_v33 = vmul.f32 %v11712_v14, %v983_v10  ;;  %v1972_v51 = vmul.f32 %v11734_v3, %v1096_v20  ;;  %4453 = vmatprep.subr.bf16.mxu0 %v15926_v9  ;;  %v2549_v15 = vmax.f32 %v2293_v29, 0.0  ;;  %1684 = vmatmul.mubr.bf16.gmra.mrb[112].mxu0 %v15927_v13  ;;  %v15928_v10 = vld [vmem:[#allocation39_spill] sm:$0xff] }
 0x251   : > { %v2551_v39 = vmax.f32 %v2295_v58, 0.0  ;;  %v2309_v34 = vadd.f32 %v11708_v38, %v1969_v60  ;;  %v2311_v7 = vadd.f32 %v11747_v47, %v1971_v4  ;;  %1797 = vmatmul.mubr.bf16.gmra.mrb[112].mxu1 %v15927_v13  ;;  %v2550_v18 = vmax.f32 %v2294_v5, 0.0 }
 0x252   : > { %v2552_v28 = vmax.f32 %v2296_v12, 0.0  ;;  %v2310_v30 = vadd.f32 %v11730_v2, %v1970_v33  ;;  %v2312_v23 = vadd.f32 %v11751_v0, %v1972_v51  ;;  %v15929_v20 = vunpack.c.l.s8.bf16 %v15928_v10  ;;  %v15934_v12 = vld [vmem:[#allocation38_spill] sm:$0xff] }
 0x253   : > { %v15930_v29 = vunpack.c.l.s8.bf16 %v11755_v57  ;;  %v2565_v58 = vmax.f32 %v2309_v34, 0.0  ;;  %v2567_v60 = vmax.f32 %v2311_v7, 0.0  ;;  %v15931_v4 = vunpack.c.l.s8.bf16 %v11757_v56  ;;  %v15937_v7 = vld [vmem:[#allocation29_spill] sm:$0xff] }
 0x254   : > { %5357 = vmatprep.subr.bf16.mxu1 %v15929_v20  ;;  %v15932_v9 = vunpack.c.h.s8.bf16 %v11737_v1  ;;  %v12222_v5 = vrot.slane %v12146_v35, %v11677_v26  ;;  %v12226_v33 = vrot.slane %v12121_v53, %v15934_v12  ;;  %v2566_v51 = vmax.f32 %v2310_v30, 0.0  ;;  %v987_v20 = vpop.f32.mrb[8].mxu0  ;;  %1693 = vmatprep.mubr.bf16.mxu0 %v15937_v7 }
 0x255   : > { %4454 = vmatpush1.bf16.msra.mxu0 %v15930_v29  ;;  %5358 = vmatpush1.bf16.msra.mxu1 %v15931_v4  ;;  %v2568_v13 = vmax.f32 %v2312_v23, 0.0  ;;  %v1100_v29 = vpop.f32.mrb[8].mxu1  ;;  %v15936_v34 = vunpack.c.h.s8.bf16 %v15928_v10  ;;  %v12233_v1 = vrot.slane %v12146_v35, %v15934_v12  ;;  %v12238_v26 = vpack.c.bf16 %v2567_v60, %v2551_v39  ;;  %v989_v23 = vpop.f32.mrb[9].mxu0 }
 0x256   : > { %4455 = vmatprep.subr.bf16.mxu0 %v15932_v9  ;;  %15933 = vst [vmem:[#allocation28_spill] sm:$0xff] %v12222_v5  ;;  %15935 = vst [vmem:[#allocation39_spill] sm:$0xff] %v12226_v33  ;;  %v12236_v9 = vpack.c.bf16 %v2565_v58, %v2549_v15  ;;  %v1985_v53 = vmul.f32 %v11697_v6, %v987_v20  ;;  %v1987_v30 = vmul.f32 %v11726_v8, %v1100_v29  ;;  %v1102_v5 = vpop.f32.mrb[9].mxu1  ;;  %v991_v15 = vpop.f32.mrb[10].mxu0  ;;  %v15952_v33 = vld [vmem:[#allocation42_spill] sm:$0xff] }
 0x257   : > { %5359 = vmatprep.subr.bf16.mxu1 %v15936_v34  ;;  %15938 = vst [vmem:[#allocation29_spill] sm:$0xff] %v12233_v1  ;;  %15940 = vst [vmem:[#allocation97_spill] sm:$0xff] %v12238_v26  ;;  %1806 = vmatprep.mubr.bf16.mxu1 %v15937_v7  ;;  %v12243_v10 = vpack.c.bf16 %v2566_v51, %v2550_v18  ;;  %v12245_v34 = vpack.c.bf16 %v2568_v13, %v2552_v28  ;;  %v1104_v58 = vpop.f32.mrb[10].mxu1  ;;  %v15943_v39 = vunpack.c.h.s8.bf16 %v11755_v57  ;;  %v993_v51 = vpop.f32.mrb[11].mxu0 }
 0x258   : > { %15939 = vst [vmem:[#allocation96_spill] sm:$0xff] %v12236_v9  ;;  %v1986_v35 = vmul.f32 %v11712_v14, %v989_v23  ;;  %v1988_v4 = vmul.f32 %v11734_v3, %v1102_v5  ;;  %v2325_v60 = vadd.f32 %v11708_v38, %v1985_v53  ;;  %v2327_v20 = vadd.f32 %v11747_v47, %v1987_v30  ;;  %v1106_v13 = vpop.f32.mrb[11].mxu1 }
 0x259   : > { %15941 = vst [vmem:[#allocation98_spill] sm:$0xff] %v12243_v10  ;;  %15942 = vst [vmem:[#allocation99_spill] sm:$0xff] %v12245_v34  ;;  %4456 = vmatpush1.bf16.msra.mxu0 %v15943_v39  ;;  %v2001_v29 = vmul.f32 %v11697_v6, %v991_v15  ;;  %v2003_v18 = vmul.f32 %v11726_v8, %v1104_v58  ;;  %v15944_v28 = vunpack.c.h.s8.bf16 %v11757_v56  ;;  %v15945_v53 = vunpack.c.l.s8.bf16 %v11765_v50  ;;  %v15946_v39 = vld [vmem:[#allocation30_spill] sm:$0xff]  ;;  %v997_v32 = vpop.f32.mrb[12].mxu0  ;;  %v1110_v59 = vpop.f32.mrb[12].mxu1 }
 0x25a   : > { %v2326_v5 = vadd.f32 %v11730_v2, %v1986_v35  ;;  %v2328_v7 = vadd.f32 %v11751_v0, %v1988_v4  ;;  %v2002_v57 = vmul.f32 %v11712_v14, %v993_v51  ;;  %v2004_v23 = vmul.f32 %v11734_v3, %v1106_v13  ;;  %1694 = vmatmul.mubr.bf16.gmra.mrb[116].mxu0 %v15946_v39  ;;  %v12267_v35 = vld [vmem:[#allocation10 + $0x4c8] sm:$0xff]  ;;  %v12269_v4 = vld [vmem:[#allocation10 + $0x4d8] sm:$0xff] }
 0x25b   : > { %5360 = vmatpush1.bf16.msra.mxu1 %v15944_v28  ;;  %4457 = vmatprep.subr.bf16.mxu0 %v15945_v53  ;;  %v2581_v30 = vmax.f32 %v2325_v60, 0.0  ;;  %v2583_v15 = vmax.f32 %v2327_v20, 0.0  ;;  %v2341_v58 = vadd.f32 %v11708_v38, %v2001_v29  ;;  %v2343_v56 = vadd.f32 %v11747_v47, %v2003_v18  ;;  %15947 = vst [vmem:[#allocation30_spill] sm:$0xff] %v12269_v4  ;;  %v15948_v60 = vld [vmem:[#allocation40_spill] sm:$0xff]  ;;  %v15950_v29 = vld [vmem:[#allocation41_spill] sm:$0xff] }
 0x25c   : > { %1807 = vmatmul.mubr.bf16.gmra.mrb[116].mxu1 %v15946_v39  ;;  %v2582_v28 = vmax.f32 %v2326_v5, 0.0  ;;  %v2584_v51 = vmax.f32 %v2328_v7, 0.0  ;;  %v2342_v13 = vadd.f32 %v11730_v2, %v2002_v57  ;;  %v2344_v53 = vadd.f32 %v11751_v0, %v2004_v23  ;;  %v1112_v7 = vpop.f32.mrb[13].mxu1 }
 0x25d   : > { %v15949_v20 = vunpack.c.l.s8.bf16 %v15948_v60  ;;  %v15951_v12 = vunpack.c.l.s8.bf16 %v15950_v29  ;;  %v2597_v18 = vmax.f32 %v2341_v58, 0.0  ;;  %v2599_v1 = vmax.f32 %v2343_v56, 0.0 }
 0x25e   : > { %v15953_v39 = vunpack.c.l.s8.bf16 %v15952_v33  ;;  %v15954_v41 = vunpack.c.h.s8.bf16 %v11765_v50  ;;  %v2598_v57 = vmax.f32 %v2342_v13, 0.0  ;;  %v2600_v23 = vmax.f32 %v2344_v53, 0.0  ;;  %v999_v53 = vpop.f32.mrb[13].mxu0 }
 0x25f   : > { %5361 = vmatprep.subr.bf16.mxu1 %v15949_v20  ;;  %4458 = vmatpush1.bf16.msra.mxu0 %v15951_v12  ;;  %v15955_v20 = vunpack.c.h.s8.bf16 %v15948_v60  ;;  %v15956_v12 = vld [vmem:[#allocation31_spill] sm:$0xff]  ;;  %v12290_v50 = vpack.c.bf16 %v2599_v1, %v2583_v15  ;;  %v2019_v13 = vmul.f32 %v11726_v8, %v1110_v59  ;;  %v2018_v58 = vmul.f32 %v11712_v14, %v999_v53 }
 0x260   : > { %5362 = vmatpush1.bf16.msra.mxu1 %v15953_v39  ;;  %4459 = vmatprep.subr.bf16.mxu0 %v15954_v41  ;;  %v12288_v39 = vpack.c.bf16 %v2597_v18, %v2581_v30  ;;  %v2017_v41 = vmul.f32 %v11697_v6, %v997_v32  ;;  %v12295_v60 = vpack.c.bf16 %v2598_v57, %v2582_v28  ;;  %v1001_v30 = vpop.f32.mrb[14].mxu0  ;;  %v1114_v18 = vpop.f32.mrb[14].mxu1  ;;  %v15961_v1 = vunpack.c.h.s8.bf16 %v15950_v29 }
 0x261   : > { %5363 = vmatprep.subr.bf16.mxu1 %v15955_v20  ;;  %1703 = vmatprep.mubr.bf16.mxu0 %v15956_v12  ;;  %15958 = vst [vmem:[#allocation41_spill] sm:$0xff] %v12290_v50  ;;  %v12297_v20 = vpack.c.bf16 %v2600_v23, %v2584_v51  ;;  %v2020_v56 = vmul.f32 %v11734_v3, %v1112_v7  ;;  %v15962_v51 = vunpack.c.h.s8.bf16 %v15952_v33  ;;  %v1003_v57 = vpop.f32.mrb[15].mxu0  ;;  %v1116_v23 = vpop.f32.mrb[15].mxu1  ;;  %v15971_v50 = vld [vmem:[#allocation45_spill] sm:$0xff] }
 0x262   : > { %15957 = vst [vmem:[#allocation40_spill] sm:$0xff] %v12288_v39  ;;  %1816 = vmatprep.mubr.bf16.mxu1 %v15956_v12  ;;  %15959 = vst [vmem:[#allocation42_spill] sm:$0xff] %v12295_v60  ;;  %v2357_v32 = vadd.f32 %v11708_v38, %v2017_v41  ;;  %v2359_v59 = vadd.f32 %v11747_v47, %v2019_v13  ;;  %v2033_v15 = vmul.f32 %v11697_v6, %v1001_v30  ;;  %v15963_v41 = vld [vmem:[#allocation43_spill] sm:$0xff]  ;;  %v12315_v13 = vld [vmem:[#allocation10 + $0x4c0] sm:$0xff]  ;;  %v1120_v26 = vpop.f32.mrb[16].mxu1 }
 0x263   : > { %15960 = vst [vmem:[#allocation31_spill] sm:$0xff] %v12297_v20  ;;  %4460 = vmatpush1.bf16.msra.mxu0 %v15961_v1  ;;  %v2035_v28 = vmul.f32 %v11726_v8, %v1114_v18  ;;  %v2358_v7 = vadd.f32 %v11730_v2, %v2018_v58  ;;  %v2360_v12 = vadd.f32 %v11751_v0, %v2020_v56  ;;  %v15964_v1 = vunpack.c.l.s8.bf16 %v15963_v41  ;;  %v12317_v30 = vld [vmem:[#allocation10 + $0x4d0] sm:$0xff] }
 0x264   : > { %5364 = vmatpush1.bf16.msra.mxu1 %v15962_v51  ;;  %v2034_v29 = vmul.f32 %v11712_v14, %v1003_v57  ;;  %v2036_v53 = vmul.f32 %v11734_v3, %v1116_v23  ;;  %15965 = vst [vmem:[#allocation43_spill] sm:$0xff] %v12315_v13  ;;  %15966 = vst [vmem:[#allocation100_spill] sm:$0xff] %v12317_v30  ;;  %v2613_v18 = vmax.f32 %v2357_v32, 0.0  ;;  %v2615_v33 = vmax.f32 %v2359_v59, 0.0  ;;  %v15967_v58 = vld [vmem:[#allocation32_spill] sm:$0xff] }
 0x265   : > { %4461 = vmatprep.subr.bf16.mxu0 %v15964_v1  ;;  %v2373_v51 = vadd.f32 %v11708_v38, %v2033_v15  ;;  %v2375_v5 = vadd.f32 %v11747_v47, %v2035_v28  ;;  %1704 = vmatmul.mubr.bf16.gmra.mrb[120].mxu0 %v15967_v58  ;;  %v2614_v56 = vmax.f32 %v2358_v7, 0.0  ;;  %v2616_v57 = vmax.f32 %v2360_v12, 0.0  ;;  %v1122_v12 = vpop.f32.mrb[17].mxu1 }
 0x266   : > { %1817 = vmatmul.mubr.bf16.gmra.mrb[120].mxu1 %v15967_v58  ;;  %v2374_v23 = vadd.f32 %v11730_v2, %v2034_v29  ;;  %v2376_v1 = vadd.f32 %v11751_v0, %v2036_v53  ;;  %5365 = vmatprep.subr.bf16.mxu1 %v15968_v21  ;;  %v15970_v32 = vunpack.c.l.s8.bf16 %v15969_v31  ;;  %v15972_v28 = vunpack.c.l.s8.bf16 %v15971_v50  ;;  %v1007_v58 = vpop.f32.mrb[16].mxu0 }
 0x267   : > { %v2629_v59 = vmax.f32 %v2373_v51, 0.0  ;;  %v2631_v15 = vmax.f32 %v2375_v5, 0.0  ;;  %v15973_v20 = vunpack.c.h.s8.bf16 %v15963_v41  ;;  %v15974_v21 = vunpack.c.h.s8.bf16 %v11787_v40 }
 0x268   : > { %4462 = vmatpush1.bf16.msra.mxu0 %v15970_v32  ;;  %5366 = vmatpush1.bf16.msra.mxu1 %v15972_v28  ;;  %v2630_v29 = vmax.f32 %v2374_v23, 0.0  ;;  %v2632_v53 = vmax.f32 %v2376_v1, 0.0  ;;  %v15975_v32 = vld [vmem:[#allocation33_spill] sm:$0xff]  ;;  %v2049_v41 = vmul.f32 %v11697_v6, %v1007_v58  ;;  %v2051_v23 = vmul.f32 %v11726_v8, %v1120_v26  ;;  %v1009_v1 = vpop.f32.mrb[17].mxu0 }
 0x269   : > { %4463 = vmatprep.subr.bf16.mxu0 %v15973_v20  ;;  %5367 = vmatprep.subr.bf16.mxu1 %v15974_v21  ;;  %v12340_v28 = vpack.c.bf16 %v2629_v59, %v2613_v18  ;;  %v12342_v20 = vpack.c.bf16 %v2631_v15, %v2615_v33  ;;  %v2050_v5 = vmul.f32 %v11712_v14, %v1009_v1  ;;  %v1011_v18 = vpop.f32.mrb[18].mxu0  ;;  %v1124_v59 = vpop.f32.mrb[18].mxu1  ;;  %v15980_v33 = vunpack.c.h.s8.bf16 %v15969_v31 }
 0x26a   : > { %1713 = vmatprep.mubr.bf16.mxu0 %v15975_v32  ;;  %1826 = vmatprep.mubr.bf16.mxu1 %v15975_v32  ;;  %v12347_v40 = vpack.c.bf16 %v2630_v29, %v2614_v56  ;;  %v12349_v21 = vpack.c.bf16 %v2632_v53, %v2616_v57  ;;  %v2052_v51 = vmul.f32 %v11734_v3, %v1122_v12  ;;  %v15981_v57 = vunpack.c.h.s8.bf16 %v15971_v50  ;;  %v1013_v29 = vpop.f32.mrb[19].mxu0  ;;  %v1126_v53 = vpop.f32.mrb[19].mxu1 }
 0x26b   : > { %15976 = vst [vmem:[#allocation32_spill] sm:$0xff] %v12340_v28  ;;  %15977 = vst [vmem:[#allocation44_spill] sm:$0xff] %v12342_v20  ;;  %v2389_v15 = vadd.f32 %v11708_v38, %v2049_v41  ;;  %v2391_v26 = vadd.f32 %v11747_v47, %v2051_v23  ;;  %v2065_v58 = vmul.f32 %v11697_v6, %v1011_v18  ;;  %v15982_v41 = vunpack.c.l.s8.bf16 %v11805_v55 }
 0x26c   : > { %15978 = vst [vmem:[#allocation45_spill] sm:$0xff] %v12347_v40  ;;  %15979 = vst [vmem:[#allocation33_spill] sm:$0xff] %v12349_v21  ;;  %4464 = vmatpush1.bf16.msra.mxu0 %v15980_v33  ;;  %v2067_v56 = vmul.f32 %v11726_v8, %v1124_v59  ;;  %5368 = vmatpush1.bf16.msra.mxu1 %v15981_v57  ;;  %v2390_v12 = vadd.f32 %v11730_v2, %v2050_v5  ;;  %v15983_v33 = vld [vmem:[#allocation34_spill] sm:$0xff]  ;;  %v15988_v20 = vunpack.c.h.s8.bf16 %v11805_v55 }
 0x26d   : > { %v2392_v32 = vadd.f32 %v11751_v0, %v2052_v51  ;;  %v2066_v31 = vmul.f32 %v11712_v14, %v1013_v29  ;;  %v2068_v1 = vmul.f32 %v11734_v3, %v1126_v53  ;;  %4465 = vmatprep.subr.bf16.mxu0 %v15982_v41  ;;  %v2645_v23 = vmax.f32 %v2389_v15, 0.0  ;;  %1714 = vmatmul.mubr.bf16.gmra.mrb[124].mxu0 %v15983_v33  ;;  %v12371_v5 = vld [vmem:[#allocation10 + $0x508] sm:$0xff]  ;;  %v12373_v51 = vld [vmem:[#allocation10 + $0x518] sm:$0xff] }
 0x26e   : > { %v2647_v18 = vmax.f32 %v2391_v26, 0.0  ;;  %v2405_v59 = vadd.f32 %v11708_v38, %v2065_v58  ;;  %v2407_v50 = vadd.f32 %v11747_v47, %v2067_v56  ;;  %1827 = vmatmul.mubr.bf16.gmra.mrb[124].mxu1 %v15983_v33  ;;  %v2646_v57 = vmax.f32 %v2390_v12, 0.0  ;;  %4469 = vmatprep.mubr.bf16.mxu0 %v12186_v16  ;;  %v15986_v33 = vld [vmem:[#allocation46_spill] sm:$0xff] }
 0x26f   : > { %v2648_v29 = vmax.f32 %v2392_v32, 0.0  ;;  %v2406_v53 = vadd.f32 %v11730_v2, %v2066_v31  ;;  %v2408_v41 = vadd.f32 %v11751_v0, %v2068_v1  ;;  %v15984_v15 = vunpack.c.l.s8.bf16 %v11807_v27  ;;  %5373 = vmatprep.mubr.bf16.mxu1 %v12186_v16  ;;  %v1017_v1 = vpop.f32.mrb[20].mxu0 }
 0x270   : > { %v15985_v26 = vunpack.c.l.s8.bf16 %v11815_v48  ;;  %v2661_v58 = vmax.f32 %v2405_v59, 0.0  ;;  %v2663_v56 = vmax.f32 %v2407_v50, 0.0  ;;  %v15987_v7 = vunpack.c.l.s8.bf16 %v15986_v33 }
 0x271   : > { %5369 = vmatprep.subr.bf16.mxu1 %v15984_v15  ;;  %v2662_v31 = vmax.f32 %v2406_v53, 0.0  ;;  %v2664_v4 = vmax.f32 %v2408_v41, 0.0  ;;  %v1130_v15 = vpop.f32.mrb[20].mxu1  ;;  %v2081_v12 = vmul.f32 %v11697_v6, %v1017_v1  ;;  %v1019_v41 = vpop.f32.mrb[21].mxu0  ;;  %v15991_v16 = vunpack.c.h.s8.bf16 %v11807_v27 }
 0x272   : > { %4466 = vmatpush1.bf16.msra.mxu0 %v15985_v26  ;;  %5370 = vmatpush1.bf16.msra.mxu1 %v15987_v7  ;;  %v12391_v26 = vpack.c.bf16 %v2661_v58, %v2645_v23  ;;  %v12393_v7 = vpack.c.bf16 %v2663_v56, %v2647_v18  ;;  %v2083_v53 = vmul.f32 %v11726_v8, %v1130_v15  ;;  %v1132_v32 = vpop.f32.mrb[21].mxu1  ;;  %v1021_v58 = vpop.f32.mrb[22].mxu0  ;;  %v15994_v56 = vunpack.c.h.s8.bf16 %v11815_v48 }
 0x273   : > { %4467 = vmatprep.subr.bf16.mxu0 %v15988_v20  ;;  %5371 = vmatprep.subr.bf16.mxu1 %v15991_v16  ;;  %v12399_v30 = vpack.c.bf16 %v2662_v31, %v2646_v57  ;;  %v12401_v55 = vpack.c.bf16 %v2664_v4, %v2648_v29  ;;  %v2082_v20 = vmul.f32 %v11712_v14, %v1019_v41  ;;  %v1134_v18 = vpop.f32.mrb[22].mxu1  ;;  %v15995_v4 = vunpack.c.h.s8.bf16 %v15986_v33  ;;  %v1023_v57 = vpop.f32.mrb[23].mxu0 }
 0x274   : > { %15989 = vst [vmem:[#allocation34_spill] sm:$0xff] %v12391_v26  ;;  %15990 = vst [vmem:[#allocation46_spill] sm:$0xff] %v12393_v7  ;;  %v2084_v23 = vmul.f32 %v11734_v3, %v1132_v32  ;;  %v2421_v1 = vadd.f32 %v11708_v38, %v2081_v12  ;;  %v2423_v15 = vadd.f32 %v11747_v47, %v2083_v53  ;;  %v1136_v29 = vpop.f32.mrb[23].mxu1  ;;  %v15996_v12 = vunpack.c.l.s8.bf16 %v11827_v22  ;;  %v12419_v53 = vld [vmem:[#allocation10 + $0x500] sm:$0xff] }
 0x275   : > { %15992 = vst [vmem:[#allocation101_spill] sm:$0xff] %v12399_v30  ;;  %15993 = vst [vmem:[#allocation102_spill] sm:$0xff] %v12401_v55  ;;  %v2097_v27 = vmul.f32 %v11697_v6, %v1021_v58  ;;  %v2099_v16 = vmul.f32 %v11726_v8, %v1134_v18  ;;  %v2422_v32 = vadd.f32 %v11730_v2, %v2082_v20  ;;  %v12421_v58 = vld [vmem:[#allocation10 + $0x510] sm:$0xff]  ;;  %v16004_v13 = vunpack.c.h.s8.bf16 %v11827_v22 }
 0x276   : > { %4468 = vmatpush1.bf16.msra.mxu0 %v15994_v56  ;;  %5372 = vmatpush1.bf16.msra.mxu1 %v15995_v4  ;;  %v2424_v31 = vadd.f32 %v11751_v0, %v2084_v23  ;;  %v2098_v48 = vmul.f32 %v11712_v14, %v1023_v57  ;;  %v2100_v41 = vmul.f32 %v11734_v3, %v1136_v29  ;;  %v2677_v18 = vmax.f32 %v2421_v1, 0.0  ;;  %v15998_v20 = vld [vmem:[#allocation47_spill] sm:$0xff] }
 0x277   : > { %4550 = vmatprep.subr.bf16.mxu0 %v15996_v12  ;;  %15997 = vst [vmem:[#allocation103_spill] sm:$0xff] %v12421_v58  ;;  %v2679_v33 = vmax.f32 %v2423_v15, 0.0  ;;  %v2437_v56 = vadd.f32 %v11708_v38, %v2097_v27  ;;  %v2439_v4 = vadd.f32 %v11747_v47, %v2099_v16  ;;  %v15999_v23 = vunpack.c.l.s8.bf16 %v15998_v20  ;;  %v16000_v27 = vld [vmem:[#allocation48_spill] sm:$0xff] }
 0x278   : > { %v2678_v57 = vmax.f32 %v2422_v32, 0.0  ;;  %v2680_v29 = vmax.f32 %v2424_v31, 0.0  ;;  %v2438_v50 = vadd.f32 %v11730_v2, %v2098_v48  ;;  %v2440_v12 = vadd.f32 %v11751_v0, %v2100_v41  ;;  %v16002_v48 = vld [vmem:[#allocation49_spill] sm:$0xff]  ;;  %v1027_v41 = vpop.f32.mrb[24].mxu0 }
 0x279   : > { %4470 = vmatmul.mubr.bf16.vlgmr.msra.gmra.mrb[128].mxu0 %v12180_v62  ;;  %5454 = vmatprep.subr.bf16.mxu1 %v15999_v23  ;;  %v2693_v1 = vmax.f32 %v2437_v56, 0.0  ;;  %v2695_v15 = vmax.f32 %v2439_v4, 0.0  ;;  %v16001_v59 = vunpack.c.l.s8.bf16 %v16000_v27  ;;  %v16003_v7 = vunpack.c.l.s8.bf16 %v16002_v48 }
 0x27a   : > { %5374 = vmatmul.mubr.bf16.vlgmr.msra.gmra.mrb[128].mxu1 %v12180_v62  ;;  %4479 = vmatprep.mubr.bf16.mxu0 %v12243_v10  ;;  %v2694_v31 = vmax.f32 %v2438_v50, 0.0  ;;  %v2696_v23 = vmax.f32 %v2440_v12, 0.0  ;;  %v1140_v62 = vpop.f32.mrb[24].mxu1  ;;  %v2113_v32 = vmul.f32 %v11697_v6, %v1027_v41  ;;  %v1029_v12 = vpop.f32.mrb[25].mxu0 }
 0x27b   : > { %4551 = vmatpush1.bf16.msra.mxu0 %v16001_v59  ;;  %5383 = vmatprep.mubr.bf16.mxu1 %v12243_v10  ;;  %v12443_v4 = vpack.c.bf16 %v2693_v1, %v2677_v18  ;;  %v12445_v10 = vpack.c.bf16 %v2695_v15, %v2679_v33  ;;  %v2115_v50 = vmul.f32 %v11726_v8, %v1140_v62  ;;  %v1142_v16 = vpop.f32.mrb[25].mxu1  ;;  %v1031_v1 = vpop.f32.mrb[26].mxu0 }
 0x27c   : > { %5455 = vmatpush1.bf16.msra.mxu1 %v16003_v7  ;;  %4552 = vmatprep.subr.bf16.mxu0 %v16004_v13  ;;  %v16007_v7 = vunpack.c.h.s8.bf16 %v15998_v20  ;;  %v12451_v55 = vpack.c.bf16 %v2694_v31, %v2678_v57  ;;  %v12453_v22 = vpack.c.bf16 %v2696_v23, %v2680_v29  ;;  %v2114_v13 = vmul.f32 %v11712_v14, %v1029_v12  ;;  %v1144_v33 = vpop.f32.mrb[26].mxu1  ;;  %v1033_v57 = vpop.f32.mrb[27].mxu0 }
 0x27d   : > { %16005 = vst [vmem:[#allocation47_spill] sm:$0xff] %v12443_v4  ;;  %16006 = vst [vmem:[#allocation48_spill] sm:$0xff] %v12445_v10  ;;  %v2116_v18 = vmul.f32 %v11734_v3, %v1142_v16  ;;  %v2453_v15 = vadd.f32 %v11708_v38, %v2113_v32  ;;  %v2455_v41 = vadd.f32 %v11747_v47, %v2115_v50  ;;  %v16010_v20 = vunpack.c.h.s8.bf16 %v16000_v27  ;;  %v1146_v29 = vpop.f32.mrb[27].mxu1 }
 0x27e   : > { %5456 = vmatprep.subr.bf16.mxu1 %v16007_v7  ;;  %16008 = vst [vmem:[#allocation49_spill] sm:$0xff] %v12451_v55  ;;  %16009 = vst [vmem:[#allocation104_spill] sm:$0xff] %v12453_v22  ;;  %v2129_v62 = vmul.f32 %v11697_v6, %v1031_v1  ;;  %v2131_v59 = vmul.f32 %v11726_v8, %v1144_v33  ;;  %v2454_v31 = vadd.f32 %v11730_v2, %v2114_v13  ;;  %v16012_v33 = vld [vmem:[#allocation50_spill] sm:$0xff] }
 0x27f   : > { %4553 = vmatpush1.bf16.msra.mxu0 %v16010_v20  ;;  %v2456_v23 = vadd.f32 %v11751_v0, %v2116_v18  ;;  %v16011_v16 = vunpack.c.h.s8.bf16 %v16002_v48  ;;  %v2130_v32 = vmul.f32 %v11712_v14, %v1033_v57  ;;  %v2132_v50 = vmul.f32 %v11734_v3, %v1146_v29  ;;  %v12474_v13 = vld [vmem:[#allocation10 + $0x548] sm:$0xff]  ;;  %v12476_v18 = vld [vmem:[#allocation10 + $0x558] sm:$0xff] }
 0x280   : > { %v2709_v12 = vmax.f32 %v2453_v15, 0.0  ;;  %v2711_v7 = vmax.f32 %v2455_v41, 0.0  ;;  %v2469_v1 = vadd.f32 %v11708_v38, %v2129_v62  ;;  %v2471_v27 = vadd.f32 %v11747_v47, %v2131_v59  ;;  %v16014_v41 = vld [vmem:[#allocation51_spill] sm:$0xff] }
 0x281   : > { %5457 = vmatpush1.bf16.msra.mxu1 %v16011_v16  ;;  %4480 = vmatmul.mubr.bf16.gmra.mrb[132].mxu0 %v12236_v9  ;;  %v16013_v20 = vunpack.c.l.s8.bf16 %v16012_v33  ;;  %v2710_v48 = vmax.f32 %v2454_v31, 0.0  ;;  %v2712_v16 = vmax.f32 %v2456_v23, 0.0  ;;  %v2470_v57 = vadd.f32 %v11730_v2, %v2130_v32 }
 0x282   : > { %v2472_v15 = vadd.f32 %v11751_v0, %v2132_v50  ;;  %5384 = vmatmul.mubr.bf16.gmra.mrb[132].mxu1 %v12236_v9  ;;  %v16015_v62 = vunpack.c.l.s8.bf16 %v16014_v41  ;;  %v2725_v59 = vmax.f32 %v2469_v1, 0.0  ;;  %v2727_v29 = vmax.f32 %v2471_v27, 0.0  ;;  %4489 = vmatprep.mubr.bf16.mxu0 %v12295_v60  ;;  %v1037_v9 = vpop.f32.mrb[28].mxu0 }
 0x283   : > { %4554 = vmatprep.subr.bf16.mxu0 %v16013_v20  ;;  %v16016_v20 = vunpack.c.l.s8.bf16 %v11857_v36  ;;  %v2726_v23 = vmax.f32 %v2470_v57, 0.0  ;;  %5393 = vmatprep.mubr.bf16.mxu1 %v12295_v60  ;;  %v16017_v50 = vunpack.c.l.s8.bf16 %v11859_v11  ;;  %v2145_v56 = vmul.f32 %v11697_v6, %v1037_v9 }
 0x284   : > { %5458 = vmatprep.subr.bf16.mxu1 %v16015_v62  ;;  %v2728_v32 = vmax.f32 %v2472_v15, 0.0  ;;  %v1150_v62 = vpop.f32.mrb[28].mxu1  ;;  %v12493_v10 = vpack.c.bf16 %v2725_v59, %v2709_v12  ;;  %v1039_v15 = vpop.f32.mrb[29].mxu0  ;;  %v16020_v60 = vunpack.c.h.s8.bf16 %v16012_v33 }
 0x285   : > { %4555 = vmatpush1.bf16.msra.mxu0 %v16016_v20  ;;  %5459 = vmatpush1.bf16.msra.mxu1 %v16017_v50  ;;  %v12495_v20 = vpack.c.bf16 %v2727_v29, %v2711_v7  ;;  %v2147_v57 = vmul.f32 %v11726_v8, %v1150_v62  ;;  %v1152_v31 = vpop.f32.mrb[29].mxu1  ;;  %v12501_v50 = vpack.c.bf16 %v2726_v23, %v2710_v48  ;;  %v16023_v7 = vunpack.c.h.s8.bf16 %v16014_v41  ;;  %v1041_v59 = vpop.f32.mrb[30].mxu0 }
 0x286   : > { %16018 = vst [vmem:[#allocation50_spill] sm:$0xff] %v12493_v10  ;;  %4556 = vmatprep.subr.bf16.mxu0 %v16020_v60  ;;  %v12503_v58 = vpack.c.bf16 %v2728_v32, %v2712_v16  ;;  %v2146_v1 = vmul.f32 %v11712_v14, %v1039_v15  ;;  %v2148_v12 = vmul.f32 %v11734_v3, %v1152_v31  ;;  %v1154_v9 = vpop.f32.mrb[30].mxu1  ;;  %v16024_v48 = vunpack.c.h.s8.bf16 %v11857_v36  ;;  %v1043_v16 = vpop.f32.mrb[31].mxu0  ;;  %v12521_v15 = vld [vmem:[#allocation10 + $0x540] sm:$0xff] }
 0x287   : > { %16019 = vst [vmem:[#allocation51_spill] sm:$0xff] %v12495_v20  ;;  %16021 = vst [vmem:[#allocation105_spill] sm:$0xff] %v12501_v50  ;;  %5460 = vmatprep.subr.bf16.mxu1 %v16023_v7  ;;  %v2485_v29 = vadd.f32 %v11708_v38, %v2145_v56  ;;  %v2487_v62 = vadd.f32 %v11747_v47, %v2147_v57  ;;  %v2161_v33 = vmul.f32 %v11697_v6, %v1041_v59  ;;  %v1156_v23 = vpop.f32.mrb[31].mxu1  ;;  %v12523_v6 = vld [vmem:[#allocation10 + $0x550] sm:$0xff] }
 0x288   : > { %16022 = vst [vmem:[#allocation106_spill] sm:$0xff] %v12503_v58  ;;  %v2163_v60 = vmul.f32 %v11726_v8, %v1154_v9  ;;  %v2486_v31 = vadd.f32 %v11730_v2, %v2146_v1  ;;  %v2488_v41 = vadd.f32 %v11751_v0, %v2148_v12  ;;  %v16025_v32 = vunpack.c.h.s8.bf16 %v11859_v11 }
 0x289   : > { %4557 = vmatpush1.bf16.msra.mxu0 %v16024_v48  ;;  %v2162_v56 = vmul.f32 %v11712_v14, %v1043_v16  ;;  %v2164_v57 = vmul.f32 %v11734_v3, %v1156_v23  ;;  %v2741_v8 = vmax.f32 %v2485_v29, 0.0  ;;  %v2743_v36 = vmax.f32 %v2487_v62, 0.0  ;;  %v1193_v48 = vpop.f32.mrb[32].mxu0  ;;  %v1306_v16 = vpop.f32.mrb[32].mxu1  ;;  %v16040_v23 = vld [vmem:[#allocation64_spill] sm:$0xff] }
 0x28a   : > { %5461 = vmatpush1.bf16.msra.mxu1 %v16025_v32  ;;  %v2501_v7 = vadd.f32 %v11708_v38, %v2161_v33  ;;  %v2503_v59 = vadd.f32 %v11747_v47, %v2163_v60  ;;  %4490 = vmatmul.mubr.bf16.gmra.mrb[136].mxu0 %v12288_v39  ;;  %v16026_v1 = vunpack.c.l.s8.bf16 %v11876_v25  ;;  %v2742_v11 = vmax.f32 %v2486_v31, 0.0  ;;  %v16037_v31 = vld [vmem:[#allocation61_spill] sm:$0xff] }
 0x28b   : > { %v2744_v12 = vmax.f32 %v2488_v41, 0.0  ;;  %v2502_v14 = vadd.f32 %v11730_v2, %v2162_v56  ;;  %v2504_v3 = vadd.f32 %v11751_v0, %v2164_v57  ;;  %5394 = vmatmul.mubr.bf16.gmra.mrb[136].mxu1 %v12288_v39  ;;  %v16027_v9 = vunpack.c.l.s8.bf16 %v11878_v49  ;;  %4499 = vmatprep.mubr.bf16.mxu0 %v12347_v40  ;;  %v16032_v57 = vld [vmem:[#allocation59_spill] sm:$0xff] }
 0x28c   : > { %4558 = vmatprep.subr.bf16.mxu0 %v16026_v1  ;;  %v2757_v29 = vmax.f32 %v2501_v7, 0.0  ;;  %v2759_v38 = vmax.f32 %v2503_v59, 0.0  ;;  %v16028_v47 = vunpack.c.l.s8.bf16 %v11886_v17  ;;  %5403 = vmatprep.mubr.bf16.mxu1 %v12347_v40  ;;  %v16029_v0 = vunpack.c.l.s8.bf16 %v11888_v45  ;;  %v1195_v59 = vpop.f32.mrb[33].mxu0  ;;  %v1308_v1 = vpop.f32.mrb[33].mxu1 }
 0x28d   : > { %5462 = vmatprep.subr.bf16.mxu1 %v16027_v9  ;;  %v2758_v60 = vmax.f32 %v2502_v14, 0.0  ;;  %v2760_v2 = vmax.f32 %v2504_v3, 0.0  ;;  %v1925_v56 = vmul.f32 %v11919_v63, %v1193_v48  ;;  %v1927_v7 = vmul.f32 %v16032_v57, %v1306_v16  ;;  %v16039_v48 = vld [vmem:[#allocation56_spill] sm:$0xff] }
 0x28e   : > { %4559 = vmatpush1.bf16.msra.mxu0 %v16028_v47  ;;  %5463 = vmatpush1.bf16.msra.mxu1 %v16029_v0  ;;  %v12545_v41 = vpack.c.bf16 %v2757_v29, %v2741_v8  ;;  %v12547_v32 = vpack.c.bf16 %v2759_v38, %v2743_v36  ;;  %v16033_v14 = vunpack.c.h.s8.bf16 %v11876_v25  ;;  %v16036_v47 = vld [vmem:[#allocation57_spill] sm:$0xff]  ;;  %v1928_v8 = vmul.f32 %v16037_v31, %v1308_v1  ;;  %v1197_v29 = vpop.f32.mrb[34].mxu0  ;;  %v1310_v38 = vpop.f32.mrb[34].mxu1 }
 0x28f   : > { %v12553_v3 = vpack.c.bf16 %v2758_v60, %v2742_v11  ;;  %v12555_v9 = vpack.c.bf16 %v2760_v2, %v2744_v12  ;;  %v1926_v0 = vmul.f32 %v16036_v47, %v1195_v59  ;;  %v16038_v36 = vunpack.c.h.s8.bf16 %v11878_v49  ;;  %v1199_v60 = vpop.f32.mrb[35].mxu0  ;;  %v1312_v2 = vpop.f32.mrb[35].mxu1  ;;  %v16042_v59 = vld [vmem:[#allocation60_spill] sm:$0xff] }
 0x290   : > { %16030 = vst [vmem:[#allocation107_spill] sm:$0xff] %v12545_v41  ;;  %16031 = vst [vmem:[#allocation108_spill] sm:$0xff] %v12547_v32  ;;  %4560 = vmatprep.subr.bf16.mxu0 %v16033_v14  ;;  %v2265_v16 = vadd.f32 %v16039_v48, %v1925_v56  ;;  %v2267_v33 = vadd.f32 %v16040_v23, %v1927_v7  ;;  %v1941_v25 = vmul.f32 %v11919_v63, %v1197_v29  ;;  %v16043_v14 = vld [vmem:[#allocation65_spill] sm:$0xff] }
 0x291   : > { %16034 = vst [vmem:[#allocation59_spill] sm:$0xff] %v12553_v3  ;;  %16035 = vst [vmem:[#allocation109_spill] sm:$0xff] %v12555_v9  ;;  %5464 = vmatprep.subr.bf16.mxu1 %v16038_v36  ;;  %v1943_v11 = vmul.f32 %v16032_v57, %v1310_v38  ;;  %v16041_v12 = vunpack.c.h.s8.bf16 %v11886_v17  ;;  %v2266_v1 = vadd.f32 %v16042_v59, %v1926_v0  ;;  %v16044_v36 = vunpack.c.h.s8.bf16 %v11888_v45  ;;  %v12578_v0 = vld [vmem:[#allocation10 + $0x588] sm:$0xff] }
 0x292   : > { %v2268_v49 = vadd.f32 %v16043_v14, %v1928_v8  ;;  %v1942_v56 = vmul.f32 %v16036_v47, %v1199_v60  ;;  %v1944_v7 = vmul.f32 %v16037_v31, %v1312_v2  ;;  %v2521_v62 = vmax.f32 %v2265_v16, 0.0  ;;  %4500 = vmatmul.mubr.bf16.gmra.mrb[140].mxu0 %v12340_v28  ;;  %v12580_v8 = vld [vmem:[#allocation10 + $0x598] sm:$0xff] }
 0x293   : > { %4561 = vmatpush1.bf16.msra.mxu0 %v16041_v12  ;;  %5465 = vmatpush1.bf16.msra.mxu1 %v16044_v36  ;;  %v2523_v29 = vmax.f32 %v2267_v33, 0.0  ;;  %v2281_v38 = vadd.f32 %v16039_v48, %v1941_v25  ;;  %v2283_v17 = vadd.f32 %v16040_v23, %v1943_v11  ;;  %v16045_v12 = vunpack.c.l.s8.bf16 %v11922_v43 }
 0x294   : > { %v2522_v45 = vmax.f32 %v2266_v1, 0.0  ;;  %v2524_v36 = vmax.f32 %v2268_v49, 0.0  ;;  %v2282_v60 = vadd.f32 %v16042_v59, %v1942_v56  ;;  %v2284_v16 = vadd.f32 %v16043_v14, %v1944_v7  ;;  %5404 = vmatmul.mubr.bf16.gmra.mrb[140].mxu1 %v12340_v28  ;;  %4509 = vmatprep.mubr.bf16.mxu0 %v12399_v30  ;;  %v16048_v7 = vld [vmem:[#allocation58_spill] sm:$0xff]  ;;  %v1203_v28 = vpop.f32.mrb[36].mxu0 }
 0x295   : > { %4562 = vmatprep.subr.bf16.mxu0 %v16045_v12  ;;  %v16046_v33 = vunpack.c.l.s8.bf16 %v11924_v46  ;;  %v2537_v25 = vmax.f32 %v2281_v38, 0.0  ;;  %v2539_v11 = vmax.f32 %v2283_v17, 0.0  ;;  %v16047_v2 = vunpack.c.l.s8.bf16 %v11938_v44  ;;  %5413 = vmatprep.mubr.bf16.mxu1 %v12399_v30  ;;  %v16060_v17 = vld [vmem:[#allocation63_spill] sm:$0xff] }
 0x296   : > { %v2538_v49 = vmax.f32 %v2282_v60, 0.0  ;;  %v2540_v56 = vmax.f32 %v2284_v16, 0.0  ;;  %v16049_v27 = vunpack.c.l.s8.bf16 %v16048_v7  ;;  %v1957_v12 = vmul.f32 %v11919_v63, %v1203_v28  ;;  %v1205_v16 = vpop.f32.mrb[37].mxu0 }
 0x297   : > { %5466 = vmatprep.subr.bf16.mxu1 %v16046_v33  ;;  %4563 = vmatpush1.bf16.msra.mxu0 %v16047_v2  ;;  %v1316_v33 = vpop.f32.mrb[36].mxu1  ;;  %v12597_v40 = vpack.c.bf16 %v2537_v25, %v2521_v62  ;;  %v12599_v2 = vpack.c.bf16 %v2539_v11, %v2523_v29  ;;  %v16052_v30 = vunpack.c.h.s8.bf16 %v11922_v43  ;;  %v1958_v38 = vmul.f32 %v16036_v47, %v1205_v16  ;;  %v1207_v25 = vpop.f32.mrb[38].mxu0  ;;  %v12625_v16 = vld [vmem:[#allocation10 + $0x580] sm:$0xff] }
 0x298   : > { %5467 = vmatpush1.bf16.msra.mxu1 %v16049_v27  ;;  %v1959_v60 = vmul.f32 %v16032_v57, %v1316_v33  ;;  %v1318_v1 = vpop.f32.mrb[37].mxu1  ;;  %v12605_v27 = vpack.c.bf16 %v2538_v49, %v2522_v45  ;;  %v12607_v39 = vpack.c.bf16 %v2540_v56, %v2524_v36  ;;  %v16055_v29 = vunpack.c.h.s8.bf16 %v11924_v46  ;;  %v1209_v36 = vpop.f32.mrb[39].mxu0 }
 0x299   : > { %16050 = vst [vmem:[#allocation57_spill] sm:$0xff] %v12597_v40  ;;  %16051 = vst [vmem:[#allocation61_spill] sm:$0xff] %v12599_v2  ;;  %4564 = vmatprep.subr.bf16.mxu0 %v16052_v30  ;;  %v1960_v62 = vmul.f32 %v16037_v31, %v1318_v1  ;;  %v1320_v28 = vpop.f32.mrb[38].mxu1  ;;  %v2297_v11 = vadd.f32 %v16039_v48, %v1957_v12  ;;  %v1973_v43 = vmul.f32 %v11919_v63, %v1207_v25  ;;  %v1213_v2 = vpop.f32.mrb[40].mxu0 }
 0x29a   : > { %16053 = vst [vmem:[#allocation56_spill] sm:$0xff] %v12605_v27  ;;  %16054 = vst [vmem:[#allocation64_spill] sm:$0xff] %v12607_v39  ;;  %5468 = vmatprep.subr.bf16.mxu1 %v16055_v29  ;;  %v2299_v33 = vadd.f32 %v16040_v23, %v1959_v60  ;;  %v1975_v30 = vmul.f32 %v16032_v57, %v1320_v28  ;;  %v16056_v45 = vunpack.c.h.s8.bf16 %v11938_v44  ;;  %v1322_v49 = vpop.f32.mrb[39].mxu1  ;;  %v16057_v56 = vunpack.c.h.s8.bf16 %v16048_v7  ;;  %v12627_v29 = vld [vmem:[#allocation10 + $0x590] sm:$0xff] }
 0x29b   : > { %v2298_v1 = vadd.f32 %v16042_v59, %v1958_v38  ;;  %v2300_v46 = vadd.f32 %v16043_v14, %v1960_v62  ;;  %v1974_v12 = vmul.f32 %v16036_v47, %v1209_v36  ;;  %v1976_v60 = vmul.f32 %v16037_v31, %v1322_v49  ;;  %4510 = vmatmul.mubr.bf16.gmra.mrb[144].mxu0 %v12391_v26  ;;  %v16058_v38 = vld [vmem:[#allocation62_spill] sm:$0xff] }
 0x29c   : > { %4565 = vmatpush1.bf16.msra.mxu0 %v16056_v45  ;;  %5469 = vmatpush1.bf16.msra.mxu1 %v16057_v56  ;;  %v2553_v25 = vmax.f32 %v2297_v11, 0.0  ;;  %v2555_v44 = vmax.f32 %v2299_v33, 0.0  ;;  %v2313_v28 = vadd.f32 %v16039_v48, %v1973_v43  ;;  %v2315_v45 = vadd.f32 %v16040_v23, %v1975_v30 }
 0x29d   : > { %v16059_v62 = vunpack.c.l.s8.bf16 %v16058_v38  ;;  %v2554_v7 = vmax.f32 %v2298_v1, 0.0  ;;  %v2556_v56 = vmax.f32 %v2300_v46, 0.0  ;;  %v2314_v36 = vadd.f32 %v16042_v59, %v1974_v12  ;;  %5414 = vmatmul.mubr.bf16.gmra.mrb[144].mxu1 %v12391_v26  ;;  %4519 = vmatprep.mubr.bf16.mxu0 %v12451_v55 }
 0x29e   : > { %v2316_v49 = vadd.f32 %v16043_v14, %v1976_v60  ;;  %v16061_v11 = vunpack.c.l.s8.bf16 %v16060_v17  ;;  %v2569_v33 = vmax.f32 %v2313_v28, 0.0  ;;  %v2571_v43 = vmax.f32 %v2315_v45, 0.0  ;;  %5423 = vmatprep.mubr.bf16.mxu1 %v12451_v55  ;;  %v16063_v60 = vld [vmem:[#allocation66_spill] sm:$0xff] }
 0x29f   : > { %4566 = vmatprep.subr.bf16.mxu0 %v16059_v62  ;;  %v16062_v30 = vunpack.c.l.s8.bf16 %v11973_v24  ;;  %v2570_v46 = vmax.f32 %v2314_v36, 0.0  ;;  %v16064_v26 = vunpack.c.l.s8.bf16 %v16063_v60  ;;  %v1989_v62 = vmul.f32 %v11919_v63, %v1213_v2 }
 0x2a0   : > { %5470 = vmatprep.subr.bf16.mxu1 %v16061_v11  ;;  %v2572_v12 = vmax.f32 %v2316_v49, 0.0  ;;  %v1326_v11 = vpop.f32.mrb[40].mxu1  ;;  %v12649_v39 = vpack.c.bf16 %v2569_v33, %v2553_v25  ;;  %v1215_v49 = vpop.f32.mrb[41].mxu0  ;;  %v16067_v55 = vunpack.c.h.s8.bf16 %v16058_v38 }
 0x2a1   : > { %4567 = vmatpush1.bf16.msra.mxu0 %v16062_v30  ;;  %5471 = vmatpush1.bf16.msra.mxu1 %v16064_v26  ;;  %v12651_v30 = vpack.c.bf16 %v2571_v43, %v2555_v44  ;;  %v1991_v36 = vmul.f32 %v16032_v57, %v1326_v11  ;;  %v1328_v1 = vpop.f32.mrb[41].mxu1  ;;  %v12657_v26 = vpack.c.bf16 %v2570_v46, %v2554_v7  ;;  %v16070_v44 = vunpack.c.h.s8.bf16 %v16060_v17  ;;  %v1217_v33 = vpop.f32.mrb[42].mxu0 }
 0x2a2   : > { %16065 = vst [vmem:[#allocation60_spill] sm:$0xff] %v12649_v39  ;;  %4568 = vmatprep.subr.bf16.mxu0 %v16067_v55  ;;  %v12659_v40 = vpack.c.bf16 %v2572_v12, %v2556_v56  ;;  %v1990_v28 = vmul.f32 %v16036_v47, %v1215_v49  ;;  %v1992_v25 = vmul.f32 %v16037_v31, %v1328_v1  ;;  %v1330_v2 = vpop.f32.mrb[42].mxu1  ;;  %v16071_v7 = vunpack.c.h.s8.bf16 %v11973_v24  ;;  %v1219_v56 = vpop.f32.mrb[43].mxu0 }
 0x2a3   : > { %16066 = vst [vmem:[#allocation65_spill] sm:$0xff] %v12651_v30  ;;  %16068 = vst [vmem:[#allocation58_spill] sm:$0xff] %v12657_v26  ;;  %5472 = vmatprep.subr.bf16.mxu1 %v16070_v44  ;;  %v2329_v43 = vadd.f32 %v16039_v48, %v1989_v62  ;;  %v2331_v11 = vadd.f32 %v16040_v23, %v1991_v36  ;;  %v2005_v38 = vmul.f32 %v11919_v63, %v1217_v33  ;;  %v1332_v46 = vpop.f32.mrb[43].mxu1 }
 0x2a4   : > { %16069 = vst [vmem:[#allocation62_spill] sm:$0xff] %v12659_v40  ;;  %v2007_v55 = vmul.f32 %v16032_v57, %v1330_v2  ;;  %v2330_v1 = vadd.f32 %v16042_v59, %v1990_v28  ;;  %v2332_v17 = vadd.f32 %v16043_v14, %v1992_v25  ;;  %v16072_v12 = vunpack.c.h.s8.bf16 %v16063_v60  ;;  %4520 = vmatmul.mubr.bf16.gmra.mrb[148].mxu0 %v12443_v4  ;;  %v16073_v2 = vld [vmem:[#allocation67_spill] sm:$0xff]  ;;  %v12684_v25 = vld [vmem:[#allocation10 + $0x5d8] sm:$0xff] }
 0x2a5   : > { %4569 = vmatpush1.bf16.msra.mxu0 %v16071_v7  ;;  %v2006_v62 = vmul.f32 %v16036_v47, %v1219_v56  ;;  %v2008_v36 = vmul.f32 %v16037_v31, %v1332_v46  ;;  %v2585_v49 = vmax.f32 %v2329_v43, 0.0  ;;  %v2587_v44 = vmax.f32 %v2331_v11, 0.0  ;;  %v12682_v28 = vld [vmem:[#allocation10 + $0x5c8] sm:$0xff]  ;;  %5424 = vmatmul.mubr.bf16.gmra.mrb[148].mxu1 %v12443_v4  ;;  %v16075_v11 = vld [vmem:[#allocation68_spill] sm:$0xff]  ;;  %v1223_v4 = vpop.f32.mrb[44].mxu0 }
 0x2a6   : > { %5473 = vmatpush1.bf16.msra.mxu1 %v16072_v12  ;;  %v2345_v33 = vadd.f32 %v16039_v48, %v2005_v38  ;;  %v2347_v24 = vadd.f32 %v16040_v23, %v2007_v55  ;;  %v16074_v7 = vunpack.c.l.s8.bf16 %v16073_v2  ;;  %v2586_v60 = vmax.f32 %v2330_v1, 0.0  ;;  %4529 = vmatprep.mubr.bf16.mxu0 %v12501_v50 }
 0x2a7   : > { %v2588_v12 = vmax.f32 %v2332_v17, 0.0  ;;  %v2346_v56 = vadd.f32 %v16042_v59, %v2006_v62  ;;  %v2348_v43 = vadd.f32 %v16043_v14, %v2008_v36  ;;  %v16076_v38 = vunpack.c.l.s8.bf16 %v16075_v11  ;;  %5433 = vmatprep.mubr.bf16.mxu1 %v12501_v50 }
 0x2a8   : > { %4570 = vmatprep.subr.bf16.mxu0 %v16074_v7  ;;  %v2601_v55 = vmax.f32 %v2345_v33, 0.0  ;;  %v2603_v46 = vmax.f32 %v2347_v24, 0.0  ;;  %v16077_v7 = vunpack.c.l.s8.bf16 %v11993_v37  ;;  %v16078_v36 = vunpack.c.l.s8.bf16 %v11995_v52  ;;  %v16089_v24 = vld [vmem:[#allocation70_spill] sm:$0xff] }
 0x2a9   : > { %5474 = vmatprep.subr.bf16.mxu1 %v16076_v38  ;;  %v2602_v17 = vmax.f32 %v2346_v56, 0.0  ;;  %v2604_v62 = vmax.f32 %v2348_v43, 0.0  ;;  %v1336_v38 = vpop.f32.mrb[44].mxu1  ;;  %v2021_v45 = vmul.f32 %v11919_v63, %v1223_v4  ;;  %v1225_v43 = vpop.f32.mrb[45].mxu0  ;;  %v16081_v50 = vunpack.c.h.s8.bf16 %v16073_v2 }
 0x2aa   : > { %4571 = vmatpush1.bf16.msra.mxu0 %v16077_v7  ;;  %5475 = vmatpush1.bf16.msra.mxu1 %v16078_v36  ;;  %v12701_v30 = vpack.c.bf16 %v2601_v55, %v2585_v49  ;;  %v12703_v7 = vpack.c.bf16 %v2603_v46, %v2587_v44  ;;  %v2023_v56 = vmul.f32 %v16032_v57, %v1336_v38  ;;  %v1338_v1 = vpop.f32.mrb[45].mxu1  ;;  %v16084_v44 = vunpack.c.h.s8.bf16 %v16075_v11  ;;  %v1227_v55 = vpop.f32.mrb[46].mxu0 }
 0x2ab   : > { %4572 = vmatprep.subr.bf16.mxu0 %v16081_v50  ;;  %v12709_v36 = vpack.c.bf16 %v2602_v17, %v2586_v60  ;;  %v12711_v40 = vpack.c.bf16 %v2604_v62, %v2588_v12  ;;  %v2022_v33 = vmul.f32 %v16036_v47, %v1225_v43  ;;  %v2024_v49 = vmul.f32 %v16037_v31, %v1338_v1  ;;  %v1340_v4 = vpop.f32.mrb[46].mxu1  ;;  %v1229_v12 = vpop.f32.mrb[47].mxu0  ;;  %v12729_v43 = vld [vmem:[#allocation10 + $0x5c0] sm:$0xff] }
 0x2ac   : > { %16079 = vst [vmem:[#allocation63_spill] sm:$0xff] %v12701_v30  ;;  %16080 = vst [vmem:[#allocation66_spill] sm:$0xff] %v12703_v7  ;;  %5476 = vmatprep.subr.bf16.mxu1 %v16084_v44  ;;  %v2361_v46 = vadd.f32 %v16039_v48, %v2021_v45  ;;  %v2363_v38 = vadd.f32 %v16040_v23, %v2023_v56  ;;  %v2037_v2 = vmul.f32 %v11919_v63, %v1227_v55  ;;  %v1342_v17 = vpop.f32.mrb[47].mxu1  ;;  %v12731_v44 = vld [vmem:[#allocation10 + $0x5d0] sm:$0xff] }
 0x2ad   : > { %16082 = vst [vmem:[#allocation67_spill] sm:$0xff] %v12709_v36  ;;  %16083 = vst [vmem:[#allocation68_spill] sm:$0xff] %v12711_v40  ;;  %v2039_v50 = vmul.f32 %v16032_v57, %v1340_v4  ;;  %v16085_v60 = vunpack.c.h.s8.bf16 %v11993_v37  ;;  %v2362_v1 = vadd.f32 %v16042_v59, %v2022_v33  ;;  %v2364_v11 = vadd.f32 %v16043_v14, %v2024_v49  ;;  %v16087_v33 = vld [vmem:[#allocation69_spill] sm:$0xff]  ;;  %v1233_v40 = vpop.f32.mrb[48].mxu0 }
 0x2ae   : > { %v16086_v62 = vunpack.c.h.s8.bf16 %v11995_v52  ;;  %v2038_v45 = vmul.f32 %v16036_v47, %v1229_v12  ;;  %v2040_v56 = vmul.f32 %v16037_v31, %v1342_v17  ;;  %v2617_v55 = vmax.f32 %v2361_v46, 0.0  ;;  %4530 = vmatmul.mubr.bf16.gmra.mrb[152].mxu0 %v12493_v10  ;;  %5434 = vmatmul.mubr.bf16.gmra.mrb[152].mxu1 %v12493_v10 }
 0x2af   : > { %4573 = vmatpush1.bf16.msra.mxu0 %v16085_v60  ;;  %v2619_v37 = vmax.f32 %v2363_v38, 0.0  ;;  %v2377_v4 = vadd.f32 %v16039_v48, %v2037_v2  ;;  %v2379_v60 = vadd.f32 %v16040_v23, %v2039_v50  ;;  %v16088_v49 = vunpack.c.l.s8.bf16 %v16087_v33  ;;  %4539 = vmatprep.mubr.bf16.mxu0 %v12553_v3  ;;  %v16091_v50 = vld [vmem:[#allocation71_spill] sm:$0xff] }
 0x2b0   : > { %5477 = vmatpush1.bf16.msra.mxu1 %v16086_v62  ;;  %v2618_v52 = vmax.f32 %v2362_v1, 0.0  ;;  %v2620_v62 = vmax.f32 %v2364_v11, 0.0  ;;  %v2378_v12 = vadd.f32 %v16042_v59, %v2038_v45  ;;  %v2380_v17 = vadd.f32 %v16043_v14, %v2040_v56  ;;  %5443 = vmatprep.mubr.bf16.mxu1 %v12553_v3  ;;  %v16093_v56 = vld [vmem:[#allocation72_spill] sm:$0xff] }
 0x2b1   : > { %4574 = vmatprep.subr.bf16.mxu0 %v16088_v49  ;;  %v16090_v46 = vunpack.c.l.s8.bf16 %v16089_v24  ;;  %v2633_v38 = vmax.f32 %v2377_v4, 0.0  ;;  %v2635_v2 = vmax.f32 %v2379_v60, 0.0  ;;  %v16092_v7 = vunpack.c.l.s8.bf16 %v16091_v50  ;;  %v16107_v60 = vld [vmem:[#allocation74_spill] sm:$0xff] }
 0x2b2   : > { %v2634_v11 = vmax.f32 %v2378_v12, 0.0  ;;  %v2636_v45 = vmax.f32 %v2380_v17, 0.0  ;;  %v16094_v10 = vunpack.c.l.s8.bf16 %v16093_v56  ;;  %v2053_v49 = vmul.f32 %v11919_v63, %v1233_v40  ;;  %v1235_v17 = vpop.f32.mrb[49].mxu0 }
 0x2b3   : > { %5478 = vmatprep.subr.bf16.mxu1 %v16090_v46  ;;  %4575 = vmatpush1.bf16.msra.mxu0 %v16092_v7  ;;  %v1346_v46 = vpop.f32.mrb[48].mxu1  ;;  %v12753_v30 = vpack.c.bf16 %v2633_v38, %v2617_v55  ;;  %v12755_v7 = vpack.c.bf16 %v2635_v2, %v2619_v37  ;;  %v16097_v3 = vunpack.c.h.s8.bf16 %v16087_v33  ;;  %v2054_v4 = vmul.f32 %v16036_v47, %v1235_v17  ;;  %v1237_v38 = vpop.f32.mrb[50].mxu0 }
 0x2b4   : > { %5479 = vmatpush1.bf16.msra.mxu1 %v16094_v10  ;;  %v2055_v12 = vmul.f32 %v16032_v57, %v1346_v46  ;;  %v1348_v1 = vpop.f32.mrb[49].mxu1  ;;  %v12761_v10 = vpack.c.bf16 %v2634_v11, %v2618_v52  ;;  %v12763_v36 = vpack.c.bf16 %v2636_v45, %v2620_v62  ;;  %v16100_v37 = vunpack.c.h.s8.bf16 %v16089_v24  ;;  %v1239_v62 = vpop.f32.mrb[51].mxu0 }
 0x2b5   : > { %16095 = vst [vmem:[#allocation69_spill] sm:$0xff] %v12753_v30  ;;  %16096 = vst [vmem:[#allocation70_spill] sm:$0xff] %v12755_v7  ;;  %4576 = vmatprep.subr.bf16.mxu0 %v16097_v3  ;;  %v2056_v55 = vmul.f32 %v16037_v31, %v1348_v1  ;;  %v1350_v40 = vpop.f32.mrb[50].mxu1  ;;  %v2393_v2 = vadd.f32 %v16039_v48, %v2053_v49  ;;  %v2069_v33 = vmul.f32 %v11919_v63, %v1237_v38 }
 0x2b6   : > { %16098 = vst [vmem:[#allocation71_spill] sm:$0xff] %v12761_v10  ;;  %16099 = vst [vmem:[#allocation72_spill] sm:$0xff] %v12763_v36  ;;  %5480 = vmatprep.subr.bf16.mxu1 %v16100_v37  ;;  %v2395_v46 = vadd.f32 %v16040_v23, %v2055_v12  ;;  %v2071_v3 = vmul.f32 %v16032_v57, %v1350_v40  ;;  %v16101_v52 = vunpack.c.h.s8.bf16 %v16091_v50  ;;  %v1352_v11 = vpop.f32.mrb[51].mxu1  ;;  %v16102_v45 = vunpack.c.h.s8.bf16 %v16093_v56 }
 0x2b7   : > { %v2394_v1 = vadd.f32 %v16042_v59, %v2054_v4  ;;  %v2396_v24 = vadd.f32 %v16043_v14, %v2056_v55  ;;  %v2070_v49 = vmul.f32 %v16036_v47, %v1239_v62  ;;  %v2072_v12 = vmul.f32 %v16037_v31, %v1352_v11  ;;  %4540 = vmatmul.mubr.bf16.gmra.mrb[156].mxu0 %v12545_v41  ;;  %v12786_v4 = vld [vmem:[#allocation10 + $0x608] sm:$0xff]  ;;  %v12788_v55 = vld [vmem:[#allocation10 + $0x618] sm:$0xff] }
 0x2b8   : > { %4577 = vmatpush1.bf16.msra.mxu0 %v16101_v52  ;;  %5481 = vmatpush1.bf16.msra.mxu1 %v16102_v45  ;;  %v2649_v17 = vmax.f32 %v2393_v2, 0.0  ;;  %v2651_v37 = vmax.f32 %v2395_v46, 0.0  ;;  %v2409_v38 = vadd.f32 %v16039_v48, %v2069_v33  ;;  %v2411_v50 = vadd.f32 %v16040_v23, %v2071_v3  ;;  %v16105_v11 = vld [vmem:[#allocation73_spill] sm:$0xff] }
 0x2b9   : > { %v16103_v40 = vunpack.c.l.s8.bf16 %v12027_v54  ;;  %v2650_v56 = vmax.f32 %v2394_v1, 0.0  ;;  %v2652_v52 = vmax.f32 %v2396_v24, 0.0  ;;  %v2410_v62 = vadd.f32 %v16042_v59, %v2070_v49  ;;  %5444 = vmatmul.mubr.bf16.gmra.mrb[156].mxu1 %v12545_v41  ;;  %4582 = vmatprep.mubr.bf16.mxu0 %v12188_v42  ;;  %v1243_v41 = vpop.f32.mrb[52].mxu0 }
 0x2ba   : > { %v2412_v2 = vadd.f32 %v16043_v14, %v2072_v12  ;;  %v16104_v46 = vunpack.c.l.s8.bf16 %v12029_v19  ;;  %v2665_v33 = vmax.f32 %v2409_v38, 0.0  ;;  %v2667_v3 = vmax.f32 %v2411_v50, 0.0  ;;  %5486 = vmatprep.mubr.bf16.mxu1 %v12188_v42 }
 0x2bb   : > { %4578 = vmatprep.subr.bf16.mxu0 %v16103_v40  ;;  %v16106_v45 = vunpack.c.l.s8.bf16 %v16105_v11  ;;  %v2666_v24 = vmax.f32 %v2410_v62, 0.0  ;;  %v16108_v12 = vunpack.c.l.s8.bf16 %v16107_v60  ;;  %v2085_v40 = vmul.f32 %v11919_v63, %v1243_v41 }
 0x2bc   : > { %5482 = vmatprep.subr.bf16.mxu1 %v16104_v46  ;;  %v2668_v49 = vmax.f32 %v2412_v2, 0.0  ;;  %v1356_v46 = vpop.f32.mrb[52].mxu1  ;;  %v12807_v7 = vpack.c.bf16 %v2667_v3, %v2651_v37  ;;  %v1245_v2 = vpop.f32.mrb[53].mxu0  ;;  %v16114_v37 = vunpack.c.h.s8.bf16 %v12029_v19 }
 0x2bd   : > { %4579 = vmatpush1.bf16.msra.mxu0 %v16106_v45  ;;  %5483 = vmatpush1.bf16.msra.mxu1 %v16108_v12  ;;  %v12805_v45 = vpack.c.bf16 %v2665_v33, %v2649_v17  ;;  %v2087_v62 = vmul.f32 %v16032_v57, %v1356_v46  ;;  %v1358_v1 = vpop.f32.mrb[53].mxu1  ;;  %v16111_v12 = vunpack.c.h.s8.bf16 %v12027_v54  ;;  %v12813_v42 = vpack.c.bf16 %v2666_v24, %v2650_v56  ;;  %v1247_v33 = vpop.f32.mrb[54].mxu0 }
 0x2be   : > { %16110 = vst [vmem:[#allocation74_spill] sm:$0xff] %v12807_v7  ;;  %v12815_v36 = vpack.c.bf16 %v2668_v49, %v2652_v52  ;;  %v2086_v38 = vmul.f32 %v16036_v47, %v1245_v2  ;;  %v2088_v17 = vmul.f32 %v16037_v31, %v1358_v1  ;;  %5484 = vmatprep.subr.bf16.mxu1 %v16114_v37  ;;  %v1360_v41 = vpop.f32.mrb[54].mxu1  ;;  %v16115_v52 = vunpack.c.h.s8.bf16 %v16105_v11  ;;  %v1249_v24 = vpop.f32.mrb[55].mxu0  ;;  %v12835_v37 = vld [vmem:[#allocation10 + $0x610] sm:$0xff] }
 0x2bf   : > { %16109 = vst [vmem:[#allocation73_spill] sm:$0xff] %v12805_v45  ;;  %4580 = vmatprep.subr.bf16.mxu0 %v16111_v12  ;;  %16112 = vst [vmem:[#allocation110_spill] sm:$0xff] %v12813_v42  ;;  %v2425_v3 = vadd.f32 %v16039_v48, %v2085_v40  ;;  %v2427_v46 = vadd.f32 %v16040_v23, %v2087_v62  ;;  %v2101_v54 = vmul.f32 %v11919_v63, %v1247_v33  ;;  %v1362_v49 = vpop.f32.mrb[55].mxu1  ;;  %v12833_v12 = vld [vmem:[#allocation10 + $0x600] sm:$0xff] }
 0x2c0   : > { %16113 = vst [vmem:[#allocation111_spill] sm:$0xff] %v12815_v36  ;;  %v2103_v56 = vmul.f32 %v16032_v57, %v1360_v41  ;;  %v2426_v1 = vadd.f32 %v16042_v59, %v2086_v38  ;;  %v2428_v19 = vadd.f32 %v16043_v14, %v2088_v17  ;;  %v16116_v2 = vunpack.c.h.s8.bf16 %v16107_v60  ;;  %v16117_v38 = vld [vmem:[#allocation75_spill] sm:$0xff]  ;;  %v16119_v17 = vld [vmem:[#allocation76_spill] sm:$0xff] }
 0x2c1   : > { %4581 = vmatpush1.bf16.msra.mxu0 %v16115_v52  ;;  %v2102_v40 = vmul.f32 %v16036_v47, %v1249_v24  ;;  %v2104_v62 = vmul.f32 %v16037_v31, %v1362_v49  ;;  %v2681_v33 = vmax.f32 %v2425_v3, 0.0  ;;  %v2683_v11 = vmax.f32 %v2427_v46, 0.0 }
 0x2c2   : > { %5485 = vmatpush1.bf16.msra.mxu1 %v16116_v2  ;;  %v2441_v41 = vadd.f32 %v16039_v48, %v2101_v54  ;;  %v2443_v52 = vadd.f32 %v16040_v23, %v2103_v56  ;;  %v16118_v50 = vunpack.c.l.s8.bf16 %v16117_v38  ;;  %v16120_v60 = vunpack.c.l.s8.bf16 %v16119_v17  ;;  %v16125_v54 = vld [vmem:[#allocation78_spill] sm:$0xff] }
 0x2c3   : > { %v2682_v2 = vmax.f32 %v2426_v1, 0.0  ;;  %v2684_v24 = vmax.f32 %v2428_v19, 0.0  ;;  %v2442_v49 = vadd.f32 %v16042_v59, %v2102_v40  ;;  %v2444_v7 = vadd.f32 %v16043_v14, %v2104_v62  ;;  %v16121_v1 = vld [vmem:[#allocation77_spill] sm:$0xff]  ;;  %v1253_v40 = vpop.f32.mrb[56].mxu0  ;;  %v1366_v62 = vpop.f32.mrb[56].mxu1 }
 0x2c4   : > { %4663 = vmatprep.subr.bf16.mxu0 %v16118_v50  ;;  %5567 = vmatprep.subr.bf16.mxu1 %v16120_v60  ;;  %v2697_v3 = vmax.f32 %v2441_v41, 0.0  ;;  %v2699_v46 = vmax.f32 %v2443_v52, 0.0  ;;  %v16122_v19 = vunpack.c.l.s8.bf16 %v16121_v1  ;;  %v16126_v45 = vunpack.c.l.s8.bf16 %v16125_v54  ;;  %v1368_v50 = vpop.f32.mrb[57].mxu1  ;;  %v16133_v52 = vld [vmem:[#allocation79_spill] sm:$0xff] }
 0x2c5   : > { %4583 = vmatmul.mubr.bf16.vlgmr.msra.gmra.mrb[128].mxu0 %v12182_v61  ;;  %5487 = vmatmul.mubr.bf16.vlgmr.msra.gmra.mrb[128].mxu1 %v12182_v61  ;;  %v2698_v56 = vmax.f32 %v2442_v49, 0.0  ;;  %v2700_v60 = vmax.f32 %v2444_v7, 0.0  ;;  %v2117_v7 = vmul.f32 %v11919_v63, %v1253_v40  ;;  %v2119_v49 = vmul.f32 %v16032_v57, %v1366_v62 }
 0x2c6   : > { %4592 = vmatprep.mubr.bf16.mxu0 %v12245_v34  ;;  %4664 = vmatpush1.bf16.msra.mxu0 %v16122_v19  ;;  %v12855_v61 = vpack.c.bf16 %v2697_v3, %v2681_v33  ;;  %v12857_v36 = vpack.c.bf16 %v2699_v46, %v2683_v11  ;;  %v1255_v19 = vpop.f32.mrb[57].mxu0  ;;  %v2120_v33 = vmul.f32 %v16037_v31, %v1368_v50  ;;  %v16129_v11 = vunpack.c.h.s8.bf16 %v16117_v38  ;;  %v1370_v46 = vpop.f32.mrb[58].mxu1 }
 0x2c7   : > { %5496 = vmatprep.mubr.bf16.mxu1 %v12245_v34  ;;  %5568 = vmatpush1.bf16.msra.mxu1 %v16126_v45  ;;  %v12863_v34 = vpack.c.bf16 %v2698_v56, %v2682_v2  ;;  %v12865_v42 = vpack.c.bf16 %v2700_v60, %v2684_v24  ;;  %v2118_v41 = vmul.f32 %v16036_v47, %v1255_v19  ;;  %v1257_v3 = vpop.f32.mrb[58].mxu0  ;;  %v16130_v62 = vunpack.c.h.s8.bf16 %v16119_v17  ;;  %v1372_v60 = vpop.f32.mrb[59].mxu1 }
 0x2c8   : > { %16123 = vst [vmem:[#allocation75_spill] sm:$0xff] %v12855_v61  ;;  %16124 = vst [vmem:[#allocation76_spill] sm:$0xff] %v12857_v36  ;;  %4665 = vmatprep.subr.bf16.mxu0 %v16129_v11  ;;  %v2457_v45 = vadd.f32 %v16039_v48, %v2117_v7  ;;  %v2459_v40 = vadd.f32 %v16040_v23, %v2119_v49  ;;  %v2133_v2 = vmul.f32 %v11919_v63, %v1257_v3  ;;  %v1259_v56 = vpop.f32.mrb[59].mxu0  ;;  %v16143_v36 = vld [vmem:[#allocation82_spill] sm:$0xff] }
 0x2c9   : > { %16127 = vst [vmem:[#allocation77_spill] sm:$0xff] %v12863_v34  ;;  %16128 = vst [vmem:[#allocation78_spill] sm:$0xff] %v12865_v42  ;;  %5569 = vmatprep.subr.bf16.mxu1 %v16130_v62  ;;  %v2135_v24 = vmul.f32 %v16032_v57, %v1370_v46  ;;  %v2458_v50 = vadd.f32 %v16042_v59, %v2118_v41  ;;  %v2460_v38 = vadd.f32 %v16043_v14, %v2120_v33  ;;  %v12889_v33 = vld [vmem:[#allocation10 + $0x648] sm:$0xff]  ;;  %v1376_v34 = vpop.f32.mrb[60].mxu1 }
 0x2ca   : > { %v16131_v19 = vunpack.c.h.s8.bf16 %v16121_v1  ;;  %v2134_v7 = vmul.f32 %v16036_v47, %v1259_v56  ;;  %v2136_v49 = vmul.f32 %v16037_v31, %v1372_v60  ;;  %v2713_v11 = vmax.f32 %v2457_v45, 0.0  ;;  %v12891_v1 = vld [vmem:[#allocation10 + $0x658] sm:$0xff] }
 0x2cb   : > { %v2715_v17 = vmax.f32 %v2459_v40, 0.0  ;;  %v2473_v62 = vadd.f32 %v16039_v48, %v2133_v2  ;;  %v2475_v3 = vadd.f32 %v16040_v23, %v2135_v24  ;;  %v16132_v46 = vunpack.c.h.s8.bf16 %v16125_v54  ;;  %v16135_v40 = vld [vmem:[#allocation97_spill] sm:$0xff]  ;;  %v16136_v2 = vld [vmem:[#allocation80_spill] sm:$0xff] }
 0x2cc   : > { %4666 = vmatpush1.bf16.msra.mxu0 %v16131_v19  ;;  %v16134_v41 = vunpack.c.l.s8.bf16 %v16133_v52  ;;  %v2714_v19 = vmax.f32 %v2458_v50, 0.0  ;;  %v2716_v56 = vmax.f32 %v2460_v38, 0.0  ;;  %v2474_v60 = vadd.f32 %v16042_v59, %v2134_v7  ;;  %v16139_v7 = vld [vmem:[#allocation81_spill] sm:$0xff]  ;;  %v1378_v50 = vpop.f32.mrb[61].mxu1 }
 0x2cd   : > { %5570 = vmatpush1.bf16.msra.mxu1 %v16132_v46  ;;  %v2476_v45 = vadd.f32 %v16043_v14, %v2136_v49  ;;  %4593 = vmatmul.mubr.bf16.gmra.mrb[132].mxu0 %v16135_v40  ;;  %v16137_v24 = vunpack.c.l.s8.bf16 %v16136_v2  ;;  %v2729_v54 = vmax.f32 %v2473_v62, 0.0  ;;  %v2731_v46 = vmax.f32 %v2475_v3, 0.0  ;;  %v1263_v49 = vpop.f32.mrb[60].mxu0 }
 0x2ce   : > { %4667 = vmatprep.subr.bf16.mxu0 %v16134_v41  ;;  %5497 = vmatmul.mubr.bf16.gmra.mrb[132].mxu1 %v16135_v40  ;;  %v16138_v41 = vld [vmem:[#allocation31_spill] sm:$0xff]  ;;  %v2730_v38 = vmax.f32 %v2474_v60, 0.0  ;;  %v16140_v61 = vunpack.c.l.s8.bf16 %v16139_v7  ;;  %v16144_v30 = vunpack.c.l.s8.bf16 %v16143_v36  ;;  %v2149_v60 = vmul.f32 %v11919_v63, %v1263_v49 }
 0x2cf   : > { %5571 = vmatprep.subr.bf16.mxu1 %v16137_v24  ;;  %4602 = vmatprep.mubr.bf16.mxu0 %v16138_v41  ;;  %v2732_v42 = vmax.f32 %v2476_v45, 0.0  ;;  %v12907_v24 = vpack.c.bf16 %v2729_v54, %v2713_v11  ;;  %v12909_v40 = vpack.c.bf16 %v2731_v46, %v2715_v17  ;;  %v2151_v45 = vmul.f32 %v16032_v57, %v1376_v34  ;;  %v1380_v46 = vpop.f32.mrb[62].mxu1 }
 0x2d0   : > { %4668 = vmatpush1.bf16.msra.mxu0 %v16140_v61  ;;  %5506 = vmatprep.mubr.bf16.mxu1 %v16138_v41  ;;  %v1265_v61 = vpop.f32.mrb[61].mxu0  ;;  %v12915_v41 = vpack.c.bf16 %v2730_v38, %v2714_v19  ;;  %v2152_v11 = vmul.f32 %v16037_v31, %v1378_v50  ;;  %v16147_v17 = vunpack.c.h.s8.bf16 %v16133_v52  ;;  %v16148_v34 = vunpack.c.h.s8.bf16 %v16136_v2  ;;  %v1382_v38 = vpop.f32.mrb[63].mxu1  ;;  %v12937_v2 = vld [vmem:[#allocation10 + $0x650] sm:$0xff] }
 0x2d1   : > { %16141 = vst [vmem:[#allocation79_spill] sm:$0xff] %v12907_v24  ;;  %16142 = vst [vmem:[#allocation80_spill] sm:$0xff] %v12909_v40  ;;  %5572 = vmatpush1.bf16.msra.mxu1 %v16144_v30  ;;  %v12917_v10 = vpack.c.bf16 %v2732_v42, %v2716_v56  ;;  %v2150_v62 = vmul.f32 %v16036_v47, %v1265_v61  ;;  %v1267_v54 = vpop.f32.mrb[62].mxu0  ;;  %v2489_v30 = vadd.f32 %v16039_v48, %v2149_v60 }
 0x2d2   : > { %16145 = vst [vmem:[#allocation81_spill] sm:$0xff] %v12915_v41  ;;  %4669 = vmatprep.subr.bf16.mxu0 %v16147_v17  ;;  %v2491_v49 = vadd.f32 %v16040_v23, %v2151_v45  ;;  %5573 = vmatprep.subr.bf16.mxu1 %v16148_v34  ;;  %v2165_v19 = vmul.f32 %v11919_v63, %v1267_v54  ;;  %v1269_v56 = vpop.f32.mrb[63].mxu0  ;;  %v16149_v61 = vunpack.c.h.s8.bf16 %v16139_v7  ;;  %v12935_v17 = vld [vmem:[#allocation10 + $0x640] sm:$0xff]  ;;  %16151 = vst [vmem:[#allocation113_spill] sm:$0xff] %v12937_v2 }
 0x2d3   : > { %16146 = vst [vmem:[#allocation82_spill] sm:$0xff] %v12917_v10  ;;  %v2167_v42 = vmul.f32 %v16032_v57, %v1380_v46  ;;  %v2490_v50 = vadd.f32 %v16042_v59, %v2150_v62  ;;  %v2492_v52 = vadd.f32 %v16043_v14, %v2152_v11  ;;  %v2166_v60 = vmul.f32 %v16036_v47, %v1269_v56  ;;  %v16153_v11 = vld [vmem:[#allocation83_spill] sm:$0xff] }
 0x2d4   : > { %4670 = vmatpush1.bf16.msra.mxu0 %v16149_v61  ;;  %v2168_v45 = vmul.f32 %v16037_v31, %v1382_v38  ;;  %16150 = vst [vmem:[#allocation112_spill] sm:$0xff] %v12935_v17  ;;  %v2745_v63 = vmax.f32 %v2489_v30, 0.0  ;;  %v2747_v54 = vmax.f32 %v2491_v49, 0.0  ;;  %v2505_v57 = vadd.f32 %v16039_v48, %v2165_v19  ;;  %v16155_v38 = vld [vmem:[#allocation41_spill] sm:$0xff]  ;;  %v16156_v30 = vld [vmem:[#allocation84_spill] sm:$0xff]  ;;  %v1532_v61 = vpop.f32.mrb[64].mxu1 }
 0x2d5   : > { %v2507_v46 = vadd.f32 %v16040_v23, %v2167_v42  ;;  %v16152_v62 = vunpack.c.h.s8.bf16 %v16143_v36  ;;  %v16154_v7 = vunpack.c.l.s8.bf16 %v16153_v11  ;;  %v2746_v34 = vmax.f32 %v2490_v50, 0.0  ;;  %4603 = vmatmul.mubr.bf16.gmra.mrb[136].mxu0 %v16155_v38  ;;  %v1534_v23 = vpop.f32.mrb[65].mxu1 }
 0x2d6   : > { %v2748_v47 = vmax.f32 %v2492_v52, 0.0  ;;  %v2506_v31 = vadd.f32 %v16042_v59, %v2166_v60  ;;  %v2508_v56 = vadd.f32 %v16043_v14, %v2168_v45  ;;  %v16157_v49 = vunpack.c.l.s8.bf16 %v16156_v30  ;;  %5507 = vmatmul.mubr.bf16.gmra.mrb[136].mxu1 %v16155_v38  ;;  %4612 = vmatprep.mubr.bf16.mxu0 %v12349_v21  ;;  %v16158_v59 = vld [vmem:[#allocation85_spill] sm:$0xff]  ;;  %v1419_v14 = vpop.f32.mrb[64].mxu0  ;;  %v16168_v60 = vld [vmem:[#allocation91_spill] sm:$0xff] }
 0x2d7   : > { %5574 = vmatpush1.bf16.msra.mxu1 %v16152_v62  ;;  %4671 = vmatprep.subr.bf16.mxu0 %v16154_v7  ;;  %v2761_v48 = vmax.f32 %v2505_v57, 0.0  ;;  %v2763_v19 = vmax.f32 %v2507_v46, 0.0  ;;  %v16159_v52 = vunpack.c.l.s8.bf16 %v16158_v59  ;;  %v16162_v62 = vld [vmem:[#allocation86_spill] sm:$0xff]  ;;  %v16169_v45 = vld [vmem:[#allocation39_spill] sm:$0xff] }
 0x2d8   : > { %5575 = vmatprep.subr.bf16.mxu1 %v16157_v49  ;;  %v2762_v42 = vmax.f32 %v2506_v31, 0.0  ;;  %v2764_v50 = vmax.f32 %v2508_v56, 0.0  ;;  %5516 = vmatprep.mubr.bf16.mxu1 %v12349_v21  ;;  %v16163_v7 = vunpack.c.l.s8.bf16 %v16162_v62  ;;  %v16164_v31 = vld [vmem:[#allocation87_spill] sm:$0xff]  ;;  %v16165_v49 = vld [vmem:[#allocation89_spill] sm:$0xff] }
 0x2d9   : > { %4672 = vmatpush1.bf16.msra.mxu0 %v16159_v52  ;;  %v12959_v57 = vpack.c.bf16 %v2761_v48, %v2745_v63  ;;  %v12961_v46 = vpack.c.bf16 %v2763_v19, %v2747_v54  ;;  %v1929_v56 = vmul.f32 %v16164_v31, %v1419_v14  ;;  %v1931_v36 = vmul.f32 %v16165_v49, %v1532_v61  ;;  %v1421_v52 = vpop.f32.mrb[65].mxu0  ;;  %v1536_v19 = vpop.f32.mrb[66].mxu1  ;;  %v16172_v14 = vld [vmem:[#allocation90_spill] sm:$0xff] }
 0x2da   : > { %v12967_v3 = vpack.c.bf16 %v2762_v42, %v2746_v34  ;;  %v12969_v21 = vpack.c.bf16 %v2764_v50, %v2748_v47  ;;  %v1930_v38 = vmul.f32 %v16168_v60, %v1421_v52  ;;  %v1932_v63 = vmul.f32 %v16169_v45, %v1534_v23  ;;  %v1423_v48 = vpop.f32.mrb[66].mxu0  ;;  %v1538_v50 = vpop.f32.mrb[67].mxu1  ;;  %v16174_v52 = vld [vmem:[#allocation28_spill] sm:$0xff] }
 0x2db   : > { %16160 = vst [vmem:[#allocation83_spill] sm:$0xff] %v12959_v57  ;;  %16161 = vst [vmem:[#allocation84_spill] sm:$0xff] %v12961_v46  ;;  %5576 = vmatpush1.bf16.msra.mxu1 %v16163_v7  ;;  %v16170_v54 = vunpack.c.h.s8.bf16 %v16153_v11  ;;  %v16171_v7 = vld [vmem:[#allocation88_spill] sm:$0xff]  ;;  %v2271_v40 = vadd.f32 %v16172_v14, %v1931_v36  ;;  %v16173_v61 = vunpack.c.h.s8.bf16 %v16156_v30  ;;  %v1945_v34 = vmul.f32 %v16164_v31, %v1423_v48  ;;  %v1425_v42 = vpop.f32.mrb[67].mxu0  ;;  %v1542_v41 = vpop.f32.mrb[68].mxu1 }
 0x2dc   : > { %16166 = vst [vmem:[#allocation85_spill] sm:$0xff] %v12967_v3  ;;  %16167 = vst [vmem:[#allocation86_spill] sm:$0xff] %v12969_v21  ;;  %v2269_v46 = vadd.f32 %v16171_v7, %v1929_v56  ;;  %v1947_v47 = vmul.f32 %v16165_v49, %v1536_v19  ;;  %v2270_v23 = vadd.f32 %v16174_v52, %v1930_v38  ;;  %v16175_v21 = vld [vmem:[#allocation29_spill] sm:$0xff]  ;;  %v16177_v19 = vunpack.c.h.s8.bf16 %v16162_v62  ;;  %v16187_v57 = vld [vmem:[#allocation100_spill] sm:$0xff] }
 0x2dd   : > { %4673 = vmatprep.subr.bf16.mxu0 %v16170_v54  ;;  %5577 = vmatprep.subr.bf16.mxu1 %v16173_v61  ;;  %v2272_v11 = vadd.f32 %v16175_v21, %v1932_v63  ;;  %v16176_v54 = vunpack.c.h.s8.bf16 %v16158_v59  ;;  %v1946_v56 = vmul.f32 %v16168_v60, %v1425_v42  ;;  %v1948_v36 = vmul.f32 %v16169_v45, %v1538_v50  ;;  %v12993_v63 = vld [vmem:[#allocation10 + $0x688] sm:$0xff]  ;;  %v12995_v59 = vld [vmem:[#allocation10 + $0x698] sm:$0xff] }
 0x2de   : > { %v2525_v10 = vmax.f32 %v2269_v46, 0.0  ;;  %v2527_v30 = vmax.f32 %v2271_v40, 0.0  ;;  %v2285_v61 = vadd.f32 %v16171_v7, %v1945_v34  ;;  %v2287_v48 = vadd.f32 %v16172_v14, %v1947_v47  ;;  %v16179_v46 = vld [vmem:[#allocation44_spill] sm:$0xff]  ;;  %v16180_v34 = vld [vmem:[#allocation30_spill] sm:$0xff] }
 0x2df   : > { %4674 = vmatpush1.bf16.msra.mxu0 %v16176_v54  ;;  %5578 = vmatpush1.bf16.msra.mxu1 %v16177_v19  ;;  %v16178_v38 = vunpack.c.l.s8.bf16 %v12267_v35  ;;  %v2526_v54 = vmax.f32 %v2270_v23, 0.0  ;;  %v2528_v42 = vmax.f32 %v2272_v11, 0.0  ;;  %v2286_v50 = vadd.f32 %v16174_v52, %v1946_v56  ;;  %v16183_v56 = vld [vmem:[#allocation43_spill] sm:$0xff]  ;;  %v1544_v23 = vpop.f32.mrb[69].mxu1 }
 0x2e0   : > { %v2288_v40 = vadd.f32 %v16175_v21, %v1948_v36  ;;  %4613 = vmatmul.mubr.bf16.gmra.mrb[140].mxu0 %v16179_v46  ;;  %v16181_v47 = vunpack.c.l.s8.bf16 %v16180_v34  ;;  %v2541_v62 = vmax.f32 %v2285_v61, 0.0  ;;  %v2543_v19 = vmax.f32 %v2287_v48, 0.0  ;;  %5517 = vmatmul.mubr.bf16.gmra.mrb[140].mxu1 %v16179_v46  ;;  %v1429_v36 = vpop.f32.mrb[68].mxu0 }
 0x2e1   : > { %4675 = vmatprep.subr.bf16.mxu0 %v16178_v38  ;;  %v16182_v38 = vld [vmem:[#allocation102_spill] sm:$0xff]  ;;  %v2542_v11 = vmax.f32 %v2286_v50, 0.0  ;;  %v16184_v24 = vunpack.c.l.s8.bf16 %v16183_v56  ;;  %v16188_v17 = vunpack.c.l.s8.bf16 %v16187_v57  ;;  %v1961_v50 = vmul.f32 %v16164_v31, %v1429_v36 }
 0x2e2   : > { %5579 = vmatprep.subr.bf16.mxu1 %v16181_v47  ;;  %4622 = vmatprep.mubr.bf16.mxu0 %v16182_v38  ;;  %v2544_v3 = vmax.f32 %v2288_v40, 0.0  ;;  %v13011_v47 = vpack.c.bf16 %v2541_v62, %v2525_v10  ;;  %v13013_v46 = vpack.c.bf16 %v2543_v19, %v2527_v30  ;;  %v1963_v40 = vmul.f32 %v16165_v49, %v1542_v41  ;;  %v1546_v19 = vpop.f32.mrb[70].mxu1 }
 0x2e3   : > { %4676 = vmatpush1.bf16.msra.mxu0 %v16184_v24  ;;  %5526 = vmatprep.mubr.bf16.mxu1 %v16182_v38  ;;  %v1431_v24 = vpop.f32.mrb[69].mxu0  ;;  %v13019_v38 = vpack.c.bf16 %v2542_v11, %v2526_v54  ;;  %v1964_v10 = vmul.f32 %v16169_v45, %v1544_v23  ;;  %v16191_v30 = vunpack.c.h.s8.bf16 %v12267_v35  ;;  %v16192_v41 = vunpack.c.h.s8.bf16 %v16180_v34  ;;  %v1548_v11 = vpop.f32.mrb[71].mxu1  ;;  %v13041_v34 = vld [vmem:[#allocation10 + $0x690] sm:$0xff] }
 0x2e4   : > { %16185 = vst [vmem:[#allocation87_spill] sm:$0xff] %v13011_v47  ;;  %16186 = vst [vmem:[#allocation89_spill] sm:$0xff] %v13013_v46  ;;  %5580 = vmatpush1.bf16.msra.mxu1 %v16188_v17  ;;  %v13021_v2 = vpack.c.bf16 %v2544_v3, %v2528_v42  ;;  %v1962_v61 = vmul.f32 %v16168_v60, %v1431_v24  ;;  %v1433_v62 = vpop.f32.mrb[70].mxu0  ;;  %v2301_v17 = vadd.f32 %v16171_v7, %v1961_v50  ;;  %v16196_v46 = vld [vmem:[#allocation46_spill] sm:$0xff] }
 0x2e5   : > { %16189 = vst [vmem:[#allocation91_spill] sm:$0xff] %v13019_v38  ;;  %4677 = vmatprep.subr.bf16.mxu0 %v16191_v30  ;;  %v2303_v36 = vadd.f32 %v16172_v14, %v1963_v40  ;;  %5581 = vmatprep.subr.bf16.mxu1 %v16192_v41  ;;  %v1977_v54 = vmul.f32 %v16164_v31, %v1433_v62  ;;  %v1435_v42 = vpop.f32.mrb[71].mxu0  ;;  %v16193_v24 = vunpack.c.h.s8.bf16 %v16183_v56  ;;  %v13039_v30 = vld [vmem:[#allocation10 + $0x680] sm:$0xff]  ;;  %v16195_v56 = vunpack.c.l.s8.bf16 %v12371_v5 }
 0x2e6   : > { %16190 = vst [vmem:[#allocation39_spill] sm:$0xff] %v13021_v2  ;;  %v1979_v3 = vmul.f32 %v16165_v49, %v1546_v19  ;;  %v2302_v23 = vadd.f32 %v16174_v52, %v1962_v61  ;;  %v2304_v35 = vadd.f32 %v16175_v21, %v1964_v10  ;;  %v1978_v50 = vmul.f32 %v16168_v60, %v1435_v42 }
 0x2e7   : > { %4678 = vmatpush1.bf16.msra.mxu0 %v16193_v24  ;;  %v1980_v40 = vmul.f32 %v16169_v45, %v1548_v11  ;;  %v2557_v62 = vmax.f32 %v2301_v17, 0.0  ;;  %v2559_v41 = vmax.f32 %v2303_v36, 0.0  ;;  %v2317_v19 = vadd.f32 %v16171_v7, %v1977_v54 }
 0x2e8   : > { %v2319_v48 = vadd.f32 %v16172_v14, %v1979_v3  ;;  %v16194_v61 = vunpack.c.h.s8.bf16 %v16187_v57  ;;  %4679 = vmatprep.subr.bf16.mxu0 %v16195_v56  ;;  %v2558_v10 = vmax.f32 %v2302_v23, 0.0  ;;  %v2560_v42 = vmax.f32 %v2304_v35, 0.0  ;;  %4623 = vmatmul.mubr.bf16.gmra.mrb[144].mxu0 %v16196_v46  ;;  %v13061_v56 = vld [vmem:[#allocation7 + $0x8] sm:$0xff] }
 0x2e9   : > { %v2318_v11 = vadd.f32 %v16174_v52, %v1978_v50  ;;  %v2320_v24 = vadd.f32 %v16175_v21, %v1980_v40  ;;  %v16197_v17 = vunpack.c.l.s8.bf16 %v12373_v51  ;;  %v2573_v36 = vmax.f32 %v2317_v19, 0.0  ;;  %5527 = vmatmul.mubr.bf16.gmra.mrb[144].mxu1 %v16196_v46  ;;  %4632 = vmatprep.mubr.bf16.mxu0 %v12453_v22  ;;  %v1439_v40 = vpop.f32.mrb[72].mxu0 }
 0x2ea   : > { %5582 = vmatpush1.bf16.msra.mxu1 %v16194_v61  ;;  %v2575_v54 = vmax.f32 %v2319_v48, 0.0  ;;  %v16198_v50 = vunpack.c.l.s8.bf16 %v12419_v53  ;;  %5536 = vmatprep.mubr.bf16.mxu1 %v12453_v22  ;;  %v1552_v61 = vpop.f32.mrb[72].mxu1  ;;  %v16199_v48 = vld [vmem:[#allocation52_spill] sm:$0xff]  ;;  %v1993_v22 = vmul.f32 %v16164_v31, %v1439_v40  ;;  %v1441_v2 = vpop.f32.mrb[73].mxu0 }
 0x2eb   : > { %5583 = vmatprep.subr.bf16.mxu1 %v16197_v17  ;;  %v2574_v23 = vmax.f32 %v2318_v11, 0.0  ;;  %v2576_v35 = vmax.f32 %v2320_v24, 0.0  ;;  %v13065_v19 = vrot.slane %v13061_v56, %v16199_v48  ;;  %v13067_v17 = vld [vmem:[#allocation8 + $0x8] sm:$0xff]  ;;  %v13073_v11 = vpack.c.bf16 %v2573_v36, %v2557_v62  ;;  %v1554_v47 = vpop.f32.mrb[73].mxu1  ;;  %v1443_v36 = vpop.f32.mrb[74].mxu0 }
 0x2ec   : > { %4680 = vmatpush1.bf16.msra.mxu0 %v16198_v50  ;;  %v13071_v3 = vrot.slane %v13067_v17, %v16199_v48  ;;  %v13075_v24 = vpack.c.bf16 %v2575_v54, %v2559_v41  ;;  %v16203_v50 = vld [vmem:[#allocation103_spill] sm:$0xff]  ;;  %v1995_v46 = vmul.f32 %v16165_v49, %v1552_v61  ;;  %v1994_v48 = vmul.f32 %v16168_v60, %v1441_v2  ;;  %v1556_v54 = vpop.f32.mrb[74].mxu1 }
 0x2ed   : > { %16200 = vst [vmem:[#allocation88_spill] sm:$0xff] %v13065_v19  ;;  %16201 = vst [vmem:[#allocation90_spill] sm:$0xff] %v13073_v11  ;;  %v16204_v57 = vunpack.c.l.s8.bf16 %v16203_v50  ;;  %v13081_v38 = vpack.c.bf16 %v2574_v23, %v2558_v10  ;;  %v13083_v19 = vpack.c.bf16 %v2576_v35, %v2560_v42  ;;  %v1996_v62 = vmul.f32 %v16169_v45, %v1554_v47  ;;  %v1445_v23 = vpop.f32.mrb[75].mxu0  ;;  %v1558_v2 = vpop.f32.mrb[75].mxu1 }
 0x2ee   : > { %16202 = vst [vmem:[#allocation28_spill] sm:$0xff] %v13075_v24  ;;  %v16207_v41 = vunpack.c.h.s8.bf16 %v12371_v5  ;;  %v2335_v40 = vadd.f32 %v16172_v14, %v1995_v46  ;;  %v16208_v61 = vunpack.c.h.s8.bf16 %v12373_v51  ;;  %v2009_v10 = vmul.f32 %v16164_v31, %v1443_v36 }
 0x2ef   : > { %5584 = vmatpush1.bf16.msra.mxu1 %v16204_v57  ;;  %16205 = vst [vmem:[#allocation29_spill] sm:$0xff] %v13081_v38  ;;  %16206 = vst [vmem:[#allocation30_spill] sm:$0xff] %v13083_v19  ;;  %v2333_v57 = vadd.f32 %v16171_v7, %v1993_v22  ;;  %v2011_v42 = vmul.f32 %v16165_v49, %v1556_v54  ;;  %v2334_v47 = vadd.f32 %v16174_v52, %v1994_v48 }
 0x2f0   : > { %4681 = vmatprep.subr.bf16.mxu0 %v16207_v41  ;;  %5585 = vmatprep.subr.bf16.mxu1 %v16208_v61  ;;  %v2336_v5 = vadd.f32 %v16175_v21, %v1996_v62  ;;  %v16209_v35 = vunpack.c.h.s8.bf16 %v12419_v53  ;;  %v2010_v22 = vmul.f32 %v16168_v60, %v1445_v23  ;;  %v2012_v46 = vmul.f32 %v16169_v45, %v1558_v2 }
 0x2f1   : > { %v2589_v41 = vmax.f32 %v2333_v57, 0.0  ;;  %v2591_v51 = vmax.f32 %v2335_v40, 0.0  ;;  %v2349_v61 = vadd.f32 %v16171_v7, %v2009_v10  ;;  %v2351_v36 = vadd.f32 %v16172_v14, %v2011_v42 }
 0x2f2   : > { %4682 = vmatpush1.bf16.msra.mxu0 %v16209_v35  ;;  %v16210_v54 = vunpack.c.h.s8.bf16 %v16203_v50  ;;  %v16211_v48 = vunpack.c.l.s8.bf16 %v12474_v13  ;;  %v2590_v62 = vmax.f32 %v2334_v47, 0.0  ;;  %v2592_v24 = vmax.f32 %v2336_v5, 0.0  ;;  %v16212_v35 = vld [vmem:[#allocation48_spill] sm:$0xff]  ;;  %v16214_v50 = vld [vmem:[#allocation54_spill] sm:$0xff] }
 0x2f3   : > { %v2350_v53 = vadd.f32 %v16174_v52, %v2010_v22  ;;  %v2352_v23 = vadd.f32 %v16175_v21, %v2012_v46  ;;  %4633 = vmatmul.mubr.bf16.gmra.mrb[148].mxu0 %v16212_v35  ;;  %v16213_v57 = vunpack.c.l.s8.bf16 %v12476_v18  ;;  %v2605_v40 = vmax.f32 %v2349_v61, 0.0  ;;  %5537 = vmatmul.mubr.bf16.gmra.mrb[148].mxu1 %v16212_v35  ;;  %v1449_v46 = vpop.f32.mrb[76].mxu0  ;;  %v1562_v61 = vpop.f32.mrb[76].mxu1 }
 0x2f4   : > { %5586 = vmatpush1.bf16.msra.mxu1 %v16210_v54  ;;  %4683 = vmatprep.subr.bf16.mxu0 %v16211_v48  ;;  %v2607_v10 = vmax.f32 %v2351_v36, 0.0  ;;  %v13116_v42 = vrot.slane %v13061_v56, %v16214_v50  ;;  %v13120_v2 = vrot.slane %v13067_v17, %v16214_v50  ;;  %v16215_v22 = vunpack.c.l.s8.bf16 %v12521_v15  ;;  %v16216_v36 = vld [vmem:[#allocation53_spill] sm:$0xff]  ;;  %v1564_v35 = vpop.f32.mrb[77].mxu1 }
 0x2f5   : > { %5587 = vmatprep.subr.bf16.mxu1 %v16213_v57  ;;  %4642 = vmatprep.mubr.bf16.mxu0 %v12503_v58  ;;  %v2606_v47 = vmax.f32 %v2350_v53, 0.0  ;;  %v2608_v5 = vmax.f32 %v2352_v23, 0.0  ;;  %v13127_v54 = vrot.slane %v13061_v56, %v16216_v36  ;;  %v13131_v48 = vrot.slane %v13067_v17, %v16216_v36 }
 0x2f6   : > { %4684 = vmatpush1.bf16.msra.mxu0 %v16215_v22  ;;  %5546 = vmatprep.mubr.bf16.mxu1 %v12503_v58  ;;  %v13133_v57 = vpack.c.bf16 %v2605_v40, %v2589_v41  ;;  %v13135_v50 = vpack.c.bf16 %v2607_v10, %v2591_v51  ;;  %v16219_v53 = vunpack.c.l.s8.bf16 %v12523_v6  ;;  %v2025_v23 = vmul.f32 %v16164_v31, %v1449_v46  ;;  %v1451_v58 = vpop.f32.mrb[77].mxu0  ;;  %v1566_v10 = vpop.f32.mrb[78].mxu1 }
 0x2f7   : > { %v2027_v22 = vmul.f32 %v16165_v49, %v1562_v61  ;;  %v13141_v19 = vpack.c.bf16 %v2606_v47, %v2590_v62  ;;  %v13143_v11 = vpack.c.bf16 %v2608_v5, %v2592_v24  ;;  %v2026_v36 = vmul.f32 %v16168_v60, %v1451_v58  ;;  %v1453_v40 = vpop.f32.mrb[78].mxu0  ;;  %v1568_v58 = vpop.f32.mrb[79].mxu1 }
 0x2f8   : > { %16217 = vst [vmem:[#allocation43_spill] sm:$0xff] %v13133_v57  ;;  %16218 = vst [vmem:[#allocation100_spill] sm:$0xff] %v13135_v50  ;;  %5588 = vmatpush1.bf16.msra.mxu1 %v16219_v53  ;;  %v2028_v41 = vmul.f32 %v16169_v45, %v1564_v35  ;;  %v16222_v51 = vunpack.c.h.s8.bf16 %v12474_v13  ;;  %v2365_v53 = vadd.f32 %v16171_v7, %v2025_v23  ;;  %v16223_v61 = vunpack.c.h.s8.bf16 %v12476_v18  ;;  %v1455_v47 = vpop.f32.mrb[79].mxu0 }
 0x2f9   : > { %16220 = vst [vmem:[#allocation103_spill] sm:$0xff] %v13141_v19  ;;  %16221 = vst [vmem:[#allocation114_spill] sm:$0xff] %v13143_v11  ;;  %v2367_v46 = vadd.f32 %v16172_v14, %v2027_v22  ;;  %v2041_v62 = vmul.f32 %v16164_v31, %v1453_v40  ;;  %v2043_v24 = vmul.f32 %v16165_v49, %v1566_v10  ;;  %v16224_v5 = vunpack.c.h.s8.bf16 %v12521_v15 }
 0x2fa   : > { %4685 = vmatprep.subr.bf16.mxu0 %v16222_v51  ;;  %5589 = vmatprep.subr.bf16.mxu1 %v16223_v61  ;;  %v2366_v35 = vadd.f32 %v16174_v52, %v2026_v36  ;;  %v2368_v13 = vadd.f32 %v16175_v21, %v2028_v41  ;;  %v2042_v23 = vmul.f32 %v16168_v60, %v1455_v47  ;;  %v2621_v51 = vmax.f32 %v2365_v53, 0.0 }
 0x2fb   : > { %4686 = vmatpush1.bf16.msra.mxu0 %v16224_v5  ;;  %v2044_v22 = vmul.f32 %v16169_v45, %v1568_v58  ;;  %v2623_v18 = vmax.f32 %v2367_v46, 0.0  ;;  %v2381_v61 = vadd.f32 %v16171_v7, %v2041_v62  ;;  %v2383_v40 = vadd.f32 %v16172_v14, %v2043_v24  ;;  %5547 = vmatmul.mubr.bf16.gmra.mrb[152].mxu1 %v12495_v20 }
 0x2fc   : > { %v16225_v10 = vunpack.c.h.s8.bf16 %v12523_v6  ;;  %v16226_v36 = vunpack.c.l.s8.bf16 %v12578_v0  ;;  %v2622_v41 = vmax.f32 %v2366_v35, 0.0  ;;  %v2624_v50 = vmax.f32 %v2368_v13, 0.0  ;;  %4643 = vmatmul.mubr.bf16.gmra.mrb[152].mxu0 %v12495_v20  ;;  %v16228_v6 = vld [vmem:[#allocation55_spill] sm:$0xff]  ;;  %5556 = vmatprep.mubr.bf16.mxu1 %v12555_v9 }
 0x2fd   : > { %v2382_v15 = vadd.f32 %v16174_v52, %v2042_v23  ;;  %v2384_v47 = vadd.f32 %v16175_v21, %v2044_v22  ;;  %v16227_v53 = vunpack.c.l.s8.bf16 %v12580_v8  ;;  %v2637_v46 = vmax.f32 %v2381_v61, 0.0  ;;  %4652 = vmatprep.mubr.bf16.mxu0 %v12555_v9  ;;  %v1459_v23 = vpop.f32.mrb[80].mxu0  ;;  %v1572_v22 = vpop.f32.mrb[80].mxu1 }
 0x2fe   : > { %5590 = vmatpush1.bf16.msra.mxu1 %v16225_v10  ;;  %4687 = vmatprep.subr.bf16.mxu0 %v16226_v36  ;;  %v2639_v62 = vmax.f32 %v2383_v40, 0.0  ;;  %v13176_v24 = vrot.slane %v13061_v56, %v16228_v6  ;;  %v13180_v58 = vrot.slane %v13067_v17, %v16228_v6  ;;  %v16229_v5 = vunpack.c.l.s8.bf16 %v12625_v16 }
 0x2ff   : > { %5591 = vmatprep.subr.bf16.mxu1 %v16227_v53  ;;  %v2638_v35 = vmax.f32 %v2382_v15, 0.0  ;;  %v2640_v13 = vmax.f32 %v2384_v47, 0.0  ;;  %v13187_v10 = vpack.c.bf16 %v2637_v46, %v2621_v51  ;;  %v16232_v17 = vunpack.c.l.s8.bf16 %v12627_v29  ;;  %v1461_v47 = vpop.f32.mrb[81].mxu0  ;;  %v1574_v53 = vpop.f32.mrb[81].mxu1 }
 0x300   : > { %4688 = vmatpush1.bf16.msra.mxu0 %v16229_v5  ;;  %v13189_v56 = vpack.c.bf16 %v2639_v62, %v2623_v18  ;;  %v2057_v36 = vmul.f32 %v16164_v31, %v1459_v23  ;;  %v2059_v15 = vmul.f32 %v16165_v49, %v1572_v22  ;;  %v2058_v61 = vmul.f32 %v16168_v60, %v1461_v47  ;;  %v1463_v46 = vpop.f32.mrb[82].mxu0  ;;  %v1576_v62 = vpop.f32.mrb[82].mxu1 }
 0x301   : > { %16230 = vst [vmem:[#allocation115_spill] sm:$0xff] %v13187_v10  ;;  %v13195_v5 = vpack.c.bf16 %v2638_v35, %v2622_v41  ;;  %v13197_v6 = vpack.c.bf16 %v2640_v13, %v2624_v50  ;;  %v2060_v51 = vmul.f32 %v16169_v45, %v1574_v53  ;;  %v16235_v18 = vunpack.c.h.s8.bf16 %v12578_v0  ;;  %v1465_v35 = vpop.f32.mrb[83].mxu0  ;;  %v1578_v13 = vpop.f32.mrb[83].mxu1 }
 0x302   : > { %16231 = vst [vmem:[#allocation116_spill] sm:$0xff] %v13189_v56  ;;  %5592 = vmatpush1.bf16.msra.mxu1 %v16232_v17  ;;  %v2397_v17 = vadd.f32 %v16171_v7, %v2057_v36  ;;  %v2399_v23 = vadd.f32 %v16172_v14, %v2059_v15  ;;  %v16236_v22 = vunpack.c.h.s8.bf16 %v12580_v8  ;;  %v2073_v41 = vmul.f32 %v16164_v31, %v1463_v46 }
 0x303   : > { %16233 = vst [vmem:[#allocation117_spill] sm:$0xff] %v13195_v5  ;;  %16234 = vst [vmem:[#allocation118_spill] sm:$0xff] %v13197_v6  ;;  %4689 = vmatprep.subr.bf16.mxu0 %v16235_v18  ;;  %v2075_v50 = vmul.f32 %v16165_v49, %v1576_v62  ;;  %v2398_v47 = vadd.f32 %v16174_v52, %v2058_v61  ;;  %v2400_v0 = vadd.f32 %v16175_v21, %v2060_v51  ;;  %v13221_v51 = vld [vmem:[#allocation10 + $0x6c8] sm:$0xff] }
 0x304   : > { %5593 = vmatprep.subr.bf16.mxu1 %v16236_v22  ;;  %v16237_v53 = vunpack.c.h.s8.bf16 %v12625_v16  ;;  %v2074_v36 = vmul.f32 %v16168_v60, %v1465_v35  ;;  %v2076_v15 = vmul.f32 %v16169_v45, %v1578_v13  ;;  %v2653_v18 = vmax.f32 %v2397_v17, 0.0  ;;  %v13223_v16 = vld [vmem:[#allocation10 + $0x6d8] sm:$0xff]  ;;  %4653 = vmatmul.mubr.bf16.gmra.mrb[156].mxu0 %v12547_v32 }
 0x305   : > { %v2655_v8 = vmax.f32 %v2399_v23, 0.0  ;;  %v2413_v22 = vadd.f32 %v16171_v7, %v2073_v41  ;;  %v2415_v46 = vadd.f32 %v16172_v14, %v2075_v50  ;;  %v16238_v62 = vunpack.c.h.s8.bf16 %v12627_v29  ;;  %5557 = vmatmul.mubr.bf16.gmra.mrb[156].mxu1 %v12547_v32  ;;  %4695 = vmatprep.mubr.bf16.mxu0 %v12605_v27 }
 0x306   : > { %4690 = vmatpush1.bf16.msra.mxu0 %v16237_v53  ;;  %v16239_v61 = vunpack.c.l.s8.bf16 %v12682_v28  ;;  %v2654_v53 = vmax.f32 %v2398_v47, 0.0  ;;  %v2656_v35 = vmax.f32 %v2400_v0, 0.0  ;;  %v2414_v13 = vadd.f32 %v16174_v52, %v2074_v36  ;;  %5599 = vmatprep.mubr.bf16.mxu1 %v12605_v27 }
 0x307   : > { %5594 = vmatpush1.bf16.msra.mxu1 %v16238_v62  ;;  %v2416_v17 = vadd.f32 %v16175_v21, %v2076_v15  ;;  %v16240_v23 = vunpack.c.l.s8.bf16 %v12684_v25  ;;  %v2669_v29 = vmax.f32 %v2413_v22, 0.0  ;;  %v2671_v41 = vmax.f32 %v2415_v46, 0.0  ;;  %v1469_v15 = vpop.f32.mrb[84].mxu0 }
 0x308   : > { %4691 = vmatprep.subr.bf16.mxu0 %v16239_v61  ;;  %v2670_v0 = vmax.f32 %v2414_v13, 0.0  ;;  %v16241_v36 = vunpack.c.l.s8.bf16 %v12729_v43  ;;  %v1582_v61 = vpop.f32.mrb[84].mxu1  ;;  %v16244_v50 = vunpack.c.l.s8.bf16 %v12731_v44  ;;  %v2089_v13 = vmul.f32 %v16164_v31, %v1469_v15 }
 0x309   : > { %5595 = vmatprep.subr.bf16.mxu1 %v16240_v23  ;;  %v2672_v62 = vmax.f32 %v2416_v17, 0.0  ;;  %v13239_v23 = vpack.c.bf16 %v2669_v29, %v2653_v18  ;;  %v13241_v40 = vpack.c.bf16 %v2671_v41, %v2655_v8  ;;  %v2091_v17 = vmul.f32 %v16165_v49, %v1582_v61  ;;  %v1584_v47 = vpop.f32.mrb[85].mxu1 }
 0x30a   : > { %4692 = vmatpush1.bf16.msra.mxu0 %v16241_v36  ;;  %v1471_v36 = vpop.f32.mrb[85].mxu0  ;;  %v13247_v27 = vpack.c.bf16 %v2670_v0, %v2654_v53  ;;  %v2092_v18 = vmul.f32 %v16169_v45, %v1584_v47  ;;  %v16247_v8 = vunpack.c.h.s8.bf16 %v12682_v28  ;;  %v1586_v41 = vpop.f32.mrb[86].mxu1  ;;  %v16248_v61 = vunpack.c.h.s8.bf16 %v12684_v25  ;;  %v13269_v25 = vld [vmem:[#allocation10 + $0x6d0] sm:$0xff] }
 0x30b   : > { %16242 = vst [vmem:[#allocation119_spill] sm:$0xff] %v13239_v23  ;;  %16243 = vst [vmem:[#allocation120_spill] sm:$0xff] %v13241_v40  ;;  %5596 = vmatpush1.bf16.msra.mxu1 %v16244_v50  ;;  %v13249_v32 = vpack.c.bf16 %v2672_v62, %v2656_v35  ;;  %v2090_v22 = vmul.f32 %v16168_v60, %v1471_v36  ;;  %v1473_v29 = vpop.f32.mrb[86].mxu0  ;;  %v2429_v50 = vadd.f32 %v16171_v7, %v2089_v13  ;;  %v1588_v62 = vpop.f32.mrb[87].mxu1 }
 0x30c   : > { %16245 = vst [vmem:[#allocation121_spill] sm:$0xff] %v13247_v27  ;;  %4693 = vmatprep.subr.bf16.mxu0 %v16247_v8  ;;  %v2431_v15 = vadd.f32 %v16172_v14, %v2091_v17  ;;  %5597 = vmatprep.subr.bf16.mxu1 %v16248_v61  ;;  %v2105_v53 = vmul.f32 %v16164_v31, %v1473_v29  ;;  %v1475_v0 = vpop.f32.mrb[87].mxu0  ;;  %v16249_v36 = vunpack.c.h.s8.bf16 %v12729_v43  ;;  %v13267_v8 = vld [vmem:[#allocation10 + $0x6c0] sm:$0xff]  ;;  %v16251_v43 = vunpack.c.l.s8.bf16 %v12786_v4 }
 0x30d   : > { %16246 = vst [vmem:[#allocation122_spill] sm:$0xff] %v13249_v32  ;;  %v2107_v35 = vmul.f32 %v16165_v49, %v1586_v41  ;;  %v2430_v47 = vadd.f32 %v16174_v52, %v2090_v22  ;;  %v2432_v28 = vadd.f32 %v16175_v21, %v2092_v18  ;;  %v2106_v13 = vmul.f32 %v16168_v60, %v1475_v0 }
 0x30e   : > { %4694 = vmatpush1.bf16.msra.mxu0 %v16249_v36  ;;  %v2108_v17 = vmul.f32 %v16169_v45, %v1588_v62  ;;  %v2685_v29 = vmax.f32 %v2429_v50, 0.0  ;;  %v2687_v61 = vmax.f32 %v2431_v15, 0.0  ;;  %v2445_v41 = vadd.f32 %v16171_v7, %v2105_v53  ;;  %v16253_v53 = vld [vmem:[#allocation57_spill] sm:$0xff] }
 0x30f   : > { %v2447_v46 = vadd.f32 %v16172_v14, %v2107_v35  ;;  %v16250_v22 = vunpack.c.h.s8.bf16 %v12731_v44  ;;  %4776 = vmatprep.subr.bf16.mxu0 %v16251_v43  ;;  %v2686_v18 = vmax.f32 %v2430_v47, 0.0  ;;  %v2688_v0 = vmax.f32 %v2432_v28, 0.0  ;;  %v1479_v47 = vpop.f32.mrb[88].mxu0  ;;  %v1592_v28 = vpop.f32.mrb[88].mxu1  ;;  %v13317_v44 = vld [vmem:[#allocation10 + $0x708] sm:$0xff] }
 0x310   : > { %v2446_v62 = vadd.f32 %v16174_v52, %v2106_v13  ;;  %v2448_v36 = vadd.f32 %v16175_v21, %v2108_v17  ;;  %v16252_v9 = vunpack.c.l.s8.bf16 %v12788_v55  ;;  %v2701_v50 = vmax.f32 %v2445_v41, 0.0 }
 0x311   : > { %5598 = vmatpush1.bf16.msra.mxu1 %v16250_v22  ;;  %v2703_v15 = vmax.f32 %v2447_v46, 0.0  ;;  %4696 = vmatmul.mubr.bf16.vlgmr.msra.gmra.mrb[128].mxu0 %v16253_v53  ;;  %v16256_v41 = vunpack.c.l.s8.bf16 %v12833_v12  ;;  %v2121_v43 = vmul.f32 %v16164_v31, %v1479_v47 }
 0x312   : > { %5680 = vmatprep.subr.bf16.mxu1 %v16252_v9  ;;  %v2702_v22 = vmax.f32 %v2446_v62, 0.0  ;;  %v2704_v20 = vmax.f32 %v2448_v36, 0.0  ;;  %4705 = vmatprep.mubr.bf16.mxu0 %v12657_v26  ;;  %v13288_v17 = vpack.c.bf16 %v2701_v50, %v2685_v29  ;;  %v1481_v62 = vpop.f32.mrb[89].mxu0  ;;  %v1594_v36 = vpop.f32.mrb[89].mxu1  ;;  %v16259_v29 = vunpack.c.l.s8.bf16 %v12835_v37 }
 0x313   : > { %v13290_v46 = vpack.c.bf16 %v2703_v15, %v2687_v61  ;;  %4777 = vmatpush1.bf16.msra.mxu0 %v16256_v41  ;;  %v2123_v61 = vmul.f32 %v16165_v49, %v1592_v28  ;;  %v2122_v50 = vmul.f32 %v16168_v60, %v1481_v62  ;;  %v1483_v15 = vpop.f32.mrb[90].mxu0  ;;  %v1596_v41 = vpop.f32.mrb[90].mxu1  ;;  %v2461_v9 = vadd.f32 %v16171_v7, %v2121_v43  ;;  %v13324_v28 = vld [vmem:[#allocation10 + $0x718] sm:$0xff] }
 0x314   : > { %5600 = vmatmul.mubr.bf16.vlgmr.msra.gmra.mrb[128].mxu1 %v16253_v53  ;;  %16254 = vst [vmem:[#allocation123_spill] sm:$0xff] %v13288_v17  ;;  %v13297_v35 = vpack.c.bf16 %v2702_v22, %v2686_v18  ;;  %v13299_v13 = vpack.c.bf16 %v2704_v20, %v2688_v0  ;;  %v2124_v47 = vmul.f32 %v16169_v45, %v1594_v36  ;;  %v16261_v18 = vunpack.c.h.s8.bf16 %v12788_v55  ;;  %v1485_v0 = vpop.f32.mrb[91].mxu0  ;;  %v1598_v22 = vpop.f32.mrb[91].mxu1 }
 0x315   : > { %16255 = vst [vmem:[#allocation124_spill] sm:$0xff] %v13290_v46  ;;  %5609 = vmatprep.mubr.bf16.mxu1 %v12657_v26  ;;  %5681 = vmatpush1.bf16.msra.mxu1 %v16259_v29  ;;  %v16260_v26 = vunpack.c.h.s8.bf16 %v12786_v4  ;;  %v2137_v20 = vmul.f32 %v16164_v31, %v1483_v15  ;;  %v2463_v62 = vadd.f32 %v16172_v14, %v2123_v61  ;;  %v16262_v15 = vunpack.c.h.s8.bf16 %v12833_v12  ;;  %v13326_v61 = vld [vmem:[#allocation10 + $0x700] sm:$0xff] }
 0x316   : > { %16257 = vst [vmem:[#allocation125_spill] sm:$0xff] %v13297_v35  ;;  %16258 = vst [vmem:[#allocation126_spill] sm:$0xff] %v13299_v13  ;;  %5682 = vmatprep.subr.bf16.mxu1 %v16261_v18  ;;  %v2462_v29 = vadd.f32 %v16174_v52, %v2122_v50  ;;  %v2139_v43 = vmul.f32 %v16165_v49, %v1596_v41  ;;  %v2138_v36 = vmul.f32 %v16168_v60, %v1485_v0 }
 0x317   : > { %4778 = vmatprep.subr.bf16.mxu0 %v16260_v26  ;;  %v2717_v26 = vmax.f32 %v2461_v9, 0.0  ;;  %v2464_v4 = vadd.f32 %v16175_v21, %v2124_v47  ;;  %v2477_v55 = vadd.f32 %v16171_v7, %v2137_v20  ;;  %v2140_v18 = vmul.f32 %v16169_v45, %v1598_v22 }
 0x318   : > { %4779 = vmatpush1.bf16.msra.mxu0 %v16262_v15  ;;  %v2719_v50 = vmax.f32 %v2463_v62, 0.0  ;;  %v2718_v41 = vmax.f32 %v2462_v29, 0.0  ;;  %v2479_v0 = vadd.f32 %v16172_v14, %v2139_v43  ;;  %v16263_v53 = vunpack.c.h.s8.bf16 %v12835_v37  ;;  %v16266_v37 = vld [vmem:[#allocation67_spill] sm:$0xff] }
 0x319   : > { %v2478_v9 = vadd.f32 %v16174_v52, %v2138_v36  ;;  %v16264_v47 = vunpack.c.l.s8.bf16 %v12889_v33  ;;  %v2720_v12 = vmax.f32 %v2464_v4, 0.0  ;;  %v2733_v20 = vmax.f32 %v2477_v55, 0.0  ;;  %4706 = vmatmul.mubr.bf16.gmra.mrb[132].mxu0 %v12649_v39  ;;  %v1602_v36 = vpop.f32.mrb[92].mxu1  ;;  %v16272_v55 = vld [vmem:[#allocation113_spill] sm:$0xff] }
 0x31a   : > { %5683 = vmatpush1.bf16.msra.mxu1 %v16263_v53  ;;  %v2480_v22 = vadd.f32 %v16175_v21, %v2140_v18  ;;  %v16265_v15 = vunpack.c.l.s8.bf16 %v12891_v1  ;;  %v2735_v29 = vmax.f32 %v2479_v0, 0.0  ;;  %4715 = vmatprep.mubr.bf16.mxu0 %v16266_v37  ;;  %v1489_v53 = vpop.f32.mrb[92].mxu0  ;;  %v13343_v18 = vld [vmem:[#allocation10 + $0x710] sm:$0xff]  ;;  %v16273_v32 = vunpack.c.l.s8.bf16 %v16272_v55 }
 0x31b   : > { %4780 = vmatprep.subr.bf16.mxu0 %v16264_v47  ;;  %v2734_v43 = vmax.f32 %v2478_v9, 0.0  ;;  %v13345_v47 = vpack.c.bf16 %v2733_v20, %v2717_v26  ;;  %v2153_v0 = vmul.f32 %v16164_v31, %v1489_v53  ;;  %v2155_v9 = vmul.f32 %v16165_v49, %v1602_v36  ;;  %v1491_v62 = vpop.f32.mrb[93].mxu0 }
 0x31c   : > { %5684 = vmatprep.subr.bf16.mxu1 %v16265_v15  ;;  %5610 = vmatmul.mubr.bf16.gmra.mrb[132].mxu1 %v12649_v39  ;;  %v2736_v46 = vmax.f32 %v2480_v22, 0.0  ;;  %v16268_v15 = vld [vmem:[#allocation112_spill] sm:$0xff]  ;;  %v1604_v39 = vpop.f32.mrb[93].mxu1  ;;  %v13352_v40 = vpack.c.bf16 %v2735_v29, %v2719_v50  ;;  %v2154_v26 = vmul.f32 %v16168_v60, %v1491_v62  ;;  %v16275_v50 = vunpack.c.h.s8.bf16 %v12889_v33 }
 0x31d   : > { %16267 = vst [vmem:[#allocation127_spill] sm:$0xff] %v13345_v47  ;;  %v16269_v13 = vunpack.c.l.s8.bf16 %v16268_v15  ;;  %5619 = vmatprep.mubr.bf16.mxu1 %v16266_v37  ;;  %v13354_v4 = vpack.c.bf16 %v2734_v43, %v2718_v41  ;;  %v2156_v20 = vmul.f32 %v16169_v45, %v1604_v39  ;;  %v1606_v22 = vpop.f32.mrb[94].mxu1  ;;  %v2493_v53 = vadd.f32 %v16171_v7, %v2153_v0 }
 0x31e   : > { %16270 = vst [vmem:[#allocation112_spill] sm:$0xff] %v13352_v40  ;;  %5685 = vmatpush1.bf16.msra.mxu1 %v16273_v32  ;;  %v13360_v37 = vpack.c.bf16 %v2736_v46, %v2720_v12  ;;  %v2495_v36 = vadd.f32 %v16172_v14, %v2155_v9  ;;  %v16276_v41 = vunpack.c.h.s8.bf16 %v12891_v1  ;;  %v1608_v32 = vpop.f32.mrb[95].mxu1  ;;  %v2494_v39 = vadd.f32 %v16174_v52, %v2154_v26 }
 0x31f   : > { %4781 = vmatpush1.bf16.msra.mxu0 %v16269_v13  ;;  %16271 = vst [vmem:[#allocation128_spill] sm:$0xff] %v13354_v4  ;;  %v1493_v13 = vpop.f32.mrb[94].mxu0  ;;  %v2496_v43 = vadd.f32 %v16175_v21, %v2156_v20  ;;  %v2171_v12 = vmul.f32 %v16165_v49, %v1606_v22  ;;  %v2749_v0 = vmax.f32 %v2493_v53, 0.0  ;;  %v16277_v33 = vunpack.c.h.s8.bf16 %v16268_v15 }
 0x320   : > { %16274 = vst [vmem:[#allocation113_spill] sm:$0xff] %v13360_v37  ;;  %4782 = vmatprep.subr.bf16.mxu0 %v16275_v50  ;;  %5686 = vmatprep.subr.bf16.mxu1 %v16276_v41  ;;  %v1495_v29 = vpop.f32.mrb[95].mxu0  ;;  %v2169_v46 = vmul.f32 %v16164_v31, %v1493_v13  ;;  %v2751_v9 = vmax.f32 %v2495_v36, 0.0  ;;  %v2172_v50 = vmul.f32 %v16169_v45, %v1608_v32  ;;  %v2750_v41 = vmax.f32 %v2494_v39, 0.0  ;;  %v16280_v13 = vld [vmem:[#allocation63_spill] sm:$0xff]  ;;  %v1758_v36 = vpop.f32.mrb[96].mxu1 }
 0x321   : > { %v2170_v1 = vmul.f32 %v16168_v60, %v1495_v29  ;;  %v2752_v40 = vmax.f32 %v2496_v43, 0.0  ;;  %v2511_v26 = vadd.f32 %v16172_v14, %v2171_v12  ;;  %v16278_v20 = vunpack.c.h.s8.bf16 %v16272_v55  ;;  %4716 = vmatmul.mubr.bf16.gmra.mrb[136].mxu0 %v16280_v13  ;;  %v16282_v55 = vld [vmem:[#allocation71_spill] sm:$0xff]  ;;  %v1645_v53 = vpop.f32.mrb[96].mxu0  ;;  %v16284_v43 = vld [vmem:[#allocation88_spill] sm:$0xff] }
 0x322   : > { %v2509_v62 = vadd.f32 %v16171_v7, %v2169_v46  ;;  %v16279_v31 = vunpack.c.l.s8.bf16 %v12993_v63  ;;  %v2512_v15 = vadd.f32 %v16175_v21, %v2172_v50  ;;  %v16281_v60 = vunpack.c.l.s8.bf16 %v12995_v59  ;;  %4725 = vmatprep.mubr.bf16.mxu0 %v16282_v55  ;;  %v1647_v12 = vpop.f32.mrb[97].mxu0 }
 0x323   : > { %4783 = vmatpush1.bf16.msra.mxu0 %v16277_v33  ;;  %5687 = vmatpush1.bf16.msra.mxu1 %v16278_v20  ;;  %v2510_v49 = vadd.f32 %v16174_v52, %v2170_v1  ;;  %v2767_v22 = vmax.f32 %v2511_v26, 0.0  ;;  %v16283_v39 = vunpack.c.l.s8.bf16 %v13039_v30  ;;  %v1935_v46 = vmul.f32 %v13116_v42, %v1758_v36  ;;  %v1760_v33 = vpop.f32.mrb[97].mxu1 }
 0x324   : > { %4784 = vmatprep.subr.bf16.mxu0 %v16279_v31  ;;  %5688 = vmatprep.subr.bf16.mxu1 %v16281_v60  ;;  %v2765_v14 = vmax.f32 %v2509_v62, 0.0  ;;  %v2768_v32 = vmax.f32 %v2512_v15, 0.0  ;;  %v1933_v62 = vmul.f32 %v16284_v43, %v1645_v53  ;;  %v16287_v26 = vunpack.c.l.s8.bf16 %v13041_v34  ;;  %v1762_v15 = vpop.f32.mrb[98].mxu1 }
 0x325   : > { %5620 = vmatmul.mubr.bf16.gmra.mrb[136].mxu1 %v16280_v13  ;;  %v2766_v29 = vmax.f32 %v2510_v49, 0.0  ;;  %v13401_v50 = vpack.c.bf16 %v2767_v22, %v2751_v9  ;;  %v1934_v20 = vmul.f32 %v13127_v54, %v1647_v12  ;;  %v1936_v31 = vmul.f32 %v13176_v24, %v1760_v33  ;;  %v1649_v49 = vpop.f32.mrb[98].mxu0  ;;  %v1764_v22 = vpop.f32.mrb[99].mxu1 }
 0x326   : > { %5629 = vmatprep.mubr.bf16.mxu1 %v16282_v55  ;;  %v13399_v1 = vpack.c.bf16 %v2765_v14, %v2749_v0  ;;  %v13409_v53 = vpack.c.bf16 %v2768_v32, %v2752_v40  ;;  %v2273_v36 = vadd.f32 %v13071_v3, %v1933_v62  ;;  %v2275_v0 = vadd.f32 %v13120_v2, %v1935_v46  ;;  %v1651_v14 = vpop.f32.mrb[99].mxu0  ;;  %v13423_v32 = vld [vmem:[#allocation10 + $0x758] sm:$0xff] }
 0x327   : > { %4785 = vmatpush1.bf16.msra.mxu0 %v16283_v39  ;;  %16286 = vst [vmem:[#allocation129_spill] sm:$0xff] %v13401_v50  ;;  %5689 = vmatpush1.bf16.msra.mxu1 %v16287_v26  ;;  %v13407_v60 = vpack.c.bf16 %v2766_v29, %v2750_v41  ;;  %v16290_v9 = vunpack.c.h.s8.bf16 %v12993_v63  ;;  %v2274_v39 = vadd.f32 %v13131_v48, %v1934_v20  ;;  %v16291_v33 = vunpack.c.h.s8.bf16 %v12995_v59  ;;  %v13421_v29 = vld [vmem:[#allocation10 + $0x748] sm:$0xff]  ;;  %v13431_v59 = vld [vmem:[#allocation10 + $0x750] sm:$0xff] }
 0x328   : > { %16285 = vst [vmem:[#allocation88_spill] sm:$0xff] %v13399_v1  ;;  %16289 = vst [vmem:[#allocation131_spill] sm:$0xff] %v13409_v53  ;;  %v2276_v12 = vadd.f32 %v13180_v58, %v1936_v31  ;;  %v1949_v41 = vmul.f32 %v16284_v43, %v1649_v49  ;;  %v1951_v40 = vmul.f32 %v13116_v42, %v1762_v15  ;;  %v2529_v62 = vmax.f32 %v2273_v36, 0.0  ;;  %v13429_v31 = vld [vmem:[#allocation10 + $0x740] sm:$0xff] }
 0x329   : > { %16288 = vst [vmem:[#allocation130_spill] sm:$0xff] %v13407_v60  ;;  %4786 = vmatprep.subr.bf16.mxu0 %v16290_v9  ;;  %5690 = vmatprep.subr.bf16.mxu1 %v16291_v33  ;;  %v2531_v63 = vmax.f32 %v2275_v0, 0.0  ;;  %v16292_v46 = vunpack.c.h.s8.bf16 %v13039_v30  ;;  %v1950_v26 = vmul.f32 %v13127_v54, %v1651_v14  ;;  %v1952_v20 = vmul.f32 %v13176_v24, %v1764_v22  ;;  %v16295_v22 = vld [vmem:[#allocation69_spill] sm:$0xff] }
 0x32a   : > { %v2530_v49 = vmax.f32 %v2274_v39, 0.0  ;;  %v2532_v9 = vmax.f32 %v2276_v12, 0.0  ;;  %v2289_v15 = vadd.f32 %v13071_v3, %v1949_v41  ;;  %v2291_v33 = vadd.f32 %v13120_v2, %v1951_v40  ;;  %4726 = vmatmul.mubr.bf16.gmra.mrb[140].mxu0 %v16295_v22 }
 0x32b   : > { %4787 = vmatpush1.bf16.msra.mxu0 %v16292_v46  ;;  %v16293_v36 = vunpack.c.h.s8.bf16 %v13041_v34  ;;  %v16294_v30 = vunpack.c.l.s8.bf16 %v13221_v51  ;;  %v2290_v0 = vadd.f32 %v13131_v48, %v1950_v26  ;;  %v2292_v14 = vadd.f32 %v13180_v58, %v1952_v20  ;;  %v16297_v34 = vld [vmem:[#allocation110_spill] sm:$0xff] }
 0x32c   : > { %v16296_v46 = vunpack.c.l.s8.bf16 %v13223_v16  ;;  %v2545_v41 = vmax.f32 %v2289_v15, 0.0  ;;  %v2547_v40 = vmax.f32 %v2291_v33, 0.0  ;;  %4735 = vmatprep.mubr.bf16.mxu0 %v16297_v34  ;;  %v16301_v26 = vunpack.c.l.s8.bf16 %v13269_v25 }
 0x32d   : > { %5691 = vmatpush1.bf16.msra.mxu1 %v16293_v36  ;;  %4788 = vmatprep.subr.bf16.mxu0 %v16294_v30  ;;  %v1655_v36 = vpop.f32.mrb[100].mxu0  ;;  %v1768_v30 = vpop.f32.mrb[100].mxu1  ;;  %v2546_v21 = vmax.f32 %v2290_v0, 0.0  ;;  %v2548_v52 = vmax.f32 %v2292_v14, 0.0 }
 0x32e   : > { %5692 = vmatprep.subr.bf16.mxu1 %v16296_v46  ;;  %5630 = vmatmul.mubr.bf16.gmra.mrb[140].mxu1 %v16295_v22  ;;  %v16298_v46 = vunpack.c.l.s8.bf16 %v13267_v8  ;;  %v1965_v15 = vmul.f32 %v16284_v43, %v1655_v36  ;;  %v1967_v33 = vmul.f32 %v13116_v42, %v1768_v30  ;;  %v1657_v12 = vpop.f32.mrb[101].mxu0  ;;  %v1770_v39 = vpop.f32.mrb[101].mxu1  ;;  %v13455_v7 = vpack.c.bf16 %v2545_v41, %v2529_v62 }
 0x32f   : > { %5639 = vmatprep.mubr.bf16.mxu1 %v16297_v34  ;;  %v13457_v45 = vpack.c.bf16 %v2547_v40, %v2531_v63  ;;  %v1966_v0 = vmul.f32 %v13127_v54, %v1657_v12  ;;  %v1968_v14 = vmul.f32 %v13176_v24, %v1770_v39  ;;  %v1772_v20 = vpop.f32.mrb[102].mxu1  ;;  %v13463_v34 = vpack.c.bf16 %v2546_v21, %v2530_v49 }
 0x330   : > { %4789 = vmatpush1.bf16.msra.mxu0 %v16298_v46  ;;  %16299 = vst [vmem:[#allocation132_spill] sm:$0xff] %v13455_v7  ;;  %v1659_v46 = vpop.f32.mrb[102].mxu0  ;;  %v13465_v36 = vpack.c.bf16 %v2548_v52, %v2532_v9  ;;  %v2305_v30 = vadd.f32 %v13071_v3, %v1965_v15  ;;  %v2307_v62 = vadd.f32 %v13120_v2, %v1967_v33  ;;  %v16304_v63 = vunpack.c.h.s8.bf16 %v13221_v51  ;;  %v1774_v40 = vpop.f32.mrb[103].mxu1 }
 0x331   : > { %16300 = vst [vmem:[#allocation133_spill] sm:$0xff] %v13457_v45  ;;  %5693 = vmatpush1.bf16.msra.mxu1 %v16301_v26  ;;  %16302 = vst [vmem:[#allocation134_spill] sm:$0xff] %v13463_v34  ;;  %v1661_v41 = vpop.f32.mrb[103].mxu0  ;;  %v2306_v26 = vadd.f32 %v13131_v48, %v1966_v0  ;;  %v2308_v12 = vadd.f32 %v13180_v58, %v1968_v14  ;;  %v16305_v39 = vunpack.c.h.s8.bf16 %v13223_v16  ;;  %v16306_v15 = vunpack.c.h.s8.bf16 %v13267_v8 }
 0x332   : > { %16303 = vst [vmem:[#allocation135_spill] sm:$0xff] %v13465_v36  ;;  %4790 = vmatprep.subr.bf16.mxu0 %v16304_v63  ;;  %v1981_v21 = vmul.f32 %v16284_v43, %v1659_v46  ;;  %v1983_v52 = vmul.f32 %v13116_v42, %v1772_v20  ;;  %v2561_v49 = vmax.f32 %v2305_v30, 0.0  ;;  %v2563_v9 = vmax.f32 %v2307_v62, 0.0  ;;  %v16309_v30 = vld [vmem:[#allocation73_spill] sm:$0xff] }
 0x333   : > { %5694 = vmatprep.subr.bf16.mxu1 %v16305_v39  ;;  %v1982_v51 = vmul.f32 %v13127_v54, %v1661_v41  ;;  %v1984_v33 = vmul.f32 %v13176_v24, %v1774_v40  ;;  %v2562_v63 = vmax.f32 %v2306_v26, 0.0  ;;  %v2564_v0 = vmax.f32 %v2308_v12, 0.0  ;;  %4736 = vmatmul.mubr.bf16.gmra.mrb[144].mxu0 %v16309_v30 }
 0x334   : > { %4791 = vmatpush1.bf16.msra.mxu0 %v16306_v15  ;;  %v2321_v14 = vadd.f32 %v13071_v3, %v1981_v21  ;;  %v2323_v16 = vadd.f32 %v13120_v2, %v1983_v52  ;;  %v16307_v39 = vunpack.c.h.s8.bf16 %v13269_v25  ;;  %v16308_v20 = vunpack.c.l.s8.bf16 %v13317_v44  ;;  %v16311_v25 = vld [vmem:[#allocation77_spill] sm:$0xff]  ;;  %v1665_v21 = vpop.f32.mrb[104].mxu0  ;;  %v1778_v52 = vpop.f32.mrb[104].mxu1 }
 0x335   : > { %v2322_v46 = vadd.f32 %v13131_v48, %v1982_v51  ;;  %v2324_v8 = vadd.f32 %v13180_v58, %v1984_v33  ;;  %v16310_v62 = vunpack.c.l.s8.bf16 %v13324_v28  ;;  %4745 = vmatprep.mubr.bf16.mxu0 %v16311_v25  ;;  %v1780_v40 = vpop.f32.mrb[105].mxu1  ;;  %v16315_v15 = vunpack.c.l.s8.bf16 %v13343_v18 }
 0x336   : > { %5695 = vmatpush1.bf16.msra.mxu1 %v16307_v39  ;;  %4792 = vmatprep.subr.bf16.mxu0 %v16308_v20  ;;  %v2577_v26 = vmax.f32 %v2321_v14, 0.0  ;;  %v2579_v12 = vmax.f32 %v2323_v16, 0.0  ;;  %v16312_v20 = vunpack.c.l.s8.bf16 %v13326_v61  ;;  %v1997_v14 = vmul.f32 %v16284_v43, %v1665_v21  ;;  %v1782_v51 = vpop.f32.mrb[106].mxu1 }
 0x337   : > { %5696 = vmatprep.subr.bf16.mxu1 %v16310_v62  ;;  %5640 = vmatmul.mubr.bf16.gmra.mrb[144].mxu1 %v16309_v30  ;;  %v2578_v33 = vmax.f32 %v2322_v46, 0.0  ;;  %v2580_v39 = vmax.f32 %v2324_v8, 0.0  ;;  %v1999_v16 = vmul.f32 %v13116_v42, %v1778_v52  ;;  %v1667_v62 = vpop.f32.mrb[105].mxu0  ;;  %v2000_v8 = vmul.f32 %v13176_v24, %v1780_v40 }
 0x338   : > { %4793 = vmatpush1.bf16.msra.mxu0 %v16312_v20  ;;  %5649 = vmatprep.mubr.bf16.mxu1 %v16311_v25  ;;  %v13503_v41 = vpack.c.bf16 %v2577_v26, %v2561_v49  ;;  %v13505_v30 = vpack.c.bf16 %v2579_v12, %v2563_v9  ;;  %v1998_v46 = vmul.f32 %v13127_v54, %v1667_v62  ;;  %v1669_v20 = vpop.f32.mrb[106].mxu0  ;;  %v16318_v9 = vunpack.c.h.s8.bf16 %v13317_v44  ;;  %v1784_v12 = vpop.f32.mrb[107].mxu1 }
 0x339   : > { %v13511_v25 = vpack.c.bf16 %v2578_v33, %v2562_v63  ;;  %v13513_v21 = vpack.c.bf16 %v2580_v39, %v2564_v0  ;;  %v2337_v52 = vadd.f32 %v13071_v3, %v1997_v14  ;;  %v2339_v49 = vadd.f32 %v13120_v2, %v1999_v16  ;;  %v1671_v26 = vpop.f32.mrb[107].mxu0  ;;  %v13525_v33 = vld [vmem:[#allocation10 + $0x788] sm:$0xff]  ;;  %v13527_v39 = vld [vmem:[#allocation10 + $0x798] sm:$0xff] }
 0x33a   : > { %16313 = vst [vmem:[#allocation136_spill] sm:$0xff] %v13503_v41  ;;  %16314 = vst [vmem:[#allocation137_spill] sm:$0xff] %v13505_v30  ;;  %5697 = vmatpush1.bf16.msra.mxu1 %v16315_v15  ;;  %4794 = vmatprep.subr.bf16.mxu0 %v16318_v9  ;;  %v2338_v15 = vadd.f32 %v13131_v48, %v1998_v46  ;;  %v2340_v62 = vadd.f32 %v13180_v58, %v2000_v8  ;;  %v16319_v40 = vunpack.c.h.s8.bf16 %v13324_v28  ;;  %v13533_v9 = vld [vmem:[#allocation10 + $0x780] sm:$0xff]  ;;  %v13535_v28 = vld [vmem:[#allocation10 + $0x790] sm:$0xff] }
 0x33b   : > { %16316 = vst [vmem:[#allocation138_spill] sm:$0xff] %v13511_v25  ;;  %16317 = vst [vmem:[#allocation139_spill] sm:$0xff] %v13513_v21  ;;  %v2013_v63 = vmul.f32 %v16284_v43, %v1669_v20  ;;  %v2015_v0 = vmul.f32 %v13116_v42, %v1782_v51  ;;  %v2593_v14 = vmax.f32 %v2337_v52, 0.0  ;;  %v2595_v44 = vmax.f32 %v2339_v49, 0.0 }
 0x33c   : > { %5698 = vmatprep.subr.bf16.mxu1 %v16319_v40  ;;  %v16320_v16 = vunpack.c.h.s8.bf16 %v13326_v61  ;;  %v2014_v46 = vmul.f32 %v13127_v54, %v1671_v26  ;;  %v2016_v8 = vmul.f32 %v13176_v24, %v1784_v12  ;;  %v2594_v20 = vmax.f32 %v2338_v15, 0.0  ;;  %v16323_v12 = vld [vmem:[#allocation75_spill] sm:$0xff] }
 0x33d   : > { %v2596_v40 = vmax.f32 %v2340_v62, 0.0  ;;  %v2353_v51 = vadd.f32 %v13071_v3, %v2013_v63  ;;  %v2355_v22 = vadd.f32 %v13120_v2, %v2015_v0  ;;  %v16321_v52 = vunpack.c.h.s8.bf16 %v13343_v18  ;;  %4746 = vmatmul.mubr.bf16.gmra.mrb[148].mxu0 %v16323_v12  ;;  %v16325_v18 = vld [vmem:[#allocation81_spill] sm:$0xff] }
 0x33e   : > { %4795 = vmatpush1.bf16.msra.mxu0 %v16320_v16  ;;  %v16322_v61 = vunpack.c.l.s8.bf16 %v13421_v29  ;;  %v2354_v49 = vadd.f32 %v13131_v48, %v2014_v46  ;;  %v2356_v26 = vadd.f32 %v13180_v58, %v2016_v8  ;;  %v16324_v16 = vunpack.c.l.s8.bf16 %v13423_v32  ;;  %4755 = vmatprep.mubr.bf16.mxu0 %v16325_v18 }
 0x33f   : > { %5699 = vmatpush1.bf16.msra.mxu1 %v16321_v52  ;;  %v3894_v15 = vunpack.c.l.s8.bf16 %v13525_v33  ;;  %v3896_v62 = vunpack.c.l.s8.bf16 %v13527_v39  ;;  %v2609_v63 = vmax.f32 %v2353_v51, 0.0  ;;  %v2611_v0 = vmax.f32 %v2355_v22, 0.0  ;;  %v1675_v52 = vpop.f32.mrb[108].mxu0 }
 0x340   : > { %4796 = vmatprep.subr.bf16.mxu0 %v16322_v61  ;;  %5700 = vmatprep.subr.bf16.mxu1 %v16324_v16  ;;  %v1788_v61 = vpop.f32.mrb[108].mxu1  ;;  %v3893_v46 = vunpack.c.l.s8.bf16 %v13533_v9  ;;  %v2610_v55 = vmax.f32 %v2354_v49, 0.0  ;;  %v2612_v13 = vmax.f32 %v2356_v26, 0.0  ;;  %v16326_v16 = vunpack.c.l.s8.bf16 %v13429_v31 }
 0x341   : > { %5650 = vmatmul.mubr.bf16.gmra.mrb[148].mxu1 %v16323_v12  ;;  %v2029_v51 = vmul.f32 %v16284_v43, %v1675_v52  ;;  %v2031_v22 = vmul.f32 %v13116_v42, %v1788_v61  ;;  %v1677_v12 = vpop.f32.mrb[109].mxu0  ;;  %v1790_v30 = vpop.f32.mrb[109].mxu1  ;;  %v13559_v21 = vpack.c.bf16 %v2609_v63, %v2593_v14  ;;  %v13561_v45 = vpack.c.bf16 %v2611_v0, %v2595_v44 }
 0x342   : > { %4797 = vmatpush1.bf16.msra.mxu0 %v16326_v16  ;;  %5659 = vmatprep.mubr.bf16.mxu1 %v16325_v18  ;;  %v16329_v36 = vunpack.c.l.s8.bf16 %v13431_v59  ;;  %v2030_v49 = vmul.f32 %v13127_v54, %v1677_v12  ;;  %v2032_v26 = vmul.f32 %v13176_v24, %v1790_v30  ;;  %v1679_v16 = vpop.f32.mrb[110].mxu0  ;;  %v1792_v8 = vpop.f32.mrb[110].mxu1  ;;  %v13567_v18 = vpack.c.bf16 %v2610_v55, %v2594_v20 }
 0x343   : > { %16327 = vst [vmem:[#allocation140_spill] sm:$0xff] %v13559_v21  ;;  %16328 = vst [vmem:[#allocation141_spill] sm:$0xff] %v13561_v45  ;;  %v13569_v52 = vpack.c.bf16 %v2612_v13, %v2596_v40  ;;  %v2369_v61 = vadd.f32 %v13071_v3, %v2029_v51  ;;  %v2371_v14 = vadd.f32 %v13120_v2, %v2031_v22  ;;  %v16332_v44 = vunpack.c.h.s8.bf16 %v13421_v29  ;;  %v1681_v63 = vpop.f32.mrb[111].mxu0  ;;  %v1794_v0 = vpop.f32.mrb[111].mxu1  ;;  %v16357_v21 = vld [vmem:[#allocation68_spill] sm:$0xff] }
 0x344   : > { %5701 = vmatpush1.bf16.msra.mxu1 %v16329_v36  ;;  %16330 = vst [vmem:[#allocation142_spill] sm:$0xff] %v13567_v18  ;;  %v2370_v36 = vadd.f32 %v13131_v48, %v2030_v49  ;;  %v2372_v12 = vadd.f32 %v13180_v58, %v2032_v26  ;;  %v16333_v30 = vunpack.c.h.s8.bf16 %v13423_v32  ;;  %v2045_v55 = vmul.f32 %v16284_v43, %v1679_v16 }
 0x345   : > { %16331 = vst [vmem:[#allocation143_spill] sm:$0xff] %v13569_v52  ;;  %4798 = vmatprep.subr.bf16.mxu0 %v16332_v44  ;;  %v2047_v13 = vmul.f32 %v13116_v42, %v1792_v8  ;;  %v2625_v20 = vmax.f32 %v2369_v61, 0.0  ;;  %v2627_v40 = vmax.f32 %v2371_v14, 0.0  ;;  %v16334_v51 = vunpack.c.h.s8.bf16 %v13429_v31  ;;  %v16336_v31 = vld [vmem:[#allocation79_spill] sm:$0xff] }
 0x346   : > { %5702 = vmatprep.subr.bf16.mxu1 %v16333_v30  ;;  %v2046_v29 = vmul.f32 %v13127_v54, %v1681_v63  ;;  %v2048_v22 = vmul.f32 %v13176_v24, %v1794_v0  ;;  %v2626_v44 = vmax.f32 %v2370_v36, 0.0  ;;  %v2628_v49 = vmax.f32 %v2372_v12, 0.0  ;;  %4756 = vmatmul.mubr.bf16.gmra.mrb[152].mxu0 %v16336_v31  ;;  %v16337_v36 = vld [vmem:[#allocation85_spill] sm:$0xff]  ;;  %v1798_v12 = vpop.f32.mrb[112].mxu1 }
 0x347   : > { %4799 = vmatpush1.bf16.msra.mxu0 %v16334_v51  ;;  %v2385_v26 = vadd.f32 %v13071_v3, %v2045_v55  ;;  %v2387_v32 = vadd.f32 %v13120_v2, %v2047_v13  ;;  %v16335_v30 = vunpack.c.h.s8.bf16 %v13431_v59  ;;  %v3902_v61 = vunpack.c.h.s8.bf16 %v13525_v33  ;;  %4765 = vmatprep.mubr.bf16.mxu0 %v16337_v36  ;;  %v1685_v59 = vpop.f32.mrb[112].mxu0 }
 0x348   : > { %4800 = vmatprep.subr.bf16.mxu0 %v3894_v15  ;;  %v2386_v8 = vadd.f32 %v13131_v48, %v2046_v29  ;;  %v2388_v16 = vadd.f32 %v13180_v58, %v2048_v22  ;;  %v3904_v14 = vunpack.c.h.s8.bf16 %v13527_v39  ;;  %v3901_v15 = vunpack.c.h.s8.bf16 %v13533_v9  ;;  %v1800_v29 = vpop.f32.mrb[113].mxu1 }
 0x349   : > { %5703 = vmatpush1.bf16.msra.mxu1 %v16335_v30  ;;  %v2641_v63 = vmax.f32 %v2385_v26, 0.0  ;;  %v2643_v0 = vmax.f32 %v2387_v32, 0.0  ;;  %v3903_v55 = vunpack.c.h.s8.bf16 %v13535_v28  ;;  %v2061_v33 = vmul.f32 %v16284_v43, %v1685_v59 }
 0x34a   : > { %5704 = vmatprep.subr.bf16.mxu1 %v3896_v62  ;;  %5660 = vmatmul.mubr.bf16.gmra.mrb[152].mxu1 %v16336_v31  ;;  %v2642_v13 = vmax.f32 %v2386_v8, 0.0  ;;  %v2644_v51 = vmax.f32 %v2388_v16, 0.0  ;;  %v2063_v39 = vmul.f32 %v13116_v42, %v1798_v12  ;;  %v1687_v62 = vpop.f32.mrb[113].mxu0  ;;  %v16340_v32 = vunpack.c.l.s8.bf16 %v13535_v28  ;;  %v1802_v8 = vpop.f32.mrb[114].mxu1 }
 0x34b   : > { %4801 = vmatpush1.bf16.msra.mxu0 %v3893_v46  ;;  %5669 = vmatprep.mubr.bf16.mxu1 %v16337_v36  ;;  %v13601_v22 = vpack.c.bf16 %v2641_v63, %v2625_v20  ;;  %v13603_v26 = vpack.c.bf16 %v2643_v0, %v2627_v40  ;;  %v2062_v9 = vmul.f32 %v13127_v54, %v1687_v62  ;;  %v1689_v46 = vpop.f32.mrb[114].mxu0  ;;  %v1804_v63 = vpop.f32.mrb[115].mxu1 }
 0x34c   : > { %v2064_v30 = vmul.f32 %v13176_v24, %v1800_v29  ;;  %v13609_v16 = vpack.c.bf16 %v2642_v13, %v2626_v44  ;;  %v13611_v59 = vpack.c.bf16 %v2644_v51, %v2628_v49  ;;  %v2401_v12 = vadd.f32 %v13071_v3, %v2061_v33  ;;  %4802 = vmatprep.subr.bf16.mxu0 %v3902_v61  ;;  %v1691_v40 = vpop.f32.mrb[115].mxu0  ;;  %v3150_v44 = vld [vmem:[#allocation10 + $0x7c8] sm:$0xff]  ;;  %v13619_v13 = vld [vmem:[#allocation10 + $0x7d8] sm:$0xff] }
 0x34d   : > { %16338 = vst [vmem:[#allocation144_spill] sm:$0xff] %v13601_v22  ;;  %16339 = vst [vmem:[#allocation145_spill] sm:$0xff] %v13603_v26  ;;  %5705 = vmatpush1.bf16.msra.mxu1 %v16340_v32  ;;  %v2403_v20 = vadd.f32 %v13120_v2, %v2063_v39  ;;  %v2402_v28 = vadd.f32 %v13131_v48, %v2062_v9  ;;  %v2077_v62 = vmul.f32 %v16284_v43, %v1689_v46  ;;  %v3149_v39 = vld [vmem:[#allocation10 + $0x7c0] sm:$0xff]  ;;  %v13623_v32 = vld [vmem:[#allocation10 + $0x7d0] sm:$0xff] }
 0x34e   : > { %16341 = vst [vmem:[#allocation146_spill] sm:$0xff] %v13609_v16  ;;  %16342 = vst [vmem:[#allocation147_spill] sm:$0xff] %v13611_v59  ;;  %v2404_v0 = vadd.f32 %v13180_v58, %v2064_v30  ;;  %5706 = vmatprep.subr.bf16.mxu1 %v3904_v14  ;;  %v2079_v29 = vmul.f32 %v13116_v42, %v1802_v8  ;;  %v2657_v49 = vmax.f32 %v2401_v12, 0.0  ;;  %v3918_v52 = vunpack.c.h.s8.bf16 %v3150_v44 }
 0x34f   : > { %v2659_v51 = vmax.f32 %v2403_v20, 0.0  ;;  %4803 = vmatpush1.bf16.msra.mxu0 %v3901_v15  ;;  %v2078_v33 = vmul.f32 %v13127_v54, %v1691_v40  ;;  %v2080_v61 = vmul.f32 %v13176_v24, %v1804_v63  ;;  %v2658_v9 = vmax.f32 %v2402_v28, 0.0  ;;  %v16343_v20 = vld [vmem:[#allocation83_spill] sm:$0xff] }
 0x350   : > { %v2660_v30 = vmax.f32 %v2404_v0, 0.0  ;;  %v2417_v14 = vadd.f32 %v13071_v3, %v2077_v62  ;;  %v2419_v46 = vadd.f32 %v13120_v2, %v2079_v29  ;;  %4766 = vmatmul.mubr.bf16.gmra.mrb[156].mxu0 %v16343_v20  ;;  %v3910_v15 = vunpack.c.l.s8.bf16 %v3150_v44  ;;  %v16344_v0 = vld [vmem:[#allocation64_spill] sm:$0xff]  ;;  %v1695_v29 = vpop.f32.mrb[116].mxu0  ;;  %v3158_v44 = vld [vmem:[#allocation10 + $0x808] sm:$0xff] }
 0x351   : > { %5707 = vmatpush1.bf16.msra.mxu1 %v3903_v55  ;;  %v2418_v8 = vadd.f32 %v13131_v48, %v2078_v33  ;;  %v2420_v12 = vadd.f32 %v13180_v58, %v2080_v61  ;;  %v3912_v40 = vunpack.c.l.s8.bf16 %v13619_v13  ;;  %v3909_v28 = vunpack.c.l.s8.bf16 %v3149_v39  ;;  %4808 = vmatprep.mubr.bf16.mxu0 %v16344_v0  ;;  %v1808_v55 = vpop.f32.mrb[116].mxu1  ;;  %v1697_v59 = vpop.f32.mrb[117].mxu0 }
 0x352   : > { %v2673_v63 = vmax.f32 %v2417_v14, 0.0  ;;  %v2675_v36 = vmax.f32 %v2419_v46, 0.0  ;;  %5670 = vmatmul.mubr.bf16.gmra.mrb[156].mxu1 %v16343_v20  ;;  %v3911_v62 = vunpack.c.l.s8.bf16 %v13623_v32  ;;  %4804 = vmatprep.subr.bf16.mxu0 %v3910_v15  ;;  %v2093_v61 = vmul.f32 %v16284_v43, %v1695_v29  ;;  %v1810_v14 = vpop.f32.mrb[117].mxu1  ;;  %v1699_v22 = vpop.f32.mrb[118].mxu0 }
 0x353   : > { %v2674_v31 = vmax.f32 %v2418_v8, 0.0  ;;  %v2676_v33 = vmax.f32 %v2420_v12, 0.0  ;;  %5708 = vmatprep.subr.bf16.mxu1 %v3912_v40  ;;  %v2095_v26 = vmul.f32 %v13116_v42, %v1808_v55  ;;  %4805 = vmatpush1.bf16.msra.mxu0 %v3909_v28  ;;  %v2094_v45 = vmul.f32 %v13127_v54, %v1697_v59  ;;  %v1812_v8 = vpop.f32.mrb[118].mxu1  ;;  %v3160_v55 = vld [vmem:[#allocation10 + $0x818] sm:$0xff] }
 0x354   : > { %v13636_v46 = vpack.c.bf16 %v2673_v63, %v2657_v49  ;;  %v13638_v20 = vpack.c.bf16 %v2675_v36, %v2659_v51  ;;  %5712 = vmatprep.mubr.bf16.mxu1 %v16344_v0  ;;  %v2433_v40 = vadd.f32 %v13071_v3, %v2093_v61  ;;  %v1701_v63 = vpop.f32.mrb[119].mxu0  ;;  %v1814_v36 = vpop.f32.mrb[119].mxu1  ;;  %v2096_v28 = vmul.f32 %v13176_v24, %v1810_v14 }
 0x355   : > { %5709 = vmatpush1.bf16.msra.mxu1 %v3911_v62  ;;  %v13641_v12 = vpack.c.bf16 %v2674_v31, %v2658_v9  ;;  %v13643_v15 = vpack.c.bf16 %v2676_v33, %v2660_v30  ;;  %v2435_v49 = vadd.f32 %v13120_v2, %v2095_v26  ;;  %v2434_v51 = vadd.f32 %v13131_v48, %v2094_v45  ;;  %v13653_v33 = vld [vmem:[#allocation10 + $0x800] sm:$0xff] }
 0x356   : > { %16345 = vst [vmem:[#allocation148_spill] sm:$0xff] %v13636_v46  ;;  %16346 = vst [vmem:[#allocation149_spill] sm:$0xff] %v13638_v20  ;;  %4806 = vmatprep.subr.bf16.mxu0 %v3918_v52  ;;  %v3920_v59 = vunpack.c.h.s8.bf16 %v13619_v13  ;;  %v2109_v31 = vmul.f32 %v16284_v43, %v1699_v22  ;;  %v2689_v9 = vmax.f32 %v2433_v40, 0.0  ;;  %v2111_v62 = vmul.f32 %v13116_v42, %v1812_v8  ;;  %v13658_v13 = vld [vmem:[#allocation10 + $0x810] sm:$0xff] }
 0x357   : > { %16347 = vst [vmem:[#allocation150_spill] sm:$0xff] %v13641_v12  ;;  %16348 = vst [vmem:[#allocation151_spill] sm:$0xff] %v13643_v15  ;;  %v2691_v30 = vmax.f32 %v2435_v49, 0.0  ;;  %v3917_v29 = vunpack.c.h.s8.bf16 %v3149_v39  ;;  %v2690_v26 = vmax.f32 %v2434_v51, 0.0  ;;  %v2436_v61 = vadd.f32 %v13180_v58, %v2096_v28  ;;  %v16352_v12 = vld [vmem:[#allocation62_spill] sm:$0xff] }
 0x358   : > { %5710 = vmatprep.subr.bf16.mxu1 %v3920_v59  ;;  %v2449_v45 = vadd.f32 %v13071_v3, %v2109_v31  ;;  %v3919_v52 = vunpack.c.h.s8.bf16 %v13623_v32  ;;  %v2451_v22 = vadd.f32 %v13120_v2, %v2111_v62  ;;  %v2110_v14 = vmul.f32 %v13127_v54, %v1701_v63  ;;  %v1705_v59 = vpop.f32.mrb[120].mxu0  ;;  %v1818_v31 = vpop.f32.mrb[120].mxu1 }
 0x359   : > { %4807 = vmatpush1.bf16.msra.mxu0 %v3917_v29  ;;  %v2112_v39 = vmul.f32 %v13176_v24, %v1814_v36  ;;  %v3926_v8 = vunpack.c.l.s8.bf16 %v3158_v44  ;;  %v2692_v40 = vmax.f32 %v2436_v61, 0.0  ;;  %v3928_v51 = vunpack.c.l.s8.bf16 %v3160_v55  ;;  %v1707_v63 = vpop.f32.mrb[121].mxu0  ;;  %v1820_v29 = vpop.f32.mrb[121].mxu1  ;;  %v16350_v61 = vld [vmem:[#allocation61_spill] sm:$0xff] }
 0x35a   : > { %v2705_v49 = vmax.f32 %v2449_v45, 0.0  ;;  %5711 = vmatpush1.bf16.msra.mxu1 %v3919_v52  ;;  %v3925_v28 = vunpack.c.l.s8.bf16 %v13653_v33  ;;  %v2707_v0 = vmax.f32 %v2451_v22, 0.0  ;;  %v2450_v32 = vadd.f32 %v13131_v48, %v2110_v14  ;;  %v1709_v22 = vpop.f32.mrb[122].mxu0  ;;  %v1822_v46 = vpop.f32.mrb[122].mxu1 }
 0x35b   : > { %v2452_v20 = vadd.f32 %v13180_v58, %v2112_v39  ;;  %4889 = vmatprep.subr.bf16.mxu0 %v3926_v8  ;;  %v3927_v62 = vunpack.c.l.s8.bf16 %v13658_v13  ;;  %5793 = vmatprep.subr.bf16.mxu1 %v3928_v51  ;;  %v2125_v45 = vmul.f32 %v16284_v43, %v1705_v59  ;;  %v2127_v52 = vmul.f32 %v13116_v42, %v1818_v31 }
 0x35c   : > { %v13667_v36 = vpack.c.bf16 %v2705_v49, %v2689_v9  ;;  %4809 = vmatmul.mubr.bf16.vlgmr.msra.gmra.mrb[128].mxu0 %v16350_v61  ;;  %v3934_v15 = vunpack.c.h.s8.bf16 %v3158_v44  ;;  %v13672_v14 = vpack.c.bf16 %v2707_v0, %v2691_v30  ;;  %v2706_v39 = vmax.f32 %v2450_v32, 0.0  ;;  %v1711_v49 = vpop.f32.mrb[123].mxu0 }
 0x35d   : > { %v2708_v8 = vmax.f32 %v2452_v20, 0.0  ;;  %5713 = vmatmul.mubr.bf16.vlgmr.msra.gmra.mrb[128].mxu1 %v16350_v61  ;;  %4818 = vmatprep.mubr.bf16.mxu0 %v16352_v12  ;;  %v2126_v9 = vmul.f32 %v13127_v54, %v1707_v63  ;;  %v2465_v51 = vadd.f32 %v13071_v3, %v2125_v45  ;;  %v2467_v44 = vadd.f32 %v13120_v2, %v2127_v52 }
 0x35e   : > { %16349 = vst [vmem:[#allocation152_spill] sm:$0xff] %v13667_v36  ;;  %16351 = vst [vmem:[#allocation153_spill] sm:$0xff] %v13672_v14  ;;  %v1824_v36 = vpop.f32.mrb[123].mxu1  ;;  %4890 = vmatpush1.bf16.msra.mxu0 %v3925_v28  ;;  %5722 = vmatprep.mubr.bf16.mxu1 %v16352_v12  ;;  %v2128_v0 = vmul.f32 %v13176_v24, %v1820_v29  ;;  %v3936_v30 = vunpack.c.h.s8.bf16 %v3160_v55  ;;  %v13681_v59 = vpack.c.bf16 %v2706_v39, %v2690_v26  ;;  %v3166_v28 = vld [vmem:[#allocation10 + $0x848] sm:$0xff]  ;;  %v13689_v29 = vld [vmem:[#allocation10 + $0x858] sm:$0xff] }
 0x35f   : > { %v13683_v20 = vpack.c.bf16 %v2708_v8, %v2692_v40  ;;  %5794 = vmatpush1.bf16.msra.mxu1 %v3927_v62  ;;  %v2466_v31 = vadd.f32 %v13131_v48, %v2126_v9  ;;  %4891 = vmatprep.subr.bf16.mxu0 %v3934_v15  ;;  %v3933_v32 = vunpack.c.h.s8.bf16 %v13653_v33  ;;  %v2721_v63 = vmax.f32 %v2465_v51, 0.0  ;;  %v13691_v55 = vld [vmem:[#allocation10 + $0x840] sm:$0xff]  ;;  %v13696_v33 = vld [vmem:[#allocation10 + $0x850] sm:$0xff]  ;;  %v1715_v51 = vpop.f32.mrb[124].mxu0 }
 0x360   : > { %16353 = vst [vmem:[#allocation154_spill] sm:$0xff] %v13681_v59  ;;  %v2723_v12 = vmax.f32 %v2467_v44, 0.0  ;;  %v2468_v45 = vadd.f32 %v13180_v58, %v2128_v0  ;;  %5795 = vmatprep.subr.bf16.mxu1 %v3936_v30  ;;  %v2141_v52 = vmul.f32 %v16284_v43, %v1709_v22  ;;  %v2143_v40 = vmul.f32 %v13116_v42, %v1822_v46  ;;  %v1828_v44 = vpop.f32.mrb[124].mxu1  ;;  %v1717_v30 = vpop.f32.mrb[125].mxu0 }
 0x361   : > { %16354 = vst [vmem:[#allocation155_spill] sm:$0xff] %v13683_v20  ;;  %v2722_v26 = vmax.f32 %v2466_v31, 0.0  ;;  %v3935_v62 = vunpack.c.h.s8.bf16 %v13658_v13  ;;  %v2142_v15 = vmul.f32 %v13127_v54, %v1711_v49  ;;  %v2144_v9 = vmul.f32 %v13176_v24, %v1824_v36  ;;  %v1830_v31 = vpop.f32.mrb[125].mxu1 }
 0x362   : > { %v2724_v39 = vmax.f32 %v2468_v45, 0.0  ;;  %v2481_v8 = vadd.f32 %v13071_v3, %v2141_v52  ;;  %4892 = vmatpush1.bf16.msra.mxu0 %v3933_v32  ;;  %v3942_v22 = vunpack.c.l.s8.bf16 %v3166_v28  ;;  %v2483_v0 = vadd.f32 %v13120_v2, %v2143_v40  ;;  %v16355_v32 = vld [vmem:[#allocation65_spill] sm:$0xff]  ;;  %v1719_v40 = vpop.f32.mrb[126].mxu0 }
 0x363   : > { %5796 = vmatpush1.bf16.msra.mxu1 %v3935_v62  ;;  %v2482_v46 = vadd.f32 %v13131_v48, %v2142_v15  ;;  %v3944_v13 = vunpack.c.l.s8.bf16 %v13689_v29  ;;  %v3941_v49 = vunpack.c.l.s8.bf16 %v13691_v55  ;;  %v2484_v52 = vadd.f32 %v13180_v58, %v2144_v9  ;;  %v1832_v62 = vpop.f32.mrb[126].mxu1  ;;  %v1721_v59 = vpop.f32.mrb[127].mxu0 }
 0x364   : > { %v2737_v45 = vmax.f32 %v2481_v8, 0.0  ;;  %4819 = vmatmul.mubr.bf16.gmra.mrb[132].mxu0 %v16355_v32  ;;  %4893 = vmatprep.subr.bf16.mxu0 %v3942_v22  ;;  %v3943_v36 = vunpack.c.l.s8.bf16 %v13696_v33  ;;  %v2157_v61 = vmul.f32 %v16284_v43, %v1715_v51  ;;  %v2739_v14 = vmax.f32 %v2483_v0, 0.0  ;;  %v1834_v9 = vpop.f32.mrb[127].mxu1 }
 0x365   : > { %v2738_v15 = vmax.f32 %v2482_v46, 0.0  ;;  %5723 = vmatmul.mubr.bf16.gmra.mrb[132].mxu1 %v16355_v32  ;;  %5797 = vmatprep.subr.bf16.mxu1 %v3944_v13  ;;  %v2159_v20 = vmul.f32 %v13116_v42, %v1828_v44  ;;  %v2158_v8 = vmul.f32 %v13127_v54, %v1717_v30  ;;  %v2740_v22 = vmax.f32 %v2484_v52, 0.0  ;;  %v3173_v52 = vld [vmem:[#allocation10 + $0x880] sm:$0xff] }
 0x366   : > { %v13711_v16 = vpack.c.bf16 %v2737_v45, %v2721_v63  ;;  %4828 = vmatprep.mubr.bf16.mxu0 %v16357_v21  ;;  %4894 = vmatpush1.bf16.msra.mxu0 %v3941_v49  ;;  %v2497_v51 = vadd.f32 %v13071_v3, %v2157_v61  ;;  %v2160_v0 = vmul.f32 %v13176_v24, %v1830_v31  ;;  %v3950_v13 = vunpack.c.h.s8.bf16 %v3166_v28  ;;  %v3174_v49 = vld [vmem:[#allocation10 + $0x888] sm:$0xff]  ;;  %v3176_v31 = vld [vmem:[#allocation10 + $0x898] sm:$0xff] }
 0x367   : > { %v13716_v46 = vpack.c.bf16 %v2739_v14, %v2723_v12  ;;  %v13718_v32 = vpack.c.bf16 %v2738_v15, %v2722_v26  ;;  %5732 = vmatprep.mubr.bf16.mxu1 %v16357_v21  ;;  %5798 = vmatpush1.bf16.msra.mxu1 %v3943_v36  ;;  %v2499_v44 = vadd.f32 %v13120_v2, %v2159_v20  ;;  %v3952_v12 = vunpack.c.h.s8.bf16 %v13689_v29  ;;  %v3175_v36 = vld [vmem:[#allocation10 + $0x890] sm:$0xff]  ;;  %v14198_v21 = vld [vmem:[#allocation10 + $0x8e8] sm:$0xff] }
 0x368   : > { %16356 = vst [vmem:[#allocation156_spill] sm:$0xff] %v13711_v16  ;;  %v13722_v63 = vpack.c.bf16 %v2740_v22, %v2724_v39  ;;  %v2753_v30 = vmax.f32 %v2497_v51, 0.0  ;;  %v2500_v45 = vadd.f32 %v13180_v58, %v2160_v0  ;;  %v2498_v61 = vadd.f32 %v13131_v48, %v2158_v8  ;;  %4895 = vmatprep.subr.bf16.mxu0 %v3950_v13  ;;  %v16361_v13 = vld [vmem:[#allocation66_spill] sm:$0xff] }
 0x369   : > { %16358 = vst [vmem:[#allocation157_spill] sm:$0xff] %v13716_v46  ;;  %16359 = vst [vmem:[#allocation158_spill] sm:$0xff] %v13718_v32  ;;  %v2173_v14 = vmul.f32 %v16284_v43, %v1719_v40  ;;  %v2175_v26 = vmul.f32 %v13116_v42, %v1832_v62  ;;  %v2755_v20 = vmax.f32 %v2499_v44, 0.0  ;;  %v3949_v39 = vunpack.c.h.s8.bf16 %v13691_v55  ;;  %5799 = vmatprep.subr.bf16.mxu1 %v3952_v12 }
 0x36a   : > { %16360 = vst [vmem:[#allocation159_spill] sm:$0xff] %v13722_v63  ;;  %v2756_v28 = vmax.f32 %v2500_v45, 0.0  ;;  %v3951_v15 = vunpack.c.h.s8.bf16 %v13696_v33  ;;  %v2174_v29 = vmul.f32 %v13127_v54, %v1721_v59  ;;  %v2176_v43 = vmul.f32 %v13176_v24, %v1834_v9  ;;  %v3182_v24 = vld [vmem:[#allocation10 + $0x8c8] sm:$0xff] }
 0x36b   : > { %v2513_v22 = vadd.f32 %v13071_v3, %v2173_v14  ;;  %v2515_v8 = vadd.f32 %v13120_v2, %v2175_v26  ;;  %4896 = vmatpush1.bf16.msra.mxu0 %v3949_v39  ;;  %v3958_v42 = vunpack.c.l.s8.bf16 %v3174_v49  ;;  %v3960_v40 = vunpack.c.l.s8.bf16 %v3176_v31  ;;  %v16364_v14 = vld [vmem:[#allocation72_spill] sm:$0xff] }
 0x36c   : > { %5800 = vmatpush1.bf16.msra.mxu1 %v3951_v15  ;;  %v3957_v62 = vunpack.c.l.s8.bf16 %v3173_v52  ;;  %v3959_v51 = vunpack.c.l.s8.bf16 %v3175_v36  ;;  %v2514_v55 = vadd.f32 %v13131_v48, %v2174_v29  ;;  %v2516_v33 = vadd.f32 %v13180_v58, %v2176_v43  ;;  %4829 = vmatmul.mubr.bf16.gmra.mrb[136].mxu0 %v16361_v13  ;;  %v3184_v48 = vld [vmem:[#allocation10 + $0x8d8] sm:$0xff] }
 0x36d   : > { %v2769_v0 = vmax.f32 %v2513_v22, 0.0  ;;  %v2771_v44 = vmax.f32 %v2515_v8, 0.0  ;;  %5733 = vmatmul.mubr.bf16.gmra.mrb[136].mxu1 %v16361_v13  ;;  %v2754_v3 = vmax.f32 %v2498_v61, 0.0  ;;  %4897 = vmatprep.subr.bf16.mxu0 %v3958_v42  ;;  %v3966_v2 = vunpack.c.h.s8.bf16 %v3174_v49  ;;  %v16367_v8 = vld [vmem:[#allocation70_spill] sm:$0xff]  ;;  %v3192_v43 = vld [vmem:[#allocation10 + $0x918] sm:$0xff] }
 0x36e   : > { %5801 = vmatprep.subr.bf16.mxu1 %v3960_v40  ;;  %v3968_v54 = vunpack.c.h.s8.bf16 %v3176_v31  ;;  %v2770_v45 = vmax.f32 %v2514_v55, 0.0  ;;  %v2772_v12 = vmax.f32 %v2516_v33, 0.0  ;;  %4838 = vmatprep.mubr.bf16.mxu0 %v16364_v14  ;;  %v3965_v58 = vunpack.c.h.s8.bf16 %v3173_v52  ;;  %v3181_v31 = vld [vmem:[#allocation10 + $0x8c0] sm:$0xff] }
 0x36f   : > { %v13739_v59 = vpack.c.bf16 %v2769_v0, %v2753_v30  ;;  %v13741_v9 = vpack.c.bf16 %v2771_v44, %v2755_v20  ;;  %5742 = vmatprep.mubr.bf16.mxu1 %v16364_v14  ;;  %4898 = vmatpush1.bf16.msra.mxu0 %v3957_v62  ;;  %v3967_v61 = vunpack.c.h.s8.bf16 %v3175_v36  ;;  %v3974_v30 = vunpack.c.l.s8.bf16 %v3182_v24  ;;  %v3183_v20 = vld [vmem:[#allocation10 + $0x8d0] sm:$0xff]  ;;  %v3190_v36 = vld [vmem:[#allocation10 + $0x908] sm:$0xff] }
 0x370   : > { %5802 = vmatpush1.bf16.msra.mxu1 %v3959_v51  ;;  %v13745_v26 = vpack.c.bf16 %v2770_v45, %v2754_v3  ;;  %v13747_v49 = vpack.c.bf16 %v2772_v12, %v2756_v28  ;;  %4899 = vmatprep.subr.bf16.mxu0 %v3966_v2  ;;  %v3976_v39 = vunpack.c.l.s8.bf16 %v3184_v48  ;;  %v3973_v15 = vunpack.c.l.s8.bf16 %v3181_v31  ;;  %v16368_v28 = vld [vmem:[#allocation111_spill] sm:$0xff]  ;;  %v3189_v51 = vld [vmem:[#allocation10 + $0x900] sm:$0xff]  ;;  %v3200_v12 = vld [vmem:[#allocation10 + $0x958] sm:$0xff] }
 0x371   : > { %16362 = vst [vmem:[#allocation160_spill] sm:$0xff] %v13739_v59  ;;  %16363 = vst [vmem:[#allocation161_spill] sm:$0xff] %v13741_v9  ;;  %5803 = vmatprep.subr.bf16.mxu1 %v3968_v54  ;;  %v3975_v22 = vunpack.c.l.s8.bf16 %v3183_v20  ;;  %v3982_v29 = vunpack.c.h.s8.bf16 %v3182_v24  ;;  %v3984_v52 = vunpack.c.h.s8.bf16 %v3184_v48  ;;  %v3981_v42 = vunpack.c.h.s8.bf16 %v3181_v31  ;;  %v3191_v0 = vld [vmem:[#allocation10 + $0x910] sm:$0xff]  ;;  %v16369_v3 = vld [vmem:[#allocation74_spill] sm:$0xff] }
 0x372   : > { %16365 = vst [vmem:[#allocation162_spill] sm:$0xff] %v13745_v26  ;;  %16366 = vst [vmem:[#allocation163_spill] sm:$0xff] %v13747_v49  ;;  %v3983_v40 = vunpack.c.h.s8.bf16 %v3183_v20  ;;  %v3990_v62 = vunpack.c.l.s8.bf16 %v3190_v36  ;;  %v3992_v44 = vunpack.c.l.s8.bf16 %v3192_v43  ;;  %v3989_v55 = vunpack.c.l.s8.bf16 %v3189_v51  ;;  %v3198_v24 = vld [vmem:[#allocation10 + $0x948] sm:$0xff]  ;;  %v3199_v31 = vld [vmem:[#allocation10 + $0x950] sm:$0xff] }
 0x373   : > { %4900 = vmatpush1.bf16.msra.mxu0 %v3965_v58  ;;  %v3991_v33 = vunpack.c.l.s8.bf16 %v3191_v0  ;;  %v3998_v2 = vunpack.c.h.s8.bf16 %v3190_v36  ;;  %v4000_v54 = vunpack.c.h.s8.bf16 %v3192_v43  ;;  %v16370_v45 = vld [vmem:[#allocation78_spill] sm:$0xff]  ;;  %v3997_v48 = vunpack.c.h.s8.bf16 %v3189_v51 }
 0x374   : > { %5804 = vmatpush1.bf16.msra.mxu1 %v3967_v61  ;;  %4839 = vmatmul.mubr.bf16.gmra.mrb[140].mxu0 %v16367_v8  ;;  %v3999_v58 = vunpack.c.h.s8.bf16 %v3191_v0  ;;  %v4006_v61 = vunpack.c.l.s8.bf16 %v3198_v24  ;;  %v4008_v20 = vunpack.c.l.s8.bf16 %v3200_v12  ;;  %v3206_v36 = vld [vmem:[#allocation10 + $0x988] sm:$0xff]  ;;  %v3205_v0 = vld [vmem:[#allocation10 + $0x980] sm:$0xff] }
 0x375   : > { %4901 = vmatprep.subr.bf16.mxu0 %v3974_v30  ;;  %5743 = vmatmul.mubr.bf16.gmra.mrb[140].mxu1 %v16367_v8  ;;  %v3197_v30 = vld [vmem:[#allocation10 + $0x940] sm:$0xff]  ;;  %v4022_v51 = vunpack.c.l.s8.bf16 %v3206_v36 }
 0x376   : > { %5805 = vmatprep.subr.bf16.mxu1 %v3976_v39  ;;  %4848 = vmatprep.mubr.bf16.mxu0 %v16368_v28  ;;  %v4005_v39 = vunpack.c.l.s8.bf16 %v3197_v30  ;;  %v16372_v43 = vld [vmem:[#allocation82_spill] sm:$0xff] }
 0x377   : > { %5752 = vmatprep.mubr.bf16.mxu1 %v16368_v28  ;;  %4902 = vmatpush1.bf16.msra.mxu0 %v3973_v15  ;;  %v4007_v15 = vunpack.c.l.s8.bf16 %v3199_v31 }
 0x378   : > { %5806 = vmatpush1.bf16.msra.mxu1 %v3975_v22  ;;  %4903 = vmatprep.subr.bf16.mxu0 %v3982_v29  ;;  %v16371_v22 = vld [vmem:[#allocation76_spill] sm:$0xff]  ;;  %v4014_v29 = vunpack.c.h.s8.bf16 %v3198_v24  ;;  %v4030_v24 = vunpack.c.h.s8.bf16 %v3206_v36 }
 0x379   : > { %5807 = vmatprep.subr.bf16.mxu1 %v3984_v52  ;;  %v4016_v52 = vunpack.c.h.s8.bf16 %v3200_v12 }
 0x37b   : > { %4904 = vmatpush1.bf16.msra.mxu0 %v3981_v42  ;;  %v3208_v42 = vld [vmem:[#allocation10 + $0x998] sm:$0xff] }
 0x37c   : > { %5808 = vmatpush1.bf16.msra.mxu1 %v3983_v40  ;;  %4849 = vmatmul.mubr.bf16.gmra.mrb[144].mxu0 %v16369_v3  ;;  %v4013_v40 = vunpack.c.h.s8.bf16 %v3197_v30  ;;  %v4032_v12 = vunpack.c.h.s8.bf16 %v3208_v42  ;;  %v4029_v30 = vunpack.c.h.s8.bf16 %v3205_v0 }
 0x37d   : > { %4905 = vmatprep.subr.bf16.mxu0 %v3990_v62  ;;  %5753 = vmatmul.mubr.bf16.gmra.mrb[144].mxu1 %v16369_v3  ;;  %v4015_v62 = vunpack.c.h.s8.bf16 %v3199_v31  ;;  %v14175_v3 = vld [vmem:[#allocation10 + $0x8b0] sm:$0xff] }
 0x37e   : > { %5809 = vmatprep.subr.bf16.mxu1 %v3992_v44  ;;  %4858 = vmatprep.mubr.bf16.mxu0 %v16370_v45  ;;  %v3207_v44 = vld [vmem:[#allocation10 + $0x990] sm:$0xff] }
 0x37f   : > { %5762 = vmatprep.mubr.bf16.mxu1 %v16370_v45  ;;  %4906 = vmatpush1.bf16.msra.mxu0 %v3989_v55  ;;  %v4024_v55 = vunpack.c.l.s8.bf16 %v3208_v42  ;;  %v4031_v31 = vunpack.c.h.s8.bf16 %v3207_v44  ;;  %v16375_v42 = vld [vmem:[#allocation84_spill] sm:$0xff]  ;;  %v14173_v45 = vld [vmem:[#allocation10 + $0x8a0] sm:$0xff] }
 0x380   : > { %5810 = vmatpush1.bf16.msra.mxu1 %v3991_v33  ;;  %4907 = vmatprep.subr.bf16.mxu0 %v3998_v2  ;;  %v4021_v33 = vunpack.c.l.s8.bf16 %v3205_v0  ;;  %v4023_v2 = vunpack.c.l.s8.bf16 %v3207_v44  ;;  %v3224_v0 = vld [vmem:[#allocation10 + $0xa18] sm:$0xff]  ;;  %v16376_v44 = vld [vmem:[#allocation91_spill] sm:$0xff] }
 0x381   : > { %5811 = vmatprep.subr.bf16.mxu1 %v4000_v54  ;;  %v16373_v54 = vld [vmem:[#allocation80_spill] sm:$0xff] }
 0x383   : > { %4908 = vmatpush1.bf16.msra.mxu0 %v3997_v48  ;;  %v3214_v48 = vld [vmem:[#allocation10 + $0x9c8] sm:$0xff] }
 0x384   : > { %5812 = vmatpush1.bf16.msra.mxu1 %v3999_v58  ;;  %4859 = vmatmul.mubr.bf16.gmra.mrb[148].mxu0 %v16371_v22  ;;  %v16374_v58 = vld [vmem:[#allocation86_spill] sm:$0xff] }
 0x385   : > { %4909 = vmatprep.subr.bf16.mxu0 %v4006_v61  ;;  %5763 = vmatmul.mubr.bf16.gmra.mrb[148].mxu1 %v16371_v22  ;;  %v3216_v61 = vld [vmem:[#allocation10 + $0x9d8] sm:$0xff] }
 0x386   : > { %5813 = vmatprep.subr.bf16.mxu1 %v4008_v20  ;;  %4868 = vmatprep.mubr.bf16.mxu0 %v16372_v43  ;;  %v4038_v20 = vunpack.c.l.s8.bf16 %v3214_v48 }
 0x387   : > { %5772 = vmatprep.mubr.bf16.mxu1 %v16372_v43  ;;  %4910 = vmatpush1.bf16.msra.mxu0 %v4005_v39  ;;  %v3213_v39 = vld [vmem:[#allocation10 + $0x9c0] sm:$0xff] }
 0x388   : > { %5814 = vmatpush1.bf16.msra.mxu1 %v4007_v15  ;;  %4911 = vmatprep.subr.bf16.mxu0 %v4014_v29  ;;  %v3215_v15 = vld [vmem:[#allocation10 + $0x9d0] sm:$0xff]  ;;  %v4040_v29 = vunpack.c.l.s8.bf16 %v3216_v61 }
 0x389   : > { %5815 = vmatprep.subr.bf16.mxu1 %v4016_v52  ;;  %v4037_v52 = vunpack.c.l.s8.bf16 %v3213_v39  ;;  %v4039_v36 = vunpack.c.l.s8.bf16 %v3215_v15 }
 0x38b   : > { %4912 = vmatpush1.bf16.msra.mxu0 %v4013_v40  ;;  %v4046_v40 = vunpack.c.h.s8.bf16 %v3214_v48  ;;  %v3223_v48 = vld [vmem:[#allocation10 + $0xa10] sm:$0xff] }
 0x38c   : > { %5816 = vmatpush1.bf16.msra.mxu1 %v4015_v62  ;;  %4869 = vmatmul.mubr.bf16.gmra.mrb[152].mxu0 %v16373_v54  ;;  %v4048_v62 = vunpack.c.h.s8.bf16 %v3216_v61 }
 0x38d   : > { %4913 = vmatprep.subr.bf16.mxu0 %v4022_v51  ;;  %5773 = vmatmul.mubr.bf16.gmra.mrb[152].mxu1 %v16373_v54  ;;  %v3222_v51 = vld [vmem:[#allocation10 + $0xa08] sm:$0xff] }
 0x38e   : > { %5817 = vmatprep.subr.bf16.mxu1 %v4024_v55  ;;  %4878 = vmatprep.mubr.bf16.mxu0 %v16374_v58  ;;  %v4045_v55 = vunpack.c.h.s8.bf16 %v3213_v39  ;;  %v3232_v39 = vld [vmem:[#allocation10 + $0xa58] sm:$0xff] }
 0x38f   : > { %5782 = vmatprep.mubr.bf16.mxu1 %v16374_v58  ;;  %4914 = vmatpush1.bf16.msra.mxu0 %v4021_v33  ;;  %v4047_v33 = vunpack.c.h.s8.bf16 %v3215_v15  ;;  %v14158_v58 = vld [vmem:[#allocation10 + $0x8a8] sm:$0xff] }
 0x390   : > { %5818 = vmatpush1.bf16.msra.mxu1 %v4023_v2  ;;  %4915 = vmatprep.subr.bf16.mxu0 %v4030_v24  ;;  %v4054_v2 = vunpack.c.l.s8.bf16 %v3222_v51  ;;  %v4056_v24 = vunpack.c.l.s8.bf16 %v3224_v0 }
 0x391   : > { %5819 = vmatprep.subr.bf16.mxu1 %v4032_v12  ;;  %v3221_v12 = vld [vmem:[#allocation10 + $0xa00] sm:$0xff] }
 0x392   : > { %v4053_v61 = vunpack.c.l.s8.bf16 %v3221_v12  ;;  %v4061_v15 = vunpack.c.h.s8.bf16 %v3221_v12  ;;  %v16378_v12 = vld [vmem:[#allocation90_spill] sm:$0xff] }
 0x393   : > { %4916 = vmatpush1.bf16.msra.mxu0 %v4029_v30  ;;  %v4055_v30 = vunpack.c.l.s8.bf16 %v3223_v48 }
 0x394   : > { %5820 = vmatpush1.bf16.msra.mxu1 %v4031_v31  ;;  %4879 = vmatmul.mubr.bf16.gmra.mrb[156].mxu0 %v16375_v42  ;;  %v4062_v31 = vunpack.c.h.s8.bf16 %v3222_v51  ;;  %v3231_v51 = vld [vmem:[#allocation10 + $0xa50] sm:$0xff] }
 0x395   : > { %4917 = vmatprep.subr.bf16.mxu0 %v4038_v20  ;;  %5783 = vmatmul.mubr.bf16.gmra.mrb[156].mxu1 %v16375_v42  ;;  %v4064_v20 = vunpack.c.h.s8.bf16 %v3224_v0 }
 0x396   : > { %5821 = vmatprep.subr.bf16.mxu1 %v4040_v29  ;;  %4921 = vmatprep.mubr.bf16.mxu0 %v16376_v44  ;;  %v3230_v29 = vld [vmem:[#allocation10 + $0xa48] sm:$0xff] }
 0x397   : > { %5825 = vmatprep.mubr.bf16.mxu1 %v16376_v44  ;;  %4918 = vmatpush1.bf16.msra.mxu0 %v4037_v52  ;;  %v16377_v44 = vld [vmem:[#allocation87_spill] sm:$0xff]  ;;  %v4063_v52 = vunpack.c.h.s8.bf16 %v3223_v48  ;;  %v3240_v48 = vld [vmem:[#allocation10 + $0xa98] sm:$0xff] }
 0x398   : > { %5822 = vmatpush1.bf16.msra.mxu1 %v4039_v36  ;;  %4919 = vmatprep.subr.bf16.mxu0 %v4046_v40  ;;  %v4070_v36 = vunpack.c.l.s8.bf16 %v3230_v29  ;;  %v3229_v40 = vld [vmem:[#allocation10 + $0xa40] sm:$0xff] }
 0x399   : > { %5823 = vmatprep.subr.bf16.mxu1 %v4048_v62  ;;  %v4072_v62 = vunpack.c.l.s8.bf16 %v3232_v39  ;;  %v4069_v0 = vunpack.c.l.s8.bf16 %v3229_v40 }
 0x39b   : > { %4920 = vmatpush1.bf16.msra.mxu0 %v4045_v55  ;;  %v4071_v55 = vunpack.c.l.s8.bf16 %v3231_v51 }
 0x39c   : > { %5824 = vmatpush1.bf16.msra.mxu1 %v4047_v33  ;;  %5002 = vmatprep.subr.bf16.mxu0 %v4054_v2  ;;  %v4078_v33 = vunpack.c.h.s8.bf16 %v3230_v29  ;;  %v4080_v2 = vunpack.c.h.s8.bf16 %v3232_v39  ;;  %v4088_v29 = vunpack.c.l.s8.bf16 %v3240_v48  ;;  %v3239_v39 = vld [vmem:[#allocation10 + $0xa90] sm:$0xff] }
 0x39d   : > { %5906 = vmatprep.subr.bf16.mxu1 %v4056_v24  ;;  %v3238_v24 = vld [vmem:[#allocation10 + $0xa88] sm:$0xff] }
 0x39e   : > { %4922 = vmatmul.mubr.bf16.vlgmr.msra.gmra.mrb[128].mxu0 %v16377_v44 }
 0x39f   : > { %5826 = vmatmul.mubr.bf16.vlgmr.msra.gmra.mrb[128].mxu1 %v16377_v44  ;;  %4931 = vmatprep.mubr.bf16.mxu0 %v13081_v38  ;;  %v16460_v44 = vld [vmem:[#allocation77_spill] sm:$0xff] }
 0x3a0   : > { %5003 = vmatpush1.bf16.msra.mxu0 %v4053_v61  ;;  %5835 = vmatprep.mubr.bf16.mxu1 %v13081_v38  ;;  %v4077_v61 = vunpack.c.h.s8.bf16 %v3229_v40  ;;  %v3248_v40 = vld [vmem:[#allocation10 + $0xad8] sm:$0xff]  ;;  %v14146_v38 = vld [vmem:[#allocation10 + $0x870] sm:$0xff] }
 0x3a1   : > { %5907 = vmatpush1.bf16.msra.mxu1 %v4055_v30  ;;  %5004 = vmatprep.subr.bf16.mxu0 %v4062_v31  ;;  %v4079_v30 = vunpack.c.h.s8.bf16 %v3231_v51  ;;  %v4086_v31 = vunpack.c.l.s8.bf16 %v3238_v24 }
 0x3a2   : > { %5908 = vmatprep.subr.bf16.mxu1 %v4064_v20  ;;  %v3237_v20 = vld [vmem:[#allocation10 + $0xa80] sm:$0xff] }
 0x3a3   : > { %v4093_v51 = vunpack.c.h.s8.bf16 %v3237_v20 }
 0x3a4   : > { %5005 = vmatpush1.bf16.msra.mxu0 %v4061_v15  ;;  %v4085_v15 = vunpack.c.l.s8.bf16 %v3237_v20  ;;  %v3256_v20 = vld [vmem:[#allocation10 + $0xb18] sm:$0xff] }
 0x3a5   : > { %5909 = vmatpush1.bf16.msra.mxu1 %v4063_v52  ;;  %5006 = vmatprep.subr.bf16.mxu0 %v4070_v36  ;;  %v4087_v52 = vunpack.c.l.s8.bf16 %v3239_v39  ;;  %v4094_v36 = vunpack.c.h.s8.bf16 %v3238_v24  ;;  %v4104_v24 = vunpack.c.l.s8.bf16 %v3248_v40 }
 0x3a6   : > { %5910 = vmatprep.subr.bf16.mxu1 %v4072_v62  ;;  %4932 = vmatmul.mubr.bf16.gmra.mrb[132].mxu0 %v16378_v12  ;;  %v4096_v62 = vunpack.c.h.s8.bf16 %v3240_v48  ;;  %v3247_v48 = vld [vmem:[#allocation10 + $0xad0] sm:$0xff] }
 0x3a7   : > { %5836 = vmatmul.mubr.bf16.gmra.mrb[132].mxu1 %v16378_v12  ;;  %4941 = vmatprep.mubr.bf16.mxu0 %v13141_v19  ;;  %v16457_v12 = vld [vmem:[#allocation73_spill] sm:$0xff] }
 0x3a8   : > { %5007 = vmatpush1.bf16.msra.mxu0 %v4069_v0  ;;  %5845 = vmatprep.mubr.bf16.mxu1 %v13141_v19  ;;  %v3246_v0 = vld [vmem:[#allocation10 + $0xac8] sm:$0xff] }
 0x3a9   : > { %5911 = vmatpush1.bf16.msra.mxu1 %v4071_v55  ;;  %5008 = vmatprep.subr.bf16.mxu0 %v4078_v33  ;;  %v4095_v55 = vunpack.c.h.s8.bf16 %v3239_v39  ;;  %v4102_v33 = vunpack.c.l.s8.bf16 %v3246_v0  ;;  %v14131_v19 = vld [vmem:[#allocation10 + $0x868] sm:$0xff] }
 0x3aa   : > { %5912 = vmatprep.subr.bf16.mxu1 %v4080_v2  ;;  %v3245_v2 = vld [vmem:[#allocation10 + $0xac0] sm:$0xff] }
 0x3ab   : > { %v4109_v39 = vunpack.c.h.s8.bf16 %v3245_v2 }
 0x3ac   : > { %5009 = vmatpush1.bf16.msra.mxu0 %v4077_v61  ;;  %v4101_v61 = vunpack.c.l.s8.bf16 %v3245_v2  ;;  %v3264_v2 = vld [vmem:[#allocation10 + $0xb58] sm:$0xff] }
 0x3ad   : > { %5913 = vmatpush1.bf16.msra.mxu1 %v4079_v30  ;;  %5010 = vmatprep.subr.bf16.mxu0 %v4086_v31  ;;  %v4103_v30 = vunpack.c.l.s8.bf16 %v3247_v48  ;;  %v4110_v31 = vunpack.c.h.s8.bf16 %v3246_v0  ;;  %v4120_v0 = vunpack.c.l.s8.bf16 %v3256_v20 }
 0x3ae   : > { %5914 = vmatprep.subr.bf16.mxu1 %v4088_v29  ;;  %4942 = vmatmul.mubr.bf16.gmra.mrb[136].mxu0 %v13133_v57  ;;  %v4112_v29 = vunpack.c.h.s8.bf16 %v3248_v40  ;;  %v3255_v40 = vld [vmem:[#allocation10 + $0xb10] sm:$0xff] }
 0x3af   : > { %5846 = vmatmul.mubr.bf16.gmra.mrb[136].mxu1 %v13133_v57  ;;  %4951 = vmatprep.mubr.bf16.mxu0 %v13195_v5  ;;  %v14133_v57 = vld [vmem:[#allocation10 + $0x878] sm:$0xff] }
 0x3b0   : > { %5011 = vmatpush1.bf16.msra.mxu0 %v4085_v15  ;;  %5855 = vmatprep.mubr.bf16.mxu1 %v13195_v5  ;;  %v3254_v15 = vld [vmem:[#allocation10 + $0xb08] sm:$0xff] }
 0x3b1   : > { %5915 = vmatpush1.bf16.msra.mxu1 %v4087_v52  ;;  %5012 = vmatprep.subr.bf16.mxu0 %v4094_v36  ;;  %v4111_v52 = vunpack.c.h.s8.bf16 %v3247_v48  ;;  %v4118_v36 = vunpack.c.l.s8.bf16 %v3254_v15  ;;  %v14111_v5 = vld [vmem:[#allocation10 + $0x828] sm:$0xff] }
 0x3b2   : > { %5916 = vmatprep.subr.bf16.mxu1 %v4096_v62  ;;  %v3253_v62 = vld [vmem:[#allocation10 + $0xb00] sm:$0xff] }
 0x3b3   : > { %v4125_v48 = vunpack.c.h.s8.bf16 %v3253_v62 }
 0x3b4   : > { %5013 = vmatpush1.bf16.msra.mxu0 %v4093_v51  ;;  %v4117_v51 = vunpack.c.l.s8.bf16 %v3253_v62  ;;  %v3272_v62 = vld [vmem:[#allocation10 + $0xb98] sm:$0xff] }
 0x3b5   : > { %5917 = vmatpush1.bf16.msra.mxu1 %v4095_v55  ;;  %5014 = vmatprep.subr.bf16.mxu0 %v4102_v33  ;;  %v4119_v55 = vunpack.c.l.s8.bf16 %v3255_v40  ;;  %v4126_v33 = vunpack.c.h.s8.bf16 %v3254_v15  ;;  %v4136_v15 = vunpack.c.l.s8.bf16 %v3264_v2 }
 0x3b6   : > { %5918 = vmatprep.subr.bf16.mxu1 %v4104_v24  ;;  %4952 = vmatmul.mubr.bf16.gmra.mrb[140].mxu0 %v13187_v10  ;;  %v4128_v24 = vunpack.c.h.s8.bf16 %v3256_v20  ;;  %v3263_v20 = vld [vmem:[#allocation10 + $0xb50] sm:$0xff] }
 0x3b7   : > { %5856 = vmatmul.mubr.bf16.gmra.mrb[140].mxu1 %v13187_v10  ;;  %4961 = vmatprep.mubr.bf16.mxu0 %v13247_v27 }
 0x3b8   : > { %5015 = vmatpush1.bf16.msra.mxu0 %v4101_v61  ;;  %5865 = vmatprep.mubr.bf16.mxu1 %v13247_v27  ;;  %v3262_v61 = vld [vmem:[#allocation10 + $0xb48] sm:$0xff]  ;;  %v14121_v27 = vld [vmem:[#allocation10 + $0x830] sm:$0xff] }
 0x3b9   : > { %5919 = vmatpush1.bf16.msra.mxu1 %v4103_v30  ;;  %5016 = vmatprep.subr.bf16.mxu0 %v4110_v31  ;;  %v4127_v30 = vunpack.c.h.s8.bf16 %v3255_v40  ;;  %v4134_v31 = vunpack.c.l.s8.bf16 %v3262_v61 }
 0x3ba   : > { %5920 = vmatprep.subr.bf16.mxu1 %v4112_v29  ;;  %v3261_v29 = vld [vmem:[#allocation10 + $0xb40] sm:$0xff] }
 0x3bb   : > { %v4141_v40 = vunpack.c.h.s8.bf16 %v3261_v29 }
 0x3bc   : > { %5017 = vmatpush1.bf16.msra.mxu0 %v4109_v39  ;;  %v4133_v39 = vunpack.c.l.s8.bf16 %v3261_v29  ;;  %v3280_v29 = vld [vmem:[#allocation10 + $0xbd8] sm:$0xff] }
 0x3bd   : > { %5921 = vmatpush1.bf16.msra.mxu1 %v4111_v52  ;;  %5018 = vmatprep.subr.bf16.mxu0 %v4118_v36  ;;  %v4135_v52 = vunpack.c.l.s8.bf16 %v3263_v20  ;;  %v4142_v36 = vunpack.c.h.s8.bf16 %v3262_v61  ;;  %v4152_v61 = vunpack.c.l.s8.bf16 %v3272_v62 }
 0x3be   : > { %5922 = vmatprep.subr.bf16.mxu1 %v4120_v0  ;;  %4962 = vmatmul.mubr.bf16.gmra.mrb[144].mxu0 %v13239_v23  ;;  %v4144_v0 = vunpack.c.h.s8.bf16 %v3264_v2  ;;  %v3271_v2 = vld [vmem:[#allocation10 + $0xb90] sm:$0xff] }
 0x3bf   : > { %5866 = vmatmul.mubr.bf16.gmra.mrb[144].mxu1 %v13239_v23  ;;  %4971 = vmatprep.mubr.bf16.mxu0 %v13297_v35  ;;  %v14226_v23 = vld [vmem:[#allocation10 + $0x8f0] sm:$0xff] }
 0x3c0   : > { %5019 = vmatpush1.bf16.msra.mxu0 %v4117_v51  ;;  %5875 = vmatprep.mubr.bf16.mxu1 %v13297_v35  ;;  %v3270_v51 = vld [vmem:[#allocation10 + $0xb88] sm:$0xff] }
 0x3c1   : > { %5923 = vmatpush1.bf16.msra.mxu1 %v4119_v55  ;;  %5020 = vmatprep.subr.bf16.mxu0 %v4126_v33  ;;  %v4143_v55 = vunpack.c.h.s8.bf16 %v3263_v20  ;;  %v4150_v33 = vunpack.c.l.s8.bf16 %v3270_v51 }
 0x3c2   : > { %5924 = vmatprep.subr.bf16.mxu1 %v4128_v24  ;;  %v3269_v24 = vld [vmem:[#allocation10 + $0xb80] sm:$0xff] }
 0x3c3   : > { %v4157_v20 = vunpack.c.h.s8.bf16 %v3269_v24 }
 0x3c4   : > { %5021 = vmatpush1.bf16.msra.mxu0 %v4125_v48  ;;  %v4149_v48 = vunpack.c.l.s8.bf16 %v3269_v24  ;;  %v3288_v24 = vld [vmem:[#allocation10 + $0xc18] sm:$0xff] }
 0x3c5   : > { %5925 = vmatpush1.bf16.msra.mxu1 %v4127_v30  ;;  %5022 = vmatprep.subr.bf16.mxu0 %v4134_v31  ;;  %v4151_v30 = vunpack.c.l.s8.bf16 %v3271_v2  ;;  %v4158_v31 = vunpack.c.h.s8.bf16 %v3270_v51  ;;  %v4168_v51 = vunpack.c.l.s8.bf16 %v3280_v29 }
 0x3c6   : > { %5926 = vmatprep.subr.bf16.mxu1 %v4136_v15  ;;  %4972 = vmatmul.mubr.bf16.gmra.mrb[148].mxu0 %v13288_v17  ;;  %v4160_v15 = vunpack.c.h.s8.bf16 %v3272_v62  ;;  %v3279_v62 = vld [vmem:[#allocation10 + $0xbd0] sm:$0xff] }
 0x3c7   : > { %5876 = vmatmul.mubr.bf16.gmra.mrb[148].mxu1 %v13288_v17  ;;  %4981 = vmatprep.mubr.bf16.mxu0 %v13354_v4  ;;  %v14083_v17 = vld [vmem:[#allocation10 + $0x7b0] sm:$0xff] }
 0x3c8   : > { %5023 = vmatpush1.bf16.msra.mxu0 %v4133_v39  ;;  %5885 = vmatprep.mubr.bf16.mxu1 %v13354_v4  ;;  %v3278_v39 = vld [vmem:[#allocation10 + $0xbc8] sm:$0xff]  ;;  %v16451_v4 = vld [vmem:[#allocation69_spill] sm:$0xff] }
 0x3c9   : > { %5927 = vmatpush1.bf16.msra.mxu1 %v4135_v52  ;;  %5024 = vmatprep.subr.bf16.mxu0 %v4142_v36  ;;  %v4159_v52 = vunpack.c.h.s8.bf16 %v3271_v2  ;;  %v4166_v36 = vunpack.c.l.s8.bf16 %v3278_v39  ;;  %v16379_v2 = vld [vmem:[#allocation39_spill] sm:$0xff] }
 0x3ca   : > { %5928 = vmatprep.subr.bf16.mxu1 %v4144_v0  ;;  %v3277_v0 = vld [vmem:[#allocation10 + $0xbc0] sm:$0xff] }
 0x3cc   : > { %5025 = vmatpush1.bf16.msra.mxu0 %v4141_v40  ;;  %v4165_v40 = vunpack.c.l.s8.bf16 %v3277_v0 }
 0x3cd   : > { %5929 = vmatpush1.bf16.msra.mxu1 %v4143_v55  ;;  %5026 = vmatprep.subr.bf16.mxu0 %v4150_v33  ;;  %v4167_v55 = vunpack.c.l.s8.bf16 %v3279_v62  ;;  %v4174_v33 = vunpack.c.h.s8.bf16 %v3278_v39  ;;  %v3285_v39 = vld [vmem:[#allocation10 + $0xc00] sm:$0xff] }
 0x3ce   : > { %5930 = vmatprep.subr.bf16.mxu1 %v4152_v61  ;;  %4982 = vmatmul.mubr.bf16.gmra.mrb[152].mxu0 %v13345_v47  ;;  %v4176_v61 = vunpack.c.h.s8.bf16 %v3280_v29  ;;  %v3287_v29 = vld [vmem:[#allocation10 + $0xc10] sm:$0xff] }
 0x3cf   : > { %5886 = vmatmul.mubr.bf16.gmra.mrb[152].mxu1 %v13345_v47  ;;  %4991 = vmatprep.mubr.bf16.mxu0 %v13407_v60  ;;  %v14045_v47 = vld [vmem:[#allocation10 + $0x778] sm:$0xff] }
 0x3d0   : > { %5027 = vmatpush1.bf16.msra.mxu0 %v4149_v48  ;;  %5895 = vmatprep.mubr.bf16.mxu1 %v13407_v60  ;;  %v3286_v48 = vld [vmem:[#allocation10 + $0xc08] sm:$0xff] }
 0x3d1   : > { %5931 = vmatpush1.bf16.msra.mxu1 %v4151_v30  ;;  %5028 = vmatprep.subr.bf16.mxu0 %v4158_v31  ;;  %v4173_v30 = vunpack.c.h.s8.bf16 %v3277_v0  ;;  %v4175_v31 = vunpack.c.h.s8.bf16 %v3279_v62  ;;  %v4192_v0 = vunpack.c.h.s8.bf16 %v3288_v24  ;;  %v16381_v62 = vld [vmem:[#allocation30_spill] sm:$0xff] }
 0x3d2   : > { %5932 = vmatprep.subr.bf16.mxu1 %v4160_v15  ;;  %v4182_v15 = vunpack.c.l.s8.bf16 %v3286_v48  ;;  %v14043_v60 = vld [vmem:[#allocation10 + $0x768] sm:$0xff] }
 0x3d4   : > { %5029 = vmatpush1.bf16.msra.mxu0 %v4157_v20  ;;  %v4184_v20 = vunpack.c.l.s8.bf16 %v3288_v24 }
 0x3d5   : > { %5933 = vmatpush1.bf16.msra.mxu1 %v4159_v52  ;;  %5030 = vmatprep.subr.bf16.mxu0 %v4166_v36  ;;  %v4181_v52 = vunpack.c.l.s8.bf16 %v3285_v39  ;;  %v4183_v36 = vunpack.c.l.s8.bf16 %v3287_v29 }
 0x3d6   : > { %5934 = vmatprep.subr.bf16.mxu1 %v4168_v51  ;;  %4992 = vmatmul.mubr.bf16.gmra.mrb[156].mxu0 %v13399_v1  ;;  %v4190_v51 = vunpack.c.h.s8.bf16 %v3286_v48 }
 0x3d7   : > { %5896 = vmatmul.mubr.bf16.gmra.mrb[156].mxu1 %v13399_v1  ;;  %5034 = vmatprep.mubr.bf16.mxu0 %v16379_v2  ;;  %v16382_v1 = vld [vmem:[#allocation28_spill] sm:$0xff] }
 0x3d8   : > { %5031 = vmatpush1.bf16.msra.mxu0 %v4165_v40  ;;  %5938 = vmatprep.mubr.bf16.mxu1 %v16379_v2  ;;  %v16380_v40 = vld [vmem:[#allocation89_spill] sm:$0xff] }
 0x3d9   : > { %5935 = vmatpush1.bf16.msra.mxu1 %v4167_v55  ;;  %5032 = vmatprep.subr.bf16.mxu0 %v4174_v33  ;;  %v3294_v55 = vld [vmem:[#allocation10 + $0xc48] sm:$0xff]  ;;  %v3296_v33 = vld [vmem:[#allocation10 + $0xc58] sm:$0xff] }
 0x3da   : > { %5936 = vmatprep.subr.bf16.mxu1 %v4176_v61  ;;  %v4189_v61 = vunpack.c.h.s8.bf16 %v3285_v39  ;;  %v4200_v48 = vunpack.c.l.s8.bf16 %v3296_v33  ;;  %v4206_v2 = vunpack.c.h.s8.bf16 %v3294_v55  ;;  %v3304_v39 = vld [vmem:[#allocation10 + $0xc98] sm:$0xff] }
 0x3dc   : > { %5033 = vmatpush1.bf16.msra.mxu0 %v4173_v30  ;;  %v4191_v30 = vunpack.c.h.s8.bf16 %v3287_v29 }
 0x3dd   : > { %5937 = vmatpush1.bf16.msra.mxu1 %v4175_v31  ;;  %5115 = vmatprep.subr.bf16.mxu0 %v4182_v15  ;;  %v4198_v31 = vunpack.c.l.s8.bf16 %v3294_v55  ;;  %v3293_v15 = vld [vmem:[#allocation10 + $0xc40] sm:$0xff]  ;;  %v4216_v55 = vunpack.c.l.s8.bf16 %v3304_v39 }
 0x3de   : > { %6019 = vmatprep.subr.bf16.mxu1 %v4184_v20  ;;  %v3295_v20 = vld [vmem:[#allocation10 + $0xc50] sm:$0xff]  ;;  %v4197_v24 = vunpack.c.l.s8.bf16 %v3293_v15  ;;  %v4205_v29 = vunpack.c.h.s8.bf16 %v3293_v15 }
 0x3df   : > { %5035 = vmatmul.mubr.bf16.vlgmr.msra.gmra.mrb[128].mxu0 %v16380_v40 }
 0x3e0   : > { %5939 = vmatmul.mubr.bf16.vlgmr.msra.gmra.mrb[128].mxu1 %v16380_v40  ;;  %5044 = vmatprep.mubr.bf16.mxu0 %v16381_v62  ;;  %v4199_v40 = vunpack.c.l.s8.bf16 %v3295_v20 }
 0x3e1   : > { %5116 = vmatpush1.bf16.msra.mxu0 %v4181_v52  ;;  %5948 = vmatprep.mubr.bf16.mxu1 %v16381_v62  ;;  %v4208_v52 = vunpack.c.h.s8.bf16 %v3296_v33  ;;  %v3302_v62 = vld [vmem:[#allocation10 + $0xc88] sm:$0xff] }
 0x3e2   : > { %6020 = vmatpush1.bf16.msra.mxu1 %v4183_v36  ;;  %5117 = vmatprep.subr.bf16.mxu0 %v4190_v51  ;;  %v4207_v36 = vunpack.c.h.s8.bf16 %v3295_v20  ;;  %v4214_v51 = vunpack.c.l.s8.bf16 %v3302_v62 }
 0x3e3   : > { %6021 = vmatprep.subr.bf16.mxu1 %v4192_v0  ;;  %v3301_v0 = vld [vmem:[#allocation10 + $0xc80] sm:$0xff] }
 0x3e4   : > { %v4213_v33 = vunpack.c.l.s8.bf16 %v3301_v0 }
 0x3e5   : > { %5118 = vmatpush1.bf16.msra.mxu0 %v4189_v61  ;;  %v3303_v61 = vld [vmem:[#allocation10 + $0xc90] sm:$0xff] }
 0x3e6   : > { %6022 = vmatpush1.bf16.msra.mxu1 %v4191_v30  ;;  %5119 = vmatprep.subr.bf16.mxu0 %v4198_v31  ;;  %v4215_v30 = vunpack.c.l.s8.bf16 %v3303_v61  ;;  %v4222_v31 = vunpack.c.h.s8.bf16 %v3302_v62  ;;  %v4223_v15 = vunpack.c.h.s8.bf16 %v3303_v61  ;;  %v3320_v61 = vld [vmem:[#allocation10 + $0xd18] sm:$0xff] }
 0x3e7   : > { %5045 = vmatmul.mubr.bf16.gmra.mrb[132].mxu0 %v16382_v1  ;;  %6023 = vmatprep.subr.bf16.mxu1 %v4200_v48  ;;  %v16383_v48 = vld [vmem:[#allocation100_spill] sm:$0xff] }
 0x3e8   : > { %5949 = vmatmul.mubr.bf16.gmra.mrb[132].mxu1 %v16382_v1  ;;  %5054 = vmatprep.mubr.bf16.mxu0 %v13143_v11  ;;  %v14067_v1 = vld [vmem:[#allocation10 + $0x7a8] sm:$0xff] }
 0x3e9   : > { %5120 = vmatpush1.bf16.msra.mxu0 %v4197_v24  ;;  %5958 = vmatprep.mubr.bf16.mxu1 %v13143_v11  ;;  %v4224_v24 = vunpack.c.h.s8.bf16 %v3304_v39  ;;  %v3310_v11 = vld [vmem:[#allocation10 + $0xcc8] sm:$0xff] }
 0x3ea   : > { %6024 = vmatpush1.bf16.msra.mxu1 %v4199_v40  ;;  %5121 = vmatprep.subr.bf16.mxu0 %v4206_v2  ;;  %v3312_v2 = vld [vmem:[#allocation10 + $0xcd8] sm:$0xff]  ;;  %v4221_v40 = vunpack.c.h.s8.bf16 %v3301_v0  ;;  %v4230_v20 = vunpack.c.l.s8.bf16 %v3310_v11  ;;  %v16384_v0 = vld [vmem:[#allocation122_spill] sm:$0xff] }
 0x3eb   : > { %6025 = vmatprep.subr.bf16.mxu1 %v4208_v52  ;;  %v3309_v52 = vld [vmem:[#allocation10 + $0xcc0] sm:$0xff]  ;;  %v4232_v62 = vunpack.c.l.s8.bf16 %v3312_v2 }
 0x3ec   : > { %v4229_v39 = vunpack.c.l.s8.bf16 %v3309_v52 }
 0x3ed   : > { %5122 = vmatpush1.bf16.msra.mxu0 %v4205_v29  ;;  %v3311_v29 = vld [vmem:[#allocation10 + $0xcd0] sm:$0xff] }
 0x3ee   : > { %6026 = vmatpush1.bf16.msra.mxu1 %v4207_v36  ;;  %5123 = vmatprep.subr.bf16.mxu0 %v4214_v51  ;;  %v4231_v36 = vunpack.c.l.s8.bf16 %v3311_v29  ;;  %v4238_v51 = vunpack.c.h.s8.bf16 %v3310_v11  ;;  %v4248_v11 = vunpack.c.l.s8.bf16 %v3320_v61 }
 0x3ef   : > { %5055 = vmatmul.mubr.bf16.gmra.mrb[136].mxu0 %v16383_v48  ;;  %6027 = vmatprep.subr.bf16.mxu1 %v4216_v55  ;;  %v4240_v55 = vunpack.c.h.s8.bf16 %v3312_v2 }
 0x3f0   : > { %5959 = vmatmul.mubr.bf16.gmra.mrb[136].mxu1 %v16383_v48  ;;  %5064 = vmatprep.mubr.bf16.mxu0 %v13197_v6 }
 0x3f1   : > { %5124 = vmatpush1.bf16.msra.mxu0 %v4213_v33  ;;  %5968 = vmatprep.mubr.bf16.mxu1 %v13197_v6  ;;  %v3318_v33 = vld [vmem:[#allocation10 + $0xd08] sm:$0xff]  ;;  %v14069_v6 = vld [vmem:[#allocation10 + $0x7b8] sm:$0xff] }
 0x3f2   : > { %6028 = vmatpush1.bf16.msra.mxu1 %v4215_v30  ;;  %5125 = vmatprep.subr.bf16.mxu0 %v4222_v31  ;;  %v4237_v30 = vunpack.c.h.s8.bf16 %v3309_v52  ;;  %v4239_v31 = vunpack.c.h.s8.bf16 %v3311_v29  ;;  %v16386_v52 = vld [vmem:[#allocation126_spill] sm:$0xff]  ;;  %v3328_v29 = vld [vmem:[#allocation10 + $0xd58] sm:$0xff] }
 0x3f3   : > { %6029 = vmatprep.subr.bf16.mxu1 %v4224_v24  ;;  %v4246_v24 = vunpack.c.l.s8.bf16 %v3318_v33 }
 0x3f5   : > { %5126 = vmatpush1.bf16.msra.mxu0 %v4221_v40  ;;  %v3317_v40 = vld [vmem:[#allocation10 + $0xd00] sm:$0xff] }
 0x3f6   : > { %6030 = vmatpush1.bf16.msra.mxu1 %v4223_v15  ;;  %5127 = vmatprep.subr.bf16.mxu0 %v4230_v20  ;;  %v3319_v15 = vld [vmem:[#allocation10 + $0xd10] sm:$0xff]  ;;  %v4245_v2 = vunpack.c.l.s8.bf16 %v3317_v40 }
 0x3f7   : > { %5065 = vmatmul.mubr.bf16.gmra.mrb[140].mxu0 %v13189_v56  ;;  %6031 = vmatprep.subr.bf16.mxu1 %v4232_v62  ;;  %v4247_v20 = vunpack.c.l.s8.bf16 %v3319_v15  ;;  %v4254_v62 = vunpack.c.h.s8.bf16 %v3318_v33  ;;  %v4264_v33 = vunpack.c.l.s8.bf16 %v3328_v29 }
 0x3f8   : > { %5969 = vmatmul.mubr.bf16.gmra.mrb[140].mxu1 %v13189_v56  ;;  %5074 = vmatprep.mubr.bf16.mxu0 %v16384_v0  ;;  %v16385_v56 = vld [vmem:[#allocation120_spill] sm:$0xff] }
 0x3f9   : > { %5128 = vmatpush1.bf16.msra.mxu0 %v4229_v39  ;;  %5978 = vmatprep.mubr.bf16.mxu1 %v16384_v0  ;;  %v4256_v39 = vunpack.c.h.s8.bf16 %v3320_v61  ;;  %v3326_v0 = vld [vmem:[#allocation10 + $0xd48] sm:$0xff] }
 0x3fa   : > { %6032 = vmatpush1.bf16.msra.mxu1 %v4231_v36  ;;  %5129 = vmatprep.subr.bf16.mxu0 %v4238_v51  ;;  %v4253_v36 = vunpack.c.h.s8.bf16 %v3317_v40  ;;  %v4255_v51 = vunpack.c.h.s8.bf16 %v3319_v15  ;;  %v3336_v40 = vld [vmem:[#allocation10 + $0xd98] sm:$0xff] }
 0x3fb   : > { %6033 = vmatprep.subr.bf16.mxu1 %v4240_v55  ;;  %v4262_v55 = vunpack.c.l.s8.bf16 %v3326_v0 }
 0x3fd   : > { %5130 = vmatpush1.bf16.msra.mxu0 %v4237_v30  ;;  %v3325_v30 = vld [vmem:[#allocation10 + $0xd40] sm:$0xff] }
 0x3fe   : > { %6034 = vmatpush1.bf16.msra.mxu1 %v4239_v31  ;;  %5131 = vmatprep.subr.bf16.mxu0 %v4246_v24  ;;  %v3327_v31 = vld [vmem:[#allocation10 + $0xd50] sm:$0xff]  ;;  %v4261_v61 = vunpack.c.l.s8.bf16 %v3325_v30  ;;  %v4269_v15 = vunpack.c.h.s8.bf16 %v3325_v30  ;;  %v3344_v30 = vld [vmem:[#allocation10 + $0xdd8] sm:$0xff] }
 0x3ff   : > { %5075 = vmatmul.mubr.bf16.gmra.mrb[144].mxu0 %v16385_v56  ;;  %6035 = vmatprep.subr.bf16.mxu1 %v4248_v11  ;;  %v4263_v24 = vunpack.c.l.s8.bf16 %v3327_v31  ;;  %v4270_v11 = vunpack.c.h.s8.bf16 %v3326_v0  ;;  %v4280_v0 = vunpack.c.l.s8.bf16 %v3336_v40 }
 0x400   : > { %5979 = vmatmul.mubr.bf16.gmra.mrb[144].mxu1 %v16385_v56  ;;  %5084 = vmatprep.mubr.bf16.mxu0 %v16386_v52  ;;  %v16387_v56 = vld [vmem:[#allocation124_spill] sm:$0xff] }
 0x401   : > { %5132 = vmatpush1.bf16.msra.mxu0 %v4245_v2  ;;  %5988 = vmatprep.mubr.bf16.mxu1 %v16386_v52  ;;  %v4272_v2 = vunpack.c.h.s8.bf16 %v3328_v29  ;;  %v3334_v52 = vld [vmem:[#allocation10 + $0xd88] sm:$0xff] }
 0x402   : > { %6036 = vmatpush1.bf16.msra.mxu1 %v4247_v20  ;;  %5133 = vmatprep.subr.bf16.mxu0 %v4254_v62  ;;  %v4271_v20 = vunpack.c.h.s8.bf16 %v3327_v31  ;;  %v4278_v62 = vunpack.c.l.s8.bf16 %v3334_v52 }
 0x403   : > { %6037 = vmatprep.subr.bf16.mxu1 %v4256_v39  ;;  %v3333_v39 = vld [vmem:[#allocation10 + $0xd80] sm:$0xff] }
 0x404   : > { %v4277_v29 = vunpack.c.l.s8.bf16 %v3333_v39  ;;  %v4285_v31 = vunpack.c.h.s8.bf16 %v3333_v39  ;;  %v3352_v39 = vld [vmem:[#allocation10 + $0xe18] sm:$0xff] }
 0x405   : > { %5134 = vmatpush1.bf16.msra.mxu0 %v4253_v36  ;;  %v3335_v36 = vld [vmem:[#allocation10 + $0xd90] sm:$0xff] }
 0x406   : > { %6038 = vmatpush1.bf16.msra.mxu1 %v4255_v51  ;;  %5135 = vmatprep.subr.bf16.mxu0 %v4262_v55  ;;  %v4279_v51 = vunpack.c.l.s8.bf16 %v3335_v36  ;;  %v4286_v55 = vunpack.c.h.s8.bf16 %v3334_v52  ;;  %v4296_v52 = vunpack.c.l.s8.bf16 %v3344_v30 }
 0x407   : > { %5085 = vmatmul.mubr.bf16.gmra.mrb[148].mxu0 %v16387_v56  ;;  %6039 = vmatprep.subr.bf16.mxu1 %v4264_v33  ;;  %v16388_v33 = vld [vmem:[#allocation112_spill] sm:$0xff] }
 0x408   : > { %5989 = vmatmul.mubr.bf16.gmra.mrb[148].mxu1 %v16387_v56  ;;  %5094 = vmatprep.mubr.bf16.mxu0 %v13360_v37 }
 0x409   : > { %5136 = vmatpush1.bf16.msra.mxu0 %v4261_v61  ;;  %5998 = vmatprep.mubr.bf16.mxu1 %v13360_v37  ;;  %v4288_v61 = vunpack.c.h.s8.bf16 %v3336_v40  ;;  %v3342_v37 = vld [vmem:[#allocation10 + $0xdc8] sm:$0xff] }
 0x40a   : > { %6040 = vmatpush1.bf16.msra.mxu1 %v4263_v24  ;;  %5137 = vmatprep.subr.bf16.mxu0 %v4270_v11  ;;  %v4287_v24 = vunpack.c.h.s8.bf16 %v3335_v36  ;;  %v4294_v11 = vunpack.c.l.s8.bf16 %v3342_v37 }
 0x40b   : > { %6041 = vmatprep.subr.bf16.mxu1 %v4272_v2  ;;  %v3341_v2 = vld [vmem:[#allocation10 + $0xdc0] sm:$0xff] }
 0x40c   : > { %v4293_v40 = vunpack.c.l.s8.bf16 %v3341_v2  ;;  %v4301_v36 = vunpack.c.h.s8.bf16 %v3341_v2  ;;  %v3360_v2 = vld [vmem:[#allocation10 + $0xe58] sm:$0xff] }
 0x40d   : > { %5138 = vmatpush1.bf16.msra.mxu0 %v4269_v15  ;;  %v3343_v15 = vld [vmem:[#allocation10 + $0xdd0] sm:$0xff] }
 0x40e   : > { %6042 = vmatpush1.bf16.msra.mxu1 %v4271_v20  ;;  %5139 = vmatprep.subr.bf16.mxu0 %v4278_v62  ;;  %v4295_v20 = vunpack.c.l.s8.bf16 %v3343_v15  ;;  %v4302_v62 = vunpack.c.h.s8.bf16 %v3342_v37  ;;  %v4312_v37 = vunpack.c.l.s8.bf16 %v3352_v39 }
 0x40f   : > { %5095 = vmatmul.mubr.bf16.gmra.mrb[152].mxu0 %v16388_v33  ;;  %6043 = vmatprep.subr.bf16.mxu1 %v4280_v0  ;;  %v4304_v0 = vunpack.c.h.s8.bf16 %v3344_v30 }
 0x410   : > { %5999 = vmatmul.mubr.bf16.gmra.mrb[152].mxu1 %v16388_v33  ;;  %5104 = vmatprep.mubr.bf16.mxu0 %v13409_v53 }
 0x411   : > { %5140 = vmatpush1.bf16.msra.mxu0 %v4277_v29  ;;  %6008 = vmatprep.mubr.bf16.mxu1 %v13409_v53  ;;  %v3350_v29 = vld [vmem:[#allocation10 + $0xe08] sm:$0xff] }
 0x412   : > { %6044 = vmatpush1.bf16.msra.mxu1 %v4279_v51  ;;  %5141 = vmatprep.subr.bf16.mxu0 %v4286_v55  ;;  %v4303_v51 = vunpack.c.h.s8.bf16 %v3343_v15  ;;  %v4310_v55 = vunpack.c.l.s8.bf16 %v3350_v29 }
 0x413   : > { %6045 = vmatprep.subr.bf16.mxu1 %v4288_v61  ;;  %v3349_v61 = vld [vmem:[#allocation10 + $0xe00] sm:$0xff] }
 0x414   : > { %v4309_v30 = vunpack.c.l.s8.bf16 %v3349_v61  ;;  %v4317_v15 = vunpack.c.h.s8.bf16 %v3349_v61  ;;  %v3368_v61 = vld [vmem:[#allocation10 + $0xe98] sm:$0xff] }
 0x415   : > { %5142 = vmatpush1.bf16.msra.mxu0 %v4285_v31  ;;  %v3351_v31 = vld [vmem:[#allocation10 + $0xe10] sm:$0xff] }
 0x416   : > { %6046 = vmatpush1.bf16.msra.mxu1 %v4287_v24  ;;  %5143 = vmatprep.subr.bf16.mxu0 %v4294_v11  ;;  %v4311_v24 = vunpack.c.l.s8.bf16 %v3351_v31  ;;  %v4318_v11 = vunpack.c.h.s8.bf16 %v3350_v29  ;;  %v4328_v29 = vunpack.c.l.s8.bf16 %v3360_v2 }
 0x417   : > { %5105 = vmatmul.mubr.bf16.gmra.mrb[156].mxu0 %v13401_v50  ;;  %6047 = vmatprep.subr.bf16.mxu1 %v4296_v52  ;;  %v4320_v52 = vunpack.c.h.s8.bf16 %v3352_v39 }
 0x418   : > { %6009 = vmatmul.mubr.bf16.gmra.mrb[156].mxu1 %v13401_v50  ;;  %5147 = vmatprep.mubr.bf16.mxu0 %v13463_v34 }
 0x419   : > { %5144 = vmatpush1.bf16.msra.mxu0 %v4293_v40  ;;  %6051 = vmatprep.mubr.bf16.mxu1 %v13463_v34  ;;  %v3358_v40 = vld [vmem:[#allocation10 + $0xe48] sm:$0xff] }
 0x41a   : > { %6048 = vmatpush1.bf16.msra.mxu1 %v4295_v20  ;;  %5145 = vmatprep.subr.bf16.mxu0 %v4302_v62  ;;  %v4319_v20 = vunpack.c.h.s8.bf16 %v3351_v31  ;;  %v4326_v62 = vunpack.c.l.s8.bf16 %v3358_v40 }
 0x41b   : > { %6049 = vmatprep.subr.bf16.mxu1 %v4304_v0  ;;  %v3357_v0 = vld [vmem:[#allocation10 + $0xe40] sm:$0xff] }
 0x41c   : > { %v4325_v39 = vunpack.c.l.s8.bf16 %v3357_v0  ;;  %v4333_v31 = vunpack.c.h.s8.bf16 %v3357_v0  ;;  %v16390_v0 = vld [vmem:[#allocation146_spill] sm:$0xff] }
 0x41d   : > { %5146 = vmatpush1.bf16.msra.mxu0 %v4301_v36  ;;  %v3359_v36 = vld [vmem:[#allocation10 + $0xe50] sm:$0xff] }
 0x41e   : > { %6050 = vmatpush1.bf16.msra.mxu1 %v4303_v51  ;;  %5228 = vmatprep.subr.bf16.mxu0 %v4310_v55  ;;  %v4327_v51 = vunpack.c.l.s8.bf16 %v3359_v36  ;;  %v4334_v55 = vunpack.c.h.s8.bf16 %v3358_v40  ;;  %v4344_v40 = vunpack.c.l.s8.bf16 %v3368_v61 }
 0x41f   : > { %6132 = vmatprep.subr.bf16.mxu1 %v4312_v37  ;;  %v4336_v37 = vunpack.c.h.s8.bf16 %v3360_v2 }
 0x420   : > { %5148 = vmatmul.mubr.bf16.vlgmr.msra.gmra.mrb[128].mxu0 %v13455_v7 }
 0x421   : > { %6052 = vmatmul.mubr.bf16.vlgmr.msra.gmra.mrb[128].mxu1 %v13455_v7  ;;  %5157 = vmatprep.mubr.bf16.mxu0 %v13511_v25 }
 0x422   : > { %5229 = vmatpush1.bf16.msra.mxu0 %v4309_v30  ;;  %6061 = vmatprep.mubr.bf16.mxu1 %v13511_v25  ;;  %v3366_v30 = vld [vmem:[#allocation10 + $0xe88] sm:$0xff]  ;;  %v14009_v25 = vld [vmem:[#allocation10 + $0x6f0] sm:$0xff] }
 0x423   : > { %6133 = vmatpush1.bf16.msra.mxu1 %v4311_v24  ;;  %5230 = vmatprep.subr.bf16.mxu0 %v4318_v11  ;;  %v4335_v24 = vunpack.c.h.s8.bf16 %v3359_v36  ;;  %v4342_v11 = vunpack.c.l.s8.bf16 %v3366_v30  ;;  %v3376_v36 = vld [vmem:[#allocation10 + $0xed8] sm:$0xff] }
 0x424   : > { %6134 = vmatprep.subr.bf16.mxu1 %v4320_v52  ;;  %v3365_v52 = vld [vmem:[#allocation10 + $0xe80] sm:$0xff] }
 0x425   : > { %v4341_v2 = vunpack.c.l.s8.bf16 %v3365_v52 }
 0x426   : > { %5231 = vmatpush1.bf16.msra.mxu0 %v4317_v15  ;;  %v3367_v15 = vld [vmem:[#allocation10 + $0xe90] sm:$0xff] }
 0x427   : > { %6135 = vmatpush1.bf16.msra.mxu1 %v4319_v20  ;;  %5232 = vmatprep.subr.bf16.mxu0 %v4326_v62  ;;  %v4343_v20 = vunpack.c.l.s8.bf16 %v3367_v15  ;;  %v4350_v62 = vunpack.c.h.s8.bf16 %v3366_v30  ;;  %v4360_v30 = vunpack.c.l.s8.bf16 %v3376_v36 }
 0x428   : > { %5158 = vmatmul.mubr.bf16.gmra.mrb[132].mxu0 %v13503_v41  ;;  %6136 = vmatprep.subr.bf16.mxu1 %v4328_v29  ;;  %v16389_v29 = vld [vmem:[#allocation140_spill] sm:$0xff] }
 0x429   : > { %6062 = vmatmul.mubr.bf16.gmra.mrb[132].mxu1 %v13503_v41  ;;  %5167 = vmatprep.mubr.bf16.mxu0 %v13567_v18  ;;  %v14007_v41 = vld [vmem:[#allocation10 + $0x6e0] sm:$0xff] }
 0x42a   : > { %5233 = vmatpush1.bf16.msra.mxu0 %v4325_v39  ;;  %6071 = vmatprep.mubr.bf16.mxu1 %v13567_v18  ;;  %v4352_v39 = vunpack.c.h.s8.bf16 %v3368_v61  ;;  %v3374_v18 = vld [vmem:[#allocation10 + $0xec8] sm:$0xff]  ;;  %v3849_v53 = vunpack.c.l.s8.bf16 %v14007_v41  ;;  %v3857_v56 = vunpack.c.h.s8.bf16 %v14007_v41 }
 0x42b   : > { %6137 = vmatpush1.bf16.msra.mxu1 %v4327_v51  ;;  %5234 = vmatprep.subr.bf16.mxu0 %v4334_v55  ;;  %v4349_v51 = vunpack.c.h.s8.bf16 %v3365_v52  ;;  %v4351_v55 = vunpack.c.h.s8.bf16 %v3367_v15  ;;  %v16392_v52 = vld [vmem:[#allocation150_spill] sm:$0xff]  ;;  %v3384_v15 = vld [vmem:[#allocation10 + $0xf18] sm:$0xff] }
 0x42c   : > { %6138 = vmatprep.subr.bf16.mxu1 %v4336_v37  ;;  %v4358_v37 = vunpack.c.l.s8.bf16 %v3374_v18 }
 0x42e   : > { %5235 = vmatpush1.bf16.msra.mxu0 %v4333_v31  ;;  %v3373_v31 = vld [vmem:[#allocation10 + $0xec0] sm:$0xff] }
 0x42f   : > { %6139 = vmatpush1.bf16.msra.mxu1 %v4335_v24  ;;  %5236 = vmatprep.subr.bf16.mxu0 %v4342_v11  ;;  %v3375_v24 = vld [vmem:[#allocation10 + $0xed0] sm:$0xff]  ;;  %v4357_v61 = vunpack.c.l.s8.bf16 %v3373_v31 }
 0x430   : > { %5168 = vmatmul.mubr.bf16.gmra.mrb[136].mxu0 %v16389_v29  ;;  %6140 = vmatprep.subr.bf16.mxu1 %v4344_v40  ;;  %v4359_v11 = vunpack.c.l.s8.bf16 %v3375_v24  ;;  %v4366_v40 = vunpack.c.h.s8.bf16 %v3374_v18  ;;  %v4376_v18 = vunpack.c.l.s8.bf16 %v3384_v15 }
 0x431   : > { %6072 = vmatmul.mubr.bf16.gmra.mrb[136].mxu1 %v16389_v29  ;;  %5177 = vmatprep.mubr.bf16.mxu0 %v16390_v0  ;;  %v16391_v29 = vld [vmem:[#allocation144_spill] sm:$0xff] }
 0x432   : > { %5237 = vmatpush1.bf16.msra.mxu0 %v4341_v2  ;;  %6081 = vmatprep.mubr.bf16.mxu1 %v16390_v0  ;;  %v4368_v2 = vunpack.c.h.s8.bf16 %v3376_v36  ;;  %v3382_v0 = vld [vmem:[#allocation10 + $0xf08] sm:$0xff] }
 0x433   : > { %6141 = vmatpush1.bf16.msra.mxu1 %v4343_v20  ;;  %5238 = vmatprep.subr.bf16.mxu0 %v4350_v62  ;;  %v4365_v20 = vunpack.c.h.s8.bf16 %v3373_v31  ;;  %v4367_v62 = vunpack.c.h.s8.bf16 %v3375_v24  ;;  %v16394_v31 = vld [vmem:[#allocation154_spill] sm:$0xff]  ;;  %v3392_v24 = vld [vmem:[#allocation10 + $0xf58] sm:$0xff] }
 0x434   : > { %6142 = vmatprep.subr.bf16.mxu1 %v4352_v39  ;;  %v4374_v39 = vunpack.c.l.s8.bf16 %v3382_v0 }
 0x436   : > { %5239 = vmatpush1.bf16.msra.mxu0 %v4349_v51  ;;  %v3381_v51 = vld [vmem:[#allocation10 + $0xf00] sm:$0xff] }
 0x437   : > { %6143 = vmatpush1.bf16.msra.mxu1 %v4351_v55  ;;  %5240 = vmatprep.subr.bf16.mxu0 %v4358_v37  ;;  %v3383_v55 = vld [vmem:[#allocation10 + $0xf10] sm:$0xff]  ;;  %v4373_v36 = vunpack.c.l.s8.bf16 %v3381_v51 }
 0x438   : > { %5178 = vmatmul.mubr.bf16.gmra.mrb[140].mxu0 %v16391_v29  ;;  %6144 = vmatprep.subr.bf16.mxu1 %v4360_v30  ;;  %v4375_v37 = vunpack.c.l.s8.bf16 %v3383_v55  ;;  %v4382_v30 = vunpack.c.h.s8.bf16 %v3382_v0  ;;  %v4392_v0 = vunpack.c.l.s8.bf16 %v3392_v24 }
 0x439   : > { %6082 = vmatmul.mubr.bf16.gmra.mrb[140].mxu1 %v16391_v29  ;;  %5187 = vmatprep.mubr.bf16.mxu0 %v16392_v52  ;;  %v16393_v29 = vld [vmem:[#allocation148_spill] sm:$0xff] }
 0x43a   : > { %5241 = vmatpush1.bf16.msra.mxu0 %v4357_v61  ;;  %6091 = vmatprep.mubr.bf16.mxu1 %v16392_v52  ;;  %v4384_v61 = vunpack.c.h.s8.bf16 %v3384_v15  ;;  %v3390_v52 = vld [vmem:[#allocation10 + $0xf48] sm:$0xff] }
 0x43b   : > { %6145 = vmatpush1.bf16.msra.mxu1 %v4359_v11  ;;  %5242 = vmatprep.subr.bf16.mxu0 %v4366_v40  ;;  %v4381_v11 = vunpack.c.h.s8.bf16 %v3381_v51  ;;  %v4383_v40 = vunpack.c.h.s8.bf16 %v3383_v55  ;;  %v3400_v51 = vld [vmem:[#allocation10 + $0xf98] sm:$0xff] }
 0x43c   : > { %6146 = vmatprep.subr.bf16.mxu1 %v4368_v2  ;;  %v4390_v2 = vunpack.c.l.s8.bf16 %v3390_v52 }
 0x43e   : > { %5243 = vmatpush1.bf16.msra.mxu0 %v4365_v20  ;;  %v3389_v20 = vld [vmem:[#allocation10 + $0xf40] sm:$0xff] }
 0x43f   : > { %6147 = vmatpush1.bf16.msra.mxu1 %v4367_v62  ;;  %5244 = vmatprep.subr.bf16.mxu0 %v4374_v39  ;;  %v3391_v62 = vld [vmem:[#allocation10 + $0xf50] sm:$0xff]  ;;  %v4389_v15 = vunpack.c.l.s8.bf16 %v3389_v20  ;;  %v4397_v55 = vunpack.c.h.s8.bf16 %v3389_v20  ;;  %v3408_v20 = vld [vmem:[#allocation10 + $0xfd8] sm:$0xff] }
 0x440   : > { %5188 = vmatmul.mubr.bf16.gmra.mrb[144].mxu0 %v16393_v29  ;;  %6148 = vmatprep.subr.bf16.mxu1 %v4376_v18  ;;  %v4391_v39 = vunpack.c.l.s8.bf16 %v3391_v62  ;;  %v4398_v18 = vunpack.c.h.s8.bf16 %v3390_v52  ;;  %v4408_v52 = vunpack.c.l.s8.bf16 %v3400_v51 }
 0x441   : > { %6092 = vmatmul.mubr.bf16.gmra.mrb[144].mxu1 %v16393_v29  ;;  %5197 = vmatprep.mubr.bf16.mxu0 %v16394_v31  ;;  %v16395_v29 = vld [vmem:[#allocation152_spill] sm:$0xff] }
 0x442   : > { %5245 = vmatpush1.bf16.msra.mxu0 %v4373_v36  ;;  %6101 = vmatprep.mubr.bf16.mxu1 %v16394_v31  ;;  %v4400_v36 = vunpack.c.h.s8.bf16 %v3392_v24  ;;  %v3398_v31 = vld [vmem:[#allocation10 + $0xf88] sm:$0xff] }
 0x443   : > { %6149 = vmatpush1.bf16.msra.mxu1 %v4375_v37  ;;  %5246 = vmatprep.subr.bf16.mxu0 %v4382_v30  ;;  %v4399_v37 = vunpack.c.h.s8.bf16 %v3391_v62  ;;  %v4406_v30 = vunpack.c.l.s8.bf16 %v3398_v31 }
 0x444   : > { %6150 = vmatprep.subr.bf16.mxu1 %v4384_v61  ;;  %v3397_v61 = vld [vmem:[#allocation10 + $0xf80] sm:$0xff] }
 0x445   : > { %v4405_v24 = vunpack.c.l.s8.bf16 %v3397_v61  ;;  %v4413_v62 = vunpack.c.h.s8.bf16 %v3397_v61  ;;  %v16396_v61 = vld [vmem:[#allocation135_spill] sm:$0xff] }
 0x446   : > { %5247 = vmatpush1.bf16.msra.mxu0 %v4381_v11  ;;  %v3399_v11 = vld [vmem:[#allocation10 + $0xf90] sm:$0xff] }
 0x447   : > { %6151 = vmatpush1.bf16.msra.mxu1 %v4383_v40  ;;  %5248 = vmatprep.subr.bf16.mxu0 %v4390_v2  ;;  %v4407_v40 = vunpack.c.l.s8.bf16 %v3399_v11  ;;  %v4414_v2 = vunpack.c.h.s8.bf16 %v3398_v31  ;;  %v4424_v31 = vunpack.c.l.s8.bf16 %v3408_v20 }
 0x448   : > { %5198 = vmatmul.mubr.bf16.gmra.mrb[148].mxu0 %v16395_v29  ;;  %6152 = vmatprep.subr.bf16.mxu1 %v4392_v0  ;;  %v4416_v0 = vunpack.c.h.s8.bf16 %v3400_v51 }
 0x449   : > { %6102 = vmatmul.mubr.bf16.gmra.mrb[148].mxu1 %v16395_v29  ;;  %5207 = vmatprep.mubr.bf16.mxu0 %v13718_v32 }
 0x44a   : > { %5249 = vmatpush1.bf16.msra.mxu0 %v4389_v15  ;;  %6111 = vmatprep.mubr.bf16.mxu1 %v13718_v32  ;;  %v3406_v15 = vld [vmem:[#allocation10 + $0xfc8] sm:$0xff] }
 0x44b   : > { %6153 = vmatpush1.bf16.msra.mxu1 %v4391_v39  ;;  %5250 = vmatprep.subr.bf16.mxu0 %v4398_v18  ;;  %v4415_v39 = vunpack.c.h.s8.bf16 %v3399_v11  ;;  %v4422_v18 = vunpack.c.l.s8.bf16 %v3406_v15  ;;  %v2908_v11 = vld [vmem:[#allocation10 + $0x38] sm:$0xff] }
 0x44c   : > { %6154 = vmatprep.subr.bf16.mxu1 %v4400_v36  ;;  %v3405_v36 = vld [vmem:[#allocation10 + $0xfc0] sm:$0xff] }
 0x44d   : > { %v4421_v51 = vunpack.c.l.s8.bf16 %v3405_v36 }
 0x44e   : > { %5251 = vmatpush1.bf16.msra.mxu0 %v4397_v55  ;;  %v3407_v55 = vld [vmem:[#allocation10 + $0xfd0] sm:$0xff] }
 0x44f   : > { %6155 = vmatpush1.bf16.msra.mxu1 %v4399_v37  ;;  %5252 = vmatprep.subr.bf16.mxu0 %v4406_v30  ;;  %v4423_v37 = vunpack.c.l.s8.bf16 %v3407_v55  ;;  %v4430_v30 = vunpack.c.h.s8.bf16 %v3406_v15  ;;  %v3420_v15 = vunpack.c.l.s8.bf16 %v2908_v11 }
 0x450   : > { %5208 = vmatmul.mubr.bf16.gmra.mrb[152].mxu0 %v13711_v16  ;;  %6156 = vmatprep.subr.bf16.mxu1 %v4408_v52  ;;  %v4432_v52 = vunpack.c.h.s8.bf16 %v3408_v20 }
 0x451   : > { %6112 = vmatmul.mubr.bf16.gmra.mrb[152].mxu1 %v13711_v16  ;;  %5217 = vmatprep.mubr.bf16.mxu0 %v13745_v26  ;;  %v16450_v16 = vld [vmem:[#allocation38_spill] sm:$0xff] }
 0x452   : > { %5253 = vmatpush1.bf16.msra.mxu0 %v4405_v24  ;;  %6121 = vmatprep.mubr.bf16.mxu1 %v13745_v26  ;;  %v2906_v24 = vld [vmem:[#allocation10 + $0x28] sm:$0xff] }
 0x453   : > { %6157 = vmatpush1.bf16.msra.mxu1 %v4407_v40  ;;  %5254 = vmatprep.subr.bf16.mxu0 %v4414_v2  ;;  %v4429_v40 = vunpack.c.h.s8.bf16 %v3405_v36  ;;  %v4431_v2 = vunpack.c.h.s8.bf16 %v3407_v55  ;;  %v16398_v36 = vld [vmem:[#allocation139_spill] sm:$0xff]  ;;  %v2916_v55 = vld [vmem:[#allocation10 + $0x78] sm:$0xff] }
 0x454   : > { %6158 = vmatprep.subr.bf16.mxu1 %v4416_v0  ;;  %v3418_v0 = vunpack.c.l.s8.bf16 %v2906_v24 }
 0x456   : > { %5255 = vmatpush1.bf16.msra.mxu0 %v4413_v62  ;;  %v2905_v62 = vld [vmem:[#allocation10 + $0x20] sm:$0xff] }
 0x457   : > { %6159 = vmatpush1.bf16.msra.mxu1 %v4415_v39  ;;  %5256 = vmatprep.subr.bf16.mxu0 %v4422_v18  ;;  %v2907_v39 = vld [vmem:[#allocation10 + $0x30] sm:$0xff]  ;;  %v3417_v20 = vunpack.c.l.s8.bf16 %v2905_v62 }
 0x458   : > { %5218 = vmatmul.mubr.bf16.gmra.mrb[156].mxu0 %v13739_v59  ;;  %6160 = vmatprep.subr.bf16.mxu1 %v4424_v31  ;;  %v3419_v18 = vunpack.c.l.s8.bf16 %v2907_v39  ;;  %v3426_v31 = vunpack.c.h.s8.bf16 %v2906_v24  ;;  %v3436_v24 = vunpack.c.l.s8.bf16 %v2916_v55 }
 0x459   : > { %6122 = vmatmul.mubr.bf16.gmra.mrb[156].mxu1 %v13739_v59  ;;  %5260 = vmatprep.mubr.bf16.mxu0 %v16396_v61  ;;  %v16397_v59 = vld [vmem:[#allocation133_spill] sm:$0xff] }
 0x45a   : > { %5257 = vmatpush1.bf16.msra.mxu0 %v4421_v51  ;;  %6164 = vmatprep.mubr.bf16.mxu1 %v16396_v61  ;;  %v3428_v51 = vunpack.c.h.s8.bf16 %v2908_v11  ;;  %v2914_v61 = vld [vmem:[#allocation10 + $0x68] sm:$0xff] }
 0x45b   : > { %6161 = vmatpush1.bf16.msra.mxu1 %v4423_v37  ;;  %5258 = vmatprep.subr.bf16.mxu0 %v4430_v30  ;;  %v3425_v37 = vunpack.c.h.s8.bf16 %v2905_v62  ;;  %v3427_v30 = vunpack.c.h.s8.bf16 %v2907_v39  ;;  %v16400_v62 = vld [vmem:[#allocation143_spill] sm:$0xff]  ;;  %v2924_v39 = vld [vmem:[#allocation10 + $0xb8] sm:$0xff] }
 0x45c   : > { %6162 = vmatprep.subr.bf16.mxu1 %v4432_v52  ;;  %v3434_v52 = vunpack.c.l.s8.bf16 %v2914_v61 }
 0x45e   : > { %5259 = vmatpush1.bf16.msra.mxu0 %v4429_v40  ;;  %v2913_v40 = vld [vmem:[#allocation10 + $0x60] sm:$0xff] }
 0x45f   : > { %6163 = vmatpush1.bf16.msra.mxu1 %v4431_v2  ;;  %6245 = vmatprep.subr.bf16.mxu0 %v3418_v0  ;;  %v2915_v2 = vld [vmem:[#allocation10 + $0x70] sm:$0xff]  ;;  %v3433_v11 = vunpack.c.l.s8.bf16 %v2913_v40 }
 0x460   : > { %7149 = vmatprep.subr.bf16.mxu1 %v3420_v15  ;;  %v3435_v0 = vunpack.c.l.s8.bf16 %v2915_v2  ;;  %v3442_v15 = vunpack.c.h.s8.bf16 %v2914_v61  ;;  %v3452_v61 = vunpack.c.l.s8.bf16 %v2924_v39 }
 0x461   : > { %5261 = vmatmul.mubr.bf16.vlgmr.msra.gmra.mrb[128].mxu0 %v16397_v59 }
 0x462   : > { %6165 = vmatmul.mubr.bf16.vlgmr.msra.gmra.mrb[128].mxu1 %v16397_v59  ;;  %5270 = vmatprep.mubr.bf16.mxu0 %v16398_v36  ;;  %v16399_v59 = vld [vmem:[#allocation137_spill] sm:$0xff] }
 0x463   : > { %6174 = vmatprep.mubr.bf16.mxu1 %v16398_v36  ;;  %6246 = vmatpush1.bf16.msra.mxu0 %v3417_v20  ;;  %v3444_v36 = vunpack.c.h.s8.bf16 %v2916_v55  ;;  %v2922_v20 = vld [vmem:[#allocation10 + $0xa8] sm:$0xff] }
 0x464   : > { %7150 = vmatpush1.bf16.msra.mxu1 %v3419_v18  ;;  %6247 = vmatprep.subr.bf16.mxu0 %v3426_v31  ;;  %v3441_v18 = vunpack.c.h.s8.bf16 %v2913_v40  ;;  %v3443_v31 = vunpack.c.h.s8.bf16 %v2915_v2  ;;  %v16402_v40 = vld [vmem:[#allocation147_spill] sm:$0xff]  ;;  %v2932_v2 = vld [vmem:[#allocation10 + $0xf8] sm:$0xff] }
 0x465   : > { %7151 = vmatprep.subr.bf16.mxu1 %v3428_v51  ;;  %v3450_v51 = vunpack.c.l.s8.bf16 %v2922_v20 }
 0x467   : > { %6248 = vmatpush1.bf16.msra.mxu0 %v3425_v37  ;;  %v2921_v37 = vld [vmem:[#allocation10 + $0xa0] sm:$0xff] }
 0x468   : > { %7152 = vmatpush1.bf16.msra.mxu1 %v3427_v30  ;;  %6249 = vmatprep.subr.bf16.mxu0 %v3434_v52  ;;  %v2923_v30 = vld [vmem:[#allocation10 + $0xb0] sm:$0xff]  ;;  %v3449_v55 = vunpack.c.l.s8.bf16 %v2921_v37 }
 0x469   : > { %5271 = vmatmul.mubr.bf16.gmra.mrb[132].mxu0 %v16399_v59  ;;  %7153 = vmatprep.subr.bf16.mxu1 %v3436_v24  ;;  %v3451_v52 = vunpack.c.l.s8.bf16 %v2923_v30  ;;  %v3458_v24 = vunpack.c.h.s8.bf16 %v2922_v20  ;;  %v3468_v20 = vunpack.c.l.s8.bf16 %v2932_v2 }
 0x46a   : > { %6175 = vmatmul.mubr.bf16.gmra.mrb[132].mxu1 %v16399_v59  ;;  %5280 = vmatprep.mubr.bf16.mxu0 %v16400_v62  ;;  %v16401_v59 = vld [vmem:[#allocation141_spill] sm:$0xff] }
 0x46b   : > { %6184 = vmatprep.mubr.bf16.mxu1 %v16400_v62  ;;  %6250 = vmatpush1.bf16.msra.mxu0 %v3433_v11  ;;  %v3460_v62 = vunpack.c.h.s8.bf16 %v2924_v39  ;;  %v2930_v11 = vld [vmem:[#allocation10 + $0xe8] sm:$0xff] }
 0x46c   : > { %7154 = vmatpush1.bf16.msra.mxu1 %v3435_v0  ;;  %6251 = vmatprep.subr.bf16.mxu0 %v3442_v15  ;;  %v3459_v0 = vunpack.c.h.s8.bf16 %v2923_v30  ;;  %v3466_v15 = vunpack.c.l.s8.bf16 %v2930_v11  ;;  %v2940_v30 = vld [vmem:[#allocation10 + $0x138] sm:$0xff] }
 0x46d   : > { %7155 = vmatprep.subr.bf16.mxu1 %v3444_v36  ;;  %v3457_v36 = vunpack.c.h.s8.bf16 %v2921_v37  ;;  %v16404_v37 = vld [vmem:[#allocation151_spill] sm:$0xff] }
 0x46f   : > { %6252 = vmatpush1.bf16.msra.mxu0 %v3441_v18  ;;  %v2929_v18 = vld [vmem:[#allocation10 + $0xe0] sm:$0xff] }
 0x470   : > { %7156 = vmatpush1.bf16.msra.mxu1 %v3443_v31  ;;  %6253 = vmatprep.subr.bf16.mxu0 %v3450_v51  ;;  %v2931_v31 = vld [vmem:[#allocation10 + $0xf0] sm:$0xff]  ;;  %v3465_v39 = vunpack.c.l.s8.bf16 %v2929_v18 }
 0x471   : > { %5281 = vmatmul.mubr.bf16.gmra.mrb[136].mxu0 %v16401_v59  ;;  %7157 = vmatprep.subr.bf16.mxu1 %v3452_v61  ;;  %v3467_v51 = vunpack.c.l.s8.bf16 %v2931_v31  ;;  %v3474_v61 = vunpack.c.h.s8.bf16 %v2930_v11  ;;  %v3484_v11 = vunpack.c.l.s8.bf16 %v2940_v30 }
 0x472   : > { %6185 = vmatmul.mubr.bf16.gmra.mrb[136].mxu1 %v16401_v59  ;;  %5290 = vmatprep.mubr.bf16.mxu0 %v16402_v40  ;;  %v16403_v59 = vld [vmem:[#allocation145_spill] sm:$0xff] }
 0x473   : > { %6194 = vmatprep.mubr.bf16.mxu1 %v16402_v40  ;;  %6254 = vmatpush1.bf16.msra.mxu0 %v3449_v55  ;;  %v3476_v40 = vunpack.c.h.s8.bf16 %v2932_v2  ;;  %v2938_v55 = vld [vmem:[#allocation10 + $0x128] sm:$0xff] }
 0x474   : > { %7158 = vmatpush1.bf16.msra.mxu1 %v3451_v52  ;;  %6255 = vmatprep.subr.bf16.mxu0 %v3458_v24  ;;  %v3475_v52 = vunpack.c.h.s8.bf16 %v2931_v31  ;;  %v3482_v24 = vunpack.c.l.s8.bf16 %v2938_v55  ;;  %v2948_v31 = vld [vmem:[#allocation10 + $0x178] sm:$0xff] }
 0x475   : > { %7159 = vmatprep.subr.bf16.mxu1 %v3460_v62  ;;  %v3473_v62 = vunpack.c.h.s8.bf16 %v2929_v18  ;;  %v16406_v18 = vld [vmem:[#allocation155_spill] sm:$0xff] }
 0x477   : > { %6256 = vmatpush1.bf16.msra.mxu0 %v3457_v36  ;;  %v2937_v36 = vld [vmem:[#allocation10 + $0x120] sm:$0xff] }
 0x478   : > { %7160 = vmatpush1.bf16.msra.mxu1 %v3459_v0  ;;  %6257 = vmatprep.subr.bf16.mxu0 %v3466_v15  ;;  %v2939_v0 = vld [vmem:[#allocation10 + $0x130] sm:$0xff]  ;;  %v3481_v2 = vunpack.c.l.s8.bf16 %v2937_v36 }
 0x479   : > { %5291 = vmatmul.mubr.bf16.gmra.mrb[140].mxu0 %v16403_v59  ;;  %7161 = vmatprep.subr.bf16.mxu1 %v3468_v20  ;;  %v3483_v15 = vunpack.c.l.s8.bf16 %v2939_v0  ;;  %v3490_v20 = vunpack.c.h.s8.bf16 %v2938_v55  ;;  %v3500_v55 = vunpack.c.l.s8.bf16 %v2948_v31 }
 0x47a   : > { %6195 = vmatmul.mubr.bf16.gmra.mrb[140].mxu1 %v16403_v59  ;;  %5300 = vmatprep.mubr.bf16.mxu0 %v16404_v37  ;;  %v16405_v59 = vld [vmem:[#allocation149_spill] sm:$0xff] }
 0x47b   : > { %6204 = vmatprep.mubr.bf16.mxu1 %v16404_v37  ;;  %6258 = vmatpush1.bf16.msra.mxu0 %v3465_v39  ;;  %v3492_v37 = vunpack.c.h.s8.bf16 %v2940_v30  ;;  %v2946_v39 = vld [vmem:[#allocation10 + $0x168] sm:$0xff] }
 0x47c   : > { %7162 = vmatpush1.bf16.msra.mxu1 %v3467_v51  ;;  %6259 = vmatprep.subr.bf16.mxu0 %v3474_v61  ;;  %v3491_v51 = vunpack.c.h.s8.bf16 %v2939_v0  ;;  %v3498_v61 = vunpack.c.l.s8.bf16 %v2946_v39 }
 0x47d   : > { %7163 = vmatprep.subr.bf16.mxu1 %v3476_v40  ;;  %v3489_v40 = vunpack.c.h.s8.bf16 %v2937_v36  ;;  %v2956_v36 = vld [vmem:[#allocation10 + $0x1b8] sm:$0xff] }
 0x47f   : > { %6260 = vmatpush1.bf16.msra.mxu0 %v3473_v62  ;;  %v2945_v62 = vld [vmem:[#allocation10 + $0x160] sm:$0xff] }
 0x480   : > { %7164 = vmatpush1.bf16.msra.mxu1 %v3475_v52  ;;  %6261 = vmatprep.subr.bf16.mxu0 %v3482_v24  ;;  %v2947_v52 = vld [vmem:[#allocation10 + $0x170] sm:$0xff]  ;;  %v3497_v30 = vunpack.c.l.s8.bf16 %v2945_v62 }
 0x481   : > { %5301 = vmatmul.mubr.bf16.gmra.mrb[144].mxu0 %v16405_v59  ;;  %7165 = vmatprep.subr.bf16.mxu1 %v3484_v11  ;;  %v3499_v24 = vunpack.c.l.s8.bf16 %v2947_v52  ;;  %v3506_v11 = vunpack.c.h.s8.bf16 %v2946_v39  ;;  %v3507_v0 = vunpack.c.h.s8.bf16 %v2947_v52  ;;  %v3516_v39 = vunpack.c.l.s8.bf16 %v2956_v36 }
 0x482   : > { %6205 = vmatmul.mubr.bf16.gmra.mrb[144].mxu1 %v16405_v59  ;;  %5310 = vmatprep.mubr.bf16.mxu0 %v16406_v18  ;;  %v16407_v59 = vld [vmem:[#allocation153_spill] sm:$0xff] }
 0x483   : > { %6214 = vmatprep.mubr.bf16.mxu1 %v16406_v18  ;;  %6262 = vmatpush1.bf16.msra.mxu0 %v3481_v2  ;;  %v3508_v18 = vunpack.c.h.s8.bf16 %v2948_v31  ;;  %v2954_v2 = vld [vmem:[#allocation10 + $0x1a8] sm:$0xff] }
 0x484   : > { %7166 = vmatpush1.bf16.msra.mxu1 %v3483_v15  ;;  %6263 = vmatprep.subr.bf16.mxu0 %v3490_v20  ;;  %v3514_v15 = vunpack.c.l.s8.bf16 %v2954_v2  ;;  %v2953_v20 = vld [vmem:[#allocation10 + $0x1a0] sm:$0xff] }
 0x485   : > { %7167 = vmatprep.subr.bf16.mxu1 %v3492_v37  ;;  %v3505_v37 = vunpack.c.h.s8.bf16 %v2945_v62  ;;  %v3513_v31 = vunpack.c.l.s8.bf16 %v2953_v20  ;;  %v2964_v62 = vld [vmem:[#allocation10 + $0x1f8] sm:$0xff] }
 0x487   : > { %6264 = vmatpush1.bf16.msra.mxu0 %v3489_v40  ;;  %v2955_v40 = vld [vmem:[#allocation10 + $0x1b0] sm:$0xff] }
 0x488   : > { %7168 = vmatpush1.bf16.msra.mxu1 %v3491_v51  ;;  %6265 = vmatprep.subr.bf16.mxu0 %v3498_v61  ;;  %v3515_v51 = vunpack.c.l.s8.bf16 %v2955_v40  ;;  %v3522_v61 = vunpack.c.h.s8.bf16 %v2954_v2  ;;  %v3523_v52 = vunpack.c.h.s8.bf16 %v2955_v40  ;;  %v3532_v2 = vunpack.c.l.s8.bf16 %v2964_v62  ;;  %v2972_v40 = vld [vmem:[#allocation10 + $0x238] sm:$0xff] }
 0x489   : > { %5311 = vmatmul.mubr.bf16.gmra.mrb[148].mxu0 %v16407_v59  ;;  %7169 = vmatprep.subr.bf16.mxu1 %v3500_v55  ;;  %v3524_v55 = vunpack.c.h.s8.bf16 %v2956_v36 }
 0x48a   : > { %6215 = vmatmul.mubr.bf16.gmra.mrb[148].mxu1 %v16407_v59  ;;  %5320 = vmatprep.mubr.bf16.mxu0 %v13722_v63 }
 0x48b   : > { %6224 = vmatprep.mubr.bf16.mxu1 %v13722_v63  ;;  %6266 = vmatpush1.bf16.msra.mxu0 %v3497_v30  ;;  %v2962_v30 = vld [vmem:[#allocation10 + $0x1e8] sm:$0xff] }
 0x48c   : > { %7170 = vmatpush1.bf16.msra.mxu1 %v3499_v24  ;;  %6267 = vmatprep.subr.bf16.mxu0 %v3506_v11  ;;  %v3530_v24 = vunpack.c.l.s8.bf16 %v2962_v30  ;;  %v2961_v11 = vld [vmem:[#allocation10 + $0x1e0] sm:$0xff]  ;;  %v13985_v63 = vld [vmem:[#allocation10 + $0x6e8] sm:$0xff] }
 0x48d   : > { %7171 = vmatprep.subr.bf16.mxu1 %v3508_v18  ;;  %v3521_v18 = vunpack.c.h.s8.bf16 %v2953_v20  ;;  %v3529_v36 = vunpack.c.l.s8.bf16 %v2961_v11  ;;  %v16408_v20 = vld [vmem:[#allocation94_spill] sm:$0xff] }
 0x48f   : > { %6268 = vmatpush1.bf16.msra.mxu0 %v3505_v37  ;;  %v2963_v37 = vld [vmem:[#allocation10 + $0x1f0] sm:$0xff] }
 0x490   : > { %7172 = vmatpush1.bf16.msra.mxu1 %v3507_v0  ;;  %6269 = vmatprep.subr.bf16.mxu0 %v3514_v15  ;;  %v3531_v0 = vunpack.c.l.s8.bf16 %v2963_v37  ;;  %v3538_v15 = vunpack.c.h.s8.bf16 %v2962_v30  ;;  %v3548_v30 = vunpack.c.l.s8.bf16 %v2972_v40 }
 0x491   : > { %5321 = vmatmul.mubr.bf16.gmra.mrb[152].mxu0 %v13716_v46  ;;  %7173 = vmatprep.subr.bf16.mxu1 %v3516_v39  ;;  %v3540_v39 = vunpack.c.h.s8.bf16 %v2964_v62 }
 0x492   : > { %6225 = vmatmul.mubr.bf16.gmra.mrb[152].mxu1 %v13716_v46  ;;  %5330 = vmatprep.mubr.bf16.mxu0 %v13747_v49 }
 0x493   : > { %6234 = vmatprep.mubr.bf16.mxu1 %v13747_v49  ;;  %6270 = vmatpush1.bf16.msra.mxu0 %v3513_v31  ;;  %v2970_v31 = vld [vmem:[#allocation10 + $0x228] sm:$0xff] }
 0x494   : > { %7174 = vmatpush1.bf16.msra.mxu1 %v3515_v51  ;;  %6271 = vmatprep.subr.bf16.mxu0 %v3522_v61  ;;  %v3537_v51 = vunpack.c.h.s8.bf16 %v2961_v11  ;;  %v3539_v61 = vunpack.c.h.s8.bf16 %v2963_v37  ;;  %v16410_v11 = vld [vmem:[#allocation98_spill] sm:$0xff]  ;;  %v2980_v37 = vld [vmem:[#allocation10 + $0x278] sm:$0xff] }
 0x495   : > { %7175 = vmatprep.subr.bf16.mxu1 %v3524_v55  ;;  %v3546_v55 = vunpack.c.l.s8.bf16 %v2970_v31  ;;  %16459 = vst [vmem:[#allocation98_spill] sm:$0xff] %v14146_v38  ;;  %v14214_v38 = vld [vmem:[#allocation10 + $0x8e0] sm:$0xff] }
 0x497   : > { %6272 = vmatpush1.bf16.msra.mxu0 %v3521_v18  ;;  %v2969_v18 = vld [vmem:[#allocation10 + $0x220] sm:$0xff] }
 0x498   : > { %7176 = vmatpush1.bf16.msra.mxu1 %v3523_v52  ;;  %6273 = vmatprep.subr.bf16.mxu0 %v3530_v24  ;;  %v2971_v52 = vld [vmem:[#allocation10 + $0x230] sm:$0xff]  ;;  %v3545_v62 = vunpack.c.l.s8.bf16 %v2969_v18 }
 0x499   : > { %5331 = vmatmul.mubr.bf16.gmra.mrb[156].mxu0 %v13741_v9  ;;  %7177 = vmatprep.subr.bf16.mxu1 %v3532_v2  ;;  %v3547_v24 = vunpack.c.l.s8.bf16 %v2971_v52  ;;  %v3554_v2 = vunpack.c.h.s8.bf16 %v2970_v31  ;;  %v3564_v31 = vunpack.c.l.s8.bf16 %v2980_v37 }
 0x49a   : > { %6235 = vmatmul.mubr.bf16.gmra.mrb[156].mxu1 %v13741_v9  ;;  %6277 = vmatprep.mubr.bf16.mxu0 %v16408_v20  ;;  %v16409_v9 = vld [vmem:[#allocation92_spill] sm:$0xff] }
 0x49b   : > { %6274 = vmatpush1.bf16.msra.mxu0 %v3529_v36  ;;  %7181 = vmatprep.mubr.bf16.mxu1 %v16408_v20  ;;  %v3556_v36 = vunpack.c.h.s8.bf16 %v2972_v40  ;;  %v2978_v20 = vld [vmem:[#allocation10 + $0x268] sm:$0xff] }
 0x49c   : > { %7178 = vmatpush1.bf16.msra.mxu1 %v3531_v0  ;;  %6275 = vmatprep.subr.bf16.mxu0 %v3538_v15  ;;  %v3553_v0 = vunpack.c.h.s8.bf16 %v2969_v18  ;;  %v3555_v15 = vunpack.c.h.s8.bf16 %v2971_v52  ;;  %v16412_v18 = vld [vmem:[#allocation42_spill] sm:$0xff]  ;;  %v2988_v52 = vld [vmem:[#allocation10 + $0x2b8] sm:$0xff] }
 0x49d   : > { %7179 = vmatprep.subr.bf16.mxu1 %v3540_v39  ;;  %v3562_v39 = vunpack.c.l.s8.bf16 %v2978_v20  ;;  %16463 = vst [vmem:[#allocation42_spill] sm:$0xff] %v14173_v45 }
 0x49f   : > { %6276 = vmatpush1.bf16.msra.mxu0 %v3537_v51  ;;  %v2977_v51 = vld [vmem:[#allocation10 + $0x260] sm:$0xff] }
 0x4a0   : > { %7180 = vmatpush1.bf16.msra.mxu1 %v3539_v61  ;;  %6358 = vmatprep.subr.bf16.mxu0 %v3546_v55  ;;  %v2979_v61 = vld [vmem:[#allocation10 + $0x270] sm:$0xff]  ;;  %v3561_v40 = vunpack.c.l.s8.bf16 %v2977_v51  ;;  %v3570_v55 = vunpack.c.h.s8.bf16 %v2978_v20  ;;  %v3580_v20 = vunpack.c.l.s8.bf16 %v2988_v52 }
 0x4a1   : > { %7262 = vmatprep.subr.bf16.mxu1 %v3548_v30  ;;  %v16411_v30 = vld [vmem:[#allocation96_spill] sm:$0xff] }
 0x4a2   : > { %6278 = vmatmul.mubr.bf16.vlgmr.msra.gmra.mrb[160].mxu0 %v16409_v9 }
 0x4a3   : > { %7182 = vmatmul.mubr.bf16.vlgmr.msra.gmra.mrb[160].mxu1 %v16409_v9  ;;  %6287 = vmatprep.mubr.bf16.mxu0 %v16410_v11  ;;  %v3563_v9 = vunpack.c.l.s8.bf16 %v2979_v61 }
 0x4a4   : > { %6359 = vmatpush1.bf16.msra.mxu0 %v3545_v62  ;;  %7191 = vmatprep.mubr.bf16.mxu1 %v16410_v11  ;;  %v3572_v62 = vunpack.c.h.s8.bf16 %v2980_v37  ;;  %v2986_v11 = vld [vmem:[#allocation10 + $0x2a8] sm:$0xff] }
 0x4a5   : > { %7263 = vmatpush1.bf16.msra.mxu1 %v3547_v24  ;;  %6360 = vmatprep.subr.bf16.mxu0 %v3554_v2  ;;  %v3569_v24 = vunpack.c.h.s8.bf16 %v2977_v51  ;;  %v3571_v2 = vunpack.c.h.s8.bf16 %v2979_v61  ;;  %v16414_v51 = vld [vmem:[#allocation45_spill] sm:$0xff] }
 0x4a6   : > { %7264 = vmatprep.subr.bf16.mxu1 %v3556_v36  ;;  %v3578_v36 = vunpack.c.l.s8.bf16 %v2986_v11  ;;  %v2996_v61 = vld [vmem:[#allocation10 + $0x2f8] sm:$0xff]  ;;  %16468 = vst [vmem:[#allocation45_spill] sm:$0xff] %v14198_v21 }
 0x4a8   : > { %6361 = vmatpush1.bf16.msra.mxu0 %v3553_v0  ;;  %v2985_v0 = vld [vmem:[#allocation10 + $0x2a0] sm:$0xff] }
 0x4a9   : > { %7265 = vmatpush1.bf16.msra.mxu1 %v3555_v15  ;;  %6362 = vmatprep.subr.bf16.mxu0 %v3562_v39  ;;  %v2987_v15 = vld [vmem:[#allocation10 + $0x2b0] sm:$0xff]  ;;  %v3577_v37 = vunpack.c.l.s8.bf16 %v2985_v0 }
 0x4aa   : > { %6288 = vmatmul.mubr.bf16.gmra.mrb[164].mxu0 %v16411_v30  ;;  %7266 = vmatprep.subr.bf16.mxu1 %v3564_v31  ;;  %v3579_v39 = vunpack.c.l.s8.bf16 %v2987_v15  ;;  %v3586_v31 = vunpack.c.h.s8.bf16 %v2986_v11  ;;  %v3596_v11 = vunpack.c.l.s8.bf16 %v2996_v61 }
 0x4ab   : > { %7192 = vmatmul.mubr.bf16.gmra.mrb[164].mxu1 %v16411_v30  ;;  %6297 = vmatprep.mubr.bf16.mxu0 %v16412_v18  ;;  %v16413_v30 = vld [vmem:[#allocation40_spill] sm:$0xff] }
 0x4ac   : > { %6363 = vmatpush1.bf16.msra.mxu0 %v3561_v40  ;;  %7201 = vmatprep.mubr.bf16.mxu1 %v16412_v18  ;;  %v3588_v40 = vunpack.c.h.s8.bf16 %v2988_v52  ;;  %v2994_v18 = vld [vmem:[#allocation10 + $0x2e8] sm:$0xff]  ;;  %16464 = vst [vmem:[#allocation40_spill] sm:$0xff] %v14175_v3 }
 0x4ad   : > { %7267 = vmatpush1.bf16.msra.mxu1 %v3563_v9  ;;  %6364 = vmatprep.subr.bf16.mxu0 %v3570_v55  ;;  %v3585_v9 = vunpack.c.h.s8.bf16 %v2985_v0  ;;  %v3587_v55 = vunpack.c.h.s8.bf16 %v2987_v15  ;;  %v16416_v0 = vld [vmem:[#allocation101_spill] sm:$0xff] }
 0x4ae   : > { %7268 = vmatprep.subr.bf16.mxu1 %v3572_v62  ;;  %v3594_v62 = vunpack.c.l.s8.bf16 %v2994_v18  ;;  %v3004_v15 = vld [vmem:[#allocation10 + $0x338] sm:$0xff]  ;;  %16471 = vst [vmem:[#allocation101_spill] sm:$0xff] %v14214_v38 }
 0x4b0   : > { %6365 = vmatpush1.bf16.msra.mxu0 %v3569_v24  ;;  %v2993_v24 = vld [vmem:[#allocation10 + $0x2e0] sm:$0xff] }
 0x4b1   : > { %7269 = vmatpush1.bf16.msra.mxu1 %v3571_v2  ;;  %6366 = vmatprep.subr.bf16.mxu0 %v3578_v36  ;;  %v2995_v2 = vld [vmem:[#allocation10 + $0x2f0] sm:$0xff]  ;;  %v3593_v52 = vunpack.c.l.s8.bf16 %v2993_v24 }
 0x4b2   : > { %6298 = vmatmul.mubr.bf16.gmra.mrb[168].mxu0 %v16413_v30  ;;  %7270 = vmatprep.subr.bf16.mxu1 %v3580_v20  ;;  %v3595_v36 = vunpack.c.l.s8.bf16 %v2995_v2  ;;  %v3602_v20 = vunpack.c.h.s8.bf16 %v2994_v18  ;;  %v3612_v18 = vunpack.c.l.s8.bf16 %v3004_v15 }
 0x4b3   : > { %7202 = vmatmul.mubr.bf16.gmra.mrb[168].mxu1 %v16413_v30  ;;  %6307 = vmatprep.mubr.bf16.mxu0 %v16414_v51  ;;  %v16415_v30 = vld [vmem:[#allocation32_spill] sm:$0xff] }
 0x4b4   : > { %6367 = vmatpush1.bf16.msra.mxu0 %v3577_v37  ;;  %7211 = vmatprep.mubr.bf16.mxu1 %v16414_v51  ;;  %v3604_v37 = vunpack.c.h.s8.bf16 %v2996_v61  ;;  %v3002_v51 = vld [vmem:[#allocation10 + $0x328] sm:$0xff] }
 0x4b5   : > { %7271 = vmatpush1.bf16.msra.mxu1 %v3579_v39  ;;  %6368 = vmatprep.subr.bf16.mxu0 %v3586_v31  ;;  %v3601_v39 = vunpack.c.h.s8.bf16 %v2993_v24  ;;  %v3603_v31 = vunpack.c.h.s8.bf16 %v2995_v2  ;;  %v16418_v24 = vld [vmem:[#allocation49_spill] sm:$0xff] }
 0x4b6   : > { %7272 = vmatprep.subr.bf16.mxu1 %v3588_v40  ;;  %v3610_v40 = vunpack.c.l.s8.bf16 %v3002_v51  ;;  %v3012_v2 = vld [vmem:[#allocation10 + $0x378] sm:$0xff] }
 0x4b8   : > { %6369 = vmatpush1.bf16.msra.mxu0 %v3585_v9  ;;  %v3001_v9 = vld [vmem:[#allocation10 + $0x320] sm:$0xff] }
 0x4b9   : > { %7273 = vmatpush1.bf16.msra.mxu1 %v3587_v55  ;;  %6370 = vmatprep.subr.bf16.mxu0 %v3594_v62  ;;  %v3003_v55 = vld [vmem:[#allocation10 + $0x330] sm:$0xff]  ;;  %v3609_v61 = vunpack.c.l.s8.bf16 %v3001_v9 }
 0x4ba   : > { %6308 = vmatmul.mubr.bf16.gmra.mrb[172].mxu0 %v16415_v30  ;;  %7274 = vmatprep.subr.bf16.mxu1 %v3596_v11  ;;  %v3611_v62 = vunpack.c.l.s8.bf16 %v3003_v55  ;;  %v3618_v11 = vunpack.c.h.s8.bf16 %v3002_v51  ;;  %v3628_v51 = vunpack.c.l.s8.bf16 %v3012_v2 }
 0x4bb   : > { %7212 = vmatmul.mubr.bf16.gmra.mrb[172].mxu1 %v16415_v30  ;;  %6317 = vmatprep.mubr.bf16.mxu0 %v16416_v0  ;;  %v16417_v30 = vld [vmem:[#allocation34_spill] sm:$0xff] }
 0x4bc   : > { %6371 = vmatpush1.bf16.msra.mxu0 %v3593_v52  ;;  %7221 = vmatprep.mubr.bf16.mxu1 %v16416_v0  ;;  %v3620_v52 = vunpack.c.h.s8.bf16 %v3004_v15  ;;  %v3010_v0 = vld [vmem:[#allocation10 + $0x368] sm:$0xff]  ;;  %16474 = vst [vmem:[#allocation34_spill] sm:$0xff] %v14226_v23 }
 0x4bd   : > { %7275 = vmatpush1.bf16.msra.mxu1 %v3595_v36  ;;  %6372 = vmatprep.subr.bf16.mxu0 %v3602_v20  ;;  %v3617_v36 = vunpack.c.h.s8.bf16 %v3001_v9  ;;  %v3619_v20 = vunpack.c.h.s8.bf16 %v3003_v55  ;;  %v16420_v9 = vld [vmem:[#allocation105_spill] sm:$0xff] }
 0x4be   : > { %7276 = vmatprep.subr.bf16.mxu1 %v3604_v37  ;;  %v3626_v37 = vunpack.c.l.s8.bf16 %v3010_v0  ;;  %v3020_v55 = vld [vmem:[#allocation10 + $0x3b8] sm:$0xff] }
 0x4c0   : > { %6373 = vmatpush1.bf16.msra.mxu0 %v3601_v39  ;;  %v3009_v39 = vld [vmem:[#allocation10 + $0x360] sm:$0xff] }
 0x4c1   : > { %7277 = vmatpush1.bf16.msra.mxu1 %v3603_v31  ;;  %6374 = vmatprep.subr.bf16.mxu0 %v3610_v40  ;;  %v3011_v31 = vld [vmem:[#allocation10 + $0x370] sm:$0xff]  ;;  %v3625_v15 = vunpack.c.l.s8.bf16 %v3009_v39 }
 0x4c2   : > { %6318 = vmatmul.mubr.bf16.gmra.mrb[176].mxu0 %v16417_v30  ;;  %7278 = vmatprep.subr.bf16.mxu1 %v3612_v18  ;;  %v3627_v40 = vunpack.c.l.s8.bf16 %v3011_v31  ;;  %v3634_v18 = vunpack.c.h.s8.bf16 %v3010_v0  ;;  %v3644_v0 = vunpack.c.l.s8.bf16 %v3020_v55 }
 0x4c3   : > { %7222 = vmatmul.mubr.bf16.gmra.mrb[176].mxu1 %v16417_v30  ;;  %6327 = vmatprep.mubr.bf16.mxu0 %v16418_v24  ;;  %v16419_v30 = vld [vmem:[#allocation47_spill] sm:$0xff] }
 0x4c4   : > { %6375 = vmatpush1.bf16.msra.mxu0 %v3609_v61  ;;  %7231 = vmatprep.mubr.bf16.mxu1 %v16418_v24  ;;  %v3636_v61 = vunpack.c.h.s8.bf16 %v3012_v2  ;;  %v3018_v24 = vld [vmem:[#allocation10 + $0x3a8] sm:$0xff] }
 0x4c5   : > { %7279 = vmatpush1.bf16.msra.mxu1 %v3611_v62  ;;  %6376 = vmatprep.subr.bf16.mxu0 %v3618_v11  ;;  %v3633_v62 = vunpack.c.h.s8.bf16 %v3009_v39  ;;  %v3635_v11 = vunpack.c.h.s8.bf16 %v3011_v31  ;;  %v16422_v39 = vld [vmem:[#allocation59_spill] sm:$0xff]  ;;  %v3028_v31 = vld [vmem:[#allocation10 + $0x3f8] sm:$0xff] }
 0x4c6   : > { %7280 = vmatprep.subr.bf16.mxu1 %v3620_v52  ;;  %v3642_v52 = vunpack.c.l.s8.bf16 %v3018_v24 }
 0x4c8   : > { %6377 = vmatpush1.bf16.msra.mxu0 %v3617_v36  ;;  %v3017_v36 = vld [vmem:[#allocation10 + $0x3a0] sm:$0xff] }
 0x4c9   : > { %7281 = vmatpush1.bf16.msra.mxu1 %v3619_v20  ;;  %6378 = vmatprep.subr.bf16.mxu0 %v3626_v37  ;;  %v3019_v20 = vld [vmem:[#allocation10 + $0x3b0] sm:$0xff]  ;;  %v3641_v2 = vunpack.c.l.s8.bf16 %v3017_v36 }
 0x4ca   : > { %6328 = vmatmul.mubr.bf16.gmra.mrb[180].mxu0 %v16419_v30  ;;  %7282 = vmatprep.subr.bf16.mxu1 %v3628_v51  ;;  %v3643_v37 = vunpack.c.l.s8.bf16 %v3019_v20  ;;  %v3650_v51 = vunpack.c.h.s8.bf16 %v3018_v24  ;;  %v3660_v24 = vunpack.c.l.s8.bf16 %v3028_v31 }
 0x4cb   : > { %7232 = vmatmul.mubr.bf16.gmra.mrb[180].mxu1 %v16419_v30  ;;  %6337 = vmatprep.mubr.bf16.mxu0 %v16420_v9  ;;  %v16421_v30 = vld [vmem:[#allocation50_spill] sm:$0xff] }
 0x4cc   : > { %6379 = vmatpush1.bf16.msra.mxu0 %v3625_v15  ;;  %7241 = vmatprep.mubr.bf16.mxu1 %v16420_v9  ;;  %v3652_v15 = vunpack.c.h.s8.bf16 %v3020_v55  ;;  %v3026_v9 = vld [vmem:[#allocation10 + $0x3e8] sm:$0xff] }
 0x4cd   : > { %7283 = vmatpush1.bf16.msra.mxu1 %v3627_v40  ;;  %6380 = vmatprep.subr.bf16.mxu0 %v3634_v18  ;;  %v3649_v40 = vunpack.c.h.s8.bf16 %v3017_v36  ;;  %v3651_v18 = vunpack.c.h.s8.bf16 %v3019_v20  ;;  %v16424_v36 = vld [vmem:[#allocation95_spill] sm:$0xff]  ;;  %v3036_v20 = vld [vmem:[#allocation10 + $0x438] sm:$0xff] }
 0x4ce   : > { %7284 = vmatprep.subr.bf16.mxu1 %v3636_v61  ;;  %v3658_v61 = vunpack.c.l.s8.bf16 %v3026_v9 }
 0x4d0   : > { %6381 = vmatpush1.bf16.msra.mxu0 %v3633_v62  ;;  %v3025_v62 = vld [vmem:[#allocation10 + $0x3e0] sm:$0xff] }
 0x4d1   : > { %7285 = vmatpush1.bf16.msra.mxu1 %v3635_v11  ;;  %6382 = vmatprep.subr.bf16.mxu0 %v3642_v52  ;;  %v3027_v11 = vld [vmem:[#allocation10 + $0x3f0] sm:$0xff]  ;;  %v3657_v55 = vunpack.c.l.s8.bf16 %v3025_v62 }
 0x4d2   : > { %6338 = vmatmul.mubr.bf16.gmra.mrb[184].mxu0 %v16421_v30  ;;  %7286 = vmatprep.subr.bf16.mxu1 %v3644_v0  ;;  %v3659_v52 = vunpack.c.l.s8.bf16 %v3027_v11  ;;  %v3666_v0 = vunpack.c.h.s8.bf16 %v3026_v9  ;;  %v3676_v9 = vunpack.c.l.s8.bf16 %v3036_v20 }
 0x4d3   : > { %7242 = vmatmul.mubr.bf16.gmra.mrb[184].mxu1 %v16421_v30  ;;  %6347 = vmatprep.mubr.bf16.mxu0 %v16422_v39  ;;  %v16423_v30 = vld [vmem:[#allocation107_spill] sm:$0xff] }
 0x4d4   : > { %6383 = vmatpush1.bf16.msra.mxu0 %v3641_v2  ;;  %7251 = vmatprep.mubr.bf16.mxu1 %v16422_v39  ;;  %v3668_v2 = vunpack.c.h.s8.bf16 %v3028_v31  ;;  %v3034_v39 = vld [vmem:[#allocation10 + $0x428] sm:$0xff] }
 0x4d5   : > { %7287 = vmatpush1.bf16.msra.mxu1 %v3643_v37  ;;  %6384 = vmatprep.subr.bf16.mxu0 %v3650_v51  ;;  %v3665_v37 = vunpack.c.h.s8.bf16 %v3025_v62  ;;  %v3667_v51 = vunpack.c.h.s8.bf16 %v3027_v11  ;;  %v16426_v62 = vld [vmem:[#allocation99_spill] sm:$0xff]  ;;  %v3044_v11 = vld [vmem:[#allocation10 + $0x478] sm:$0xff] }
 0x4d6   : > { %7288 = vmatprep.subr.bf16.mxu1 %v3652_v15  ;;  %v3674_v15 = vunpack.c.l.s8.bf16 %v3034_v39 }
 0x4d8   : > { %6385 = vmatpush1.bf16.msra.mxu0 %v3649_v40  ;;  %v3033_v40 = vld [vmem:[#allocation10 + $0x420] sm:$0xff] }
 0x4d9   : > { %7289 = vmatpush1.bf16.msra.mxu1 %v3651_v18  ;;  %6386 = vmatprep.subr.bf16.mxu0 %v3658_v61  ;;  %v3035_v18 = vld [vmem:[#allocation10 + $0x430] sm:$0xff]  ;;  %v3673_v31 = vunpack.c.l.s8.bf16 %v3033_v40 }
 0x4da   : > { %6348 = vmatmul.mubr.bf16.gmra.mrb[188].mxu0 %v16423_v30  ;;  %7290 = vmatprep.subr.bf16.mxu1 %v3660_v24  ;;  %v3675_v61 = vunpack.c.l.s8.bf16 %v3035_v18  ;;  %v3682_v24 = vunpack.c.h.s8.bf16 %v3034_v39  ;;  %v3692_v39 = vunpack.c.l.s8.bf16 %v3044_v11 }
 0x4db   : > { %7252 = vmatmul.mubr.bf16.gmra.mrb[188].mxu1 %v16423_v30  ;;  %6390 = vmatprep.mubr.bf16.mxu0 %v16424_v36  ;;  %v16425_v30 = vld [vmem:[#allocation93_spill] sm:$0xff] }
 0x4dc   : > { %6387 = vmatpush1.bf16.msra.mxu0 %v3657_v55  ;;  %7294 = vmatprep.mubr.bf16.mxu1 %v16424_v36  ;;  %v3684_v55 = vunpack.c.h.s8.bf16 %v3036_v20  ;;  %v3042_v36 = vld [vmem:[#allocation10 + $0x468] sm:$0xff] }
 0x4dd   : > { %7291 = vmatpush1.bf16.msra.mxu1 %v3659_v52  ;;  %6388 = vmatprep.subr.bf16.mxu0 %v3666_v0  ;;  %v3681_v52 = vunpack.c.h.s8.bf16 %v3033_v40  ;;  %v3683_v0 = vunpack.c.h.s8.bf16 %v3035_v18  ;;  %v16428_v40 = vld [vmem:[#allocation31_spill] sm:$0xff]  ;;  %v3052_v18 = vld [vmem:[#allocation10 + $0x4b8] sm:$0xff] }
 0x4de   : > { %7292 = vmatprep.subr.bf16.mxu1 %v3668_v2  ;;  %v3690_v2 = vunpack.c.l.s8.bf16 %v3042_v36 }
 0x4e0   : > { %6389 = vmatpush1.bf16.msra.mxu0 %v3665_v37  ;;  %v3041_v37 = vld [vmem:[#allocation10 + $0x460] sm:$0xff] }
 0x4e1   : > { %7293 = vmatpush1.bf16.msra.mxu1 %v3667_v51  ;;  %6471 = vmatprep.subr.bf16.mxu0 %v3674_v15  ;;  %v3043_v51 = vld [vmem:[#allocation10 + $0x470] sm:$0xff]  ;;  %v3689_v20 = vunpack.c.l.s8.bf16 %v3041_v37 }
 0x4e2   : > { %7375 = vmatprep.subr.bf16.mxu1 %v3676_v9  ;;  %v3691_v15 = vunpack.c.l.s8.bf16 %v3043_v51  ;;  %v3698_v9 = vunpack.c.h.s8.bf16 %v3042_v36  ;;  %v3708_v36 = vunpack.c.l.s8.bf16 %v3052_v18 }
 0x4e3   : > { %6391 = vmatmul.mubr.bf16.vlgmr.msra.gmra.mrb[160].mxu0 %v16425_v30 }
 0x4e4   : > { %7295 = vmatmul.mubr.bf16.vlgmr.msra.gmra.mrb[160].mxu1 %v16425_v30  ;;  %6400 = vmatprep.mubr.bf16.mxu0 %v16426_v62  ;;  %v16427_v30 = vld [vmem:[#allocation97_spill] sm:$0xff] }
 0x4e5   : > { %6472 = vmatpush1.bf16.msra.mxu0 %v3673_v31  ;;  %7304 = vmatprep.mubr.bf16.mxu1 %v16426_v62  ;;  %v3700_v31 = vunpack.c.h.s8.bf16 %v3044_v11  ;;  %v3050_v62 = vld [vmem:[#allocation10 + $0x4a8] sm:$0xff] }
 0x4e6   : > { %7376 = vmatpush1.bf16.msra.mxu1 %v3675_v61  ;;  %6473 = vmatprep.subr.bf16.mxu0 %v3682_v24  ;;  %v3697_v61 = vunpack.c.h.s8.bf16 %v3041_v37  ;;  %v3699_v24 = vunpack.c.h.s8.bf16 %v3043_v51  ;;  %v16430_v37 = vld [vmem:[#allocation33_spill] sm:$0xff] }
 0x4e7   : > { %7377 = vmatprep.subr.bf16.mxu1 %v3684_v55  ;;  %v3706_v55 = vunpack.c.l.s8.bf16 %v3050_v62  ;;  %v3060_v51 = vld [vmem:[#allocation10 + $0x4f8] sm:$0xff] }
 0x4e9   : > { %6474 = vmatpush1.bf16.msra.mxu0 %v3681_v52  ;;  %v3049_v52 = vld [vmem:[#allocation10 + $0x4a0] sm:$0xff] }
 0x4ea   : > { %7378 = vmatpush1.bf16.msra.mxu1 %v3683_v0  ;;  %6475 = vmatprep.subr.bf16.mxu0 %v3690_v2  ;;  %v3051_v0 = vld [vmem:[#allocation10 + $0x4b0] sm:$0xff]  ;;  %v3705_v11 = vunpack.c.l.s8.bf16 %v3049_v52 }
 0x4eb   : > { %6401 = vmatmul.mubr.bf16.gmra.mrb[164].mxu0 %v16427_v30  ;;  %7379 = vmatprep.subr.bf16.mxu1 %v3692_v39  ;;  %v3707_v2 = vunpack.c.l.s8.bf16 %v3051_v0  ;;  %v3714_v39 = vunpack.c.h.s8.bf16 %v3050_v62  ;;  %v3724_v62 = vunpack.c.l.s8.bf16 %v3060_v51 }
 0x4ec   : > { %7305 = vmatmul.mubr.bf16.gmra.mrb[164].mxu1 %v16427_v30  ;;  %6410 = vmatprep.mubr.bf16.mxu0 %v16428_v40  ;;  %v16429_v30 = vld [vmem:[#allocation41_spill] sm:$0xff] }
 0x4ed   : > { %6476 = vmatpush1.bf16.msra.mxu0 %v3689_v20  ;;  %7314 = vmatprep.mubr.bf16.mxu1 %v16428_v40  ;;  %v3716_v20 = vunpack.c.h.s8.bf16 %v3052_v18  ;;  %v3058_v40 = vld [vmem:[#allocation10 + $0x4e8] sm:$0xff] }
 0x4ee   : > { %7380 = vmatpush1.bf16.msra.mxu1 %v3691_v15  ;;  %6477 = vmatprep.subr.bf16.mxu0 %v3698_v9  ;;  %v3713_v15 = vunpack.c.h.s8.bf16 %v3049_v52  ;;  %v3715_v9 = vunpack.c.h.s8.bf16 %v3051_v0  ;;  %v16432_v52 = vld [vmem:[#allocation102_spill] sm:$0xff]  ;;  %v3068_v0 = vld [vmem:[#allocation10 + $0x538] sm:$0xff] }
 0x4ef   : > { %7381 = vmatprep.subr.bf16.mxu1 %v3700_v31  ;;  %v3722_v31 = vunpack.c.l.s8.bf16 %v3058_v40 }
 0x4f1   : > { %6478 = vmatpush1.bf16.msra.mxu0 %v3697_v61  ;;  %v3057_v61 = vld [vmem:[#allocation10 + $0x4e0] sm:$0xff] }
 0x4f2   : > { %7382 = vmatpush1.bf16.msra.mxu1 %v3699_v24  ;;  %6479 = vmatprep.subr.bf16.mxu0 %v3706_v55  ;;  %v3059_v24 = vld [vmem:[#allocation10 + $0x4f0] sm:$0xff]  ;;  %v3721_v18 = vunpack.c.l.s8.bf16 %v3057_v61 }
 0x4f3   : > { %6411 = vmatmul.mubr.bf16.gmra.mrb[168].mxu0 %v16429_v30  ;;  %7383 = vmatprep.subr.bf16.mxu1 %v3708_v36  ;;  %v3723_v55 = vunpack.c.l.s8.bf16 %v3059_v24  ;;  %v3730_v36 = vunpack.c.h.s8.bf16 %v3058_v40  ;;  %v3740_v40 = vunpack.c.l.s8.bf16 %v3068_v0 }
 0x4f4   : > { %7315 = vmatmul.mubr.bf16.gmra.mrb[168].mxu1 %v16429_v30  ;;  %6420 = vmatprep.mubr.bf16.mxu0 %v16430_v37  ;;  %v16431_v30 = vld [vmem:[#allocation44_spill] sm:$0xff] }
 0x4f5   : > { %6480 = vmatpush1.bf16.msra.mxu0 %v3705_v11  ;;  %7324 = vmatprep.mubr.bf16.mxu1 %v16430_v37  ;;  %v3732_v11 = vunpack.c.h.s8.bf16 %v3060_v51  ;;  %v3066_v37 = vld [vmem:[#allocation10 + $0x528] sm:$0xff] }
 0x4f6   : > { %7384 = vmatpush1.bf16.msra.mxu1 %v3707_v2  ;;  %6481 = vmatprep.subr.bf16.mxu0 %v3714_v39  ;;  %v3729_v2 = vunpack.c.h.s8.bf16 %v3057_v61  ;;  %v3731_v39 = vunpack.c.h.s8.bf16 %v3059_v24  ;;  %v16434_v61 = vld [vmem:[#allocation104_spill] sm:$0xff] }
 0x4f7   : > { %7385 = vmatprep.subr.bf16.mxu1 %v3716_v20  ;;  %v3738_v20 = vunpack.c.l.s8.bf16 %v3066_v37  ;;  %v3076_v24 = vld [vmem:[#allocation10 + $0x578] sm:$0xff] }
 0x4f9   : > { %6482 = vmatpush1.bf16.msra.mxu0 %v3713_v15  ;;  %v3065_v15 = vld [vmem:[#allocation10 + $0x520] sm:$0xff] }
 0x4fa   : > { %7386 = vmatpush1.bf16.msra.mxu1 %v3715_v9  ;;  %6483 = vmatprep.subr.bf16.mxu0 %v3722_v31  ;;  %v3067_v9 = vld [vmem:[#allocation10 + $0x530] sm:$0xff]  ;;  %v3737_v51 = vunpack.c.l.s8.bf16 %v3065_v15 }
 0x4fb   : > { %6421 = vmatmul.mubr.bf16.gmra.mrb[172].mxu0 %v16431_v30  ;;  %7387 = vmatprep.subr.bf16.mxu1 %v3724_v62  ;;  %v3739_v31 = vunpack.c.l.s8.bf16 %v3067_v9  ;;  %v3746_v62 = vunpack.c.h.s8.bf16 %v3066_v37  ;;  %v3756_v37 = vunpack.c.l.s8.bf16 %v3076_v24 }
 0x4fc   : > { %7325 = vmatmul.mubr.bf16.gmra.mrb[172].mxu1 %v16431_v30  ;;  %6430 = vmatprep.mubr.bf16.mxu0 %v16432_v52  ;;  %v16433_v30 = vld [vmem:[#allocation46_spill] sm:$0xff] }
 0x4fd   : > { %6484 = vmatpush1.bf16.msra.mxu0 %v3721_v18  ;;  %7334 = vmatprep.mubr.bf16.mxu1 %v16432_v52  ;;  %v3748_v18 = vunpack.c.h.s8.bf16 %v3068_v0  ;;  %v3074_v52 = vld [vmem:[#allocation10 + $0x568] sm:$0xff] }
 0x4fe   : > { %7388 = vmatpush1.bf16.msra.mxu1 %v3723_v55  ;;  %6485 = vmatprep.subr.bf16.mxu0 %v3730_v36  ;;  %v3745_v55 = vunpack.c.h.s8.bf16 %v3065_v15  ;;  %v3747_v36 = vunpack.c.h.s8.bf16 %v3067_v9  ;;  %v16436_v15 = vld [vmem:[#allocation106_spill] sm:$0xff]  ;;  %v3084_v9 = vld [vmem:[#allocation10 + $0x5b8] sm:$0xff] }
 0x4ff   : > { %7389 = vmatprep.subr.bf16.mxu1 %v3732_v11  ;;  %v3754_v11 = vunpack.c.l.s8.bf16 %v3074_v52 }
 0x501   : > { %6486 = vmatpush1.bf16.msra.mxu0 %v3729_v2  ;;  %v3073_v2 = vld [vmem:[#allocation10 + $0x560] sm:$0xff] }
 0x502   : > { %7390 = vmatpush1.bf16.msra.mxu1 %v3731_v39  ;;  %6487 = vmatprep.subr.bf16.mxu0 %v3738_v20  ;;  %v3075_v39 = vld [vmem:[#allocation10 + $0x570] sm:$0xff]  ;;  %v3753_v0 = vunpack.c.l.s8.bf16 %v3073_v2 }
 0x503   : > { %6431 = vmatmul.mubr.bf16.gmra.mrb[176].mxu0 %v16433_v30  ;;  %7391 = vmatprep.subr.bf16.mxu1 %v3740_v40  ;;  %v3755_v20 = vunpack.c.l.s8.bf16 %v3075_v39  ;;  %v3762_v40 = vunpack.c.h.s8.bf16 %v3074_v52  ;;  %v3772_v52 = vunpack.c.l.s8.bf16 %v3084_v9 }
 0x504   : > { %7335 = vmatmul.mubr.bf16.gmra.mrb[176].mxu1 %v16433_v30  ;;  %6440 = vmatprep.mubr.bf16.mxu0 %v16434_v61  ;;  %v16435_v30 = vld [vmem:[#allocation48_spill] sm:$0xff] }
 0x505   : > { %6488 = vmatpush1.bf16.msra.mxu0 %v3737_v51  ;;  %7344 = vmatprep.mubr.bf16.mxu1 %v16434_v61  ;;  %v3764_v51 = vunpack.c.h.s8.bf16 %v3076_v24  ;;  %v3082_v61 = vld [vmem:[#allocation10 + $0x5a8] sm:$0xff] }
 0x506   : > { %7392 = vmatpush1.bf16.msra.mxu1 %v3739_v31  ;;  %6489 = vmatprep.subr.bf16.mxu0 %v3746_v62  ;;  %v3761_v31 = vunpack.c.h.s8.bf16 %v3073_v2  ;;  %v3763_v62 = vunpack.c.h.s8.bf16 %v3075_v39  ;;  %v16438_v2 = vld [vmem:[#allocation109_spill] sm:$0xff] }
 0x507   : > { %7393 = vmatprep.subr.bf16.mxu1 %v3748_v18  ;;  %v3770_v18 = vunpack.c.l.s8.bf16 %v3082_v61  ;;  %v3092_v39 = vld [vmem:[#allocation10 + $0x5f8] sm:$0xff] }
 0x509   : > { %6490 = vmatpush1.bf16.msra.mxu0 %v3745_v55  ;;  %v3081_v55 = vld [vmem:[#allocation10 + $0x5a0] sm:$0xff] }
 0x50a   : > { %7394 = vmatpush1.bf16.msra.mxu1 %v3747_v36  ;;  %6491 = vmatprep.subr.bf16.mxu0 %v3754_v11  ;;  %v3083_v36 = vld [vmem:[#allocation10 + $0x5b0] sm:$0xff]  ;;  %v3769_v24 = vunpack.c.l.s8.bf16 %v3081_v55 }
 0x50b   : > { %6441 = vmatmul.mubr.bf16.gmra.mrb[180].mxu0 %v16435_v30  ;;  %7395 = vmatprep.subr.bf16.mxu1 %v3756_v37  ;;  %v3771_v11 = vunpack.c.l.s8.bf16 %v3083_v36  ;;  %v3778_v37 = vunpack.c.h.s8.bf16 %v3082_v61  ;;  %v3788_v61 = vunpack.c.l.s8.bf16 %v3092_v39 }
 0x50c   : > { %7345 = vmatmul.mubr.bf16.gmra.mrb[180].mxu1 %v16435_v30  ;;  %6450 = vmatprep.mubr.bf16.mxu0 %v16436_v15  ;;  %v16437_v30 = vld [vmem:[#allocation51_spill] sm:$0xff] }
 0x50d   : > { %6492 = vmatpush1.bf16.msra.mxu0 %v3753_v0  ;;  %7354 = vmatprep.mubr.bf16.mxu1 %v16436_v15  ;;  %v3780_v0 = vunpack.c.h.s8.bf16 %v3084_v9  ;;  %v3090_v15 = vld [vmem:[#allocation10 + $0x5e8] sm:$0xff] }
 0x50e   : > { %7396 = vmatpush1.bf16.msra.mxu1 %v3755_v20  ;;  %6493 = vmatprep.subr.bf16.mxu0 %v3762_v40  ;;  %v3777_v20 = vunpack.c.h.s8.bf16 %v3081_v55  ;;  %v3779_v40 = vunpack.c.h.s8.bf16 %v3083_v36  ;;  %v16440_v55 = vld [vmem:[#allocation56_spill] sm:$0xff] }
 0x50f   : > { %7397 = vmatprep.subr.bf16.mxu1 %v3764_v51  ;;  %v3786_v51 = vunpack.c.l.s8.bf16 %v3090_v15  ;;  %v3100_v36 = vld [vmem:[#allocation10 + $0x638] sm:$0xff] }
 0x511   : > { %6494 = vmatpush1.bf16.msra.mxu0 %v3761_v31  ;;  %v3089_v31 = vld [vmem:[#allocation10 + $0x5e0] sm:$0xff] }
 0x512   : > { %7398 = vmatpush1.bf16.msra.mxu1 %v3763_v62  ;;  %6495 = vmatprep.subr.bf16.mxu0 %v3770_v18  ;;  %v3091_v62 = vld [vmem:[#allocation10 + $0x5f0] sm:$0xff]  ;;  %v3785_v9 = vunpack.c.l.s8.bf16 %v3089_v31 }
 0x513   : > { %6451 = vmatmul.mubr.bf16.gmra.mrb[184].mxu0 %v16437_v30  ;;  %7399 = vmatprep.subr.bf16.mxu1 %v3772_v52  ;;  %v3787_v18 = vunpack.c.l.s8.bf16 %v3091_v62  ;;  %v3794_v52 = vunpack.c.h.s8.bf16 %v3090_v15  ;;  %v3804_v15 = vunpack.c.l.s8.bf16 %v3100_v36 }
 0x514   : > { %7355 = vmatmul.mubr.bf16.gmra.mrb[184].mxu1 %v16437_v30  ;;  %6460 = vmatprep.mubr.bf16.mxu0 %v16438_v2  ;;  %v16439_v30 = vld [vmem:[#allocation108_spill] sm:$0xff] }
 0x515   : > { %6496 = vmatpush1.bf16.msra.mxu0 %v3769_v24  ;;  %7364 = vmatprep.mubr.bf16.mxu1 %v16438_v2  ;;  %v3796_v24 = vunpack.c.h.s8.bf16 %v3092_v39  ;;  %v3098_v2 = vld [vmem:[#allocation10 + $0x628] sm:$0xff] }
 0x516   : > { %7400 = vmatpush1.bf16.msra.mxu1 %v3771_v11  ;;  %6497 = vmatprep.subr.bf16.mxu0 %v3778_v37  ;;  %v3793_v11 = vunpack.c.h.s8.bf16 %v3089_v31  ;;  %v3795_v37 = vunpack.c.h.s8.bf16 %v3091_v62  ;;  %v16442_v31 = vld [vmem:[#allocation58_spill] sm:$0xff]  ;;  %v3108_v62 = vld [vmem:[#allocation10 + $0x678] sm:$0xff] }
 0x517   : > { %7401 = vmatprep.subr.bf16.mxu1 %v3780_v0  ;;  %v3802_v0 = vunpack.c.l.s8.bf16 %v3098_v2 }
 0x519   : > { %6498 = vmatpush1.bf16.msra.mxu0 %v3777_v20  ;;  %v3097_v20 = vld [vmem:[#allocation10 + $0x620] sm:$0xff] }
 0x51a   : > { %7402 = vmatpush1.bf16.msra.mxu1 %v3779_v40  ;;  %6499 = vmatprep.subr.bf16.mxu0 %v3786_v51  ;;  %v3099_v40 = vld [vmem:[#allocation10 + $0x630] sm:$0xff]  ;;  %v3801_v39 = vunpack.c.l.s8.bf16 %v3097_v20 }
 0x51b   : > { %6461 = vmatmul.mubr.bf16.gmra.mrb[188].mxu0 %v16439_v30  ;;  %7403 = vmatprep.subr.bf16.mxu1 %v3788_v61  ;;  %v3803_v51 = vunpack.c.l.s8.bf16 %v3099_v40  ;;  %v3810_v61 = vunpack.c.h.s8.bf16 %v3098_v2  ;;  %v3820_v2 = vunpack.c.l.s8.bf16 %v3108_v62 }
 0x51c   : > { %7365 = vmatmul.mubr.bf16.gmra.mrb[188].mxu1 %v16439_v30  ;;  %6503 = vmatprep.mubr.bf16.mxu0 %v16440_v55  ;;  %v16441_v30 = vld [vmem:[#allocation57_spill] sm:$0xff] }
 0x51d   : > { %6500 = vmatpush1.bf16.msra.mxu0 %v3785_v9  ;;  %7407 = vmatprep.mubr.bf16.mxu1 %v16440_v55  ;;  %v3812_v9 = vunpack.c.h.s8.bf16 %v3100_v36  ;;  %v3106_v55 = vld [vmem:[#allocation10 + $0x668] sm:$0xff] }
 0x51e   : > { %7404 = vmatpush1.bf16.msra.mxu1 %v3787_v18  ;;  %6501 = vmatprep.subr.bf16.mxu0 %v3794_v52  ;;  %v3809_v18 = vunpack.c.h.s8.bf16 %v3097_v20  ;;  %v3811_v52 = vunpack.c.h.s8.bf16 %v3099_v40  ;;  %v16444_v20 = vld [vmem:[#allocation67_spill] sm:$0xff]  ;;  %v3116_v40 = vld [vmem:[#allocation10 + $0x6b8] sm:$0xff] }
 0x51f   : > { %7405 = vmatprep.subr.bf16.mxu1 %v3796_v24  ;;  %v3818_v24 = vunpack.c.l.s8.bf16 %v3106_v55 }
 0x521   : > { %6502 = vmatpush1.bf16.msra.mxu0 %v3793_v11  ;;  %v3105_v11 = vld [vmem:[#allocation10 + $0x660] sm:$0xff] }
 0x522   : > { %7406 = vmatpush1.bf16.msra.mxu1 %v3795_v37  ;;  %6584 = vmatprep.subr.bf16.mxu0 %v3802_v0  ;;  %v3107_v37 = vld [vmem:[#allocation10 + $0x670] sm:$0xff]  ;;  %v3817_v36 = vunpack.c.l.s8.bf16 %v3105_v11 }
 0x523   : > { %7488 = vmatprep.subr.bf16.mxu1 %v3804_v15  ;;  %v3819_v0 = vunpack.c.l.s8.bf16 %v3107_v37  ;;  %v3826_v15 = vunpack.c.h.s8.bf16 %v3106_v55  ;;  %v3113_v55 = vld [vmem:[#allocation10 + $0x6a0] sm:$0xff] }
 0x524   : > { %6504 = vmatmul.mubr.bf16.vlgmr.msra.gmra.mrb[160].mxu0 %v16441_v30  ;;  %v3833_v49 = vunpack.c.l.s8.bf16 %v3113_v55  ;;  %v3841_v29 = vunpack.c.h.s8.bf16 %v3113_v55 }
 0x525   : > { %7408 = vmatmul.mubr.bf16.vlgmr.msra.gmra.mrb[160].mxu1 %v16441_v30  ;;  %6513 = vmatprep.mubr.bf16.mxu0 %v16442_v31  ;;  %v16443_v30 = vld [vmem:[#allocation60_spill] sm:$0xff] }
 0x526   : > { %6585 = vmatpush1.bf16.msra.mxu0 %v3801_v39  ;;  %7417 = vmatprep.mubr.bf16.mxu1 %v16442_v31  ;;  %v3828_v39 = vunpack.c.h.s8.bf16 %v3108_v62  ;;  %v3114_v31 = vld [vmem:[#allocation10 + $0x6a8] sm:$0xff] }
 0x527   : > { %7489 = vmatpush1.bf16.msra.mxu1 %v3803_v51  ;;  %6586 = vmatprep.subr.bf16.mxu0 %v3810_v61  ;;  %v3825_v51 = vunpack.c.h.s8.bf16 %v3105_v11  ;;  %v8053_v61 = vld [vmem:[#allocation11] sm:$0xff]  ;;  %v8223_v62 = vld [vmem:[#allocation13] sm:$0xff] }
 0x528   : > { %7490 = vmatprep.subr.bf16.mxu1 %v3812_v9  ;;  %v3827_v9 = vunpack.c.h.s8.bf16 %v3107_v37  ;;  %v14019_v55 = vrot.slane %v8223_v62, %v16450_v16 }
 0x52a   : > { %6587 = vmatpush1.bf16.msra.mxu0 %v3809_v18  ;;  %v3834_v18 = vunpack.c.l.s8.bf16 %v3114_v31 }
 0x52b   : > { %7491 = vmatpush1.bf16.msra.mxu1 %v3811_v52  ;;  %6588 = vmatprep.subr.bf16.mxu0 %v3818_v24  ;;  %v3836_v52 = vunpack.c.l.s8.bf16 %v3116_v40  ;;  %v13969_v24 = vld [vmem:[#allocation10 + $0x6b0] sm:$0xff] }
 0x52c   : > { %6514 = vmatmul.mubr.bf16.gmra.mrb[164].mxu0 %v16443_v30  ;;  %7492 = vmatprep.subr.bf16.mxu1 %v3820_v2  ;;  %v16445_v2 = vld [vmem:[#allocation35_spill] sm:$0xff]  ;;  %v3835_v11 = vunpack.c.l.s8.bf16 %v13969_v24 }
 0x52d   : > { %7418 = vmatmul.mubr.bf16.gmra.mrb[164].mxu1 %v16443_v30  ;;  %6523 = vmatprep.mubr.bf16.mxu0 %v16444_v20  ;;  %v13972_v30 = vrot.slane %v8053_v61, %v16445_v2  ;;  %v13979_v37 = vrot.slane %v8223_v62, %v16445_v2 }
 0x52e   : > { %6589 = vmatpush1.bf16.msra.mxu0 %v3817_v36  ;;  %7427 = vmatprep.mubr.bf16.mxu1 %v16444_v20  ;;  %v16446_v36 = vld [vmem:[#allocation37_spill] sm:$0xff] }
 0x52f   : > { %7493 = vmatpush1.bf16.msra.mxu1 %v3819_v0  ;;  %6590 = vmatprep.subr.bf16.mxu0 %v3826_v15  ;;  %v13975_v46 = vrot.slane %v8053_v61, %v16446_v36  ;;  %v3842_v0 = vunpack.c.h.s8.bf16 %v3114_v31  ;;  %v16447_v15 = vld [vmem:[#allocation63_spill] sm:$0xff]  ;;  %v13983_v20 = vrot.slane %v8223_v62, %v16446_v36  ;;  %v16449_v31 = vld [vmem:[#allocation36_spill] sm:$0xff] }
 0x530   : > { %7494 = vmatprep.subr.bf16.mxu1 %v3828_v39  ;;  %v13993_v26 = vrot.slane %v8053_v61, %v16449_v31  ;;  %v14000_v36 = vrot.slane %v8223_v62, %v16449_v31  ;;  %v3843_v31 = vunpack.c.h.s8.bf16 %v13969_v24  ;;  %v14033_v62 = vld [vmem:[#allocation10 + $0x720] sm:$0xff] }
 0x531   : > { %v16461_v54 = vunpack.c.l.s8.bf16 %v14033_v62  ;;  %v16470_v13 = vunpack.c.h.s8.bf16 %v14033_v62 }
 0x532   : > { %6591 = vmatpush1.bf16.msra.mxu0 %v3825_v51  ;;  %v3844_v51 = vunpack.c.h.s8.bf16 %v3116_v40 }
 0x533   : > { %7495 = vmatpush1.bf16.msra.mxu1 %v3827_v9  ;;  %6592 = vmatprep.subr.bf16.mxu0 %v3834_v18  ;;  %v16448_v9 = vld [vmem:[#allocation71_spill] sm:$0xff] }
 0x534   : > { %6524 = vmatmul.mubr.bf16.gmra.mrb[168].mxu0 %v16447_v15  ;;  %7496 = vmatprep.subr.bf16.mxu1 %v3836_v52  ;;  %v5262_v39 = vpop.f32.mrb[128].mxu0  ;;  %v13995_v52 = vld [vmem:[#allocation10 + $0x6f8] sm:$0xff] }
 0x535   : > { %7428 = vmatmul.mubr.bf16.gmra.mrb[168].mxu1 %v16447_v15  ;;  %6533 = vmatprep.mubr.bf16.mxu0 %v16448_v9  ;;  %v8095_v18 = vmul.f32 %v13972_v30, %v5262_v39  ;;  %v6166_v59 = vpop.f32.mrb[128].mxu1  ;;  %v13990_v2 = vpop.f32.mrb[129].mxu0  ;;  %v14005_v39 = vrot.slane %v8053_v61, %v16450_v16  ;;  %v3850_v61 = vunpack.c.l.s8.bf16 %v13985_v63  ;;  %v3858_v16 = vunpack.c.h.s8.bf16 %v13985_v63  ;;  %v16453_v63 = vld [vmem:[#allocation110_spill] sm:$0xff] }
 0x536   : > { %6593 = vmatpush1.bf16.msra.mxu0 %v3833_v49  ;;  %7437 = vmatprep.mubr.bf16.mxu1 %v16448_v9  ;;  %v8097_v40 = vmul.f32 %v13975_v46, %v6166_v59  ;;  %v14002_v15 = vpop.f32.mrb[129].mxu1  ;;  %v5266_v32 = vpop.f32.mrb[130].mxu0  ;;  %v3860_v33 = vunpack.c.h.s8.bf16 %v13995_v52  ;;  %v8096_v14 = vmul.f32 %v13993_v26, %v13990_v2 }
 0x537   : > { %7497 = vmatpush1.bf16.msra.mxu1 %v3835_v11  ;;  %v8265_v49 = vadd.f32 %v13979_v37, %v8095_v18  ;;  %6594 = vmatprep.subr.bf16.mxu0 %v3842_v0  ;;  %v8103_v59 = vmul.f32 %v13972_v30, %v5266_v32  ;;  %v6170_v9 = vpop.f32.mrb[130].mxu1  ;;  %v14014_v7 = vpop.f32.mrb[131].mxu0  ;;  %v3852_v0 = vunpack.c.l.s8.bf16 %v13995_v52  ;;  %v14025_v32 = vld [vmem:[#allocation10 + $0x728] sm:$0xff]  ;;  %v14027_v18 = vld [vmem:[#allocation10 + $0x738] sm:$0xff] }
 0x538   : > { %v8267_v34 = vadd.f32 %v13983_v20, %v8097_v40  ;;  %7498 = vmatprep.subr.bf16.mxu1 %v3844_v51  ;;  %v8105_v11 = vmul.f32 %v13975_v46, %v6170_v9  ;;  %v14022_v50 = vpop.f32.mrb[131].mxu1  ;;  %v3851_v40 = vunpack.c.l.s8.bf16 %v14009_v25  ;;  %v14035_v51 = vld [vmem:[#allocation10 + $0x730] sm:$0xff]  ;;  %v14095_v52 = vld [vmem:[#allocation10 + $0x7f8] sm:$0xff]  ;;  %v16456_v10 = vunpack.c.l.s8.bf16 %v14025_v32 }
 0x539   : > { %v8273_v24 = vadd.f32 %v13979_v37, %v8103_v59  ;;  %v8393_v59 = vmax.f32 %v8265_v49, 0.0  ;;  %v14081_v49 = vld [vmem:[#allocation10 + $0x7a0] sm:$0xff]  ;;  %v8106_v2 = vmul.f32 %v14005_v39, %v14022_v50  ;;  %v16472_v8 = vunpack.c.h.s8.bf16 %v14035_v51 }
 0x53a   : > { %v8275_v9 = vadd.f32 %v13983_v20, %v8105_v11  ;;  %6595 = vmatpush1.bf16.msra.mxu0 %v3841_v29  ;;  %v8395_v11 = vmax.f32 %v8267_v34, 0.0 }
 0x53b   : > { %v8401_v48 = vmax.f32 %v8273_v24, 0.0  ;;  %7499 = vmatpush1.bf16.msra.mxu1 %v3843_v31  ;;  %6596 = vmatprep.subr.bf16.mxu0 %v3850_v61  ;;  %v14052_v31 = vld [vmem:[#allocation10 + $0x760] sm:$0xff]  ;;  %v14054_v61 = vld [vmem:[#allocation10 + $0x770] sm:$0xff]  ;;  %v14270_v3 = vadd.f32 %v14019_v55, %v8106_v2 }
 0x53c   : > { %v8403_v29 = vmax.f32 %v8275_v9, 0.0  ;;  %6534 = vmatmul.mubr.bf16.gmra.mrb[172].mxu0 %v16451_v4  ;;  %7500 = vmatprep.subr.bf16.mxu1 %v3852_v0  ;;  %v14048_v41 = vpop.f32.mrb[132].mxu0  ;;  %v14119_v0 = vld [vmem:[#allocation10 + $0x820] sm:$0xff] }
 0x53d   : > { %v14056_v24 = vpack.c.bf16 %v8401_v48, %v8393_v59  ;;  %7438 = vmatmul.mubr.bf16.gmra.mrb[172].mxu1 %v16451_v4  ;;  %6543 = vmatprep.mubr.bf16.mxu0 %v16453_v63  ;;  %v14060_v34 = vpop.f32.mrb[132].mxu1  ;;  %v14062_v9 = vpop.f32.mrb[133].mxu0 }
 0x53e   : > { %v14071_v48 = vpack.c.bf16 %v8403_v29, %v8395_v11  ;;  %6597 = vmatpush1.bf16.msra.mxu0 %v3849_v53  ;;  %7447 = vmatprep.mubr.bf16.mxu1 %v16453_v63  ;;  %v14074_v4 = vpop.f32.mrb[133].mxu1  ;;  %v14076_v59 = vpop.f32.mrb[134].mxu0  ;;  %v14103_v29 = vld [vmem:[#allocation10 + $0x7e0] sm:$0xff]  ;;  %v14171_v63 = vld [vmem:[#allocation10 + $0x8b8] sm:$0xff]  ;;  %v8113_v50 = vmul.f32 %v13975_v46, %v14060_v34 }
 0x53f   : > { %16452 = vst [vmem:[#allocation94_spill] sm:$0xff] %v14056_v24  ;;  %7501 = vmatpush1.bf16.msra.mxu1 %v3851_v40  ;;  %6598 = vmatprep.subr.bf16.mxu0 %v3858_v16  ;;  %v14085_v11 = vpop.f32.mrb[134].mxu1  ;;  %v14087_v53 = vpop.f32.mrb[135].mxu0  ;;  %v14105_v24 = vld [vmem:[#allocation10 + $0x7f0] sm:$0xff]  ;;  %v14113_v40 = vld [vmem:[#allocation10 + $0x838] sm:$0xff]  ;;  %v14144_v16 = vld [vmem:[#allocation10 + $0x860] sm:$0xff]  ;;  %v8119_v34 = vmul.f32 %v13972_v30, %v14076_v59 }
 0x540   : > { %16454 = vst [vmem:[#allocation92_spill] sm:$0xff] %v14071_v48  ;;  %v14093_v48 = vld [vmem:[#allocation10 + $0x7e8] sm:$0xff]  ;;  %7502 = vmatprep.subr.bf16.mxu1 %v3860_v33  ;;  %v14097_v35 = vpop.f32.mrb[135].mxu1  ;;  %v16455_v33 = vunpack.c.h.s8.bf16 %v14009_v25  ;;  %v16458_v25 = vunpack.c.l.s8.bf16 %v14027_v18  ;;  %16462 = vst [vmem:[#allocation96_spill] sm:$0xff] %v14171_v63 }
 0x541   : > { %v14304_v2 = vadd.f32 %v13979_v37, %v8119_v34 }
 0x542   : > { %6599 = vmatpush1.bf16.msra.mxu0 %v3857_v56 }
 0x543   : > { %7503 = vmatpush1.bf16.msra.mxu1 %v16455_v33  ;;  %6600 = vmatprep.subr.bf16.mxu0 %v16456_v10  ;;  %v8098_v10 = vmul.f32 %v14005_v39, %v14002_v15  ;;  %v14229_v15 = vadd.f32 %v14000_v36, %v8096_v14  ;;  %v8114_v14 = vmul.f32 %v14005_v39, %v14074_v4  ;;  %v16478_v4 = vunpack.c.l.s8.bf16 %v14052_v31 }
 0x544   : > { %6544 = vmatmul.mubr.bf16.gmra.mrb[176].mxu0 %v16457_v12  ;;  %7504 = vmatprep.subr.bf16.mxu1 %v16458_v25  ;;  %v14138_v33 = vpop.f32.mrb[136].mxu0 }
 0x545   : > { %7448 = vmatmul.mubr.bf16.gmra.mrb[176].mxu1 %v16457_v12  ;;  %6553 = vmatprep.mubr.bf16.mxu0 %v16460_v44  ;;  %v14150_v42 = vpop.f32.mrb[136].mxu1  ;;  %v14152_v25 = vpop.f32.mrb[137].mxu0  ;;  %v14301_v63 = vadd.f32 %v14019_v55, %v8114_v14  ;;  %v16484_v14 = vunpack.c.h.s8.bf16 %v14052_v31  ;;  %v16490_v31 = vld [vmem:[#allocation85_spill] sm:$0xff] }
 0x546   : > { %6601 = vmatpush1.bf16.msra.mxu0 %v16461_v54  ;;  %7457 = vmatprep.mubr.bf16.mxu1 %v16460_v44  ;;  %v14163_v12 = vpop.f32.mrb[137].mxu1  ;;  %v14165_v43 = vpop.f32.mrb[138].mxu0  ;;  %v16465_v54 = vunpack.c.l.s8.bf16 %v14035_v51  ;;  %v16466_v44 = vunpack.c.h.s8.bf16 %v14025_v32  ;;  %v16475_v51 = vld [vmem:[#allocation75_spill] sm:$0xff] }
 0x547   : > { %v14181_v28 = vpop.f32.mrb[138].mxu1  ;;  %v14183_v22 = vpop.f32.mrb[139].mxu0 }
 0x548   : > { %7505 = vmatpush1.bf16.msra.mxu1 %v16465_v54  ;;  %6602 = vmatprep.subr.bf16.mxu0 %v16466_v44  ;;  %v16467_v54 = vunpack.c.h.s8.bf16 %v14027_v18  ;;  %v14193_v32 = vpop.f32.mrb[139].mxu1  ;;  %v8104_v44 = vmul.f32 %v13993_v26, %v14014_v7  ;;  %v8111_v18 = vmul.f32 %v13972_v30, %v14048_v41  ;;  %v16473_v7 = vunpack.c.l.s8.bf16 %v14043_v60 }
 0x549   : > { %v8112_v41 = vmul.f32 %v13993_v26, %v14062_v9  ;;  %v16477_v9 = vld [vmem:[#allocation81_spill] sm:$0xff] }
 0x54a   : > { %7506 = vmatprep.subr.bf16.mxu1 %v16467_v54  ;;  %v14205_v54 = vld [vmem:[#allocation10 + $0x8f8] sm:$0xff]  ;;  %6603 = vmatpush1.bf16.msra.mxu0 %v16470_v13  ;;  %v14242_v13 = vadd.f32 %v14019_v55, %v8098_v10  ;;  %v14256_v62 = vadd.f32 %v14000_v36, %v8104_v44  ;;  %v8121_v10 = vmul.f32 %v13975_v46, %v14085_v11 }
 0x54b   : > { %16469 = vst [vmem:[#allocation32_spill] sm:$0xff] %v14205_v54  ;;  %6604 = vmatprep.subr.bf16.mxu0 %v16473_v7  ;;  %v14273_v44 = vadd.f32 %v13979_v37, %v8111_v18  ;;  %v8120_v11 = vmul.f32 %v13993_v26, %v14087_v53  ;;  %v14288_v18 = vadd.f32 %v13983_v20, %v8113_v50 }
 0x54c   : > { %7507 = vmatpush1.bf16.msra.mxu1 %v16472_v8  ;;  %6554 = vmatmul.mubr.bf16.gmra.mrb[180].mxu0 %v16475_v51  ;;  %v16476_v8 = vunpack.c.l.s8.bf16 %v14045_v47  ;;  %v14238_v7 = vpop.f32.mrb[140].mxu0  ;;  %v14291_v23 = vadd.f32 %v14000_v36, %v8112_v41  ;;  %v8122_v53 = vmul.f32 %v14005_v39, %v14097_v35  ;;  %v8127_v50 = vmul.f32 %v13972_v30, %v14138_v33 }
 0x54d   : > { %7458 = vmatmul.mubr.bf16.gmra.mrb[180].mxu1 %v16475_v51  ;;  %6563 = vmatprep.mubr.bf16.mxu0 %v16477_v9  ;;  %v14250_v56 = vpop.f32.mrb[140].mxu1  ;;  %16481 = vst [vmem:[#allocation49_spill] sm:$0xff] %v14288_v18  ;;  %v14310_v35 = vadd.f32 %v13983_v20, %v8121_v10  ;;  %v14321_v33 = vadd.f32 %v14000_v36, %v8120_v11  ;;  %v16485_v41 = vunpack.c.h.s8.bf16 %v14054_v61 }
 0x54e   : > { %7508 = vmatprep.subr.bf16.mxu1 %v16476_v8  ;;  %v14252_v8 = vpop.f32.mrb[141].mxu0  ;;  %6605 = vmatpush1.bf16.msra.mxu0 %v16478_v4  ;;  %v14263_v59 = vpop.f32.mrb[141].mxu1  ;;  %v16479_v4 = vunpack.c.l.s8.bf16 %v14054_v61  ;;  %v8130_v10 = vmul.f32 %v14005_v39, %v14163_v12  ;;  %v8135_v11 = vmul.f32 %v13972_v30, %v14165_v43  ;;  %v16488_v12 = vunpack.c.l.s8.bf16 %v14069_v6 }
 0x54f   : > { %7467 = vmatprep.mubr.bf16.mxu1 %v16477_v9  ;;  %v14265_v51 = vpop.f32.mrb[142].mxu0  ;;  %v16480_v9 = vunpack.c.h.s8.bf16 %v14043_v60  ;;  %v14281_v38 = vpop.f32.mrb[142].mxu1  ;;  %v16482_v60 = vunpack.c.h.s8.bf16 %v14045_v47  ;;  %16483 = vst [vmem:[#allocation47_spill] sm:$0xff] %v14310_v35  ;;  %v8129_v47 = vmul.f32 %v13975_v46, %v14150_v42  ;;  %v16486_v42 = vunpack.c.l.s8.bf16 %v14067_v1 }
 0x550   : > { %7509 = vmatpush1.bf16.msra.mxu1 %v16479_v4  ;;  %v14283_v45 = vpop.f32.mrb[143].mxu0  ;;  %v14297_v4 = vpop.f32.mrb[143].mxu1  ;;  %v14364_v54 = vadd.f32 %v14019_v55, %v8130_v10  ;;  %v14380_v10 = vadd.f32 %v13979_v37, %v8135_v11  ;;  %v8146_v11 = vmul.f32 %v14005_v39, %v14263_v59  ;;  %v8151_v21 = vmul.f32 %v13972_v30, %v14265_v51 }
 0x551   : > { %6606 = vmatprep.subr.bf16.mxu0 %v16480_v9  ;;  %7510 = vmatprep.subr.bf16.mxu1 %v16482_v60  ;;  %v8128_v60 = vmul.f32 %v13993_v26, %v14152_v25  ;;  %v16487_v9 = vld [vmem:[#allocation79_spill] sm:$0xff]  ;;  %v14342_v25 = vadd.f32 %v13979_v37, %v8127_v50  ;;  %v8136_v50 = vmul.f32 %v13993_v26, %v14183_v22  ;;  %v16494_v22 = vunpack.c.l.s8.bf16 %v14083_v17 }
 0x552   : > { %6607 = vmatpush1.bf16.msra.mxu0 %v16484_v14  ;;  %v14332_v14 = vadd.f32 %v14019_v55, %v8122_v53  ;;  %v8137_v53 = vmul.f32 %v13975_v46, %v14181_v28  ;;  %16493 = vst [vmem:[#allocation59_spill] sm:$0xff] %v14364_v54  ;;  %16496 = vst [vmem:[#allocation107_spill] sm:$0xff] %v14380_v10 }
 0x553   : > { %6608 = vmatprep.subr.bf16.mxu0 %v16486_v42  ;;  %16489 = vst [vmem:[#allocation105_spill] sm:$0xff] %v14342_v25  ;;  %v16492_v42 = vunpack.c.l.s8.bf16 %v14081_v49 }
 0x554   : > { %7511 = vmatpush1.bf16.msra.mxu1 %v16485_v41  ;;  %6564 = vmatmul.mubr.bf16.gmra.mrb[184].mxu0 %v16487_v9  ;;  %v5302_v61 = vpop.f32.mrb[144].mxu0  ;;  %v14353_v41 = vadd.f32 %v14000_v36, %v8128_v60  ;;  %v8143_v60 = vmul.f32 %v13972_v30, %v14238_v7  ;;  %v8144_v7 = vmul.f32 %v13993_v26, %v14252_v8  ;;  %v16501_v8 = vunpack.c.l.s8.bf16 %v14093_v48 }
 0x555   : > { %7512 = vmatprep.subr.bf16.mxu1 %v16488_v12  ;;  %7468 = vmatmul.mubr.bf16.gmra.mrb[184].mxu1 %v16487_v9  ;;  %v6206_v43 = vpop.f32.mrb[144].mxu1  ;;  %v5304_v34 = vpop.f32.mrb[145].mxu0  ;;  %v14350_v12 = vadd.f32 %v13983_v20, %v8129_v47  ;;  %v8138_v47 = vmul.f32 %v14005_v39, %v14193_v32  ;;  %v8145_v32 = vmul.f32 %v13975_v46, %v14250_v56 }
 0x556   : > { %6573 = vmatprep.mubr.bf16.mxu0 %v16490_v31  ;;  %6609 = vmatpush1.bf16.msra.mxu0 %v16492_v42  ;;  %v6208_v28 = vpop.f32.mrb[145].mxu1  ;;  %v14360_v9 = vpop.f32.mrb[146].mxu0  ;;  %v16495_v42 = vunpack.c.h.s8.bf16 %v14067_v1  ;;  %v14392_v18 = vadd.f32 %v13983_v20, %v8137_v53  ;;  %v14412_v51 = vadd.f32 %v13979_v37, %v8143_v60  ;;  %v8152_v56 = vmul.f32 %v13993_v26, %v14283_v45 }
 0x557   : > { %16491 = vst [vmem:[#allocation50_spill] sm:$0xff] %v14350_v12  ;;  %7477 = vmatprep.mubr.bf16.mxu1 %v16490_v31  ;;  %v14374_v31 = vpop.f32.mrb[146].mxu1  ;;  %v14376_v35 = vpop.f32.mrb[147].mxu0  ;;  %v14409_v59 = vadd.f32 %v14019_v55, %v8138_v47  ;;  %v14425_v47 = vadd.f32 %v14000_v36, %v8144_v7  ;;  %v8154_v60 = vmul.f32 %v14005_v39, %v14297_v4  ;;  %v16503_v45 = vunpack.c.l.s8.bf16 %v14095_v52 }
 0x558   : > { %7513 = vmatpush1.bf16.msra.mxu1 %v16494_v22  ;;  %6610 = vmatprep.subr.bf16.mxu0 %v16495_v42  ;;  %v16497_v22 = vunpack.c.h.s8.bf16 %v14069_v6  ;;  %v14388_v1 = vpop.f32.mrb[147].mxu1  ;;  %16498 = vst [vmem:[#allocation95_spill] sm:$0xff] %v14392_v18  ;;  %v14401_v6 = vadd.f32 %v14000_v36, %v8136_v50  ;;  %v16499_v42 = vunpack.c.h.s8.bf16 %v14081_v49  ;;  %v16500_v50 = vunpack.c.h.s8.bf16 %v14083_v17 }
 0x559   : > { %v14422_v49 = vadd.f32 %v13983_v20, %v8145_v32  ;;  %v14437_v32 = vadd.f32 %v13979_v37, %v8151_v21  ;;  %v8159_v7 = vmul.f32 %v13972_v30, %v5302_v61  ;;  %v16506_v21 = vunpack.c.l.s8.bf16 %v14103_v29 }
 0x55a   : > { %7514 = vmatprep.subr.bf16.mxu1 %v16497_v22  ;;  %v8153_v22 = vmul.f32 %v13975_v46, %v14281_v38  ;;  %6611 = vmatpush1.bf16.msra.mxu0 %v16499_v42  ;;  %v16502_v42 = vld [vmem:[#allocation83_spill] sm:$0xff]  ;;  %v16504_v38 = vld [vmem:[#allocation64_spill] sm:$0xff]  ;;  %v14454_v12 = vadd.f32 %v14000_v36, %v8152_v56  ;;  %v14464_v18 = vadd.f32 %v14019_v55, %v8154_v60  ;;  %v16515_v60 = vunpack.c.h.s8.bf16 %v14105_v24 }
 0x55b   : > { %6612 = vmatprep.subr.bf16.mxu0 %v16501_v8  ;;  %v14434_v8 = vadd.f32 %v14019_v55, %v8146_v11  ;;  %v8160_v11 = vmul.f32 %v13993_v26, %v5304_v34  ;;  %v16508_v34 = vunpack.c.h.s8.bf16 %v14093_v48  ;;  %v8167_v56 = vmul.f32 %v13972_v30, %v14360_v9 }
 0x55c   : > { %7515 = vmatpush1.bf16.msra.mxu1 %v16500_v50  ;;  %6574 = vmatmul.mubr.bf16.gmra.mrb[188].mxu0 %v16502_v42  ;;  %v5312_v17 = vpop.f32.mrb[148].mxu0  ;;  %v8161_v50 = vmul.f32 %v13975_v46, %v6206_v43  ;;  %v16507_v43 = vunpack.c.l.s8.bf16 %v14105_v24 }
 0x55d   : > { %7516 = vmatprep.subr.bf16.mxu1 %v16503_v45  ;;  %7478 = vmatmul.mubr.bf16.gmra.mrb[188].mxu1 %v16502_v42  ;;  %v6216_v4 = vpop.f32.mrb[148].mxu1  ;;  %v5314_v53 = vpop.f32.mrb[149].mxu0  ;;  %v14444_v45 = vadd.f32 %v13983_v20, %v8153_v22  ;;  %v8162_v22 = vmul.f32 %v14005_v39, %v6208_v28  ;;  %v16509_v28 = vunpack.c.h.s8.bf16 %v14095_v52  ;;  %v14482_v9 = vadd.f32 %v14000_v36, %v8160_v11 }
 0x55e   : > { %6616 = vmatprep.mubr.bf16.mxu0 %v16504_v38  ;;  %6613 = vmatpush1.bf16.msra.mxu0 %v16506_v21  ;;  %v6218_v61 = vpop.f32.mrb[149].mxu1  ;;  %v5316_v42 = vpop.f32.mrb[150].mxu0  ;;  %v14479_v54 = vadd.f32 %v13983_v20, %v8161_v50  ;;  %v8168_v52 = vmul.f32 %v13993_v26, %v14376_v35  ;;  %v8175_v50 = vmul.f32 %v13972_v30, %v5312_v17  ;;  %v16516_v11 = vunpack.c.l.s8.bf16 %v14111_v5  ;;  %v16518_v35 = vld [vmem:[#allocation61_spill] sm:$0xff] }
 0x55f   : > { %16505 = vst [vmem:[#allocation93_spill] sm:$0xff] %v14444_v45  ;;  %7520 = vmatprep.mubr.bf16.mxu1 %v16504_v38  ;;  %6614 = vmatprep.subr.bf16.mxu0 %v16508_v34  ;;  %v6220_v21 = vpop.f32.mrb[150].mxu1  ;;  %v5318_v25 = vpop.f32.mrb[151].mxu0  ;;  %v14473_v34 = vadd.f32 %v13979_v37, %v8159_v7  ;;  %v8169_v38 = vmul.f32 %v13975_v46, %v14374_v31  ;;  %16512 = vst [vmem:[#allocation31_spill] sm:$0xff] %v14482_v9 }
 0x560   : > { %7517 = vmatpush1.bf16.msra.mxu1 %v16507_v43  ;;  %v6222_v10 = vpop.f32.mrb[151].mxu1  ;;  %16511 = vst [vmem:[#allocation97_spill] sm:$0xff] %v14479_v54  ;;  %v14490_v48 = vadd.f32 %v14019_v55, %v8162_v22  ;;  %v8170_v31 = vmul.f32 %v14005_v39, %v14388_v1  ;;  %v8176_v22 = vmul.f32 %v13993_v26, %v5314_v53  ;;  %v16517_v43 = vunpack.c.l.s8.bf16 %v14113_v40 }
 0x561   : > { %7518 = vmatprep.subr.bf16.mxu1 %v16509_v28  ;;  %16510 = vst [vmem:[#allocation99_spill] sm:$0xff] %v14473_v34  ;;  %v16513_v28 = vunpack.c.h.s8.bf16 %v14103_v29  ;;  %v14501_v29 = vadd.f32 %v13979_v37, %v8167_v56  ;;  %v14509_v24 = vadd.f32 %v13983_v20, %v8169_v38  ;;  %v8185_v17 = vmul.f32 %v13975_v46, %v6220_v21  ;;  %v16519_v38 = vld [vmem:[#allocation62_spill] sm:$0xff] }
 0x562   : > { %16514 = vst [vmem:[#allocation41_spill] sm:$0xff] %v14490_v48  ;;  %v14524_v45 = vadd.f32 %v14019_v55, %v8170_v31  ;;  %v8184_v53 = vmul.f32 %v13993_v26, %v5318_v25  ;;  %v14538_v31 = vadd.f32 %v14000_v36, %v8176_v22  ;;  %v16524_v25 = vunpack.c.h.s8.bf16 %v14111_v5 }
 0x563   : > { %6615 = vmatpush1.bf16.msra.mxu0 %v16513_v28  ;;  %v8177_v28 = vmul.f32 %v13975_v46, %v6216_v4  ;;  %v14527_v4 = vadd.f32 %v13979_v37, %v8175_v50  ;;  %v8186_v50 = vmul.f32 %v14005_v39, %v6222_v10  ;;  %v16527_v54 = vunpack.c.h.s8.bf16 %v14113_v40 }
 0x564   : > { %7519 = vmatpush1.bf16.msra.mxu1 %v16515_v60  ;;  %6697 = vmatprep.subr.bf16.mxu0 %v16516_v11  ;;  %v5322_v1 = vpop.f32.mrb[152].mxu0  ;;  %v8178_v60 = vmul.f32 %v14005_v39, %v6218_v61  ;;  %v8183_v11 = vmul.f32 %v13972_v30, %v5316_v42  ;;  %v16523_v42 = vunpack.c.l.s8.bf16 %v14121_v27  ;;  %v16529_v40 = vunpack.c.h.s8.bf16 %v14119_v0 }
 0x565   : > { %7601 = vmatprep.subr.bf16.mxu1 %v16517_v43  ;;  %v6226_v56 = vpop.f32.mrb[152].mxu1  ;;  %v5324_v7 = vpop.f32.mrb[153].mxu0  ;;  %v14517_v43 = vadd.f32 %v14000_v36, %v8168_v52  ;;  %16520 = vst [vmem:[#allocation33_spill] sm:$0xff] %v14527_v4  ;;  %v16521_v52 = vunpack.c.l.s8.bf16 %v14119_v0  ;;  %v14535_v9 = vadd.f32 %v13983_v20, %v8177_v28  ;;  %v8191_v22 = vmul.f32 %v13972_v30, %v5322_v1 }
 0x566   : > { %6617 = vmatmul.mubr.bf16.vlgmr.msra.gmra.mrb[160].mxu0 %v16518_v35  ;;  %v6228_v61 = vpop.f32.mrb[153].mxu1  ;;  %v5326_v34 = vpop.f32.mrb[154].mxu0  ;;  %v14547_v48 = vadd.f32 %v14019_v55, %v8178_v60  ;;  %v14550_v28 = vadd.f32 %v13979_v37, %v8183_v11  ;;  %v8193_v5 = vmul.f32 %v13975_v46, %v6226_v56  ;;  %v14564_v11 = vadd.f32 %v14000_v36, %v8184_v53 }
 0x567   : > { %7521 = vmatmul.mubr.bf16.vlgmr.msra.gmra.mrb[160].mxu1 %v16518_v35  ;;  %6626 = vmatprep.mubr.bf16.mxu0 %v16519_v38  ;;  %v6230_v21 = vpop.f32.mrb[154].mxu1  ;;  %v5328_v35 = vpop.f32.mrb[155].mxu0  ;;  %16522 = vst [vmem:[#allocation44_spill] sm:$0xff] %v14535_v9  ;;  %v8194_v1 = vmul.f32 %v14005_v39, %v6228_v61  ;;  %v14572_v56 = vadd.f32 %v14019_v55, %v8186_v50  ;;  %v16530_v60 = vunpack.c.h.s8.bf16 %v14121_v27  ;;  %v16531_v53 = vunpack.c.l.s8.bf16 %v14131_v19  ;;  %v16532_v50 = vld [vmem:[#allocation65_spill] sm:$0xff] }
 0x568   : > { %6698 = vmatpush1.bf16.msra.mxu0 %v16521_v52  ;;  %7530 = vmatprep.mubr.bf16.mxu1 %v16519_v38  ;;  %v6232_v52 = vpop.f32.mrb[155].mxu1  ;;  %16525 = vst [vmem:[#allocation102_spill] sm:$0xff] %v14547_v48  ;;  %16526 = vst [vmem:[#allocation46_spill] sm:$0xff] %v14550_v28 }
 0x569   : > { %7602 = vmatpush1.bf16.msra.mxu1 %v16523_v42  ;;  %6699 = vmatprep.subr.bf16.mxu0 %v16524_v25  ;;  %v14557_v42 = vadd.f32 %v13983_v20, %v8185_v17  ;;  %v8192_v25 = vmul.f32 %v13993_v26, %v5324_v7  ;;  %v8199_v7 = vmul.f32 %v13972_v30, %v5326_v34  ;;  %v16533_v34 = vunpack.c.l.s8.bf16 %v14133_v57 }
 0x56a   : > { %7603 = vmatprep.subr.bf16.mxu1 %v16527_v54  ;;  %v8201_v54 = vmul.f32 %v13975_v46, %v6230_v21  ;;  %v16534_v21 = vld [vmem:[#allocation68_spill] sm:$0xff]  ;;  %v14600_v9 = vadd.f32 %v14019_v55, %v8194_v1  ;;  %v8202_v17 = vmul.f32 %v14005_v39, %v6232_v52 }
 0x56b   : > { %16528 = vst [vmem:[#allocation104_spill] sm:$0xff] %v14557_v42  ;;  %v14593_v61 = vadd.f32 %v14000_v36, %v8192_v25  ;;  %v14609_v28 = vadd.f32 %v13979_v37, %v8199_v7  ;;  %v16539_v42 = vunpack.c.h.s8.bf16 %v14133_v57 }
 0x56c   : > { %6700 = vmatpush1.bf16.msra.mxu0 %v16529_v40  ;;  %v5332_v38 = vpop.f32.mrb[156].mxu0  ;;  %v14582_v40 = vadd.f32 %v13979_v37, %v8191_v22  ;;  %v8200_v22 = vmul.f32 %v13993_v26, %v5328_v35 }
 0x56d   : > { %7604 = vmatpush1.bf16.msra.mxu1 %v16530_v60  ;;  %6701 = vmatprep.subr.bf16.mxu0 %v16531_v53  ;;  %v6236_v27 = vpop.f32.mrb[156].mxu1  ;;  %v5334_v60 = vpop.f32.mrb[157].mxu0  ;;  %v14590_v53 = vadd.f32 %v13983_v20, %v8193_v5  ;;  %v16535_v5 = vunpack.c.l.s8.bf16 %v14144_v16  ;;  %v8207_v35 = vmul.f32 %v13972_v30, %v5332_v38  ;;  %v14618_v38 = vadd.f32 %v13983_v20, %v8201_v54 }
 0x56e   : > { %6627 = vmatmul.mubr.bf16.gmra.mrb[164].mxu0 %v16532_v50  ;;  %7605 = vmatprep.subr.bf16.mxu1 %v16533_v34  ;;  %v6238_v0 = vpop.f32.mrb[157].mxu1  ;;  %v5336_v10 = vpop.f32.mrb[158].mxu0  ;;  %v16536_v34 = vld [vmem:[#allocation98_spill] sm:$0xff]  ;;  %v8209_v1 = vmul.f32 %v13975_v46, %v6236_v27  ;;  %v8208_v52 = vmul.f32 %v13993_v26, %v5334_v60  ;;  %v8489_v27 = vmax.f32 %v14582_v40, 0.0  ;;  %v8492_v54 = vmax.f32 %v14600_v9, 0.0 }
 0x56f   : > { %7531 = vmatmul.mubr.bf16.gmra.mrb[164].mxu1 %v16532_v50  ;;  %6636 = vmatprep.mubr.bf16.mxu0 %v16534_v21  ;;  %v6240_v25 = vpop.f32.mrb[158].mxu1  ;;  %v5338_v50 = vpop.f32.mrb[159].mxu0  ;;  %v16537_v4 = vunpack.c.l.s8.bf16 %v16536_v34  ;;  %v8210_v48 = vmul.f32 %v14005_v39, %v6238_v0  ;;  %v8215_v7 = vmul.f32 %v13972_v30, %v5336_v10  ;;  %v8491_v60 = vmax.f32 %v14590_v53, 0.0  ;;  %v16624_v40 = vld [vmem:[#allocation34_spill] sm:$0xff] }
 0x570   : > { %6702 = vmatpush1.bf16.msra.mxu0 %v16535_v5  ;;  %7540 = vmatprep.mubr.bf16.mxu1 %v16534_v21  ;;  %v16538_v5 = vunpack.c.h.s8.bf16 %v14131_v19  ;;  %v6242_v21 = vpop.f32.mrb[159].mxu1  ;;  %v8490_v19 = vmax.f32 %v14593_v61, 0.0  ;;  %v14633_v0 = vadd.f32 %v14019_v55, %v8202_v17  ;;  %v14636_v57 = vadd.f32 %v13979_v37, %v8207_v35 }
 0x571   : > { %7606 = vmatpush1.bf16.msra.mxu1 %v16537_v4  ;;  %v8217_v4 = vmul.f32 %v13975_v46, %v6240_v25  ;;  %v16540_v30 = vunpack.c.h.s8.bf16 %v14144_v16  ;;  %v8216_v46 = vmul.f32 %v13993_v26, %v5338_v50  ;;  %v8497_v10 = vmax.f32 %v14609_v28, 0.0 }
 0x572   : > { %6703 = vmatprep.subr.bf16.mxu0 %v16538_v5  ;;  %7607 = vmatprep.subr.bf16.mxu1 %v16539_v42  ;;  %v14629_v5 = vadd.f32 %v14000_v36, %v8200_v22  ;;  %v14643_v42 = vadd.f32 %v13983_v20, %v8209_v1  ;;  %v14646_v22 = vadd.f32 %v14000_v36, %v8208_v52  ;;  %v16541_v25 = vunpack.c.h.s8.bf16 %v16536_v34  ;;  %v16543_v52 = vld [vmem:[#allocation66_spill] sm:$0xff]  ;;  %v16544_v34 = vld [vmem:[#allocation96_spill] sm:$0xff] }
 0x573   : > { %v8218_v17 = vmul.f32 %v14005_v39, %v6242_v21  ;;  %v16542_v35 = vunpack.c.l.s8.bf16 %v14158_v58  ;;  %v8499_v16 = vmax.f32 %v14618_v38, 0.0  ;;  %v14655_v26 = vadd.f32 %v14019_v55, %v8210_v48  ;;  %v16546_v21 = vld [vmem:[#allocation72_spill] sm:$0xff] }
 0x574   : > { %6704 = vmatpush1.bf16.msra.mxu0 %v16540_v30  ;;  %v14658_v50 = vadd.f32 %v13979_v37, %v8215_v7  ;;  %v14661_v1 = vadd.f32 %v13983_v20, %v8217_v4  ;;  %v16545_v30 = vunpack.c.l.s8.bf16 %v16544_v34  ;;  %v8498_v39 = vmax.f32 %v14629_v5, 0.0 }
 0x575   : > { %7608 = vmatpush1.bf16.msra.mxu1 %v16541_v25  ;;  %6705 = vmatprep.subr.bf16.mxu0 %v16542_v35  ;;  %v16547_v48 = vmax.f32 %v14229_v15, 0.0  ;;  %v16548_v38 = vmax.f32 %v14256_v62, 0.0  ;;  %v16549_v20 = vmax.f32 %v14242_v13, 0.0  ;;  %v16550_v7 = vmax.f32 %v14270_v3, 0.0 }
 0x576   : > { %6637 = vmatmul.mubr.bf16.gmra.mrb[168].mxu0 %v16543_v52  ;;  %7609 = vmatprep.subr.bf16.mxu1 %v16545_v30  ;;  %v16551_v25 = vmax.f32 %v14291_v23, 0.0  ;;  %v16552_v5 = vmax.f32 %v14321_v33, 0.0  ;;  %v8386_v15 = vadd.f32 %v14000_v36, %v8216_v46  ;;  %v16553_v30 = vld [vmem:[#allocation42_spill] sm:$0xff]  ;;  %v16555_v13 = vmax.f32 %v14301_v63, 0.0  ;;  %v16559_v46 = vld [vmem:[#allocation40_spill] sm:$0xff]  ;;  %v16562_v63 = vld [vmem:[#allocation49_spill] sm:$0xff] }
 0x577   : > { %7541 = vmatmul.mubr.bf16.gmra.mrb[168].mxu1 %v16543_v52  ;;  %6646 = vmatprep.mubr.bf16.mxu0 %v16546_v21  ;;  %v14673_v37 = vpack.c.bf16 %v16548_v38, %v16547_v48  ;;  %v14679_v4 = vpack.c.bf16 %v16550_v7, %v16549_v20  ;;  %v8500_v52 = vmax.f32 %v14633_v0, 0.0  ;;  %v16554_v62 = vunpack.c.l.s8.bf16 %v16553_v30  ;;  %v16564_v7 = vld [vmem:[#allocation47_spill] sm:$0xff] }
 0x578   : > { %v14685_v35 = vpack.c.bf16 %v16552_v5, %v16551_v25  ;;  %7550 = vmatprep.mubr.bf16.mxu1 %v16546_v21  ;;  %v16556_v3 = vmax.f32 %v14332_v14, 0.0  ;;  %v16557_v23 = vmax.f32 %v14273_v44, 0.0  ;;  %v16558_v33 = vmax.f32 %v14304_v2, 0.0 }
 0x579   : > { %6706 = vmatpush1.bf16.msra.mxu0 %v16554_v62  ;;  %v8505_v0 = vmax.f32 %v14636_v57, 0.0  ;;  %v8388_v36 = vadd.f32 %v14019_v55, %v8218_v17  ;;  %v16560_v20 = vunpack.c.l.s8.bf16 %v16559_v46  ;;  %v16561_v21 = vunpack.c.h.s8.bf16 %v14158_v58  ;;  %v16569_v57 = vld [vmem:[#allocation59_spill] sm:$0xff] }
 0x57a   : > { %v14696_v48 = vpack.c.bf16 %v16556_v3, %v16555_v13  ;;  %v14702_v38 = vpack.c.bf16 %v16558_v33, %v16557_v23  ;;  %v16563_v14 = vmax.f32 %v16562_v63, 0.0  ;;  %v16565_v25 = vmax.f32 %v16564_v7, 0.0  ;;  %v16572_v3 = vld [vmem:[#allocation105_spill] sm:$0xff]  ;;  %v16574_v33 = vld [vmem:[#allocation107_spill] sm:$0xff] }
 0x57b   : > { %7610 = vmatpush1.bf16.msra.mxu1 %v16560_v20  ;;  %6707 = vmatprep.subr.bf16.mxu0 %v16561_v21  ;;  %v16566_v44 = vmax.f32 %v14353_v41, 0.0  ;;  %v16567_v2 = vmax.f32 %v14401_v6, 0.0  ;;  %v16568_v55 = vunpack.c.h.s8.bf16 %v16544_v34  ;;  %v16570_v17 = vmax.f32 %v16569_v57, 0.0  ;;  %v16576_v41 = vld [vmem:[#allocation50_spill] sm:$0xff]  ;;  %v16578_v6 = vld [vmem:[#allocation95_spill] sm:$0xff] }
 0x57c   : > { %v14714_v5 = vpack.c.bf16 %v16565_v25, %v16563_v14  ;;  %v16571_v58 = vmax.f32 %v14409_v59, 0.0  ;;  %v16573_v23 = vmax.f32 %v16572_v3, 0.0  ;;  %v16575_v20 = vmax.f32 %v16574_v33, 0.0  ;;  %v16588_v33 = vld [vmem:[#allocation93_spill] sm:$0xff] }
 0x57d   : > { %v14720_v62 = vpack.c.bf16 %v16567_v2, %v16566_v44  ;;  %7611 = vmatprep.subr.bf16.mxu1 %v16568_v55  ;;  %v16577_v63 = vmax.f32 %v16576_v41, 0.0  ;;  %v16579_v14 = vmax.f32 %v16578_v6, 0.0  ;;  %v16580_v34 = vmax.f32 %v14425_v47, 0.0 }
 0x57e   : > { %v14728_v13 = vpack.c.bf16 %v16571_v58, %v16570_v17  ;;  %v14734_v21 = vpack.c.bf16 %v16575_v20, %v16573_v23  ;;  %v16581_v25 = vmax.f32 %v14454_v12, 0.0  ;;  %v8506_v59 = vmax.f32 %v14646_v22, 0.0 }
 0x57f   : > { %v14740_v7 = vpack.c.bf16 %v16579_v14, %v16577_v63  ;;  %v8513_v2 = vmax.f32 %v14658_v50, 0.0  ;;  %v16582_v55 = vmax.f32 %v14434_v8, 0.0  ;;  %v16583_v57 = vmax.f32 %v14464_v18, 0.0  ;;  %v16590_v8 = vld [vmem:[#allocation31_spill] sm:$0xff] }
 0x580   : > { %v14746_v44 = vpack.c.bf16 %v16581_v25, %v16580_v34  ;;  %v16584_v58 = vmax.f32 %v14412_v51, 0.0  ;;  %v16585_v3 = vmax.f32 %v14437_v32, 0.0  ;;  %v8514_v47 = vmax.f32 %v8386_v15, 0.0  ;;  %v16593_v51 = vld [vmem:[#allocation41_spill] sm:$0xff]  ;;  %v16599_v25 = vld [vmem:[#allocation99_spill] sm:$0xff] }
 0x581   : > { %v14754_v17 = vpack.c.bf16 %v16583_v57, %v16582_v55  ;;  %v16586_v12 = vunpack.c.h.s8.bf16 %v16553_v30  ;;  %v16587_v22 = vmax.f32 %v14422_v49, 0.0  ;;  %v16589_v50 = vmax.f32 %v16588_v33, 0.0  ;;  %v16597_v49 = vld [vmem:[#allocation45_spill] sm:$0xff] }
 0x582   : > { %v14760_v23 = vpack.c.bf16 %v16585_v3, %v16584_v58  ;;  %v16591_v18 = vmax.f32 %v16590_v8, 0.0  ;;  %v16592_v41 = vmax.f32 %v14517_v43, 0.0  ;;  %v16594_v32 = vmax.f32 %v16593_v51, 0.0  ;;  %v16602_v58 = vld [vmem:[#allocation97_spill] sm:$0xff]  ;;  %v16608_v8 = vld [vmem:[#allocation32_spill] sm:$0xff] }
 0x583   : > { %6708 = vmatpush1.bf16.msra.mxu0 %v16586_v12  ;;  %v14768_v20 = vpack.c.bf16 %v16589_v50, %v16587_v22  ;;  %v16595_v6 = vmax.f32 %v14524_v45, 0.0  ;;  %v8516_v30 = vmax.f32 %v8388_v36, 0.0  ;;  %v16596_v14 = vunpack.c.h.s8.bf16 %v16559_v46  ;;  %v16607_v50 = vld [vmem:[#allocation70_spill] sm:$0xff] }
 0x584   : > { %v14774_v63 = vpack.c.bf16 %v16592_v41, %v16591_v18  ;;  %v16598_v34 = vunpack.c.l.s8.bf16 %v16597_v49  ;;  %v16600_v55 = vmax.f32 %v16599_v25, 0.0  ;;  %v16601_v57 = vmax.f32 %v14501_v29, 0.0  ;;  %6647 = vmatmul.mubr.bf16.gmra.mrb[172].mxu0 %v16607_v50  ;;  %v3194_v18 = vld [vmem:[#allocation10 + $0x928] sm:$0xff]  ;;  %v16617_v25 = vld [vmem:[#allocation44_spill] sm:$0xff]  ;;  %7551 = vmatmul.mubr.bf16.gmra.mrb[172].mxu1 %v16607_v50  ;;  %v16622_v50 = vld [vmem:[#allocation101_spill] sm:$0xff] }
 0x585   : > { %v14780_v15 = vpack.c.bf16 %v16595_v6, %v16594_v32  ;;  %7612 = vmatpush1.bf16.msra.mxu1 %v16596_v14  ;;  %v16603_v3 = vmax.f32 %v16602_v58, 0.0  ;;  %v16604_v12 = vmax.f32 %v14509_v24, 0.0  ;;  %v16605_v36 = vmax.f32 %v14538_v31, 0.0  ;;  %v16610_v41 = vld [vmem:[#allocation102_spill] sm:$0xff]  ;;  %v16613_v6 = vld [vmem:[#allocation33_spill] sm:$0xff] }
 0x586   : > { %6709 = vmatprep.subr.bf16.mxu0 %v16598_v34  ;;  %v14790_v43 = vpack.c.bf16 %v16601_v57, %v16600_v55  ;;  %v16606_v46 = vmax.f32 %v14564_v11, 0.0  ;;  %v8515_v33 = vmax.f32 %v14661_v1, 0.0  ;;  %v16609_v29 = vunpack.c.l.s8.bf16 %v16608_v8  ;;  %v16615_v14 = vld [vmem:[#allocation46_spill] sm:$0xff]  ;;  %v16619_v55 = vld [vmem:[#allocation104_spill] sm:$0xff] }
 0x587   : > { %v14796_v45 = vpack.c.bf16 %v16604_v12, %v16603_v3  ;;  %v16611_v51 = vmax.f32 %v16610_v41, 0.0  ;;  %v16612_v24 = vmax.f32 %v14572_v56, 0.0  ;;  %v16614_v31 = vmax.f32 %v16613_v6, 0.0  ;;  %v16621_v12 = vld [vmem:[#allocation111_spill] sm:$0xff]  ;;  %v3196_v56 = vld [vmem:[#allocation10 + $0x938] sm:$0xff] }
 0x588   : > { %v14802_v22 = vpack.c.bf16 %v16606_v46, %v16605_v36  ;;  %7613 = vmatprep.subr.bf16.mxu1 %v16609_v29  ;;  %v16616_v11 = vmax.f32 %v16615_v14, 0.0  ;;  %v16618_v1 = vmax.f32 %v16617_v25, 0.0  ;;  %v16620_v57 = vmax.f32 %v16619_v55, 0.0  ;;  %6656 = vmatprep.mubr.bf16.mxu0 %v16621_v12  ;;  %v3202_v6 = vld [vmem:[#allocation10 + $0x968] sm:$0xff]  ;;  %v3201_v14 = vld [vmem:[#allocation10 + $0x960] sm:$0xff] }
 0x589   : > { %v14812_v32 = vpack.c.bf16 %v16612_v24, %v16611_v51  ;;  %v8508_v3 = vmax.f32 %v14655_v26, 0.0  ;;  %v14831_v36 = vpack.c.bf16 %v8498_v39, %v8490_v19  ;;  %v14835_v46 = vpack.c.bf16 %v8500_v52, %v8492_v54  ;;  %7560 = vmatprep.mubr.bf16.mxu1 %v16621_v12  ;;  %v16628_v24 = vld [vmem:[#allocation74_spill] sm:$0xff] }
 0x58a   : > { %v14818_v34 = vpack.c.bf16 %v16616_v11, %v16614_v31  ;;  %v14824_v58 = vpack.c.bf16 %v16620_v57, %v16618_v1  ;;  %v14841_v29 = vpack.c.bf16 %v8497_v10, %v8489_v27  ;;  %v8507_v26 = vmax.f32 %v14643_v42, 0.0  ;;  %v3193_v42 = vld [vmem:[#allocation10 + $0x920] sm:$0xff]  ;;  %v3203_v11 = vld [vmem:[#allocation10 + $0x970] sm:$0xff]  ;;  %v3210_v12 = vld [vmem:[#allocation10 + $0x9a8] sm:$0xff] }
 0x58b   : > { %v16623_v41 = vunpack.c.l.s8.bf16 %v16622_v50  ;;  %v3985_v61 = vunpack.c.h.s8.bf16 %v16622_v50  ;;  %v14850_v9 = vpack.c.bf16 %v8499_v16, %v8491_v60  ;;  %v14852_v19 = vpack.c.bf16 %v8514_v47, %v8506_v59  ;;  %v3195_v16 = vld [vmem:[#allocation10 + $0x930] sm:$0xff] }
 0x58c   : > { %v16625_v54 = vunpack.c.l.s8.bf16 %v16624_v40  ;;  %v16626_v28 = vunpack.c.h.s8.bf16 %v16597_v49  ;;  %v3987_v27 = vunpack.c.h.s8.bf16 %v16624_v40  ;;  %v3994_v10 = vunpack.c.l.s8.bf16 %v3194_v18  ;;  %6657 = vmatmul.mubr.bf16.gmra.mrb[176].mxu0 %v16628_v24  ;;  %7561 = vmatmul.mubr.bf16.gmra.mrb[176].mxu1 %v16628_v24  ;;  %v16630_v57 = vld [vmem:[#allocation76_spill] sm:$0xff]  ;;  %v3209_v40 = vld [vmem:[#allocation10 + $0x9a0] sm:$0xff] }
 0x58d   : > { %6710 = vmatpush1.bf16.msra.mxu0 %v16623_v41  ;;  %v14859_v39 = vpack.c.bf16 %v8516_v30, %v8508_v3  ;;  %v14861_v52 = vpack.c.bf16 %v8513_v2, %v8505_v0  ;;  %v16627_v53 = vunpack.c.h.s8.bf16 %v16608_v8  ;;  %v3996_v60 = vunpack.c.l.s8.bf16 %v3196_v56  ;;  %v16629_v0 = vld [vmem:[#allocation78_spill] sm:$0xff]  ;;  %v3204_v2 = vld [vmem:[#allocation10 + $0x978] sm:$0xff] }
 0x58e   : > { %7614 = vmatpush1.bf16.msra.mxu1 %v16625_v54  ;;  %6711 = vmatprep.subr.bf16.mxu0 %v16626_v28  ;;  %v14865_v59 = vpack.c.bf16 %v8515_v33, %v8507_v26  ;;  %v3993_v47 = vunpack.c.l.s8.bf16 %v3193_v42  ;;  %v3995_v49 = vunpack.c.l.s8.bf16 %v3195_v16  ;;  %v4002_v51 = vunpack.c.h.s8.bf16 %v3194_v18  ;;  %v3212_v26 = vld [vmem:[#allocation10 + $0x9b8] sm:$0xff]  ;;  %v3211_v28 = vld [vmem:[#allocation10 + $0x9b0] sm:$0xff] }
 0x58f   : > { %7615 = vmatprep.subr.bf16.mxu1 %v16627_v53  ;;  %v4004_v30 = vunpack.c.h.s8.bf16 %v3196_v56  ;;  %6666 = vmatprep.mubr.bf16.mxu0 %v16629_v0  ;;  %v4001_v33 = vunpack.c.h.s8.bf16 %v3193_v42  ;;  %v4003_v8 = vunpack.c.h.s8.bf16 %v3195_v16  ;;  %v4010_v31 = vunpack.c.l.s8.bf16 %v3202_v6  ;;  %v16631_v56 = vld [vmem:[#allocation82_spill] sm:$0xff]  ;;  %v16632_v53 = vld [vmem:[#allocation80_spill] sm:$0xff] }
 0x590   : > { %7570 = vmatprep.mubr.bf16.mxu1 %v16629_v0  ;;  %v4012_v18 = vunpack.c.l.s8.bf16 %v3204_v2  ;;  %v4009_v25 = vunpack.c.l.s8.bf16 %v3201_v14  ;;  %v4011_v1 = vunpack.c.l.s8.bf16 %v3203_v11  ;;  %v4018_v55 = vunpack.c.h.s8.bf16 %v3202_v6  ;;  %v3218_v16 = vld [vmem:[#allocation10 + $0x9e8] sm:$0xff]  ;;  %v3217_v6 = vld [vmem:[#allocation10 + $0x9e0] sm:$0xff] }
 0x591   : > { %6712 = vmatpush1.bf16.msra.mxu0 %v3985_v61  ;;  %v4020_v3 = vunpack.c.h.s8.bf16 %v3204_v2  ;;  %v4017_v50 = vunpack.c.h.s8.bf16 %v3201_v14  ;;  %v4019_v41 = vunpack.c.h.s8.bf16 %v3203_v11  ;;  %v4026_v61 = vunpack.c.l.s8.bf16 %v3210_v12  ;;  %v3219_v2 = vld [vmem:[#allocation10 + $0x9f0] sm:$0xff]  ;;  %v3226_v11 = vld [vmem:[#allocation10 + $0xa28] sm:$0xff] }
 0x592   : > { %7616 = vmatpush1.bf16.msra.mxu1 %v3987_v27  ;;  %6713 = vmatprep.subr.bf16.mxu0 %v3994_v10  ;;  %v4028_v54 = vunpack.c.l.s8.bf16 %v3212_v26  ;;  %v4025_v27 = vunpack.c.l.s8.bf16 %v3209_v40  ;;  %v4027_v10 = vunpack.c.l.s8.bf16 %v3211_v28  ;;  %v4034_v42 = vunpack.c.h.s8.bf16 %v3210_v12  ;;  %v16634_v14 = vld [vmem:[#allocation84_spill] sm:$0xff] }
 0x593   : > { %7617 = vmatprep.subr.bf16.mxu1 %v3996_v60  ;;  %v4036_v60 = vunpack.c.h.s8.bf16 %v3212_v26  ;;  %v4035_v24 = vunpack.c.h.s8.bf16 %v3211_v28  ;;  %v3227_v26 = vld [vmem:[#allocation10 + $0xa30] sm:$0xff]  ;;  %v3234_v28 = vld [vmem:[#allocation10 + $0xa68] sm:$0xff] }
 0x594   : > { %6667 = vmatmul.mubr.bf16.gmra.mrb[180].mxu0 %v16630_v57  ;;  %7571 = vmatmul.mubr.bf16.gmra.mrb[180].mxu1 %v16630_v57  ;;  %v4051_v57 = vunpack.c.h.s8.bf16 %v3219_v2 }
 0x595   : > { %6714 = vmatpush1.bf16.msra.mxu0 %v3993_v47  ;;  %6676 = vmatprep.mubr.bf16.mxu0 %v16631_v56  ;;  %v16633_v47 = vld [vmem:[#allocation86_spill] sm:$0xff] }
 0x596   : > { %7618 = vmatpush1.bf16.msra.mxu1 %v3995_v49  ;;  %6715 = vmatprep.subr.bf16.mxu0 %v4002_v51  ;;  %v3220_v49 = vld [vmem:[#allocation10 + $0x9f8] sm:$0xff]  ;;  %v4033_v51 = vunpack.c.h.s8.bf16 %v3209_v40  ;;  %v16636_v40 = vld [vmem:[#allocation87_spill] sm:$0xff] }
 0x597   : > { %7619 = vmatprep.subr.bf16.mxu1 %v4004_v30  ;;  %7580 = vmatprep.mubr.bf16.mxu1 %v16631_v56  ;;  %v4042_v30 = vunpack.c.l.s8.bf16 %v3218_v16  ;;  %v4044_v0 = vunpack.c.l.s8.bf16 %v3220_v49  ;;  %v3225_v56 = vld [vmem:[#allocation10 + $0xa20] sm:$0xff] }
 0x599   : > { %6716 = vmatpush1.bf16.msra.mxu0 %v4001_v33  ;;  %v4041_v33 = vunpack.c.l.s8.bf16 %v3217_v6 }
 0x59a   : > { %7620 = vmatpush1.bf16.msra.mxu1 %v4003_v8  ;;  %6717 = vmatprep.subr.bf16.mxu0 %v4010_v31  ;;  %v4043_v8 = vunpack.c.l.s8.bf16 %v3219_v2  ;;  %v4050_v31 = vunpack.c.h.s8.bf16 %v3218_v16  ;;  %v3233_v16 = vld [vmem:[#allocation10 + $0xa60] sm:$0xff]  ;;  %v3242_v2 = vld [vmem:[#allocation10 + $0xaa8] sm:$0xff] }
 0x59b   : > { %7621 = vmatprep.subr.bf16.mxu1 %v4012_v18  ;;  %v4052_v18 = vunpack.c.h.s8.bf16 %v3220_v49  ;;  %v3235_v49 = vld [vmem:[#allocation10 + $0xa70] sm:$0xff] }
 0x59c   : > { %6677 = vmatmul.mubr.bf16.gmra.mrb[184].mxu0 %v16632_v53  ;;  %7581 = vmatmul.mubr.bf16.gmra.mrb[184].mxu1 %v16632_v53  ;;  %v4067_v53 = vunpack.c.h.s8.bf16 %v3227_v26 }
 0x59d   : > { %6718 = vmatpush1.bf16.msra.mxu0 %v4009_v25  ;;  %6686 = vmatprep.mubr.bf16.mxu0 %v16633_v47  ;;  %v16635_v25 = vld [vmem:[#allocation91_spill] sm:$0xff] }
 0x59e   : > { %7622 = vmatpush1.bf16.msra.mxu1 %v4011_v1  ;;  %6719 = vmatprep.subr.bf16.mxu0 %v4018_v55  ;;  %v3228_v1 = vld [vmem:[#allocation10 + $0xa38] sm:$0xff]  ;;  %v4049_v55 = vunpack.c.h.s8.bf16 %v3217_v6  ;;  %v16638_v6 = vld [vmem:[#allocation90_spill] sm:$0xff] }
 0x59f   : > { %7623 = vmatprep.subr.bf16.mxu1 %v4020_v3  ;;  %7590 = vmatprep.mubr.bf16.mxu1 %v16633_v47  ;;  %v4058_v3 = vunpack.c.l.s8.bf16 %v3226_v11  ;;  %v4060_v12 = vunpack.c.l.s8.bf16 %v3228_v1 }
 0x5a1   : > { %6720 = vmatpush1.bf16.msra.mxu0 %v4017_v50  ;;  %v4057_v50 = vunpack.c.l.s8.bf16 %v3225_v56 }
 0x5a2   : > { %7624 = vmatpush1.bf16.msra.mxu1 %v4019_v41  ;;  %6721 = vmatprep.subr.bf16.mxu0 %v4026_v61  ;;  %v4059_v41 = vunpack.c.l.s8.bf16 %v3227_v26  ;;  %v4066_v61 = vunpack.c.h.s8.bf16 %v3226_v11  ;;  %v3241_v11 = vld [vmem:[#allocation10 + $0xaa0] sm:$0xff]  ;;  %v3250_v26 = vld [vmem:[#allocation10 + $0xae8] sm:$0xff] }
 0x5a3   : > { %7625 = vmatprep.subr.bf16.mxu1 %v4028_v54  ;;  %v4068_v54 = vunpack.c.h.s8.bf16 %v3228_v1  ;;  %v3243_v1 = vld [vmem:[#allocation10 + $0xab0] sm:$0xff] }
 0x5a4   : > { %6687 = vmatmul.mubr.bf16.gmra.mrb[188].mxu0 %v16634_v14  ;;  %7591 = vmatmul.mubr.bf16.gmra.mrb[188].mxu1 %v16634_v14  ;;  %v4083_v14 = vunpack.c.h.s8.bf16 %v3235_v49 }
 0x5a5   : > { %6722 = vmatpush1.bf16.msra.mxu0 %v4025_v27  ;;  %6729 = vmatprep.mubr.bf16.mxu0 %v16635_v25  ;;  %v16637_v27 = vld [vmem:[#allocation29_spill] sm:$0xff] }
 0x5a6   : > { %7626 = vmatpush1.bf16.msra.mxu1 %v4027_v10  ;;  %6723 = vmatprep.subr.bf16.mxu0 %v4034_v42  ;;  %v3236_v10 = vld [vmem:[#allocation10 + $0xa78] sm:$0xff]  ;;  %v4065_v42 = vunpack.c.h.s8.bf16 %v3225_v56 }
 0x5a7   : > { %7627 = vmatprep.subr.bf16.mxu1 %v4036_v60  ;;  %7633 = vmatprep.mubr.bf16.mxu1 %v16635_v25  ;;  %v4074_v60 = vunpack.c.l.s8.bf16 %v3234_v28  ;;  %v4076_v47 = vunpack.c.l.s8.bf16 %v3236_v10 }
 0x5a9   : > { %6724 = vmatpush1.bf16.msra.mxu0 %v4033_v51  ;;  %v4073_v51 = vunpack.c.l.s8.bf16 %v3233_v16 }
 0x5aa   : > { %7628 = vmatpush1.bf16.msra.mxu1 %v4035_v24  ;;  %6725 = vmatprep.subr.bf16.mxu0 %v4042_v30  ;;  %v4075_v24 = vunpack.c.l.s8.bf16 %v3235_v49  ;;  %v4082_v30 = vunpack.c.h.s8.bf16 %v3234_v28  ;;  %v3249_v28 = vld [vmem:[#allocation10 + $0xae0] sm:$0xff]  ;;  %v3258_v49 = vld [vmem:[#allocation10 + $0xb28] sm:$0xff] }
 0x5ab   : > { %7629 = vmatprep.subr.bf16.mxu1 %v4044_v0  ;;  %v4084_v0 = vunpack.c.h.s8.bf16 %v3236_v10  ;;  %v3251_v10 = vld [vmem:[#allocation10 + $0xaf0] sm:$0xff] }
 0x5ad   : > { %6726 = vmatpush1.bf16.msra.mxu0 %v4041_v33  ;;  %v16639_v33 = vld [vmem:[#allocation103_spill] sm:$0xff] }
 0x5ae   : > { %7630 = vmatpush1.bf16.msra.mxu1 %v4043_v8  ;;  %6727 = vmatprep.subr.bf16.mxu0 %v4050_v31  ;;  %v3244_v8 = vld [vmem:[#allocation10 + $0xab8] sm:$0xff]  ;;  %v4081_v31 = vunpack.c.h.s8.bf16 %v3233_v16  ;;  %v16642_v16 = vld [vmem:[#allocation115_spill] sm:$0xff] }
 0x5af   : > { %7631 = vmatprep.subr.bf16.mxu1 %v4052_v18  ;;  %v4090_v18 = vunpack.c.l.s8.bf16 %v3242_v2  ;;  %v4092_v25 = vunpack.c.l.s8.bf16 %v3244_v8  ;;  %v4100_v56 = vunpack.c.h.s8.bf16 %v3244_v8  ;;  %v3259_v8 = vld [vmem:[#allocation10 + $0xb30] sm:$0xff] }
 0x5b1   : > { %6728 = vmatpush1.bf16.msra.mxu0 %v4049_v55  ;;  %v4089_v55 = vunpack.c.l.s8.bf16 %v3241_v11 }
 0x5b2   : > { %7632 = vmatpush1.bf16.msra.mxu1 %v4051_v57  ;;  %6810 = vmatprep.subr.bf16.mxu0 %v4058_v3  ;;  %v4091_v57 = vunpack.c.l.s8.bf16 %v3243_v1  ;;  %v4098_v3 = vunpack.c.h.s8.bf16 %v3242_v2  ;;  %v3257_v2 = vld [vmem:[#allocation10 + $0xb20] sm:$0xff] }
 0x5b3   : > { %7714 = vmatprep.subr.bf16.mxu1 %v4060_v12  ;;  %v16640_v12 = vld [vmem:[#allocation43_spill] sm:$0xff] }
 0x5b4   : > { %6730 = vmatmul.mubr.bf16.vlgmr.msra.gmra.mrb[160].mxu0 %v16636_v40 }
 0x5b5   : > { %7634 = vmatmul.mubr.bf16.vlgmr.msra.gmra.mrb[160].mxu1 %v16636_v40  ;;  %6739 = vmatprep.mubr.bf16.mxu0 %v16637_v27  ;;  %v4099_v40 = vunpack.c.h.s8.bf16 %v3243_v1  ;;  %v3266_v1 = vld [vmem:[#allocation10 + $0xb68] sm:$0xff] }
 0x5b6   : > { %6811 = vmatpush1.bf16.msra.mxu0 %v4057_v50  ;;  %7643 = vmatprep.mubr.bf16.mxu1 %v16637_v27  ;;  %v16641_v50 = vld [vmem:[#allocation117_spill] sm:$0xff] }
 0x5b7   : > { %7715 = vmatpush1.bf16.msra.mxu1 %v4059_v41  ;;  %6812 = vmatprep.subr.bf16.mxu0 %v4066_v61  ;;  %v3252_v41 = vld [vmem:[#allocation10 + $0xaf8] sm:$0xff]  ;;  %v4097_v61 = vunpack.c.h.s8.bf16 %v3241_v11  ;;  %v16644_v11 = vld [vmem:[#allocation119_spill] sm:$0xff] }
 0x5b8   : > { %7716 = vmatprep.subr.bf16.mxu1 %v4068_v54  ;;  %v4106_v54 = vunpack.c.l.s8.bf16 %v3250_v26  ;;  %v4108_v27 = vunpack.c.l.s8.bf16 %v3252_v41 }
 0x5ba   : > { %6813 = vmatpush1.bf16.msra.mxu0 %v4065_v42  ;;  %v4105_v42 = vunpack.c.l.s8.bf16 %v3249_v28 }
 0x5bb   : > { %7717 = vmatpush1.bf16.msra.mxu1 %v4067_v53  ;;  %6814 = vmatprep.subr.bf16.mxu0 %v4074_v60  ;;  %v4107_v53 = vunpack.c.l.s8.bf16 %v3251_v10  ;;  %v4114_v60 = vunpack.c.h.s8.bf16 %v3250_v26  ;;  %v3265_v26 = vld [vmem:[#allocation10 + $0xb60] sm:$0xff] }
 0x5bc   : > { %6740 = vmatmul.mubr.bf16.gmra.mrb[164].mxu0 %v16638_v6  ;;  %7718 = vmatprep.subr.bf16.mxu1 %v4076_v47  ;;  %v4116_v47 = vunpack.c.h.s8.bf16 %v3252_v41  ;;  %v3267_v41 = vld [vmem:[#allocation10 + $0xb70] sm:$0xff] }
 0x5bd   : > { %7644 = vmatmul.mubr.bf16.gmra.mrb[164].mxu1 %v16638_v6  ;;  %6749 = vmatprep.mubr.bf16.mxu0 %v16639_v33  ;;  %v4115_v6 = vunpack.c.h.s8.bf16 %v3251_v10  ;;  %v3274_v10 = vld [vmem:[#allocation10 + $0xba8] sm:$0xff] }
 0x5be   : > { %6815 = vmatpush1.bf16.msra.mxu0 %v4073_v51  ;;  %7653 = vmatprep.mubr.bf16.mxu1 %v16639_v33  ;;  %v16643_v51 = vld [vmem:[#allocation121_spill] sm:$0xff] }
 0x5bf   : > { %7719 = vmatpush1.bf16.msra.mxu1 %v4075_v24  ;;  %6816 = vmatprep.subr.bf16.mxu0 %v4082_v30  ;;  %v3260_v24 = vld [vmem:[#allocation10 + $0xb38] sm:$0xff]  ;;  %v4113_v30 = vunpack.c.h.s8.bf16 %v3249_v28  ;;  %v16646_v28 = vld [vmem:[#allocation123_spill] sm:$0xff] }
 0x5c0   : > { %7720 = vmatprep.subr.bf16.mxu1 %v4084_v0  ;;  %v4122_v0 = vunpack.c.l.s8.bf16 %v3258_v49  ;;  %v4124_v33 = vunpack.c.l.s8.bf16 %v3260_v24 }
 0x5c2   : > { %6817 = vmatpush1.bf16.msra.mxu0 %v4081_v31  ;;  %v4121_v31 = vunpack.c.l.s8.bf16 %v3257_v2 }
 0x5c3   : > { %7721 = vmatpush1.bf16.msra.mxu1 %v4083_v14  ;;  %6818 = vmatprep.subr.bf16.mxu0 %v4090_v18  ;;  %v4123_v14 = vunpack.c.l.s8.bf16 %v3259_v8  ;;  %v4130_v18 = vunpack.c.h.s8.bf16 %v3258_v49  ;;  %v3273_v49 = vld [vmem:[#allocation10 + $0xba0] sm:$0xff] }
 0x5c4   : > { %6750 = vmatmul.mubr.bf16.gmra.mrb[168].mxu0 %v16640_v12  ;;  %7722 = vmatprep.subr.bf16.mxu1 %v4092_v25  ;;  %v4132_v25 = vunpack.c.h.s8.bf16 %v3260_v24  ;;  %v3275_v24 = vld [vmem:[#allocation10 + $0xbb0] sm:$0xff] }
 0x5c5   : > { %7654 = vmatmul.mubr.bf16.gmra.mrb[168].mxu1 %v16640_v12  ;;  %6759 = vmatprep.mubr.bf16.mxu0 %v16641_v50  ;;  %v4131_v12 = vunpack.c.h.s8.bf16 %v3259_v8  ;;  %v3282_v8 = vld [vmem:[#allocation10 + $0xbe8] sm:$0xff] }
 0x5c6   : > { %6819 = vmatpush1.bf16.msra.mxu0 %v4089_v55  ;;  %7663 = vmatprep.mubr.bf16.mxu1 %v16641_v50  ;;  %v16645_v55 = vld [vmem:[#allocation125_spill] sm:$0xff] }
 0x5c7   : > { %7723 = vmatpush1.bf16.msra.mxu1 %v4091_v57  ;;  %6820 = vmatprep.subr.bf16.mxu0 %v4098_v3  ;;  %v3268_v57 = vld [vmem:[#allocation10 + $0xb78] sm:$0xff]  ;;  %v4129_v3 = vunpack.c.h.s8.bf16 %v3257_v2  ;;  %v16648_v2 = vld [vmem:[#allocation127_spill] sm:$0xff] }
 0x5c8   : > { %7724 = vmatprep.subr.bf16.mxu1 %v4100_v56  ;;  %v4138_v56 = vunpack.c.l.s8.bf16 %v3266_v1  ;;  %v4140_v50 = vunpack.c.l.s8.bf16 %v3268_v57 }
 0x5ca   : > { %6821 = vmatpush1.bf16.msra.mxu0 %v4097_v61  ;;  %v4137_v61 = vunpack.c.l.s8.bf16 %v3265_v26 }
 0x5cb   : > { %7725 = vmatpush1.bf16.msra.mxu1 %v4099_v40  ;;  %6822 = vmatprep.subr.bf16.mxu0 %v4106_v54  ;;  %v4139_v40 = vunpack.c.l.s8.bf16 %v3267_v41  ;;  %v4146_v54 = vunpack.c.h.s8.bf16 %v3266_v1  ;;  %v3281_v1 = vld [vmem:[#allocation10 + $0xbe0] sm:$0xff] }
 0x5cc   : > { %6760 = vmatmul.mubr.bf16.gmra.mrb[172].mxu0 %v16642_v16  ;;  %7726 = vmatprep.subr.bf16.mxu1 %v4108_v27  ;;  %v4148_v27 = vunpack.c.h.s8.bf16 %v3268_v57  ;;  %v3283_v57 = vld [vmem:[#allocation10 + $0xbf0] sm:$0xff] }
 0x5cd   : > { %7664 = vmatmul.mubr.bf16.gmra.mrb[172].mxu1 %v16642_v16  ;;  %6769 = vmatprep.mubr.bf16.mxu0 %v16643_v51  ;;  %v4147_v16 = vunpack.c.h.s8.bf16 %v3267_v41  ;;  %v3290_v41 = vld [vmem:[#allocation10 + $0xc28] sm:$0xff] }
 0x5ce   : > { %6823 = vmatpush1.bf16.msra.mxu0 %v4105_v42  ;;  %7673 = vmatprep.mubr.bf16.mxu1 %v16643_v51  ;;  %v16647_v42 = vld [vmem:[#allocation128_spill] sm:$0xff] }
 0x5cf   : > { %7727 = vmatpush1.bf16.msra.mxu1 %v4107_v53  ;;  %6824 = vmatprep.subr.bf16.mxu0 %v4114_v60  ;;  %v3276_v53 = vld [vmem:[#allocation10 + $0xbb8] sm:$0xff]  ;;  %v4145_v60 = vunpack.c.h.s8.bf16 %v3265_v26 }
 0x5d0   : > { %7728 = vmatprep.subr.bf16.mxu1 %v4116_v47  ;;  %v4154_v47 = vunpack.c.l.s8.bf16 %v3274_v10  ;;  %v4156_v51 = vunpack.c.l.s8.bf16 %v3276_v53  ;;  %v16650_v26 = vld [vmem:[#allocation88_spill] sm:$0xff] }
 0x5d2   : > { %6825 = vmatpush1.bf16.msra.mxu0 %v4113_v30  ;;  %v4153_v30 = vunpack.c.l.s8.bf16 %v3273_v49 }
 0x5d3   : > { %7729 = vmatpush1.bf16.msra.mxu1 %v4115_v6  ;;  %6826 = vmatprep.subr.bf16.mxu0 %v4122_v0  ;;  %v4155_v6 = vunpack.c.l.s8.bf16 %v3275_v24  ;;  %v4162_v0 = vunpack.c.h.s8.bf16 %v3274_v10 }
 0x5d4   : > { %6770 = vmatmul.mubr.bf16.gmra.mrb[176].mxu0 %v16644_v11  ;;  %7730 = vmatprep.subr.bf16.mxu1 %v4124_v33  ;;  %v4164_v33 = vunpack.c.h.s8.bf16 %v3276_v53  ;;  %v3291_v53 = vld [vmem:[#allocation10 + $0xc30] sm:$0xff] }
 0x5d5   : > { %7674 = vmatmul.mubr.bf16.gmra.mrb[176].mxu1 %v16644_v11  ;;  %6779 = vmatprep.mubr.bf16.mxu0 %v16645_v55  ;;  %v4163_v11 = vunpack.c.h.s8.bf16 %v3275_v24  ;;  %v3298_v24 = vld [vmem:[#allocation10 + $0xc68] sm:$0xff] }
 0x5d6   : > { %6827 = vmatpush1.bf16.msra.mxu0 %v4121_v31  ;;  %7683 = vmatprep.mubr.bf16.mxu1 %v16645_v55  ;;  %v16649_v31 = vld [vmem:[#allocation130_spill] sm:$0xff] }
 0x5d7   : > { %7731 = vmatpush1.bf16.msra.mxu1 %v4123_v14  ;;  %6828 = vmatprep.subr.bf16.mxu0 %v4130_v18  ;;  %v3284_v14 = vld [vmem:[#allocation10 + $0xbf8] sm:$0xff]  ;;  %v4161_v18 = vunpack.c.h.s8.bf16 %v3273_v49 }
 0x5d8   : > { %7732 = vmatprep.subr.bf16.mxu1 %v4132_v25  ;;  %v4170_v25 = vunpack.c.l.s8.bf16 %v3282_v8  ;;  %v4172_v55 = vunpack.c.l.s8.bf16 %v3284_v14  ;;  %v16652_v49 = vld [vmem:[#allocation89_spill] sm:$0xff] }
 0x5da   : > { %6829 = vmatpush1.bf16.msra.mxu0 %v4129_v3  ;;  %v4169_v3 = vunpack.c.l.s8.bf16 %v3281_v1 }
 0x5db   : > { %7733 = vmatpush1.bf16.msra.mxu1 %v4131_v12  ;;  %6830 = vmatprep.subr.bf16.mxu0 %v4138_v56  ;;  %v4171_v12 = vunpack.c.l.s8.bf16 %v3283_v57  ;;  %v4178_v56 = vunpack.c.h.s8.bf16 %v3282_v8  ;;  %v3297_v8 = vld [vmem:[#allocation10 + $0xc60] sm:$0xff] }
 0x5dc   : > { %6780 = vmatmul.mubr.bf16.gmra.mrb[180].mxu0 %v16646_v28  ;;  %7734 = vmatprep.subr.bf16.mxu1 %v4140_v50  ;;  %v4180_v50 = vunpack.c.h.s8.bf16 %v3284_v14  ;;  %v3299_v14 = vld [vmem:[#allocation10 + $0xc70] sm:$0xff] }
 0x5dd   : > { %7684 = vmatmul.mubr.bf16.gmra.mrb[180].mxu1 %v16646_v28  ;;  %6789 = vmatprep.mubr.bf16.mxu0 %v16647_v42  ;;  %v4179_v28 = vunpack.c.h.s8.bf16 %v3283_v57  ;;  %v3306_v57 = vld [vmem:[#allocation10 + $0xca8] sm:$0xff] }
 0x5de   : > { %6831 = vmatpush1.bf16.msra.mxu0 %v4137_v61  ;;  %7693 = vmatprep.mubr.bf16.mxu1 %v16647_v42  ;;  %v16651_v61 = vld [vmem:[#allocation39_spill] sm:$0xff]  ;;  %v3289_v42 = vld [vmem:[#allocation10 + $0xc20] sm:$0xff] }
 0x5df   : > { %7735 = vmatpush1.bf16.msra.mxu1 %v4139_v40  ;;  %6832 = vmatprep.subr.bf16.mxu0 %v4146_v54  ;;  %v3292_v40 = vld [vmem:[#allocation10 + $0xc38] sm:$0xff]  ;;  %v4177_v54 = vunpack.c.h.s8.bf16 %v3281_v1 }
 0x5e0   : > { %7736 = vmatprep.subr.bf16.mxu1 %v4148_v27  ;;  %v4186_v27 = vunpack.c.l.s8.bf16 %v3290_v41  ;;  %v4188_v10 = vunpack.c.l.s8.bf16 %v3292_v40  ;;  %v16654_v1 = vld [vmem:[#allocation28_spill] sm:$0xff] }
 0x5e2   : > { %6833 = vmatpush1.bf16.msra.mxu0 %v4145_v60  ;;  %v4185_v60 = vunpack.c.l.s8.bf16 %v3289_v42 }
 0x5e3   : > { %7737 = vmatpush1.bf16.msra.mxu1 %v4147_v16  ;;  %6834 = vmatprep.subr.bf16.mxu0 %v4154_v47  ;;  %v4187_v16 = vunpack.c.l.s8.bf16 %v3291_v53  ;;  %v4194_v47 = vunpack.c.h.s8.bf16 %v3290_v41  ;;  %v3305_v41 = vld [vmem:[#allocation10 + $0xca0] sm:$0xff] }
 0x5e4   : > { %6790 = vmatmul.mubr.bf16.gmra.mrb[184].mxu0 %v16648_v2  ;;  %7738 = vmatprep.subr.bf16.mxu1 %v4156_v51  ;;  %v4196_v51 = vunpack.c.h.s8.bf16 %v3292_v40  ;;  %v3307_v40 = vld [vmem:[#allocation10 + $0xcb0] sm:$0xff] }
 0x5e5   : > { %7694 = vmatmul.mubr.bf16.gmra.mrb[184].mxu1 %v16648_v2  ;;  %6799 = vmatprep.mubr.bf16.mxu0 %v16649_v31  ;;  %v4195_v2 = vunpack.c.h.s8.bf16 %v3291_v53  ;;  %v3314_v53 = vld [vmem:[#allocation10 + $0xce8] sm:$0xff] }
 0x5e6   : > { %6835 = vmatpush1.bf16.msra.mxu0 %v4153_v30  ;;  %7703 = vmatprep.mubr.bf16.mxu1 %v16649_v31  ;;  %v16653_v30 = vld [vmem:[#allocation30_spill] sm:$0xff] }
 0x5e7   : > { %7739 = vmatpush1.bf16.msra.mxu1 %v4155_v6  ;;  %6836 = vmatprep.subr.bf16.mxu0 %v4162_v0  ;;  %v3300_v6 = vld [vmem:[#allocation10 + $0xc78] sm:$0xff]  ;;  %v4193_v0 = vunpack.c.h.s8.bf16 %v3289_v42 }
 0x5e8   : > { %7740 = vmatprep.subr.bf16.mxu1 %v4164_v33  ;;  %v4202_v33 = vunpack.c.l.s8.bf16 %v3298_v24  ;;  %v4204_v31 = vunpack.c.l.s8.bf16 %v3300_v6 }
 0x5ea   : > { %6837 = vmatpush1.bf16.msra.mxu0 %v4161_v18  ;;  %v4201_v18 = vunpack.c.l.s8.bf16 %v3297_v8 }
 0x5eb   : > { %7741 = vmatpush1.bf16.msra.mxu1 %v4163_v11  ;;  %6838 = vmatprep.subr.bf16.mxu0 %v4170_v25  ;;  %v4203_v11 = vunpack.c.l.s8.bf16 %v3299_v14  ;;  %v4210_v25 = vunpack.c.h.s8.bf16 %v3298_v24  ;;  %v3313_v24 = vld [vmem:[#allocation10 + $0xce0] sm:$0xff] }
 0x5ec   : > { %6800 = vmatmul.mubr.bf16.gmra.mrb[188].mxu0 %v16650_v26  ;;  %7742 = vmatprep.subr.bf16.mxu1 %v4172_v55  ;;  %v4212_v55 = vunpack.c.h.s8.bf16 %v3300_v6  ;;  %v3315_v6 = vld [vmem:[#allocation10 + $0xcf0] sm:$0xff] }
 0x5ed   : > { %7704 = vmatmul.mubr.bf16.gmra.mrb[188].mxu1 %v16650_v26  ;;  %6842 = vmatprep.mubr.bf16.mxu0 %v16651_v61  ;;  %v4211_v26 = vunpack.c.h.s8.bf16 %v3299_v14  ;;  %v3322_v14 = vld [vmem:[#allocation10 + $0xd28] sm:$0xff] }
 0x5ee   : > { %6839 = vmatpush1.bf16.msra.mxu0 %v4169_v3  ;;  %7746 = vmatprep.mubr.bf16.mxu1 %v16651_v61  ;;  %v16655_v3 = vld [vmem:[#allocation114_spill] sm:$0xff] }
 0x5ef   : > { %7743 = vmatpush1.bf16.msra.mxu1 %v4171_v12  ;;  %6840 = vmatprep.subr.bf16.mxu0 %v4178_v56  ;;  %v3308_v12 = vld [vmem:[#allocation10 + $0xcb8] sm:$0xff]  ;;  %v4209_v56 = vunpack.c.h.s8.bf16 %v3297_v8 }
 0x5f0   : > { %7744 = vmatprep.subr.bf16.mxu1 %v4180_v50  ;;  %v4218_v50 = vunpack.c.l.s8.bf16 %v3306_v57  ;;  %v4220_v61 = vunpack.c.l.s8.bf16 %v3308_v12  ;;  %v4228_v42 = vunpack.c.h.s8.bf16 %v3308_v12  ;;  %v16658_v8 = vld [vmem:[#allocation116_spill] sm:$0xff] }
 0x5f1   : > { %v3323_v12 = vld [vmem:[#allocation10 + $0xd30] sm:$0xff] }
 0x5f2   : > { %6841 = vmatpush1.bf16.msra.mxu0 %v4177_v54  ;;  %v4217_v54 = vunpack.c.l.s8.bf16 %v3305_v41 }
 0x5f3   : > { %7745 = vmatpush1.bf16.msra.mxu1 %v4179_v28  ;;  %6923 = vmatprep.subr.bf16.mxu0 %v4186_v27  ;;  %v4219_v28 = vunpack.c.l.s8.bf16 %v3307_v40  ;;  %v4226_v27 = vunpack.c.h.s8.bf16 %v3306_v57  ;;  %v3321_v57 = vld [vmem:[#allocation10 + $0xd20] sm:$0xff] }
 0x5f4   : > { %7827 = vmatprep.subr.bf16.mxu1 %v4188_v10  ;;  %v16656_v10 = vld [vmem:[#allocation100_spill] sm:$0xff] }
 0x5f5   : > { %6843 = vmatmul.mubr.bf16.vlgmr.msra.gmra.mrb[160].mxu0 %v16652_v49 }
 0x5f6   : > { %7747 = vmatmul.mubr.bf16.vlgmr.msra.gmra.mrb[160].mxu1 %v16652_v49  ;;  %6852 = vmatprep.mubr.bf16.mxu0 %v16653_v30  ;;  %v4227_v49 = vunpack.c.h.s8.bf16 %v3307_v40  ;;  %v3330_v40 = vld [vmem:[#allocation10 + $0xd68] sm:$0xff] }
 0x5f7   : > { %6924 = vmatpush1.bf16.msra.mxu0 %v4185_v60  ;;  %7756 = vmatprep.mubr.bf16.mxu1 %v16653_v30  ;;  %v16657_v60 = vld [vmem:[#allocation118_spill] sm:$0xff] }
 0x5f8   : > { %7828 = vmatpush1.bf16.msra.mxu1 %v4187_v16  ;;  %6925 = vmatprep.subr.bf16.mxu0 %v4194_v47  ;;  %v3316_v16 = vld [vmem:[#allocation10 + $0xcf8] sm:$0xff]  ;;  %v4225_v47 = vunpack.c.h.s8.bf16 %v3305_v41 }
 0x5f9   : > { %7829 = vmatprep.subr.bf16.mxu1 %v4196_v51  ;;  %v4234_v51 = vunpack.c.l.s8.bf16 %v3314_v53  ;;  %v4236_v30 = vunpack.c.l.s8.bf16 %v3316_v16  ;;  %v16660_v41 = vld [vmem:[#allocation120_spill] sm:$0xff] }
 0x5fb   : > { %6926 = vmatpush1.bf16.msra.mxu0 %v4193_v0  ;;  %v4233_v0 = vunpack.c.l.s8.bf16 %v3313_v24 }
 0x5fc   : > { %7830 = vmatpush1.bf16.msra.mxu1 %v4195_v2  ;;  %6927 = vmatprep.subr.bf16.mxu0 %v4202_v33  ;;  %v4235_v2 = vunpack.c.l.s8.bf16 %v3315_v6  ;;  %v4242_v33 = vunpack.c.h.s8.bf16 %v3314_v53  ;;  %v3329_v53 = vld [vmem:[#allocation10 + $0xd60] sm:$0xff] }
 0x5fd   : > { %6853 = vmatmul.mubr.bf16.gmra.mrb[164].mxu0 %v16654_v1  ;;  %7831 = vmatprep.subr.bf16.mxu1 %v4204_v31  ;;  %v4244_v31 = vunpack.c.h.s8.bf16 %v3316_v16  ;;  %v3331_v16 = vld [vmem:[#allocation10 + $0xd70] sm:$0xff] }
 0x5fe   : > { %7757 = vmatmul.mubr.bf16.gmra.mrb[164].mxu1 %v16654_v1  ;;  %6862 = vmatprep.mubr.bf16.mxu0 %v16655_v3  ;;  %v4243_v1 = vunpack.c.h.s8.bf16 %v3315_v6  ;;  %v3338_v6 = vld [vmem:[#allocation10 + $0xda8] sm:$0xff] }
 0x5ff   : > { %6928 = vmatpush1.bf16.msra.mxu0 %v4201_v18  ;;  %7766 = vmatprep.mubr.bf16.mxu1 %v16655_v3  ;;  %v16659_v18 = vld [vmem:[#allocation122_spill] sm:$0xff] }
 0x600   : > { %7832 = vmatpush1.bf16.msra.mxu1 %v4203_v11  ;;  %6929 = vmatprep.subr.bf16.mxu0 %v4210_v25  ;;  %v3324_v11 = vld [vmem:[#allocation10 + $0xd38] sm:$0xff]  ;;  %v4241_v25 = vunpack.c.h.s8.bf16 %v3313_v24 }
 0x601   : > { %7833 = vmatprep.subr.bf16.mxu1 %v4212_v55  ;;  %v4250_v55 = vunpack.c.l.s8.bf16 %v3322_v14  ;;  %v4252_v3 = vunpack.c.l.s8.bf16 %v3324_v11  ;;  %v16662_v24 = vld [vmem:[#allocation124_spill] sm:$0xff] }
 0x603   : > { %6930 = vmatpush1.bf16.msra.mxu0 %v4209_v56  ;;  %v4249_v56 = vunpack.c.l.s8.bf16 %v3321_v57 }
 0x604   : > { %7834 = vmatpush1.bf16.msra.mxu1 %v4211_v26  ;;  %6931 = vmatprep.subr.bf16.mxu0 %v4218_v50  ;;  %v4251_v26 = vunpack.c.l.s8.bf16 %v3323_v12  ;;  %v4258_v50 = vunpack.c.h.s8.bf16 %v3322_v14  ;;  %v3337_v14 = vld [vmem:[#allocation10 + $0xda0] sm:$0xff] }
 0x605   : > { %6863 = vmatmul.mubr.bf16.gmra.mrb[168].mxu0 %v16656_v10  ;;  %7835 = vmatprep.subr.bf16.mxu1 %v4220_v61  ;;  %v4260_v61 = vunpack.c.h.s8.bf16 %v3324_v11  ;;  %v3339_v11 = vld [vmem:[#allocation10 + $0xdb0] sm:$0xff] }
 0x606   : > { %7767 = vmatmul.mubr.bf16.gmra.mrb[168].mxu1 %v16656_v10  ;;  %6872 = vmatprep.mubr.bf16.mxu0 %v16657_v60  ;;  %v4259_v10 = vunpack.c.h.s8.bf16 %v3323_v12  ;;  %v3346_v12 = vld [vmem:[#allocation10 + $0xde8] sm:$0xff] }
 0x607   : > { %6932 = vmatpush1.bf16.msra.mxu0 %v4217_v54  ;;  %7776 = vmatprep.mubr.bf16.mxu1 %v16657_v60  ;;  %v16661_v54 = vld [vmem:[#allocation126_spill] sm:$0xff] }
 0x608   : > { %7836 = vmatpush1.bf16.msra.mxu1 %v4219_v28  ;;  %6933 = vmatprep.subr.bf16.mxu0 %v4226_v27  ;;  %v3332_v28 = vld [vmem:[#allocation10 + $0xd78] sm:$0xff]  ;;  %v4257_v27 = vunpack.c.h.s8.bf16 %v3321_v57 }
 0x609   : > { %7837 = vmatprep.subr.bf16.mxu1 %v4228_v42  ;;  %v4266_v42 = vunpack.c.l.s8.bf16 %v3330_v40  ;;  %v4268_v60 = vunpack.c.l.s8.bf16 %v3332_v28  ;;  %v16664_v57 = vld [vmem:[#allocation112_spill] sm:$0xff] }
 0x60b   : > { %6934 = vmatpush1.bf16.msra.mxu0 %v4225_v47  ;;  %v4265_v47 = vunpack.c.l.s8.bf16 %v3329_v53 }
 0x60c   : > { %7838 = vmatpush1.bf16.msra.mxu1 %v4227_v49  ;;  %6935 = vmatprep.subr.bf16.mxu0 %v4234_v51  ;;  %v4267_v49 = vunpack.c.l.s8.bf16 %v3331_v16  ;;  %v4274_v51 = vunpack.c.h.s8.bf16 %v3330_v40  ;;  %v3345_v40 = vld [vmem:[#allocation10 + $0xde0] sm:$0xff] }
 0x60d   : > { %6873 = vmatmul.mubr.bf16.gmra.mrb[172].mxu0 %v16658_v8  ;;  %7839 = vmatprep.subr.bf16.mxu1 %v4236_v30  ;;  %v4276_v30 = vunpack.c.h.s8.bf16 %v3332_v28  ;;  %v3347_v28 = vld [vmem:[#allocation10 + $0xdf0] sm:$0xff] }
 0x60e   : > { %7777 = vmatmul.mubr.bf16.gmra.mrb[172].mxu1 %v16658_v8  ;;  %6882 = vmatprep.mubr.bf16.mxu0 %v16659_v18  ;;  %v4275_v8 = vunpack.c.h.s8.bf16 %v3331_v16  ;;  %v3354_v16 = vld [vmem:[#allocation10 + $0xe28] sm:$0xff] }
 0x60f   : > { %6936 = vmatpush1.bf16.msra.mxu0 %v4233_v0  ;;  %7786 = vmatprep.mubr.bf16.mxu1 %v16659_v18  ;;  %v16663_v0 = vld [vmem:[#allocation113_spill] sm:$0xff] }
 0x610   : > { %7840 = vmatpush1.bf16.msra.mxu1 %v4235_v2  ;;  %6937 = vmatprep.subr.bf16.mxu0 %v4242_v33  ;;  %v3340_v2 = vld [vmem:[#allocation10 + $0xdb8] sm:$0xff]  ;;  %v4273_v33 = vunpack.c.h.s8.bf16 %v3329_v53 }
 0x611   : > { %7841 = vmatprep.subr.bf16.mxu1 %v4244_v31  ;;  %v4282_v31 = vunpack.c.l.s8.bf16 %v3338_v6  ;;  %v4284_v18 = vunpack.c.l.s8.bf16 %v3340_v2  ;;  %v16666_v53 = vld [vmem:[#allocation129_spill] sm:$0xff] }
 0x613   : > { %6938 = vmatpush1.bf16.msra.mxu0 %v4241_v25  ;;  %v4281_v25 = vunpack.c.l.s8.bf16 %v3337_v14 }
 0x614   : > { %7842 = vmatpush1.bf16.msra.mxu1 %v4243_v1  ;;  %6939 = vmatprep.subr.bf16.mxu0 %v4250_v55  ;;  %v4283_v1 = vunpack.c.l.s8.bf16 %v3339_v11  ;;  %v4290_v55 = vunpack.c.h.s8.bf16 %v3338_v6 }
 0x615   : > { %6883 = vmatmul.mubr.bf16.gmra.mrb[176].mxu0 %v16660_v41  ;;  %7843 = vmatprep.subr.bf16.mxu1 %v4252_v3  ;;  %v4292_v3 = vunpack.c.h.s8.bf16 %v3340_v2  ;;  %v3355_v2 = vld [vmem:[#allocation10 + $0xe30] sm:$0xff] }
 0x616   : > { %7787 = vmatmul.mubr.bf16.gmra.mrb[176].mxu1 %v16660_v41  ;;  %6892 = vmatprep.mubr.bf16.mxu0 %v16661_v54  ;;  %v4291_v41 = vunpack.c.h.s8.bf16 %v3339_v11  ;;  %v3362_v11 = vld [vmem:[#allocation10 + $0xe68] sm:$0xff] }
 0x617   : > { %6940 = vmatpush1.bf16.msra.mxu0 %v4249_v56  ;;  %7796 = vmatprep.mubr.bf16.mxu1 %v16661_v54  ;;  %v16665_v56 = vld [vmem:[#allocation131_spill] sm:$0xff] }
 0x618   : > { %7844 = vmatpush1.bf16.msra.mxu1 %v4251_v26  ;;  %6941 = vmatprep.subr.bf16.mxu0 %v4258_v50  ;;  %v3348_v26 = vld [vmem:[#allocation10 + $0xdf8] sm:$0xff]  ;;  %v4289_v50 = vunpack.c.h.s8.bf16 %v3337_v14 }
 0x619   : > { %7845 = vmatprep.subr.bf16.mxu1 %v4260_v61  ;;  %v4298_v61 = vunpack.c.l.s8.bf16 %v3346_v12  ;;  %v4300_v54 = vunpack.c.l.s8.bf16 %v3348_v26  ;;  %v16668_v14 = vld [vmem:[#allocation132_spill] sm:$0xff] }
 0x61b   : > { %6942 = vmatpush1.bf16.msra.mxu0 %v4257_v27  ;;  %v4297_v27 = vunpack.c.l.s8.bf16 %v3345_v40 }
 0x61c   : > { %7846 = vmatpush1.bf16.msra.mxu1 %v4259_v10  ;;  %6943 = vmatprep.subr.bf16.mxu0 %v4266_v42  ;;  %v4299_v10 = vunpack.c.l.s8.bf16 %v3347_v28  ;;  %v4306_v42 = vunpack.c.h.s8.bf16 %v3346_v12  ;;  %v3361_v12 = vld [vmem:[#allocation10 + $0xe60] sm:$0xff] }
 0x61d   : > { %6893 = vmatmul.mubr.bf16.gmra.mrb[180].mxu0 %v16662_v24  ;;  %7847 = vmatprep.subr.bf16.mxu1 %v4268_v60  ;;  %v4308_v60 = vunpack.c.h.s8.bf16 %v3348_v26  ;;  %v3363_v26 = vld [vmem:[#allocation10 + $0xe70] sm:$0xff] }
 0x61e   : > { %7797 = vmatmul.mubr.bf16.gmra.mrb[180].mxu1 %v16662_v24  ;;  %6902 = vmatprep.mubr.bf16.mxu0 %v16663_v0  ;;  %v4307_v24 = vunpack.c.h.s8.bf16 %v3347_v28  ;;  %v3370_v28 = vld [vmem:[#allocation10 + $0xea8] sm:$0xff] }
 0x61f   : > { %6944 = vmatpush1.bf16.msra.mxu0 %v4265_v47  ;;  %7806 = vmatprep.mubr.bf16.mxu1 %v16663_v0  ;;  %v16667_v47 = vld [vmem:[#allocation134_spill] sm:$0xff] }
 0x620   : > { %7848 = vmatpush1.bf16.msra.mxu1 %v4267_v49  ;;  %6945 = vmatprep.subr.bf16.mxu0 %v4274_v51  ;;  %v3356_v49 = vld [vmem:[#allocation10 + $0xe38] sm:$0xff]  ;;  %v4305_v51 = vunpack.c.h.s8.bf16 %v3345_v40  ;;  %v3353_v0 = vld [vmem:[#allocation10 + $0xe20] sm:$0xff] }
 0x621   : > { %7849 = vmatprep.subr.bf16.mxu1 %v4276_v30  ;;  %v4314_v30 = vunpack.c.l.s8.bf16 %v3354_v16  ;;  %v4316_v6 = vunpack.c.l.s8.bf16 %v3356_v49  ;;  %v16670_v40 = vld [vmem:[#allocation136_spill] sm:$0xff] }
 0x623   : > { %6946 = vmatpush1.bf16.msra.mxu0 %v4273_v33  ;;  %v4313_v33 = vunpack.c.l.s8.bf16 %v3353_v0 }
 0x624   : > { %7850 = vmatpush1.bf16.msra.mxu1 %v4275_v8  ;;  %6947 = vmatprep.subr.bf16.mxu0 %v4282_v31  ;;  %v4315_v8 = vunpack.c.l.s8.bf16 %v3355_v2  ;;  %v4322_v31 = vunpack.c.h.s8.bf16 %v3354_v16  ;;  %v3369_v16 = vld [vmem:[#allocation10 + $0xea0] sm:$0xff] }
 0x625   : > { %6903 = vmatmul.mubr.bf16.gmra.mrb[184].mxu0 %v16664_v57  ;;  %7851 = vmatprep.subr.bf16.mxu1 %v4284_v18  ;;  %v4324_v18 = vunpack.c.h.s8.bf16 %v3356_v49  ;;  %v3371_v49 = vld [vmem:[#allocation10 + $0xeb0] sm:$0xff] }
 0x626   : > { %7807 = vmatmul.mubr.bf16.gmra.mrb[184].mxu1 %v16664_v57  ;;  %6912 = vmatprep.mubr.bf16.mxu0 %v16665_v56  ;;  %v4323_v57 = vunpack.c.h.s8.bf16 %v3355_v2  ;;  %v3378_v2 = vld [vmem:[#allocation10 + $0xee8] sm:$0xff] }
 0x627   : > { %6948 = vmatpush1.bf16.msra.mxu0 %v4281_v25  ;;  %7816 = vmatprep.mubr.bf16.mxu1 %v16665_v56  ;;  %v16669_v25 = vld [vmem:[#allocation138_spill] sm:$0xff] }
 0x628   : > { %7852 = vmatpush1.bf16.msra.mxu1 %v4283_v1  ;;  %6949 = vmatprep.subr.bf16.mxu0 %v4290_v55  ;;  %v3364_v1 = vld [vmem:[#allocation10 + $0xe78] sm:$0xff]  ;;  %v4321_v55 = vunpack.c.h.s8.bf16 %v3353_v0 }
 0x629   : > { %7853 = vmatprep.subr.bf16.mxu1 %v4292_v3  ;;  %v4330_v3 = vunpack.c.l.s8.bf16 %v3362_v11  ;;  %v4332_v56 = vunpack.c.l.s8.bf16 %v3364_v1 }
 0x62b   : > { %6950 = vmatpush1.bf16.msra.mxu0 %v4289_v50  ;;  %v4329_v50 = vunpack.c.l.s8.bf16 %v3361_v12 }
 0x62c   : > { %7854 = vmatpush1.bf16.msra.mxu1 %v4291_v41  ;;  %6951 = vmatprep.subr.bf16.mxu0 %v4298_v61  ;;  %v4331_v41 = vunpack.c.l.s8.bf16 %v3363_v26  ;;  %v4338_v61 = vunpack.c.h.s8.bf16 %v3362_v11  ;;  %v3377_v11 = vld [vmem:[#allocation10 + $0xee0] sm:$0xff] }
 0x62d   : > { %6913 = vmatmul.mubr.bf16.gmra.mrb[188].mxu0 %v16666_v53  ;;  %7855 = vmatprep.subr.bf16.mxu1 %v4300_v54  ;;  %v4340_v54 = vunpack.c.h.s8.bf16 %v3364_v1  ;;  %v3379_v1 = vld [vmem:[#allocation10 + $0xef0] sm:$0xff] }
 0x62e   : > { %7817 = vmatmul.mubr.bf16.gmra.mrb[188].mxu1 %v16666_v53  ;;  %6955 = vmatprep.mubr.bf16.mxu0 %v16667_v47  ;;  %v4339_v53 = vunpack.c.h.s8.bf16 %v3363_v26  ;;  %v3386_v26 = vld [vmem:[#allocation10 + $0xf28] sm:$0xff] }
 0x62f   : > { %6952 = vmatpush1.bf16.msra.mxu0 %v4297_v27  ;;  %7859 = vmatprep.mubr.bf16.mxu1 %v16667_v47  ;;  %v16671_v27 = vld [vmem:[#allocation142_spill] sm:$0xff] }
 0x630   : > { %7856 = vmatpush1.bf16.msra.mxu1 %v4299_v10  ;;  %6953 = vmatprep.subr.bf16.mxu0 %v4306_v42  ;;  %v3372_v10 = vld [vmem:[#allocation10 + $0xeb8] sm:$0xff]  ;;  %v4337_v42 = vunpack.c.h.s8.bf16 %v3361_v12 }
 0x631   : > { %7857 = vmatprep.subr.bf16.mxu1 %v4308_v60  ;;  %v4346_v60 = vunpack.c.l.s8.bf16 %v3370_v28  ;;  %v4348_v47 = vunpack.c.l.s8.bf16 %v3372_v10  ;;  %v4356_v0 = vunpack.c.h.s8.bf16 %v3372_v10  ;;  %v16674_v12 = vld [vmem:[#allocation144_spill] sm:$0xff] }
 0x632   : > { %v3387_v10 = vld [vmem:[#allocation10 + $0xf30] sm:$0xff] }
 0x633   : > { %6954 = vmatpush1.bf16.msra.mxu0 %v4305_v51  ;;  %v4345_v51 = vunpack.c.l.s8.bf16 %v3369_v16 }
 0x634   : > { %7858 = vmatpush1.bf16.msra.mxu1 %v4307_v24  ;;  %7036 = vmatprep.subr.bf16.mxu0 %v4314_v30  ;;  %v4347_v24 = vunpack.c.l.s8.bf16 %v3371_v49  ;;  %v4354_v30 = vunpack.c.h.s8.bf16 %v3370_v28  ;;  %v3385_v28 = vld [vmem:[#allocation10 + $0xf20] sm:$0xff] }
 0x635   : > { %7940 = vmatprep.subr.bf16.mxu1 %v4316_v6  ;;  %v16672_v6 = vld [vmem:[#allocation140_spill] sm:$0xff] }
 0x636   : > { %6956 = vmatmul.mubr.bf16.vlgmr.msra.gmra.mrb[160].mxu0 %v16668_v14 }
 0x637   : > { %7860 = vmatmul.mubr.bf16.vlgmr.msra.gmra.mrb[160].mxu1 %v16668_v14  ;;  %6965 = vmatprep.mubr.bf16.mxu0 %v16669_v25  ;;  %v4355_v14 = vunpack.c.h.s8.bf16 %v3371_v49  ;;  %v3394_v49 = vld [vmem:[#allocation10 + $0xf68] sm:$0xff] }
 0x638   : > { %7037 = vmatpush1.bf16.msra.mxu0 %v4313_v33  ;;  %7869 = vmatprep.mubr.bf16.mxu1 %v16669_v25  ;;  %v16673_v33 = vld [vmem:[#allocation146_spill] sm:$0xff] }
 0x639   : > { %7941 = vmatpush1.bf16.msra.mxu1 %v4315_v8  ;;  %7038 = vmatprep.subr.bf16.mxu0 %v4322_v31  ;;  %v3380_v8 = vld [vmem:[#allocation10 + $0xef8] sm:$0xff]  ;;  %v4353_v31 = vunpack.c.h.s8.bf16 %v3369_v16 }
 0x63a   : > { %7942 = vmatprep.subr.bf16.mxu1 %v4324_v18  ;;  %v4362_v18 = vunpack.c.l.s8.bf16 %v3378_v2  ;;  %v4364_v25 = vunpack.c.l.s8.bf16 %v3380_v8  ;;  %v16676_v16 = vld [vmem:[#allocation148_spill] sm:$0xff] }
 0x63c   : > { %7039 = vmatpush1.bf16.msra.mxu0 %v4321_v55  ;;  %v4361_v55 = vunpack.c.l.s8.bf16 %v3377_v11 }
 0x63d   : > { %7943 = vmatpush1.bf16.msra.mxu1 %v4323_v57  ;;  %7040 = vmatprep.subr.bf16.mxu0 %v4330_v3  ;;  %v4363_v57 = vunpack.c.l.s8.bf16 %v3379_v1  ;;  %v4370_v3 = vunpack.c.h.s8.bf16 %v3378_v2  ;;  %v3393_v2 = vld [vmem:[#allocation10 + $0xf60] sm:$0xff] }
 0x63e   : > { %6966 = vmatmul.mubr.bf16.gmra.mrb[164].mxu0 %v16670_v40  ;;  %7944 = vmatprep.subr.bf16.mxu1 %v4332_v56  ;;  %v4372_v56 = vunpack.c.h.s8.bf16 %v3380_v8  ;;  %v3395_v8 = vld [vmem:[#allocation10 + $0xf70] sm:$0xff] }
 0x63f   : > { %7870 = vmatmul.mubr.bf16.gmra.mrb[164].mxu1 %v16670_v40  ;;  %6975 = vmatprep.mubr.bf16.mxu0 %v16671_v27  ;;  %v4371_v40 = vunpack.c.h.s8.bf16 %v3379_v1  ;;  %v3402_v1 = vld [vmem:[#allocation10 + $0xfa8] sm:$0xff] }
 0x640   : > { %7041 = vmatpush1.bf16.msra.mxu0 %v4329_v50  ;;  %7879 = vmatprep.mubr.bf16.mxu1 %v16671_v27  ;;  %v16675_v50 = vld [vmem:[#allocation150_spill] sm:$0xff] }
 0x641   : > { %7945 = vmatpush1.bf16.msra.mxu1 %v4331_v41  ;;  %7042 = vmatprep.subr.bf16.mxu0 %v4338_v61  ;;  %v3388_v41 = vld [vmem:[#allocation10 + $0xf38] sm:$0xff]  ;;  %v4369_v61 = vunpack.c.h.s8.bf16 %v3377_v11 }
 0x642   : > { %7946 = vmatprep.subr.bf16.mxu1 %v4340_v54  ;;  %v4378_v54 = vunpack.c.l.s8.bf16 %v3386_v26  ;;  %v4380_v27 = vunpack.c.l.s8.bf16 %v3388_v41  ;;  %v16678_v11 = vld [vmem:[#allocation152_spill] sm:$0xff] }
 0x644   : > { %7043 = vmatpush1.bf16.msra.mxu0 %v4337_v42  ;;  %v4377_v42 = vunpack.c.l.s8.bf16 %v3385_v28 }
 0x645   : > { %7947 = vmatpush1.bf16.msra.mxu1 %v4339_v53  ;;  %7044 = vmatprep.subr.bf16.mxu0 %v4346_v60  ;;  %v4379_v53 = vunpack.c.l.s8.bf16 %v3387_v10  ;;  %v4386_v60 = vunpack.c.h.s8.bf16 %v3386_v26  ;;  %v3401_v26 = vld [vmem:[#allocation10 + $0xfa0] sm:$0xff] }
 0x646   : > { %6976 = vmatmul.mubr.bf16.gmra.mrb[168].mxu0 %v16672_v6  ;;  %7948 = vmatprep.subr.bf16.mxu1 %v4348_v47  ;;  %v4388_v47 = vunpack.c.h.s8.bf16 %v3388_v41  ;;  %v3403_v41 = vld [vmem:[#allocation10 + $0xfb0] sm:$0xff] }
 0x647   : > { %7880 = vmatmul.mubr.bf16.gmra.mrb[168].mxu1 %v16672_v6  ;;  %6985 = vmatprep.mubr.bf16.mxu0 %v16673_v33  ;;  %v4387_v6 = vunpack.c.h.s8.bf16 %v3387_v10  ;;  %v3410_v10 = vld [vmem:[#allocation10 + $0xfe8] sm:$0xff] }
 0x648   : > { %7045 = vmatpush1.bf16.msra.mxu0 %v4345_v51  ;;  %7889 = vmatprep.mubr.bf16.mxu1 %v16673_v33  ;;  %v16677_v51 = vld [vmem:[#allocation154_spill] sm:$0xff] }
 0x649   : > { %7949 = vmatpush1.bf16.msra.mxu1 %v4347_v24  ;;  %7046 = vmatprep.subr.bf16.mxu0 %v4354_v30  ;;  %v3396_v24 = vld [vmem:[#allocation10 + $0xf78] sm:$0xff]  ;;  %v4385_v30 = vunpack.c.h.s8.bf16 %v3385_v28 }
 0x64a   : > { %7950 = vmatprep.subr.bf16.mxu1 %v4356_v0  ;;  %v4394_v0 = vunpack.c.l.s8.bf16 %v3394_v49  ;;  %v4396_v33 = vunpack.c.l.s8.bf16 %v3396_v24  ;;  %v16680_v28 = vld [vmem:[#allocation156_spill] sm:$0xff] }
 0x64c   : > { %7047 = vmatpush1.bf16.msra.mxu0 %v4353_v31  ;;  %v4393_v31 = vunpack.c.l.s8.bf16 %v3393_v2 }
 0x64d   : > { %7951 = vmatpush1.bf16.msra.mxu1 %v4355_v14  ;;  %7048 = vmatprep.subr.bf16.mxu0 %v4362_v18  ;;  %v4395_v14 = vunpack.c.l.s8.bf16 %v3395_v8  ;;  %v4402_v18 = vunpack.c.h.s8.bf16 %v3394_v49  ;;  %v3409_v49 = vld [vmem:[#allocation10 + $0xfe0] sm:$0xff] }
 0x64e   : > { %6986 = vmatmul.mubr.bf16.gmra.mrb[172].mxu0 %v16674_v12  ;;  %7952 = vmatprep.subr.bf16.mxu1 %v4364_v25  ;;  %v4404_v25 = vunpack.c.h.s8.bf16 %v3396_v24  ;;  %v3411_v24 = vld [vmem:[#allocation10 + $0xff0] sm:$0xff] }
 0x64f   : > { %7890 = vmatmul.mubr.bf16.gmra.mrb[172].mxu1 %v16674_v12  ;;  %6995 = vmatprep.mubr.bf16.mxu0 %v16675_v50  ;;  %v4403_v12 = vunpack.c.h.s8.bf16 %v3395_v8  ;;  %v8589_v8 = vld [vmem:[#allocation14 + $0x20] sm:$0xff] }
 0x650   : > { %7049 = vmatpush1.bf16.msra.mxu0 %v4361_v55  ;;  %7899 = vmatprep.mubr.bf16.mxu1 %v16675_v50  ;;  %v16679_v55 = vld [vmem:[#allocation158_spill] sm:$0xff] }
 0x651   : > { %7953 = vmatpush1.bf16.msra.mxu1 %v4363_v57  ;;  %7050 = vmatprep.subr.bf16.mxu0 %v4370_v3  ;;  %v3404_v57 = vld [vmem:[#allocation10 + $0xfb8] sm:$0xff]  ;;  %v4401_v3 = vunpack.c.h.s8.bf16 %v3393_v2 }
 0x652   : > { %7954 = vmatprep.subr.bf16.mxu1 %v4372_v56  ;;  %v4410_v56 = vunpack.c.l.s8.bf16 %v3402_v1  ;;  %v4412_v50 = vunpack.c.l.s8.bf16 %v3404_v57  ;;  %v16682_v2 = vld [vmem:[#allocation160_spill] sm:$0xff] }
 0x654   : > { %7051 = vmatpush1.bf16.msra.mxu0 %v4369_v61  ;;  %v4409_v61 = vunpack.c.l.s8.bf16 %v3401_v26 }
 0x655   : > { %7955 = vmatpush1.bf16.msra.mxu1 %v4371_v40  ;;  %7052 = vmatprep.subr.bf16.mxu0 %v4378_v54  ;;  %v4411_v40 = vunpack.c.l.s8.bf16 %v3403_v41  ;;  %v4418_v54 = vunpack.c.h.s8.bf16 %v3402_v1 }
 0x656   : > { %6996 = vmatmul.mubr.bf16.gmra.mrb[176].mxu0 %v16676_v16  ;;  %7956 = vmatprep.subr.bf16.mxu1 %v4380_v27  ;;  %v4420_v27 = vunpack.c.h.s8.bf16 %v3404_v57  ;;  %v8593_v57 = vld [vmem:[#allocation14 + $0x40] sm:$0xff] }
 0x657   : > { %7900 = vmatmul.mubr.bf16.gmra.mrb[176].mxu1 %v16676_v16  ;;  %7005 = vmatprep.mubr.bf16.mxu0 %v16677_v51  ;;  %v4419_v16 = vunpack.c.h.s8.bf16 %v3403_v41  ;;  %v8590_v41 = vld [vmem:[#allocation14 + $0x28] sm:$0xff] }
 0x658   : > { %7053 = vmatpush1.bf16.msra.mxu0 %v4377_v42  ;;  %7909 = vmatprep.mubr.bf16.mxu1 %v16677_v51  ;;  %v16681_v42 = vld [vmem:[#allocation162_spill] sm:$0xff] }
 0x659   : > { %7957 = vmatpush1.bf16.msra.mxu1 %v4379_v53  ;;  %7054 = vmatprep.subr.bf16.mxu0 %v4386_v60  ;;  %v3412_v53 = vld [vmem:[#allocation10 + $0xff8] sm:$0xff]  ;;  %v4417_v60 = vunpack.c.h.s8.bf16 %v3401_v26 }
 0x65a   : > { %7958 = vmatprep.subr.bf16.mxu1 %v4388_v47  ;;  %v4426_v47 = vunpack.c.l.s8.bf16 %v3410_v10  ;;  %v4428_v51 = vunpack.c.l.s8.bf16 %v3412_v53  ;;  %v16684_v26 = vld [vmem:[#allocation133_spill] sm:$0xff] }
 0x65c   : > { %7055 = vmatpush1.bf16.msra.mxu0 %v4385_v30  ;;  %v4425_v30 = vunpack.c.l.s8.bf16 %v3409_v49 }
 0x65d   : > { %7959 = vmatpush1.bf16.msra.mxu1 %v4387_v6  ;;  %7056 = vmatprep.subr.bf16.mxu0 %v4394_v0  ;;  %v4427_v6 = vunpack.c.l.s8.bf16 %v3411_v24  ;;  %v4434_v0 = vunpack.c.h.s8.bf16 %v3410_v10  ;;  %v8586_v10 = vld [vmem:[#allocation14 + $0x8] sm:$0xff] }
 0x65e   : > { %7006 = vmatmul.mubr.bf16.gmra.mrb[180].mxu0 %v16678_v11  ;;  %7960 = vmatprep.subr.bf16.mxu1 %v4396_v33  ;;  %v4436_v33 = vunpack.c.h.s8.bf16 %v3412_v53  ;;  %v8594_v53 = vld [vmem:[#allocation14 + $0x48] sm:$0xff] }
 0x65f   : > { %7910 = vmatmul.mubr.bf16.gmra.mrb[180].mxu1 %v16678_v11  ;;  %7015 = vmatprep.mubr.bf16.mxu0 %v16679_v55  ;;  %v4435_v11 = vunpack.c.h.s8.bf16 %v3411_v24  ;;  %v8591_v24 = vld [vmem:[#allocation14 + $0x30] sm:$0xff] }
 0x660   : > { %7057 = vmatpush1.bf16.msra.mxu0 %v4393_v31  ;;  %7919 = vmatprep.mubr.bf16.mxu1 %v16679_v55  ;;  %v16683_v31 = vld [vmem:[#allocation135_spill] sm:$0xff] }
 0x661   : > { %7961 = vmatpush1.bf16.msra.mxu1 %v4395_v14  ;;  %7058 = vmatprep.subr.bf16.mxu0 %v4402_v18  ;;  %v8597_v14 = vld [vmem:[#allocation14 + $0x60] sm:$0xff]  ;;  %v4433_v18 = vunpack.c.h.s8.bf16 %v3409_v49  ;;  %v16686_v49 = vld [vmem:[#allocation137_spill] sm:$0xff] }
 0x662   : > { %7962 = vmatprep.subr.bf16.mxu1 %v4404_v25  ;;  %v8625_v25 = vunpack.c.l.s8.bf16 %v8589_v8  ;;  %v8641_v1 = vunpack.c.l.s8.bf16 %v8597_v14  ;;  %v8585_v55 = vld [vmem:[#allocation14] sm:$0xff] }
 0x664   : > { %7059 = vmatpush1.bf16.msra.mxu0 %v4401_v3  ;;  %v8617_v3 = vunpack.c.l.s8.bf16 %v8585_v55 }
 0x665   : > { %7963 = vmatpush1.bf16.msra.mxu1 %v4403_v12  ;;  %7060 = vmatprep.subr.bf16.mxu0 %v4410_v56  ;;  %v8633_v12 = vunpack.c.l.s8.bf16 %v8593_v57  ;;  %v8626_v56 = vunpack.c.h.s8.bf16 %v8589_v8  ;;  %v8587_v8 = vld [vmem:[#allocation14 + $0x10] sm:$0xff] }
 0x666   : > { %7016 = vmatmul.mubr.bf16.gmra.mrb[184].mxu0 %v16680_v28  ;;  %7964 = vmatprep.subr.bf16.mxu1 %v4412_v50  ;;  %v8642_v50 = vunpack.c.h.s8.bf16 %v8597_v14  ;;  %v8595_v14 = vld [vmem:[#allocation14 + $0x50] sm:$0xff] }
 0x667   : > { %7920 = vmatmul.mubr.bf16.gmra.mrb[184].mxu1 %v16680_v28  ;;  %7025 = vmatprep.mubr.bf16.mxu0 %v16681_v42  ;;  %v8634_v28 = vunpack.c.h.s8.bf16 %v8593_v57  ;;  %v8592_v57 = vld [vmem:[#allocation14 + $0x38] sm:$0xff] }
 0x668   : > { %7061 = vmatpush1.bf16.msra.mxu0 %v4409_v61  ;;  %7929 = vmatprep.mubr.bf16.mxu1 %v16681_v42  ;;  %v16685_v61 = vld [vmem:[#allocation139_spill] sm:$0xff] }
 0x669   : > { %7965 = vmatpush1.bf16.msra.mxu1 %v4411_v40  ;;  %7062 = vmatprep.subr.bf16.mxu0 %v4418_v54  ;;  %v8598_v40 = vld [vmem:[#allocation14 + $0x68] sm:$0xff]  ;;  %v8618_v54 = vunpack.c.h.s8.bf16 %v8585_v55 }
 0x66a   : > { %7966 = vmatprep.subr.bf16.mxu1 %v4420_v27  ;;  %v8627_v27 = vunpack.c.l.s8.bf16 %v8590_v41  ;;  %v8643_v42 = vunpack.c.l.s8.bf16 %v8598_v40 }
 0x66c   : > { %7063 = vmatpush1.bf16.msra.mxu0 %v4417_v60  ;;  %v8619_v60 = vunpack.c.l.s8.bf16 %v8586_v10 }
 0x66d   : > { %7967 = vmatpush1.bf16.msra.mxu1 %v4419_v16  ;;  %7064 = vmatprep.subr.bf16.mxu0 %v4426_v47  ;;  %v8635_v16 = vunpack.c.l.s8.bf16 %v8594_v53  ;;  %v8628_v47 = vunpack.c.h.s8.bf16 %v8590_v41  ;;  %v8588_v41 = vld [vmem:[#allocation14 + $0x18] sm:$0xff] }
 0x66e   : > { %7026 = vmatmul.mubr.bf16.gmra.mrb[188].mxu0 %v16682_v2  ;;  %7968 = vmatprep.subr.bf16.mxu1 %v4428_v51  ;;  %v8644_v51 = vunpack.c.h.s8.bf16 %v8598_v40  ;;  %v8596_v40 = vld [vmem:[#allocation14 + $0x58] sm:$0xff] }
 0x66f   : > { %7930 = vmatmul.mubr.bf16.gmra.mrb[188].mxu1 %v16682_v2  ;;  %7068 = vmatprep.mubr.bf16.mxu0 %v16683_v31  ;;  %v8636_v2 = vunpack.c.h.s8.bf16 %v8594_v53  ;;  %v8605_v53 = vld [vmem:[#allocation14 + $0xa0] sm:$0xff] }
 0x670   : > { %7065 = vmatpush1.bf16.msra.mxu0 %v4425_v30  ;;  %7972 = vmatprep.mubr.bf16.mxu1 %v16683_v31  ;;  %v16687_v30 = vld [vmem:[#allocation143_spill] sm:$0xff] }
 0x671   : > { %7969 = vmatpush1.bf16.msra.mxu1 %v4427_v6  ;;  %7066 = vmatprep.subr.bf16.mxu0 %v4434_v0  ;;  %v8599_v6 = vld [vmem:[#allocation14 + $0x70] sm:$0xff]  ;;  %v8620_v0 = vunpack.c.h.s8.bf16 %v8586_v10 }
 0x672   : > { %7970 = vmatprep.subr.bf16.mxu1 %v4436_v33  ;;  %v8629_v33 = vunpack.c.l.s8.bf16 %v8591_v24  ;;  %v8645_v31 = vunpack.c.l.s8.bf16 %v8599_v6  ;;  %v8646_v55 = vunpack.c.h.s8.bf16 %v8599_v6  ;;  %v16690_v10 = vld [vmem:[#allocation145_spill] sm:$0xff]  ;;  %v16693_v6 = vld [vmem:[#allocation155_spill] sm:$0xff] }
 0x674   : > { %7067 = vmatpush1.bf16.msra.mxu0 %v4433_v18  ;;  %v8621_v18 = vunpack.c.l.s8.bf16 %v8587_v8 }
 0x675   : > { %7971 = vmatpush1.bf16.msra.mxu1 %v4435_v11  ;;  %9342 = vmatprep.subr.bf16.mxu0 %v8625_v25  ;;  %v8637_v11 = vunpack.c.l.s8.bf16 %v8595_v14  ;;  %v8630_v25 = vunpack.c.h.s8.bf16 %v8591_v24 }
 0x676   : > { %9406 = vmatprep.subr.bf16.mxu1 %v8641_v1  ;;  %v16688_v1 = vld [vmem:[#allocation141_spill] sm:$0xff] }
 0x677   : > { %7069 = vmatmul.mubr.bf16.vlgmr.msra.gmra.mrb[160].mxu0 %v16684_v26 }
 0x678   : > { %7973 = vmatmul.mubr.bf16.vlgmr.msra.gmra.mrb[160].mxu1 %v16684_v26  ;;  %7078 = vmatprep.mubr.bf16.mxu0 %v16685_v61  ;;  %v8638_v26 = vunpack.c.h.s8.bf16 %v8595_v14  ;;  %v8601_v14 = vld [vmem:[#allocation14 + $0x80] sm:$0xff] }
 0x679   : > { %7982 = vmatprep.mubr.bf16.mxu1 %v16685_v61  ;;  %9343 = vmatpush3.bf16.msra.mxu0 %v8617_v3  ;;  %v16689_v3 = vld [vmem:[#allocation147_spill] sm:$0xff] }
 0x67a   : > { %9407 = vmatpush3.bf16.msra.mxu1 %v8633_v12  ;;  %9344 = vmatprep.subr.bf16.mxu0 %v8626_v56  ;;  %v8600_v12 = vld [vmem:[#allocation14 + $0x78] sm:$0xff]  ;;  %v8622_v56 = vunpack.c.h.s8.bf16 %v8587_v8 }
 0x67b   : > { %9408 = vmatprep.subr.bf16.mxu1 %v8642_v50  ;;  %v8631_v50 = vunpack.c.l.s8.bf16 %v8592_v57  ;;  %v8647_v61 = vunpack.c.l.s8.bf16 %v8600_v12  ;;  %v16697_v8 = vld [vmem:[#allocation163_spill] sm:$0xff] }
 0x67d   : > { %9345 = vmatpush3.bf16.msra.mxu0 %v8618_v54  ;;  %v8623_v54 = vunpack.c.l.s8.bf16 %v8588_v41 }
 0x67e   : > { %9409 = vmatpush3.bf16.msra.mxu1 %v8634_v28  ;;  %9346 = vmatprep.subr.bf16.mxu0 %v8627_v27  ;;  %v8639_v28 = vunpack.c.l.s8.bf16 %v8596_v40  ;;  %v8632_v27 = vunpack.c.h.s8.bf16 %v8592_v57 }
 0x67f   : > { %7079 = vmatmul.mubr.bf16.gmra.mrb[164].mxu0 %v16686_v49  ;;  %9410 = vmatprep.subr.bf16.mxu1 %v8643_v42  ;;  %v8648_v42 = vunpack.c.h.s8.bf16 %v8600_v12  ;;  %v16700_v12 = vld [vmem:[#allocation92_spill] sm:$0xff] }
 0x680   : > { %7983 = vmatmul.mubr.bf16.gmra.mrb[164].mxu1 %v16686_v49  ;;  %7088 = vmatprep.mubr.bf16.mxu0 %v16687_v30  ;;  %v8640_v49 = vunpack.c.h.s8.bf16 %v8596_v40 }
 0x681   : > { %7992 = vmatprep.mubr.bf16.mxu1 %v16687_v30  ;;  %9347 = vmatpush3.bf16.msra.mxu0 %v8619_v60  ;;  %v16691_v60 = vld [vmem:[#allocation151_spill] sm:$0xff]  ;;  %v16692_v30 = vld [vmem:[#allocation149_spill] sm:$0xff] }
 0x682   : > { %9411 = vmatpush3.bf16.msra.mxu1 %v8635_v16  ;;  %9348 = vmatprep.subr.bf16.mxu0 %v8628_v47  ;;  %v8613_v16 = vld [vmem:[#allocation14 + $0xe0] sm:$0xff]  ;;  %v8624_v47 = vunpack.c.h.s8.bf16 %v8588_v41 }
 0x683   : > { %9412 = vmatprep.subr.bf16.mxu1 %v8644_v51  ;;  %v8657_v51 = vunpack.c.l.s8.bf16 %v8605_v53  ;;  %v8673_v24 = vunpack.c.l.s8.bf16 %v8613_v16  ;;  %v8674_v57 = vunpack.c.h.s8.bf16 %v8613_v16 }
 0x685   : > { %9349 = vmatpush3.bf16.msra.mxu0 %v8620_v0  ;;  %v16694_v0 = vld [vmem:[#allocation153_spill] sm:$0xff] }
 0x686   : > { %9413 = vmatpush3.bf16.msra.mxu1 %v8636_v2  ;;  %9350 = vmatprep.subr.bf16.mxu0 %v8629_v33  ;;  %v16695_v2 = vld [vmem:[#allocation159_spill] sm:$0xff]  ;;  %v16696_v33 = vld [vmem:[#allocation157_spill] sm:$0xff] }
 0x687   : > { %7089 = vmatmul.mubr.bf16.gmra.mrb[168].mxu0 %v16688_v1  ;;  %9414 = vmatprep.subr.bf16.mxu1 %v8645_v31  ;;  %v16698_v31 = vld [vmem:[#allocation161_spill] sm:$0xff] }
 0x688   : > { %7993 = vmatmul.mubr.bf16.gmra.mrb[168].mxu1 %v16688_v1  ;;  %7098 = vmatprep.mubr.bf16.mxu0 %v16689_v3  ;;  %v8658_v1 = vunpack.c.h.s8.bf16 %v8605_v53 }
 0x689   : > { %8002 = vmatprep.mubr.bf16.mxu1 %v16689_v3  ;;  %9351 = vmatpush3.bf16.msra.mxu0 %v8621_v18  ;;  %v8609_v18 = vld [vmem:[#allocation14 + $0xc0] sm:$0xff]  ;;  %v8606_v3 = vld [vmem:[#allocation14 + $0xa8] sm:$0xff] }
 0x68a   : > { %9415 = vmatpush3.bf16.msra.mxu1 %v8637_v11  ;;  %9352 = vmatprep.subr.bf16.mxu0 %v8630_v25  ;;  %v8649_v11 = vunpack.c.l.s8.bf16 %v8601_v14  ;;  %v8665_v25 = vunpack.c.l.s8.bf16 %v8609_v18 }
 0x68b   : > { %9416 = vmatprep.subr.bf16.mxu1 %v8646_v55  ;;  %v16699_v55 = vld [vmem:[#allocation94_spill] sm:$0xff] }
 0x68d   : > { %9353 = vmatpush3.bf16.msra.mxu0 %v8622_v56  ;;  %v8614_v56 = vld [vmem:[#allocation14 + $0xe8] sm:$0xff] }
 0x68e   : > { %9417 = vmatpush3.bf16.msra.mxu1 %v8638_v26  ;;  %9354 = vmatprep.subr.bf16.mxu0 %v8631_v50  ;;  %v8659_v26 = vunpack.c.l.s8.bf16 %v8606_v3  ;;  %v8602_v50 = vld [vmem:[#allocation14 + $0x88] sm:$0xff]  ;;  %v8675_v41 = vunpack.c.l.s8.bf16 %v8614_v56 }
 0x68f   : > { %7099 = vmatmul.mubr.bf16.gmra.mrb[172].mxu0 %v16690_v10  ;;  %9418 = vmatprep.subr.bf16.mxu1 %v8647_v61  ;;  %v8610_v61 = vld [vmem:[#allocation14 + $0xc8] sm:$0xff]  ;;  %v8651_v40 = vunpack.c.l.s8.bf16 %v8602_v50 }
 0x690   : > { %8003 = vmatmul.mubr.bf16.gmra.mrb[172].mxu1 %v16690_v10  ;;  %7108 = vmatprep.mubr.bf16.mxu0 %v16691_v60  ;;  %v8652_v10 = vunpack.c.h.s8.bf16 %v8602_v50 }
 0x691   : > { %8012 = vmatprep.mubr.bf16.mxu1 %v16691_v60  ;;  %9355 = vmatpush3.bf16.msra.mxu0 %v8623_v54  ;;  %v8667_v54 = vunpack.c.l.s8.bf16 %v8610_v61  ;;  %v8603_v60 = vld [vmem:[#allocation14 + $0x90] sm:$0xff] }
 0x692   : > { %9419 = vmatpush3.bf16.msra.mxu1 %v8639_v28  ;;  %9356 = vmatprep.subr.bf16.mxu0 %v8632_v27  ;;  %v8660_v28 = vunpack.c.h.s8.bf16 %v8606_v3  ;;  %v8615_v27 = vld [vmem:[#allocation14 + $0xf0] sm:$0xff] }
 0x693   : > { %9420 = vmatprep.subr.bf16.mxu1 %v8648_v42  ;;  %v8668_v42 = vunpack.c.h.s8.bf16 %v8610_v61  ;;  %v8677_v16 = vunpack.c.l.s8.bf16 %v8615_v27 }
 0x695   : > { %9357 = vmatpush3.bf16.msra.mxu0 %v8624_v47  ;;  %v8653_v47 = vunpack.c.l.s8.bf16 %v8603_v60 }
 0x696   : > { %9421 = vmatpush3.bf16.msra.mxu1 %v8640_v49  ;;  %9470 = vmatprep.subr.bf16.mxu0 %v8657_v51  ;;  %v8616_v51 = vld [vmem:[#allocation14 + $0xf8] sm:$0xff] }
 0x697   : > { %7109 = vmatmul.mubr.bf16.gmra.mrb[176].mxu0 %v16692_v30  ;;  %9534 = vmatprep.subr.bf16.mxu1 %v8673_v24  ;;  %v8654_v24 = vunpack.c.h.s8.bf16 %v8603_v60 }
 0x698   : > { %8013 = vmatmul.mubr.bf16.gmra.mrb[176].mxu1 %v16692_v30  ;;  %7118 = vmatprep.mubr.bf16.mxu0 %v16693_v6 }
 0x699   : > { %8022 = vmatprep.mubr.bf16.mxu1 %v16693_v6 }
 0x69f   : > { %7119 = vmatmul.mubr.bf16.gmra.mrb[180].mxu0 %v16694_v0 }
 0x6a0   : > { %8023 = vmatmul.mubr.bf16.gmra.mrb[180].mxu1 %v16694_v0  ;;  %7128 = vmatprep.mubr.bf16.mxu0 %v16695_v2  ;;  %v8604_v0 = vld [vmem:[#allocation14 + $0x98] sm:$0xff] }
 0x6a1   : > { %8032 = vmatprep.mubr.bf16.mxu1 %v16695_v2  ;;  %v8679_v2 = vunpack.c.l.s8.bf16 %v8616_v51 }
 0x6a7   : > { %7129 = vmatmul.mubr.bf16.gmra.mrb[184].mxu0 %v16696_v33 }
 0x6a8   : > { %8033 = vmatmul.mubr.bf16.gmra.mrb[184].mxu1 %v16696_v33  ;;  %7138 = vmatprep.mubr.bf16.mxu0 %v16697_v8  ;;  %v8680_v33 = vunpack.c.h.s8.bf16 %v8616_v51 }
 0x6a9   : > { %8042 = vmatprep.mubr.bf16.mxu1 %v16697_v8  ;;  %v8656_v8 = vunpack.c.h.s8.bf16 %v8604_v0 }
 0x6af   : > { %7139 = vmatmul.mubr.bf16.gmra.mrb[188].mxu0 %v16698_v31 }
 0x6b0   : > { %8043 = vmatmul.mubr.bf16.gmra.mrb[188].mxu1 %v16698_v31  ;;  %8713 = vmatprep.mubr.bf16.mxu0 %v14673_v37  ;;  %v8650_v37 = vunpack.c.h.s8.bf16 %v8601_v14 }
 0x6b1   : > { %8810 = vmatprep.mubr.bf16.mxu1 %v14679_v4  ;;  %v8666_v4 = vunpack.c.h.s8.bf16 %v8609_v18 }
 0x6b7   : > { %8714 = vmatmul.mubr.bf16.vlgmr.msra.gmra.mrb[192].mxu0 %v16699_v55 }
 0x6b8   : > { %8811 = vmatmul.mubr.bf16.vlgmr.msra.gmra.mrb[192].mxu1 %v16700_v12  ;;  %8721 = vmatprep.mubr.bf16.mxu0 %v14685_v35  ;;  %v8676_v35 = vunpack.c.h.s8.bf16 %v8614_v56 }
 0x6b9   : > { %8818 = vmatprep.mubr.bf16.mxu1 %v14696_v48  ;;  %9471 = vmatpush3.bf16.msra.mxu0 %v8649_v11  ;;  %v8607_v48 = vld [vmem:[#allocation14 + $0xb0] sm:$0xff] }
 0x6ba   : > { %9535 = vmatpush3.bf16.msra.mxu1 %v8665_v25  ;;  %9472 = vmatprep.subr.bf16.mxu0 %v8658_v1  ;;  %v8661_v53 = vunpack.c.l.s8.bf16 %v8607_v48  ;;  %v8662_v49 = vunpack.c.h.s8.bf16 %v8607_v48 }
 0x6bb   : > { %9536 = vmatprep.subr.bf16.mxu1 %v8674_v57 }
 0x6bd   : > { %9473 = vmatpush3.bf16.msra.mxu0 %v8650_v37 }
 0x6be   : > { %9537 = vmatpush3.bf16.msra.mxu1 %v8666_v4  ;;  %9474 = vmatprep.subr.bf16.mxu0 %v8659_v26 }
 0x6bf   : > { %8722 = vmatmul.mubr.bf16.gmra.mrb[196].mxu0 %v14702_v38  ;;  %9538 = vmatprep.subr.bf16.mxu1 %v8675_v41  ;;  %v8611_v38 = vld [vmem:[#allocation14 + $0xd0] sm:$0xff] }
 0x6c0   : > { %8819 = vmatmul.mubr.bf16.gmra.mrb[196].mxu1 %v14714_v5  ;;  %8729 = vmatprep.mubr.bf16.mxu0 %v14720_v62  ;;  %v8669_v5 = vunpack.c.l.s8.bf16 %v8611_v38  ;;  %v8678_v62 = vunpack.c.h.s8.bf16 %v8615_v27  ;;  %v8670_v30 = vunpack.c.h.s8.bf16 %v8611_v38 }
 0x6c1   : > { %8826 = vmatprep.mubr.bf16.mxu1 %v14728_v13  ;;  %9475 = vmatpush3.bf16.msra.mxu0 %v8651_v40  ;;  %v8608_v13 = vld [vmem:[#allocation14 + $0xb8] sm:$0xff] }
 0x6c2   : > { %9539 = vmatpush3.bf16.msra.mxu1 %v8667_v54  ;;  %9476 = vmatprep.subr.bf16.mxu0 %v8660_v28  ;;  %v8663_v6 = vunpack.c.l.s8.bf16 %v8608_v13 }
 0x6c3   : > { %9540 = vmatprep.subr.bf16.mxu1 %v8676_v35 }
 0x6c5   : > { %9477 = vmatpush3.bf16.msra.mxu0 %v8652_v10 }
 0x6c6   : > { %9541 = vmatpush3.bf16.msra.mxu1 %v8668_v42  ;;  %9478 = vmatprep.subr.bf16.mxu0 %v8661_v53 }
 0x6c7   : > { %8730 = vmatmul.mubr.bf16.gmra.mrb[200].mxu0 %v14734_v21  ;;  %9542 = vmatprep.subr.bf16.mxu1 %v8677_v16  ;;  %v8655_v21 = vunpack.c.l.s8.bf16 %v8604_v0 }
 0x6c8   : > { %8827 = vmatmul.mubr.bf16.gmra.mrb[200].mxu1 %v14740_v7  ;;  %8737 = vmatprep.mubr.bf16.mxu0 %v14746_v44  ;;  %v8612_v7 = vld [vmem:[#allocation14 + $0xd8] sm:$0xff] }
 0x6c9   : > { %8834 = vmatprep.mubr.bf16.mxu1 %v14754_v17  ;;  %9479 = vmatpush3.bf16.msra.mxu0 %v8653_v47  ;;  %v8671_v44 = vunpack.c.l.s8.bf16 %v8612_v7  ;;  %v8664_v17 = vunpack.c.h.s8.bf16 %v8608_v13 }
 0x6ca   : > { %9543 = vmatpush3.bf16.msra.mxu1 %v8669_v5  ;;  %9480 = vmatprep.subr.bf16.mxu0 %v8662_v49 }
 0x6cb   : > { %9544 = vmatprep.subr.bf16.mxu1 %v8678_v62 }
 0x6cd   : > { %9481 = vmatpush3.bf16.msra.mxu0 %v8654_v24 }
 0x6ce   : > { %9545 = vmatpush3.bf16.msra.mxu1 %v8670_v30  ;;  %9482 = vmatprep.subr.bf16.mxu0 %v8663_v6 }
 0x6cf   : > { %8738 = vmatmul.mubr.bf16.gmra.mrb[204].mxu0 %v14760_v23  ;;  %9546 = vmatprep.subr.bf16.mxu1 %v8679_v2  ;;  %v8672_v23 = vunpack.c.h.s8.bf16 %v8612_v7 }
 0x6d0   : > { %8835 = vmatmul.mubr.bf16.gmra.mrb[204].mxu1 %v14768_v20  ;;  %8745 = vmatprep.mubr.bf16.mxu0 %v14774_v63  ;;  %v10642_v20 = vld [vmem:[#allocation11] sm:$0xff]  ;;  %v16701_v63 = vld [vmem:[#allocation52_spill] sm:$0xff] }
 0x6d1   : > { %8842 = vmatprep.mubr.bf16.mxu1 %v14780_v15  ;;  %9483 = vmatpush3.bf16.msra.mxu0 %v8655_v21  ;;  %v15042_v15 = vrot.slane %v10642_v20, %v16701_v63 }
 0x6d2   : > { %9547 = vmatpush3.bf16.msra.mxu1 %v8671_v44  ;;  %9484 = vmatprep.subr.bf16.mxu0 %v8664_v17 }
 0x6d3   : > { %9548 = vmatprep.subr.bf16.mxu1 %v8680_v33 }
 0x6d5   : > { %9485 = vmatpush3.bf16.msra.mxu0 %v8656_v8 }
 0x6d6   : > { %9549 = vmatpush3.bf16.msra.mxu1 %v8672_v23 }
 0x6d7   : > { %8746 = vmatmul.mubr.bf16.gmra.mrb[208].mxu0 %v14790_v43  ;;  %v16702_v43 = vld [vmem:[#allocation54_spill] sm:$0xff] }
 0x6d8   : > { %8843 = vmatmul.mubr.bf16.gmra.mrb[208].mxu1 %v14796_v45  ;;  %8753 = vmatprep.mubr.bf16.mxu0 %v14802_v22  ;;  %v15045_v45 = vrot.slane %v10642_v20, %v16702_v43  ;;  %v16703_v22 = vld [vmem:[#allocation53_spill] sm:$0xff] }
 0x6d9   : > { %8850 = vmatprep.mubr.bf16.mxu1 %v14812_v32  ;;  %v15048_v32 = vrot.slane %v10642_v20, %v16703_v22 }
 0x6df   : > { %8754 = vmatmul.mubr.bf16.gmra.mrb[212].mxu0 %v14818_v34  ;;  %v10643_v34 = vld [vmem:[#allocation13] sm:$0xff] }
 0x6e0   : > { %8851 = vmatmul.mubr.bf16.gmra.mrb[212].mxu1 %v14824_v58  ;;  %8761 = vmatprep.mubr.bf16.mxu0 %v14831_v36  ;;  %v15051_v58 = vrot.slane %v10643_v34, %v16701_v63  ;;  %v16704_v36 = vld [vmem:[#allocation55_spill] sm:$0xff] }
 0x6e1   : > { %8858 = vmatprep.mubr.bf16.mxu1 %v14835_v46  ;;  %v15054_v46 = vrot.slane %v10642_v20, %v16704_v36  ;;  %v15064_v31 = vrot.slane %v10643_v34, %v16704_v36 }
 0x6e7   : > { %8762 = vmatmul.mubr.bf16.gmra.mrb[216].mxu0 %v14841_v29 }
 0x6e8   : > { %8859 = vmatmul.mubr.bf16.gmra.mrb[216].mxu1 %v14850_v9  ;;  %8769 = vmatprep.mubr.bf16.mxu0 %v14852_v19  ;;  %v15057_v9 = vrot.slane %v10643_v34, %v16702_v43  ;;  %v15060_v19 = vrot.slane %v10643_v34, %v16703_v22 }
 0x6e9   : > { %8866 = vmatprep.mubr.bf16.mxu1 %v14859_v39 }
 0x6ef   : > { %8770 = vmatmul.mubr.bf16.gmra.mrb[220].mxu0 %v14861_v52 }
 0x6f0   : > { %8867 = vmatmul.mubr.bf16.gmra.mrb[220].mxu1 %v14865_v59 }
 0x74a   : > { %v7070_v29 = vpop.f32.mrb[160].mxu0 }
 0x74b   : > { %v8099_v39 = vmul.f32 %v15042_v15, %v7070_v29  ;;  %v7974_v52 = vpop.f32.mrb[160].mxu1  ;;  %v7072_v59 = vpop.f32.mrb[161].mxu0 }
 0x74c   : > { %v8101_v14 = vmul.f32 %v15045_v45, %v7974_v52  ;;  %v8100_v18 = vmul.f32 %v15048_v32, %v7072_v59  ;;  %v7976_v11 = vpop.f32.mrb[161].mxu1  ;;  %v7074_v25 = vpop.f32.mrb[162].mxu0 }
 0x74d   : > { %v8269_v1 = vadd.f32 %v15051_v58, %v8099_v39  ;;  %v8102_v55 = vmul.f32 %v15054_v46, %v7976_v11  ;;  %v8107_v57 = vmul.f32 %v15042_v15, %v7074_v25  ;;  %v7978_v3 = vpop.f32.mrb[162].mxu1  ;;  %v7076_v12 = vpop.f32.mrb[163].mxu0 }
 0x74e   : > { %v8271_v56 = vadd.f32 %v15057_v9, %v8101_v14  ;;  %v8270_v37 = vadd.f32 %v15060_v19, %v8100_v18  ;;  %v8109_v4 = vmul.f32 %v15045_v45, %v7978_v3  ;;  %v8108_v26 = vmul.f32 %v15048_v32, %v7076_v12  ;;  %v7980_v50 = vpop.f32.mrb[163].mxu1 }
 0x74f   : > { %v8272_v41 = vadd.f32 %v15064_v31, %v8102_v55  ;;  %v8277_v61 = vadd.f32 %v15051_v58, %v8107_v57  ;;  %v8110_v40 = vmul.f32 %v15054_v46, %v7980_v50  ;;  %v8397_v35 = vmax.f32 %v8269_v1, 0.0 }
 0x750   : > { %v8279_v54 = vadd.f32 %v15057_v9, %v8109_v4  ;;  %v8278_v28 = vadd.f32 %v15060_v19, %v8108_v26  ;;  %v8399_v10 = vmax.f32 %v8271_v56, 0.0  ;;  %v8398_v42 = vmax.f32 %v8270_v37, 0.0 }
 0x751   : > { %v8405_v48 = vmax.f32 %v8277_v61, 0.0  ;;  %v8280_v27 = vadd.f32 %v15064_v31, %v8110_v40  ;;  %v8400_v38 = vmax.f32 %v8272_v41, 0.0 }
 0x752   : > { %v8407_v53 = vmax.f32 %v8279_v54, 0.0  ;;  %v8406_v60 = vmax.f32 %v8278_v28, 0.0  ;;  %v7080_v16 = vpop.f32.mrb[164].mxu0 }
 0x753   : > { %v8525_v47 = vpack.c.bf16 %v8405_v48, %v8397_v35  ;;  %v8408_v5 = vmax.f32 %v8280_v27, 0.0  ;;  %v8115_v49 = vmul.f32 %v15042_v15, %v7080_v16  ;;  %v7984_v62 = vpop.f32.mrb[164].mxu1  ;;  %v7082_v13 = vpop.f32.mrb[165].mxu0 }
 0x754   : > { %v8527_v51 = vpack.c.bf16 %v8407_v53, %v8399_v10  ;;  %v8117_v24 = vmul.f32 %v15045_v45, %v7984_v62  ;;  %v8116_v30 = vmul.f32 %v15048_v32, %v7082_v13  ;;  %v7986_v6 = vpop.f32.mrb[165].mxu1  ;;  %v7084_v0 = vpop.f32.mrb[166].mxu0  ;;  %v8526_v2 = vpack.c.bf16 %v8406_v60, %v8398_v42 }
 0x755   : > { %v8285_v21 = vadd.f32 %v15051_v58, %v8115_v49  ;;  %v8118_v7 = vmul.f32 %v15054_v46, %v7986_v6  ;;  %v8123_v44 = vmul.f32 %v15042_v15, %v7084_v0  ;;  %v7988_v17 = vpop.f32.mrb[166].mxu1  ;;  %v7086_v33 = vpop.f32.mrb[167].mxu0  ;;  %v8528_v8 = vpack.c.bf16 %v8408_v5, %v8400_v38 }
 0x756   : > { %v8287_v23 = vadd.f32 %v15057_v9, %v8117_v24  ;;  %v8286_v20 = vadd.f32 %v15060_v19, %v8116_v30  ;;  %v8125_v63 = vmul.f32 %v15045_v45, %v7988_v17  ;;  %v8124_v43 = vmul.f32 %v15048_v32, %v7086_v33  ;;  %v7990_v22 = vpop.f32.mrb[167].mxu1  ;;  %8907 = vmatprep.mubr.bf16.mxu0 %v8526_v2 }
 0x757   : > { %v8288_v34 = vadd.f32 %v15064_v31, %v8118_v7  ;;  %v8293_v36 = vadd.f32 %v15051_v58, %v8123_v44  ;;  %v8126_v29 = vmul.f32 %v15054_v46, %v7990_v22  ;;  %9004 = vmatprep.mubr.bf16.mxu1 %v8528_v8  ;;  %8908 = vmatmul.mubr.bf16.vlgmr.msra.gmra.mrb[224].mxu0 %v8525_v47  ;;  %v8413_v59 = vmax.f32 %v8285_v21, 0.0 }
 0x758   : > { %v8295_v39 = vadd.f32 %v15057_v9, %v8125_v63  ;;  %v8294_v52 = vadd.f32 %v15060_v19, %v8124_v43  ;;  %9005 = vmatmul.mubr.bf16.vlgmr.msra.gmra.mrb[224].mxu1 %v8527_v51  ;;  %v8415_v11 = vmax.f32 %v8287_v23, 0.0  ;;  %v8414_v25 = vmax.f32 %v8286_v20, 0.0 }
 0x759   : > { %v8421_v14 = vmax.f32 %v8293_v36, 0.0  ;;  %v8296_v18 = vadd.f32 %v15064_v31, %v8126_v29  ;;  %v8416_v3 = vmax.f32 %v8288_v34, 0.0 }
 0x75a   : > { %v8423_v1 = vmax.f32 %v8295_v39, 0.0  ;;  %v8422_v55 = vmax.f32 %v8294_v52, 0.0  ;;  %v7090_v57 = vpop.f32.mrb[168].mxu0 }
 0x75b   : > { %v8424_v12 = vmax.f32 %v8296_v18, 0.0  ;;  %v8131_v56 = vmul.f32 %v15042_v15, %v7090_v57  ;;  %v7994_v37 = vpop.f32.mrb[168].mxu1  ;;  %v7092_v4 = vpop.f32.mrb[169].mxu0  ;;  %v8533_v26 = vpack.c.bf16 %v8421_v14, %v8413_v59 }
 0x75c   : > { %v8133_v50 = vmul.f32 %v15045_v45, %v7994_v37  ;;  %v8132_v41 = vmul.f32 %v15048_v32, %v7092_v4  ;;  %v7996_v61 = vpop.f32.mrb[169].mxu1  ;;  %v7094_v40 = vpop.f32.mrb[170].mxu0  ;;  %v8534_v54 = vpack.c.bf16 %v8422_v55, %v8414_v25  ;;  %v8535_v28 = vpack.c.bf16 %v8423_v1, %v8415_v11 }
 0x75d   : > { %v8301_v35 = vadd.f32 %v15051_v58, %v8131_v56  ;;  %v8134_v48 = vmul.f32 %v15054_v46, %v7996_v61  ;;  %v8139_v27 = vmul.f32 %v15042_v15, %v7094_v40  ;;  %v7998_v10 = vpop.f32.mrb[170].mxu1  ;;  %v7096_v42 = vpop.f32.mrb[171].mxu0  ;;  %v8536_v53 = vpack.c.bf16 %v8424_v12, %v8416_v3 }
 0x75e   : > { %v8303_v60 = vadd.f32 %v15057_v9, %v8133_v50  ;;  %v8302_v16 = vadd.f32 %v15060_v19, %v8132_v41  ;;  %v8141_v38 = vmul.f32 %v15045_v45, %v7998_v10  ;;  %v8140_v47 = vmul.f32 %v15048_v32, %v7096_v42  ;;  %v8000_v5 = vpop.f32.mrb[171].mxu1  ;;  %8915 = vmatprep.mubr.bf16.mxu0 %v8534_v54 }
 0x75f   : > { %v8304_v49 = vadd.f32 %v15064_v31, %v8134_v48  ;;  %v8309_v62 = vadd.f32 %v15051_v58, %v8139_v27  ;;  %v8142_v13 = vmul.f32 %v15054_v46, %v8000_v5  ;;  %9012 = vmatprep.mubr.bf16.mxu1 %v8536_v53  ;;  %8916 = vmatmul.mubr.bf16.gmra.mrb[228].mxu0 %v8533_v26  ;;  %v8429_v30 = vmax.f32 %v8301_v35, 0.0 }
 0x760   : > { %v8311_v51 = vadd.f32 %v15057_v9, %v8141_v38  ;;  %v8310_v24 = vadd.f32 %v15060_v19, %v8140_v47  ;;  %9013 = vmatmul.mubr.bf16.gmra.mrb[228].mxu1 %v8535_v28  ;;  %v8431_v2 = vmax.f32 %v8303_v60, 0.0  ;;  %v8430_v21 = vmax.f32 %v8302_v16, 0.0 }
 0x761   : > { %v8437_v6 = vmax.f32 %v8309_v62, 0.0  ;;  %v8312_v0 = vadd.f32 %v15064_v31, %v8142_v13  ;;  %v8432_v33 = vmax.f32 %v8304_v49, 0.0 }
 0x762   : > { %v8439_v7 = vmax.f32 %v8311_v51, 0.0  ;;  %v8438_v44 = vmax.f32 %v8310_v24, 0.0  ;;  %v7100_v17 = vpop.f32.mrb[172].mxu0 }
 0x763   : > { %v8440_v8 = vmax.f32 %v8312_v0, 0.0  ;;  %v8147_v23 = vmul.f32 %v15042_v15, %v7100_v17  ;;  %v8004_v20 = vpop.f32.mrb[172].mxu1  ;;  %v7102_v63 = vpop.f32.mrb[173].mxu0  ;;  %v8541_v43 = vpack.c.bf16 %v8437_v6, %v8429_v30 }
 0x764   : > { %v8149_v22 = vmul.f32 %v15045_v45, %v8004_v20  ;;  %v8148_v34 = vmul.f32 %v15048_v32, %v7102_v63  ;;  %v8006_v36 = vpop.f32.mrb[173].mxu1  ;;  %v7104_v29 = vpop.f32.mrb[174].mxu0  ;;  %v8542_v39 = vpack.c.bf16 %v8438_v44, %v8430_v21  ;;  %v8543_v52 = vpack.c.bf16 %v8439_v7, %v8431_v2 }
 0x765   : > { %v8317_v59 = vadd.f32 %v15051_v58, %v8147_v23  ;;  %v8150_v14 = vmul.f32 %v15054_v46, %v8006_v36  ;;  %v8155_v18 = vmul.f32 %v15042_v15, %v7104_v29  ;;  %v8008_v11 = vpop.f32.mrb[174].mxu1  ;;  %v7106_v25 = vpop.f32.mrb[175].mxu0  ;;  %v8544_v1 = vpack.c.bf16 %v8440_v8, %v8432_v33 }
 0x766   : > { %v8319_v55 = vadd.f32 %v15057_v9, %v8149_v22  ;;  %v8318_v57 = vadd.f32 %v15060_v19, %v8148_v34  ;;  %v8157_v3 = vmul.f32 %v15045_v45, %v8008_v11  ;;  %v8156_v12 = vmul.f32 %v15048_v32, %v7106_v25  ;;  %v8010_v56 = vpop.f32.mrb[175].mxu1  ;;  %8923 = vmatprep.mubr.bf16.mxu0 %v8542_v39 }
 0x767   : > { %v8320_v37 = vadd.f32 %v15064_v31, %v8150_v14  ;;  %v8325_v4 = vadd.f32 %v15051_v58, %v8155_v18  ;;  %v8158_v26 = vmul.f32 %v15054_v46, %v8010_v56  ;;  %9020 = vmatprep.mubr.bf16.mxu1 %v8544_v1  ;;  %8924 = vmatmul.mubr.bf16.gmra.mrb[232].mxu0 %v8541_v43  ;;  %v8445_v61 = vmax.f32 %v8317_v59, 0.0 }
 0x768   : > { %v8327_v50 = vadd.f32 %v15057_v9, %v8157_v3  ;;  %v8326_v41 = vadd.f32 %v15060_v19, %v8156_v12  ;;  %9021 = vmatmul.mubr.bf16.gmra.mrb[232].mxu1 %v8543_v52  ;;  %v8447_v28 = vmax.f32 %v8319_v55, 0.0  ;;  %v8446_v35 = vmax.f32 %v8318_v57, 0.0 }
 0x769   : > { %v8453_v40 = vmax.f32 %v8325_v4, 0.0  ;;  %v8328_v54 = vadd.f32 %v15064_v31, %v8158_v26  ;;  %v8448_v42 = vmax.f32 %v8320_v37, 0.0 }
 0x76a   : > { %v8455_v48 = vmax.f32 %v8327_v50, 0.0  ;;  %v8454_v27 = vmax.f32 %v8326_v41, 0.0  ;;  %v7110_v10 = vpop.f32.mrb[176].mxu0 }
 0x76b   : > { %v8456_v53 = vmax.f32 %v8328_v54, 0.0  ;;  %v8163_v60 = vmul.f32 %v15042_v15, %v7110_v10  ;;  %v8014_v16 = vpop.f32.mrb[176].mxu1  ;;  %v7112_v38 = vpop.f32.mrb[177].mxu0  ;;  %v8549_v47 = vpack.c.bf16 %v8453_v40, %v8445_v61 }
 0x76c   : > { %v8165_v5 = vmul.f32 %v15045_v45, %v8014_v16  ;;  %v8164_v49 = vmul.f32 %v15048_v32, %v7112_v38  ;;  %v8016_v62 = vpop.f32.mrb[177].mxu1  ;;  %v7114_v13 = vpop.f32.mrb[178].mxu0  ;;  %v8550_v51 = vpack.c.bf16 %v8454_v27, %v8446_v35  ;;  %v8551_v24 = vpack.c.bf16 %v8455_v48, %v8447_v28 }
 0x76d   : > { %v8333_v30 = vadd.f32 %v15051_v58, %v8163_v60  ;;  %v8166_v6 = vmul.f32 %v15054_v46, %v8016_v62  ;;  %v8171_v0 = vmul.f32 %v15042_v15, %v7114_v13  ;;  %v8018_v2 = vpop.f32.mrb[178].mxu1  ;;  %v7116_v21 = vpop.f32.mrb[179].mxu0  ;;  %v8552_v7 = vpack.c.bf16 %v8456_v53, %v8448_v42 }
 0x76e   : > { %v8335_v44 = vadd.f32 %v15057_v9, %v8165_v5  ;;  %v8334_v17 = vadd.f32 %v15060_v19, %v8164_v49  ;;  %v8173_v33 = vmul.f32 %v15045_v45, %v8018_v2  ;;  %v8172_v8 = vmul.f32 %v15048_v32, %v7116_v21  ;;  %v8020_v23 = vpop.f32.mrb[179].mxu1  ;;  %8931 = vmatprep.mubr.bf16.mxu0 %v8550_v51 }
 0x76f   : > { %v8336_v20 = vadd.f32 %v15064_v31, %v8166_v6  ;;  %v8341_v63 = vadd.f32 %v15051_v58, %v8171_v0  ;;  %v8174_v43 = vmul.f32 %v15054_v46, %v8020_v23  ;;  %9028 = vmatprep.mubr.bf16.mxu1 %v8552_v7  ;;  %8932 = vmatmul.mubr.bf16.gmra.mrb[236].mxu0 %v8549_v47  ;;  %v8461_v36 = vmax.f32 %v8333_v30, 0.0 }
 0x770   : > { %v8343_v22 = vadd.f32 %v15057_v9, %v8173_v33  ;;  %v8342_v34 = vadd.f32 %v15060_v19, %v8172_v8  ;;  %9029 = vmatmul.mubr.bf16.gmra.mrb[236].mxu1 %v8551_v24  ;;  %v8463_v52 = vmax.f32 %v8335_v44, 0.0  ;;  %v8462_v59 = vmax.f32 %v8334_v17, 0.0 }
 0x771   : > { %v8469_v29 = vmax.f32 %v8341_v63, 0.0  ;;  %v8344_v39 = vadd.f32 %v15064_v31, %v8174_v43  ;;  %v8464_v25 = vmax.f32 %v8336_v20, 0.0 }
 0x772   : > { %v8471_v14 = vmax.f32 %v8343_v22, 0.0  ;;  %v8470_v18 = vmax.f32 %v8342_v34, 0.0  ;;  %v7120_v11 = vpop.f32.mrb[180].mxu0 }
 0x773   : > { %v8472_v1 = vmax.f32 %v8344_v39, 0.0  ;;  %v8179_v55 = vmul.f32 %v15042_v15, %v7120_v11  ;;  %v8024_v57 = vpop.f32.mrb[180].mxu1  ;;  %v7122_v3 = vpop.f32.mrb[181].mxu0  ;;  %v8557_v12 = vpack.c.bf16 %v8469_v29, %v8461_v36 }
 0x774   : > { %v8181_v56 = vmul.f32 %v15045_v45, %v8024_v57  ;;  %v8180_v37 = vmul.f32 %v15048_v32, %v7122_v3  ;;  %v8026_v4 = vpop.f32.mrb[181].mxu1  ;;  %v7124_v26 = vpop.f32.mrb[182].mxu0  ;;  %v8558_v50 = vpack.c.bf16 %v8470_v18, %v8462_v59  ;;  %v8559_v41 = vpack.c.bf16 %v8471_v14, %v8463_v52 }
 0x775   : > { %v8349_v61 = vadd.f32 %v15051_v58, %v8179_v55  ;;  %v8182_v40 = vmul.f32 %v15054_v46, %v8026_v4  ;;  %v8187_v54 = vmul.f32 %v15042_v15, %v7124_v26  ;;  %v8028_v28 = vpop.f32.mrb[182].mxu1  ;;  %v7126_v35 = vpop.f32.mrb[183].mxu0  ;;  %v8560_v48 = vpack.c.bf16 %v8472_v1, %v8464_v25 }
 0x776   : > { %v8351_v27 = vadd.f32 %v15057_v9, %v8181_v56  ;;  %v8350_v10 = vadd.f32 %v15060_v19, %v8180_v37  ;;  %v8189_v42 = vmul.f32 %v15045_v45, %v8028_v28  ;;  %v8188_v53 = vmul.f32 %v15048_v32, %v7126_v35  ;;  %v8030_v60 = vpop.f32.mrb[183].mxu1  ;;  %8939 = vmatprep.mubr.bf16.mxu0 %v8558_v50 }
 0x777   : > { %v8352_v16 = vadd.f32 %v15064_v31, %v8182_v40  ;;  %v8357_v38 = vadd.f32 %v15051_v58, %v8187_v54  ;;  %v8190_v47 = vmul.f32 %v15054_v46, %v8030_v60  ;;  %9036 = vmatprep.mubr.bf16.mxu1 %v8560_v48  ;;  %8940 = vmatmul.mubr.bf16.gmra.mrb[240].mxu0 %v8557_v12  ;;  %v8477_v62 = vmax.f32 %v8349_v61, 0.0 }
 0x778   : > { %v8359_v5 = vadd.f32 %v15057_v9, %v8189_v42  ;;  %v8358_v49 = vadd.f32 %v15060_v19, %v8188_v53  ;;  %9037 = vmatmul.mubr.bf16.gmra.mrb[240].mxu1 %v8559_v41  ;;  %v8479_v24 = vmax.f32 %v8351_v27, 0.0  ;;  %v8478_v30 = vmax.f32 %v8350_v10, 0.0 }
 0x779   : > { %v8485_v13 = vmax.f32 %v8357_v38, 0.0  ;;  %v8360_v51 = vadd.f32 %v15064_v31, %v8190_v47  ;;  %v8480_v21 = vmax.f32 %v8352_v16, 0.0 }
 0x77a   : > { %v8487_v6 = vmax.f32 %v8359_v5, 0.0  ;;  %v8486_v0 = vmax.f32 %v8358_v49, 0.0  ;;  %v7130_v2 = vpop.f32.mrb[184].mxu0 }
 0x77b   : > { %v8488_v7 = vmax.f32 %v8360_v51, 0.0  ;;  %v8195_v44 = vmul.f32 %v15042_v15, %v7130_v2  ;;  %v8034_v17 = vpop.f32.mrb[184].mxu1  ;;  %v7132_v33 = vpop.f32.mrb[185].mxu0  ;;  %v8565_v8 = vpack.c.bf16 %v8485_v13, %v8477_v62 }
 0x77c   : > { %v8197_v23 = vmul.f32 %v15045_v45, %v8034_v17  ;;  %v8196_v20 = vmul.f32 %v15048_v32, %v7132_v33  ;;  %v8036_v63 = vpop.f32.mrb[185].mxu1  ;;  %v7134_v43 = vpop.f32.mrb[186].mxu0  ;;  %v8566_v22 = vpack.c.bf16 %v8486_v0, %v8478_v30  ;;  %v8567_v34 = vpack.c.bf16 %v8487_v6, %v8479_v24 }
 0x77d   : > { %v8365_v36 = vadd.f32 %v15051_v58, %v8195_v44  ;;  %v8198_v29 = vmul.f32 %v15054_v46, %v8036_v63  ;;  %v8203_v39 = vmul.f32 %v15042_v15, %v7134_v43  ;;  %v8038_v52 = vpop.f32.mrb[186].mxu1  ;;  %v7136_v59 = vpop.f32.mrb[187].mxu0  ;;  %v8568_v14 = vpack.c.bf16 %v8488_v7, %v8480_v21 }
 0x77e   : > { %v8367_v18 = vadd.f32 %v15057_v9, %v8197_v23  ;;  %v8366_v11 = vadd.f32 %v15060_v19, %v8196_v20  ;;  %v8205_v25 = vmul.f32 %v15045_v45, %v8038_v52  ;;  %v8204_v1 = vmul.f32 %v15048_v32, %v7136_v59  ;;  %v8040_v55 = vpop.f32.mrb[187].mxu1  ;;  %8947 = vmatprep.mubr.bf16.mxu0 %v8566_v22 }
 0x77f   : > { %v8368_v57 = vadd.f32 %v15064_v31, %v8198_v29  ;;  %v8373_v3 = vadd.f32 %v15051_v58, %v8203_v39  ;;  %v8206_v12 = vmul.f32 %v15054_v46, %v8040_v55  ;;  %9044 = vmatprep.mubr.bf16.mxu1 %v8568_v14  ;;  %8948 = vmatmul.mubr.bf16.gmra.mrb[244].mxu0 %v8565_v8  ;;  %v8493_v4 = vmax.f32 %v8365_v36, 0.0 }
 0x780   : > { %v8375_v56 = vadd.f32 %v15057_v9, %v8205_v25  ;;  %v8374_v37 = vadd.f32 %v15060_v19, %v8204_v1  ;;  %9045 = vmatmul.mubr.bf16.gmra.mrb[244].mxu1 %v8567_v34  ;;  %v8495_v41 = vmax.f32 %v8367_v18, 0.0  ;;  %v8494_v61 = vmax.f32 %v8366_v11, 0.0 }
 0x781   : > { %v8501_v26 = vmax.f32 %v8373_v3, 0.0  ;;  %v8376_v50 = vadd.f32 %v15064_v31, %v8206_v12  ;;  %v8496_v35 = vmax.f32 %v8368_v57, 0.0 }
 0x782   : > { %v8503_v40 = vmax.f32 %v8375_v56, 0.0  ;;  %v8502_v54 = vmax.f32 %v8374_v37, 0.0  ;;  %v7140_v28 = vpop.f32.mrb[188].mxu0 }
 0x783   : > { %v8504_v48 = vmax.f32 %v8376_v50, 0.0  ;;  %v8211_v27 = vmul.f32 %v15042_v15, %v7140_v28  ;;  %v8044_v10 = vpop.f32.mrb[188].mxu1  ;;  %v7142_v42 = vpop.f32.mrb[189].mxu0  ;;  %v8573_v53 = vpack.c.bf16 %v8501_v26, %v8493_v4 }
 0x784   : > { %v8213_v60 = vmul.f32 %v15045_v45, %v8044_v10  ;;  %v8212_v16 = vmul.f32 %v15048_v32, %v7142_v42  ;;  %v8046_v38 = vpop.f32.mrb[189].mxu1  ;;  %v7144_v47 = vpop.f32.mrb[190].mxu0  ;;  %v8574_v5 = vpack.c.bf16 %v8502_v54, %v8494_v61  ;;  %v8575_v49 = vpack.c.bf16 %v8503_v40, %v8495_v41 }
 0x785   : > { %v8381_v62 = vadd.f32 %v15051_v58, %v8211_v27  ;;  %v8214_v13 = vmul.f32 %v15054_v46, %v8046_v38  ;;  %v8219_v51 = vmul.f32 %v15042_v15, %v7144_v47  ;;  %v8048_v24 = vpop.f32.mrb[190].mxu1  ;;  %v7146_v30 = vpop.f32.mrb[191].mxu0  ;;  %v8576_v6 = vpack.c.bf16 %v8504_v48, %v8496_v35 }
 0x786   : > { %v8383_v0 = vadd.f32 %v15057_v9, %v8213_v60  ;;  %v8382_v2 = vadd.f32 %v15060_v19, %v8212_v16  ;;  %v8221_v21 = vmul.f32 %v15045_v45, %v8048_v24  ;;  %v8220_v7 = vmul.f32 %v15048_v32, %v7146_v30  ;;  %v8050_v44 = vpop.f32.mrb[191].mxu1  ;;  %8955 = vmatprep.mubr.bf16.mxu0 %v8574_v5 }
 0x787   : > { %v8384_v17 = vadd.f32 %v15064_v31, %v8214_v13  ;;  %v8389_v33 = vadd.f32 %v15051_v58, %v8219_v51  ;;  %v8222_v8 = vmul.f32 %v15054_v46, %v8050_v44  ;;  %9052 = vmatprep.mubr.bf16.mxu1 %v8576_v6  ;;  %8956 = vmatmul.mubr.bf16.gmra.mrb[248].mxu0 %v8573_v53  ;;  %v8509_v20 = vmax.f32 %v8381_v62, 0.0 }
 0x788   : > { %v8391_v15 = vadd.f32 %v15057_v9, %v8221_v21  ;;  %v8390_v23 = vadd.f32 %v15060_v19, %v8220_v7  ;;  %9053 = vmatmul.mubr.bf16.gmra.mrb[248].mxu1 %v8575_v49  ;;  %v8511_v32 = vmax.f32 %v8383_v0, 0.0  ;;  %v8510_v43 = vmax.f32 %v8382_v2, 0.0 }
 0x789   : > { %v8517_v63 = vmax.f32 %v8389_v33, 0.0  ;;  %v8392_v45 = vadd.f32 %v15064_v31, %v8222_v8  ;;  %v8512_v29 = vmax.f32 %v8384_v17, 0.0 }
 0x78a   : > { %v8519_v22 = vmax.f32 %v8391_v15, 0.0  ;;  %v8518_v34 = vmax.f32 %v8390_v23, 0.0  ;;  %v9358_v36 = vpop.f32.mrb[192].mxu0 }
 0x78b   : > { %v8520_v58 = vmax.f32 %v8392_v45, 0.0  ;;  %v9422_v39 = vpop.f32.mrb[192].mxu1  ;;  %v9359_v46 = vpop.f32.mrb[193].mxu0  ;;  %v8581_v52 = vpack.c.bf16 %v8517_v63, %v8509_v20 }
 0x78c   : > { %v9360_v59 = vadd.f32 %v9359_v46, %v9358_v36  ;;  %v9423_v14 = vpop.f32.mrb[193].mxu1  ;;  %v9361_v9 = vpop.f32.mrb[194].mxu0  ;;  %v8582_v18 = vpack.c.bf16 %v8518_v34, %v8510_v43  ;;  %v8583_v19 = vpack.c.bf16 %v8519_v22, %v8511_v32 }
 0x78d   : > { %v9424_v11 = vadd.f32 %v9423_v14, %v9422_v39  ;;  %v9425_v25 = vpop.f32.mrb[194].mxu1  ;;  %v9362_v1 = vpop.f32.mrb[195].mxu0  ;;  %v8584_v55 = vpack.c.bf16 %v8520_v58, %v8512_v29 }
 0x78e   : > { %v9363_v31 = vadd.f32 %v9362_v1, %v9361_v9  ;;  %v9426_v57 = vpop.f32.mrb[195].mxu1  ;;  %8963 = vmatprep.mubr.bf16.mxu0 %v8582_v18 }
 0x78f   : > { %v15193_v3 = vadd.f32 %v9424_v11, %v9360_v59  ;;  %v9427_v12 = vadd.f32 %v9426_v57, %v9425_v25  ;;  %9060 = vmatprep.mubr.bf16.mxu1 %v8584_v55  ;;  %8964 = vmatmul.mubr.bf16.gmra.mrb[252].mxu0 %v8581_v52 }
 0x790   : > { %9061 = vmatmul.mubr.bf16.gmra.mrb[252].mxu1 %v8583_v19 }
 0x791   : > { %v15195_v56 = vadd.f32 %v9427_v12, %v9363_v31 }
 0x792   : > { %v9364_v37 = vpop.f32.mrb[196].mxu0 }
 0x793   : > { %v9428_v4 = vpop.f32.mrb[196].mxu1  ;;  %v9365_v26 = vpop.f32.mrb[197].mxu0 }
 0x794   : > { %v9366_v50 = vadd.f32 %v9365_v26, %v9364_v37  ;;  %v9429_v41 = vpop.f32.mrb[197].mxu1  ;;  %v9367_v61 = vpop.f32.mrb[198].mxu0 }
 0x795   : > { %v9430_v40 = vadd.f32 %v9429_v41, %v9428_v4  ;;  %v9431_v54 = vpop.f32.mrb[198].mxu1  ;;  %v9368_v28 = vpop.f32.mrb[199].mxu0 }
 0x796   : > { %v9369_v35 = vadd.f32 %v9368_v28, %v9367_v61  ;;  %v9432_v48 = vpop.f32.mrb[199].mxu1 }
 0x797   : > { %v15197_v27 = vadd.f32 %v9430_v40, %v9366_v50  ;;  %v9433_v10 = vadd.f32 %v9432_v48, %v9431_v54 }
 0x799   : > { %v15199_v42 = vadd.f32 %v9433_v10, %v9369_v35 }
 0x79a   : > { %v9370_v53 = vpop.f32.mrb[200].mxu0 }
 0x79b   : > { %v9434_v60 = vpop.f32.mrb[200].mxu1  ;;  %v9371_v16 = vpop.f32.mrb[201].mxu0 }
 0x79c   : > { %v9372_v38 = vadd.f32 %v9371_v16, %v9370_v53  ;;  %v9435_v47 = vpop.f32.mrb[201].mxu1  ;;  %v9373_v5 = vpop.f32.mrb[202].mxu0 }
 0x79d   : > { %v9436_v49 = vadd.f32 %v9435_v47, %v9434_v60  ;;  %v9437_v62 = vpop.f32.mrb[202].mxu1  ;;  %v9374_v13 = vpop.f32.mrb[203].mxu0 }
 0x79e   : > { %v9375_v51 = vadd.f32 %v9374_v13, %v9373_v5  ;;  %v9438_v24 = vpop.f32.mrb[203].mxu1 }
 0x79f   : > { %v15201_v30 = vadd.f32 %v9436_v49, %v9372_v38  ;;  %v9439_v6 = vadd.f32 %v9438_v24, %v9437_v62 }
 0x7a1   : > { %v15203_v0 = vadd.f32 %v9439_v6, %v9375_v51 }
 0x7a2   : > { %v9376_v2 = vpop.f32.mrb[204].mxu0 }
 0x7a3   : > { %v9440_v21 = vpop.f32.mrb[204].mxu1  ;;  %v9377_v7 = vpop.f32.mrb[205].mxu0 }
 0x7a4   : > { %v9378_v44 = vadd.f32 %v9377_v7, %v9376_v2  ;;  %v9441_v17 = vpop.f32.mrb[205].mxu1  ;;  %v9379_v33 = vpop.f32.mrb[206].mxu0 }
 0x7a5   : > { %v9442_v8 = vadd.f32 %v9441_v17, %v9440_v21  ;;  %v9443_v15 = vpop.f32.mrb[206].mxu1  ;;  %v9380_v23 = vpop.f32.mrb[207].mxu0 }
 0x7a6   : > { %v9381_v20 = vadd.f32 %v9380_v23, %v9379_v33  ;;  %v9444_v63 = vpop.f32.mrb[207].mxu1 }
 0x7a7   : > { %v15205_v45 = vadd.f32 %v9442_v8, %v9378_v44  ;;  %v9445_v32 = vadd.f32 %v9444_v63, %v9443_v15 }
 0x7a9   : > { %v15207_v43 = vadd.f32 %v9445_v32, %v9381_v20 }
 0x7aa   : > { %v9382_v22 = vpop.f32.mrb[208].mxu0 }
 0x7ab   : > { %v9446_v34 = vpop.f32.mrb[208].mxu1  ;;  %v9383_v36 = vpop.f32.mrb[209].mxu0 }
 0x7ac   : > { %v9384_v29 = vadd.f32 %v9383_v36, %v9382_v22  ;;  %v9447_v58 = vpop.f32.mrb[209].mxu1  ;;  %v9385_v39 = vpop.f32.mrb[210].mxu0 }
 0x7ad   : > { %v9448_v46 = vadd.f32 %v9447_v58, %v9446_v34  ;;  %v9449_v52 = vpop.f32.mrb[210].mxu1  ;;  %v9386_v59 = vpop.f32.mrb[211].mxu0 }
 0x7ae   : > { %v9387_v14 = vadd.f32 %v9386_v59, %v9385_v39  ;;  %v9450_v9 = vpop.f32.mrb[211].mxu1 }
 0x7af   : > { %v15209_v18 = vadd.f32 %v9448_v46, %v9384_v29  ;;  %v9451_v19 = vadd.f32 %v9450_v9, %v9449_v52 }
 0x7b1   : > { %v15211_v11 = vadd.f32 %v9451_v19, %v9387_v14 }
 0x7b2   : > { %v9388_v25 = vpop.f32.mrb[212].mxu0 }
 0x7b3   : > { %v9452_v1 = vpop.f32.mrb[212].mxu1  ;;  %v9389_v55 = vpop.f32.mrb[213].mxu0 }
 0x7b4   : > { %v9390_v31 = vadd.f32 %v9389_v55, %v9388_v25  ;;  %v9453_v57 = vpop.f32.mrb[213].mxu1  ;;  %v9391_v12 = vpop.f32.mrb[214].mxu0  ;;  %v15226_v25 = vld [vmem:[#allocation16] ss:$0 sm:$0xff] }
 0x7b5   : > { %v9454_v37 = vadd.f32 %v9453_v57, %v9452_v1  ;;  %v9455_v4 = vpop.f32.mrb[214].mxu1  ;;  %v9392_v26 = vpop.f32.mrb[215].mxu0  ;;  %v15230_v57 = vld [vmem:[#allocation17] ss:$0 sm:$0xff] }
 0x7b6   : > { %v9393_v50 = vadd.f32 %v9392_v26, %v9391_v12  ;;  %v9456_v41 = vpop.f32.mrb[215].mxu1 }
 0x7b7   : > { %v15213_v61 = vadd.f32 %v9454_v37, %v9390_v31  ;;  %v9457_v40 = vadd.f32 %v9456_v41, %v9455_v4 }
 0x7b9   : > { %v15215_v54 = vadd.f32 %v9457_v40, %v9393_v50 }
 0x7ba   : > { %v9394_v28 = vpop.f32.mrb[216].mxu0 }
 0x7bb   : > { %v9458_v35 = vpop.f32.mrb[216].mxu1  ;;  %v9395_v48 = vpop.f32.mrb[217].mxu0 }
 0x7bc   : > { %v9396_v10 = vadd.f32 %v9395_v48, %v9394_v28  ;;  %v9459_v53 = vpop.f32.mrb[217].mxu1  ;;  %v9397_v60 = vpop.f32.mrb[218].mxu0 }
 0x7bd   : > { %v9460_v16 = vadd.f32 %v9459_v53, %v9458_v35  ;;  %v9461_v38 = vpop.f32.mrb[218].mxu1  ;;  %v9398_v47 = vpop.f32.mrb[219].mxu0 }
 0x7be   : > { %v9399_v5 = vadd.f32 %v9398_v47, %v9397_v60  ;;  %v9462_v49 = vpop.f32.mrb[219].mxu1 }
 0x7bf   : > { %v15217_v62 = vadd.f32 %v9460_v16, %v9396_v10  ;;  %v9463_v13 = vadd.f32 %v9462_v49, %v9461_v38 }
 0x7c1   : > { %v15219_v51 = vadd.f32 %v9463_v13, %v9399_v5 }
 0x7c2   : > { %v9400_v24 = vpop.f32.mrb[220].mxu0 }
 0x7c3   : > { %v9464_v6 = vpop.f32.mrb[220].mxu1  ;;  %v9401_v2 = vpop.f32.mrb[221].mxu0 }
 0x7c4   : > { %v9402_v21 = vadd.f32 %v9401_v2, %v9400_v24  ;;  %v9465_v7 = vpop.f32.mrb[221].mxu1  ;;  %v9403_v44 = vpop.f32.mrb[222].mxu0 }
 0x7c5   : > { %v9466_v17 = vadd.f32 %v9465_v7, %v9464_v6  ;;  %v9467_v33 = vpop.f32.mrb[222].mxu1  ;;  %v9404_v8 = vpop.f32.mrb[223].mxu0 }
 0x7c6   : > { %v9405_v15 = vadd.f32 %v9404_v8, %v9403_v44  ;;  %v9468_v23 = vpop.f32.mrb[223].mxu1 }
 0x7c7   : > { %v15221_v20 = vadd.f32 %v9466_v17, %v9402_v21  ;;  %v9469_v63 = vadd.f32 %v9468_v23, %v9467_v33 }
 0x7c9   : > { %v15223_v32 = vadd.f32 %v9469_v63, %v9405_v15 }
 0x82a   : > { %v9486_v22 = vpop.f32.mrb[224].mxu0 }
 0x82b   : > { %v9550_v34 = vpop.f32.mrb[224].mxu1  ;;  %v9487_v36 = vpop.f32.mrb[225].mxu0 }
 0x82c   : > { %v9488_v29 = vadd.f32 %v9487_v36, %v9486_v22  ;;  %v9551_v58 = vpop.f32.mrb[225].mxu1  ;;  %v9489_v39 = vpop.f32.mrb[226].mxu0 }
 0x82d   : > { %v9552_v46 = vadd.f32 %v9551_v58, %v9550_v34  ;;  %v9553_v52 = vpop.f32.mrb[226].mxu1  ;;  %v9490_v59 = vpop.f32.mrb[227].mxu0 }
 0x82e   : > { %v8910_v14 = vadd.f32 %v9488_v29, %v15193_v3  ;;  %v9491_v9 = vadd.f32 %v9490_v59, %v9489_v39  ;;  %v9554_v19 = vpop.f32.mrb[227].mxu1 }
 0x82f   : > { %v9555_v1 = vadd.f32 %v9554_v19, %v9553_v52 }
 0x830   : > { %v9007_v55 = vadd.f32 %v9552_v46, %v8910_v14  ;;  %v8913_v31 = vadd.f32 %v9491_v9, %v15195_v56 }
 0x832   : > { %v9076_v12 = vmul.f32 %v15226_v25, %v9007_v55  ;;  %v9010_v37 = vadd.f32 %v9555_v1, %v8913_v31  ;;  %v9492_v4 = vpop.f32.mrb[228].mxu0 }
 0x833   : > { %v9556_v26 = vpop.f32.mrb[228].mxu1  ;;  %v9493_v50 = vpop.f32.mrb[229].mxu0 }
 0x834   : > { %v9099_v41 = vadd.f32 %v15230_v57, %v9076_v12  ;;  %v9077_v3 = vmul.f32 %v15226_v25, %v9010_v37  ;;  %v9494_v40 = vadd.f32 %v9493_v50, %v9492_v4  ;;  %v9557_v28 = vpop.f32.mrb[229].mxu1  ;;  %v9495_v35 = vpop.f32.mrb[230].mxu0 }
 0x835   : > { %v9558_v48 = vadd.f32 %v9557_v28, %v9556_v26  ;;  %v9559_v10 = vpop.f32.mrb[230].mxu1  ;;  %v9496_v53 = vpop.f32.mrb[231].mxu0 }
 0x836   : > { %9115 = vst [vmem:[%s15235_s18] sm:$0xff] %v9099_v41  ;;  %v9100_v56 = vadd.f32 %v15230_v57, %v9077_v3  ;;  %v8918_v60 = vadd.f32 %v9494_v40, %v15197_v27  ;;  %v9497_v16 = vadd.f32 %v9496_v53, %v9495_v35  ;;  %v9560_v38 = vpop.f32.mrb[231].mxu1 }
 0x837   : > { %v9561_v47 = vadd.f32 %v9560_v38, %v9559_v10 }
 0x838   : > { %9116 = vst [vmem:[%s15235_s18 + $0x8] sm:$0xff] %v9100_v56  ;;  %v9015_v5 = vadd.f32 %v9558_v48, %v8918_v60  ;;  %v8921_v49 = vadd.f32 %v9497_v16, %v15199_v42 }
 0x83a   : > { %v9078_v13 = vmul.f32 %v15226_v25, %v9015_v5  ;;  %v9018_v24 = vadd.f32 %v9561_v47, %v8921_v49  ;;  %v9498_v6 = vpop.f32.mrb[232].mxu0 }
 0x83b   : > { %v9562_v2 = vpop.f32.mrb[232].mxu1  ;;  %v9499_v21 = vpop.f32.mrb[233].mxu0 }
 0x83c   : > { %v9101_v7 = vadd.f32 %v15230_v57, %v9078_v13  ;;  %v9079_v44 = vmul.f32 %v15226_v25, %v9018_v24  ;;  %v9500_v27 = vadd.f32 %v9499_v21, %v9498_v6  ;;  %v9563_v17 = vpop.f32.mrb[233].mxu1  ;;  %v9501_v33 = vpop.f32.mrb[234].mxu0 }
 0x83d   : > { %v9564_v8 = vadd.f32 %v9563_v17, %v9562_v2  ;;  %v9565_v15 = vpop.f32.mrb[234].mxu1  ;;  %v9502_v23 = vpop.f32.mrb[235].mxu0 }
 0x83e   : > { %9117 = vst [vmem:[%s15235_s18 + $0x10] sm:$0xff] %v9101_v7  ;;  %v9102_v42 = vadd.f32 %v15230_v57, %v9079_v44  ;;  %v8926_v63 = vadd.f32 %v9500_v27, %v15201_v30  ;;  %v9503_v22 = vadd.f32 %v9502_v23, %v9501_v33  ;;  %v9566_v34 = vpop.f32.mrb[235].mxu1 }
 0x83f   : > { %v9567_v36 = vadd.f32 %v9566_v34, %v9565_v15 }
 0x840   : > { %9118 = vst [vmem:[%s15235_s18 + $0x18] sm:$0xff] %v9102_v42  ;;  %v9023_v29 = vadd.f32 %v9564_v8, %v8926_v63  ;;  %v8929_v58 = vadd.f32 %v9503_v22, %v15203_v0 }
 0x842   : > { %v9080_v39 = vmul.f32 %v15226_v25, %v9023_v29  ;;  %v9026_v46 = vadd.f32 %v9567_v36, %v8929_v58  ;;  %v9504_v52 = vpop.f32.mrb[236].mxu0 }
 0x843   : > { %v9568_v59 = vpop.f32.mrb[236].mxu1  ;;  %v9505_v14 = vpop.f32.mrb[237].mxu0 }
 0x844   : > { %v9103_v9 = vadd.f32 %v15230_v57, %v9080_v39  ;;  %v9081_v19 = vmul.f32 %v15226_v25, %v9026_v46  ;;  %v9506_v30 = vadd.f32 %v9505_v14, %v9504_v52  ;;  %v9569_v1 = vpop.f32.mrb[237].mxu1  ;;  %v9507_v55 = vpop.f32.mrb[238].mxu0 }
 0x845   : > { %v9570_v31 = vadd.f32 %v9569_v1, %v9568_v59  ;;  %v9571_v12 = vpop.f32.mrb[238].mxu1  ;;  %v9508_v37 = vpop.f32.mrb[239].mxu0 }
 0x846   : > { %9119 = vst [vmem:[%s15235_s18 + $0x20] sm:$0xff] %v9103_v9  ;;  %v9104_v0 = vadd.f32 %v15230_v57, %v9081_v19  ;;  %v8934_v4 = vadd.f32 %v9506_v30, %v15205_v45  ;;  %v9509_v26 = vadd.f32 %v9508_v37, %v9507_v55  ;;  %v9572_v50 = vpop.f32.mrb[239].mxu1 }
 0x847   : > { %v9573_v41 = vadd.f32 %v9572_v50, %v9571_v12 }
 0x848   : > { %9120 = vst [vmem:[%s15235_s18 + $0x28] sm:$0xff] %v9104_v0  ;;  %v9031_v3 = vadd.f32 %v9570_v31, %v8934_v4  ;;  %v8937_v40 = vadd.f32 %v9509_v26, %v15207_v43 }
 0x84a   : > { %v9082_v28 = vmul.f32 %v15226_v25, %v9031_v3  ;;  %v9034_v35 = vadd.f32 %v9573_v41, %v8937_v40  ;;  %v9510_v48 = vpop.f32.mrb[240].mxu0 }
 0x84b   : > { %v9574_v10 = vpop.f32.mrb[240].mxu1  ;;  %v9511_v53 = vpop.f32.mrb[241].mxu0 }
 0x84c   : > { %v9105_v56 = vadd.f32 %v15230_v57, %v9082_v28  ;;  %v9083_v60 = vmul.f32 %v15226_v25, %v9034_v35  ;;  %v9512_v45 = vadd.f32 %v9511_v53, %v9510_v48  ;;  %v9575_v16 = vpop.f32.mrb[241].mxu1  ;;  %v9513_v38 = vpop.f32.mrb[242].mxu0 }
 0x84d   : > { %v9576_v47 = vadd.f32 %v9575_v16, %v9574_v10  ;;  %v9577_v5 = vpop.f32.mrb[242].mxu1  ;;  %v9514_v49 = vpop.f32.mrb[243].mxu0 }
 0x84e   : > { %9121 = vst [vmem:[%s15235_s18 + $0x30] sm:$0xff] %v9105_v56  ;;  %v9106_v43 = vadd.f32 %v15230_v57, %v9083_v60  ;;  %v8942_v13 = vadd.f32 %v9512_v45, %v15209_v18  ;;  %v9515_v24 = vadd.f32 %v9514_v49, %v9513_v38  ;;  %v9578_v6 = vpop.f32.mrb[243].mxu1 }
 0x84f   : > { %v9579_v2 = vadd.f32 %v9578_v6, %v9577_v5 }
 0x850   : > { %9122 = vst [vmem:[%s15235_s18 + $0x38] sm:$0xff] %v9106_v43  ;;  %v9039_v21 = vadd.f32 %v9576_v47, %v8942_v13  ;;  %v8945_v7 = vadd.f32 %v9515_v24, %v15211_v11 }
 0x852   : > { %v9084_v44 = vmul.f32 %v15226_v25, %v9039_v21  ;;  %v9042_v27 = vadd.f32 %v9579_v2, %v8945_v7  ;;  %v9516_v17 = vpop.f32.mrb[244].mxu0 }
 0x853   : > { %v9580_v33 = vpop.f32.mrb[244].mxu1  ;;  %v9517_v8 = vpop.f32.mrb[245].mxu0 }
 0x854   : > { %v9107_v15 = vadd.f32 %v15230_v57, %v9084_v44  ;;  %v9085_v23 = vmul.f32 %v15226_v25, %v9042_v27  ;;  %v9518_v18 = vadd.f32 %v9517_v8, %v9516_v17  ;;  %v9581_v42 = vpop.f32.mrb[245].mxu1  ;;  %v9519_v63 = vpop.f32.mrb[246].mxu0 }
 0x855   : > { %v9582_v22 = vadd.f32 %v9581_v42, %v9580_v33  ;;  %v9583_v34 = vpop.f32.mrb[246].mxu1  ;;  %v9520_v36 = vpop.f32.mrb[247].mxu0 }
 0x856   : > { %9123 = vst [vmem:[%s15235_s18 + $0x40] sm:$0xff] %v9107_v15  ;;  %v9108_v11 = vadd.f32 %v15230_v57, %v9085_v23  ;;  %v8950_v29 = vadd.f32 %v9518_v18, %v15213_v61  ;;  %v9521_v58 = vadd.f32 %v9520_v36, %v9519_v63  ;;  %v9584_v39 = vpop.f32.mrb[247].mxu1 }
 0x857   : > { %v9585_v46 = vadd.f32 %v9584_v39, %v9583_v34 }
 0x858   : > { %9124 = vst [vmem:[%s15235_s18 + $0x48] sm:$0xff] %v9108_v11  ;;  %v9047_v52 = vadd.f32 %v9582_v22, %v8950_v29  ;;  %v8953_v59 = vadd.f32 %v9521_v58, %v15215_v54 }
 0x85a   : > { %v9086_v14 = vmul.f32 %v15226_v25, %v9047_v52  ;;  %v9050_v9 = vadd.f32 %v9585_v46, %v8953_v59  ;;  %v9522_v19 = vpop.f32.mrb[248].mxu0 }
 0x85b   : > { %v9586_v30 = vpop.f32.mrb[248].mxu1  ;;  %v9523_v1 = vpop.f32.mrb[249].mxu0 }
 0x85c   : > { %v9109_v55 = vadd.f32 %v15230_v57, %v9086_v14  ;;  %v9087_v31 = vmul.f32 %v15226_v25, %v9050_v9  ;;  %v9524_v61 = vadd.f32 %v9523_v1, %v9522_v19  ;;  %v9587_v12 = vpop.f32.mrb[249].mxu1  ;;  %v9525_v37 = vpop.f32.mrb[250].mxu0 }
 0x85d   : > { %v9588_v0 = vadd.f32 %v9587_v12, %v9586_v30  ;;  %v9589_v4 = vpop.f32.mrb[250].mxu1  ;;  %v9526_v26 = vpop.f32.mrb[251].mxu0 }
 0x85e   : > { %9125 = vst [vmem:[%s15235_s18 + $0x50] sm:$0xff] %v9109_v55  ;;  %v9110_v54 = vadd.f32 %v15230_v57, %v9087_v31  ;;  %v8958_v50 = vadd.f32 %v9524_v61, %v15217_v62  ;;  %v9527_v41 = vadd.f32 %v9526_v26, %v9525_v37  ;;  %v9590_v3 = vpop.f32.mrb[251].mxu1 }
 0x85f   : > { %v9591_v40 = vadd.f32 %v9590_v3, %v9589_v4 }
 0x860   : > { %9126 = vst [vmem:[%s15235_s18 + $0x58] sm:$0xff] %v9110_v54  ;;  %v9055_v28 = vadd.f32 %v9588_v0, %v8958_v50  ;;  %v8961_v35 = vadd.f32 %v9527_v41, %v15219_v51 }
 0x862   : > { %v9088_v48 = vmul.f32 %v15226_v25, %v9055_v28  ;;  %v9058_v10 = vadd.f32 %v9591_v40, %v8961_v35  ;;  %v9528_v53 = vpop.f32.mrb[252].mxu0 }
 0x863   : > { %v9592_v56 = vpop.f32.mrb[252].mxu1  ;;  %v9529_v60 = vpop.f32.mrb[253].mxu0 }
 0x864   : > { %v9111_v45 = vadd.f32 %v15230_v57, %v9088_v48  ;;  %v9089_v16 = vmul.f32 %v15226_v25, %v9058_v10  ;;  %v9530_v62 = vadd.f32 %v9529_v60, %v9528_v53  ;;  %v9593_v38 = vpop.f32.mrb[253].mxu1  ;;  %v9531_v47 = vpop.f32.mrb[254].mxu0 }
 0x865   : > { %v9594_v5 = vadd.f32 %v9593_v38, %v9592_v56  ;;  %v9595_v49 = vpop.f32.mrb[254].mxu1  ;;  %v9532_v43 = vpop.f32.mrb[255].mxu0 }
 0x866   : > { %9127 = vst [vmem:[%s15235_s18 + $0x60] sm:$0xff] %v9111_v45  ;;  %v9112_v51 = vadd.f32 %v15230_v57, %v9089_v16  ;;  %v8966_v13 = vadd.f32 %v9530_v62, %v15221_v20  ;;  %v9533_v24 = vadd.f32 %v9532_v43, %v9531_v47  ;;  %v9596_v6 = vpop.f32.mrb[255].mxu1 }
 0x867   : > { %v9597_v2 = vadd.f32 %v9596_v6, %v9595_v49 }
 0x868   : > { %9128 = vst [vmem:[%s15235_s18 + $0x68] sm:$0xff] %v9112_v51  ;;  %v9063_v21 = vadd.f32 %v9594_v5, %v8966_v13  ;;  %v8969_v7 = vadd.f32 %v9533_v24, %v15223_v32 }
 0x86a   : > { %v9090_v44 = vmul.f32 %v15226_v25, %v9063_v21  ;;  %v9066_v27 = vadd.f32 %v9597_v2, %v8969_v7 }
 0x86c   : > { %v9113_v17 = vadd.f32 %v15230_v57, %v9090_v44  ;;  %v9091_v33 = vmul.f32 %v15226_v25, %v9066_v27 }
 0x86e   : > { %9129 = vst [vmem:[%s15235_s18 + $0x70] sm:$0xff] %v9113_v17  ;;  %v9114_v20 = vadd.f32 %v15230_v57, %v9091_v33 }
 0x870   : > { %9130 = vst [vmem:[%s15235_s18 + $0x78] sm:$0xff] %v9114_v20 }
 0x871   : > { %10939 = shalt.err (!%p10936_p3)
}
 0x872   : > { %s10940_s1 = scalar_lea.hbm %s15298_s22, 2048  ;;  %s10944_s27 = scalar_lea.hbm %s16705_s30, 4096 }
 0x873   : > { %p10941_p5 = scmp.ne.s32.totalorder %s15298_s22, %s10940_s1  ;;  %p10945_p9 = scmp.lt.u32.totalorder %s15298_s22, %s16705_s30 }
 0x874   : > { %p10946_p12 = scmp.lt.u32.totalorder %s10944_s27, %s10940_s1  ;;  %p10948_p13 = scmp.lt.u32.totalorder %s10940_s1, %s15298_s22 }
 0x875   : > { %p10942_p7 = pnand %p10941_p5, %p16706_p0 }
 0x876   : > { %p10947_p1 = por %p10946_p12, %p10945_p9 }
 0x877   : > { %p10943_p6 = pneg %p10942_p7 }
 0x878   : > { %p10949_p2 = por %p10948_p13, %p10947_p1 }
 0x87a   : > { %p10950_p8 = pnand %p10949_p2, %p10943_p6 }
 0x87c   : > { %10953 = shalt.err (!%p10950_p8)
}
 0x87d   : > { %s11032_s21 = smov 128   ;;  %s11033_s17 = smov 8  }
 0x87e   : > { %10532 = dma.vmem_to_hbm [thread:$0]  (%p16706_p0), %s15300_s29, 2048, %s15298_s22, %s9132_s19, %s11032_s21, %s11032_s21, %s11033_s17  }
 0x87f PF: > { %s9160_s20 = sand.u32 1, %s11000_s13   ;;  %p16707_p4 = scmp.ne.s32.totalorder %s15802_s2, 0 }
 0x880   : > { %p16708_p10 = scmp.ge.s32.totalorder %s11012_s16, 2  ;;  %s9161_s24 = scalar_lea.sflag [#allocation4], %s9160_s20 }
 0x882   : > { %p10567_p11 = pnand %p16708_p10, %p16707_p4 }
 0x884   : > { %10995 = dma.done.wait (!%p10567_p11), %s9161_s24, 2048  }
 0x885   : > { %10997 = vsyncadd (!%p10567_p11), %s9161_s24, 4294965248  ;;  %p28_p3 = scmp.ge.s32.totalorder %s11322_s23, 4   ;;  %s16709_s13 = smov %s11004_s14 }
 0x886   : > { %s16710_s14 = smov %s11008_s15  ;;  %s16711_s15 = smov %s11333_s12 }
 0x887   : > { %s16712_s16 = smov %s11322_s23  ;;  %30 = sbr.rel (!%p28_p3) target bundleno = 14 (0xe), region = 141 }
 0x88e   :  { %9166 = vsyncpa [#allocation3], 1 }
 0x88f   :  { %9168 = vsyncpa [#allocation3 + $0x1], 1 }
 0x890   :  { %9169 = vsyncpa [#allocation6], 1 }
 0x891   :  { %9170 = vsyncpa [#allocation9], 1 }
 0x892   :  { %9171 = vsyncpa [#allocation12], 1 }
 0x893   :  { %9172 = vsyncpa [#allocation15], 1 }
 0x894   :  { %9173 = vsyncpa [#allocation18], 1 }
 0x895   :  { %9174 = vsyncpa [#allocation4], 1 }
 0x896   :  { %9176 = vsyncpa [#allocation4 + $0x1], 1 }

</bundles_post_ra>
